<compile_context>
chip_gen: v5e
topology: v5e:2x2
jax: 0.10.0
libtpu: 0.0.40
codegen_flags: <defaults>
</compile_context>

<pallas_src>
import jax
import jax.numpy as jnp
from jax.experimental import pallas as pl
from jax.experimental.pallas import tpu as pltpu

BN_EPS = 1e-05


def conv_bn_kernel(x_ref, w_ref, gamma_ref, beta_ref, o_ref):
    # x_ref:     (Cin,  M)    bf16   (channel-major activations)
    # w_ref:     (Cout, Cin)  bf16   (conv weight, already 2-D)
    # gamma_ref: (Cout, 1)    f32
    # beta_ref:  (Cout, 1)    f32
    # o_ref:     (Cout, M)    f32
    # 1x1 conv == matmul on the MXU; bf16 operands, f32 accumulation.
    y = jnp.dot(w_ref[...], x_ref[...],
                preferred_element_type=jnp.float32)          # (Cout, M)

    # BatchNorm2d (training-mode stats over all M = N*H*W positions), one-pass:
    # E[y] and E[y^2] -> per-channel scale/bias, then a single fused write.
    m = y.shape[1]
    inv_m = 1.0 / m
    s = jnp.sum(y, axis=1, keepdims=True)                    # (Cout, 1)
    ss = jnp.sum(y * y, axis=1, keepdims=True)               # (Cout, 1)
    mean = s * inv_m
    var = ss * inv_m - mean * mean                           # biased variance
    scale = gamma_ref[...] * jax.lax.rsqrt(var + BN_EPS)     # (Cout, 1)
    bias = beta_ref[...] - mean * scale                      # (Cout, 1)

    o_ref[...] = y * scale + bias


def conv2d_batchnorm(x_nchw, weight, gamma, beta):
    """x_nchw: (N, Cin, H, W); weight: (Cout, Cin, 1, 1); gamma/beta: (Cout,)."""
    N, Cin, H, W = x_nchw.shape
    Cout = weight.shape[0]
    M = N * H * W

    # NCHW -> (Cin, M).  For N == 1 this is a pure reshape (no data movement);
    # only for N > 1 do we need a transpose to bring the batch inside.
    if N == 1:
        x_cm = x_nchw.reshape(Cin, M)
    else:
        x_cm = jnp.transpose(x_nchw, (1, 0, 2, 3)).reshape(Cin, M)

    # bf16 operands for the MXU (halves input DMA bytes, 2x MXU rate);
    # BN parameters and all BN math stay in f32.
    x_cm = x_cm.astype(jnp.bfloat16)
    w_cm = weight.reshape(Cout, Cin).astype(jnp.bfloat16)    # (Cout, Cin)
    gamma2 = gamma.reshape(Cout, 1).astype(jnp.float32)
    beta2 = beta.reshape(Cout, 1).astype(jnp.float32)

    out_cm = pl.pallas_call(
        conv_bn_kernel,
        out_shape=jax.ShapeDtypeStruct((Cout, M), jnp.float32),
        grid=(1,),
        in_specs=[
            pl.BlockSpec((Cin, M), lambda i: (0, 0)),
            pl.BlockSpec((Cout, Cin), lambda i: (0, 0)),
            pl.BlockSpec((Cout, 1), lambda i: (0, 0)),
            pl.BlockSpec((Cout, 1), lambda i: (0, 0)),
        ],
        out_specs=pl.BlockSpec((Cout, M), lambda i: (0, 0)),
        compiler_params=pltpu.CompilerParams(
            dimension_semantics=("arbitrary",),
            vmem_limit_bytes=32 * 1024 * 1024,
        ),
    )(x_cm, w_cm, gamma2, beta2)

    # (Cout, M) -> NCHW.  For N == 1 this is again a pure reshape.
    if N == 1:
        return out_cm.reshape(1, Cout, H, W)
    return jnp.transpose(out_cm.reshape(Cout, N, H, W), (1, 0, 2, 3))


def _reference(x_nchw, weight, gamma, beta, *, cast_bf16):
    # Pure-JAX reference: 1x1 conv + training-mode batchnorm (two-pass stats).
    N, Cin, H, W = x_nchw.shape
    Cout = weight.shape[0]
    x_mat = jnp.transpose(x_nchw, (0, 2, 3, 1)).reshape(-1, Cin)
    w_mat = weight.reshape(Cout, Cin).T
    if cast_bf16:
        x_mat = x_mat.astype(jnp.bfloat16)
        w_mat = w_mat.astype(jnp.bfloat16)
    y = jnp.dot(x_mat, w_mat, preferred_element_type=jnp.float32)
    mean = jnp.mean(y, axis=0, keepdims=True)
    var = jnp.mean((y - mean) ** 2, axis=0, keepdims=True)
    yn = (y - mean) / jnp.sqrt(var + BN_EPS) * gamma[None, :] + beta[None, :]
    return jnp.transpose(yn.reshape(N, H, W, Cout), (0, 3, 1, 2))


if __name__ == "__main__":
    key = jax.random.PRNGKey(0)
    k_x, k_w = jax.random.split(key)

    # Shapes straight from the PyTorch module spec.
    N, Cin, H, W = 1, 72, 28, 28
    Cout = 432

    x = jax.random.normal(k_x, (N, Cin, H, W), dtype=jnp.float32)
    fan_in = Cin * 1 * 1
    weight = jax.random.normal(k_w, (Cout, Cin, 1, 1), dtype=jnp.float32) * (2.0 / fan_in) ** 0.5
    gamma = jnp.ones((Cout,), dtype=jnp.float32)   # BN affine defaults
    beta = jnp.zeros((Cout,), dtype=jnp.float32)

    out = conv2d_batchnorm(x, weight, gamma, beta)
    out = jax.block_until_ready(out)
    assert out.shape == (N, Cout, H, W), out.shape

    # Tight check against a reference that uses the same bf16 conv operands
    # (isolates kernel structure / BN math from the deliberate bf16 cast).
    ref_bf16 = _reference(x, weight, gamma, beta, cast_bf16=True)
    err_bf16 = float(jnp.max(jnp.abs(out - ref_bf16)))
    assert jnp.allclose(out, ref_bf16, atol=2e-3, rtol=2e-3), err_bf16

    # Looser sanity check against the full-f32 reference (bounds bf16 error).
    ref_f32 = _reference(x, weight, gamma, beta, cast_bf16=False)
    err_f32 = float(jnp.max(jnp.abs(out - ref_f32)))
    assert jnp.allclose(out, ref_f32, atol=5e-2, rtol=5e-2), err_f32

    print("KERNEL_OK")
</pallas_src>

<mosaic_0001>
module attributes {stable_mosaic.version = 11 : i64} {
  func.func @conv_bn_kernel(%arg0: i32, %arg1: memref<72x784xbf16, #tpu.memory_space<vmem>>, %arg2: memref<432x72xbf16, #tpu.memory_space<vmem>>, %arg3: memref<432x1xf32, #tpu.memory_space<vmem>>, %arg4: memref<432x1xf32, #tpu.memory_space<vmem>>, %arg5: memref<432x784xf32, #tpu.memory_space<vmem>>) attributes {dimension_semantics = [#tpu.dimension_semantics<arbitrary>], iteration_bounds = array<i64: 1>, scalar_prefetch = 0 : i64, scratch_operands = 0 : i64, tpu.core_type = #tpu.core_type<tc>, window_params = [{pipeline_mode = #tpu.pipeline_mode<synchronous>, transform_indices = @transform_0, window_bounds = array<i64: 72, 784>}, {pipeline_mode = #tpu.pipeline_mode<synchronous>, transform_indices = @transform_1, window_bounds = array<i64: 432, 72>}, {pipeline_mode = #tpu.pipeline_mode<synchronous>, transform_indices = @transform_2, window_bounds = array<i64: 432, 1>}, {pipeline_mode = #tpu.pipeline_mode<synchronous>, transform_indices = @transform_3, window_bounds = array<i64: 432, 1>}, {pipeline_mode = #tpu.pipeline_mode<synchronous>, transform_indices = @transform_4, window_bounds = array<i64: 432, 784>}]} {
    %c0 = arith.constant 0 : index
    %c0_0 = arith.constant 0 : index
    %0 = vector.load %arg2[%c0, %c0_0] : memref<432x72xbf16, #tpu.memory_space<vmem>>, vector<432x72xbf16>
    %c0_1 = arith.constant 0 : index
    %c0_2 = arith.constant 0 : index
    %1 = vector.load %arg1[%c0_1, %c0_2] : memref<72x784xbf16, #tpu.memory_space<vmem>>, vector<72x784xbf16>
    %cst = arith.constant dense<0.000000e+00> : vector<432x784xf32>
    %2 = tpu.matmul %0, %1, %cst {dimension_numbers = #tpu.dot_dimension_numbers<[1], [0], [0], [1], [0, 0, 1, 1], [], []>} : vector<432x72xbf16>, vector<72x784xbf16>, vector<432x784xf32> -> vector<432x784xf32>
    %cst_3 = arith.constant dense<0.000000e+00> : vector<432xf32>
    %3 = vector.multi_reduction <add>, %2, %cst_3 [1] : vector<432x784xf32> to vector<432xf32>
    %4 = vector.shape_cast %3 : vector<432xf32> to vector<432x1xf32>
    %5 = arith.mulf %2, %2 : vector<432x784xf32>
    %cst_4 = arith.constant dense<0.000000e+00> : vector<432xf32>
    %6 = vector.multi_reduction <add>, %5, %cst_4 [1] : vector<432x784xf32> to vector<432xf32>
    %7 = vector.shape_cast %6 : vector<432xf32> to vector<432x1xf32>
    %cst_5 = arith.constant 0.00127551018 : f32
    %8 = vector.broadcast %cst_5 : f32 to vector<432x1xf32>
    %9 = arith.mulf %4, %8 : vector<432x1xf32>
    %cst_6 = arith.constant 0.00127551018 : f32
    %10 = vector.broadcast %cst_6 : f32 to vector<432x1xf32>
    %11 = arith.mulf %7, %10 : vector<432x1xf32>
    %12 = arith.mulf %9, %9 : vector<432x1xf32>
    %13 = arith.subf %11, %12 : vector<432x1xf32>
    %c0_7 = arith.constant 0 : index
    %c0_8 = arith.constant 0 : index
    %14 = vector.load %arg3[%c0_7, %c0_8] : memref<432x1xf32, #tpu.memory_space<vmem>>, vector<432x1xf32>
    %cst_9 = arith.constant 9.99999974E-6 : f32
    %15 = vector.broadcast %cst_9 : f32 to vector<432x1xf32>
    %16 = arith.addf %13, %15 : vector<432x1xf32>
    %17 = math.rsqrt %16 : vector<432x1xf32>
    %18 = arith.mulf %14, %17 : vector<432x1xf32>
    %c0_10 = arith.constant 0 : index
    %c0_11 = arith.constant 0 : index
    %19 = vector.load %arg4[%c0_10, %c0_11] : memref<432x1xf32, #tpu.memory_space<vmem>>, vector<432x1xf32>
    %20 = arith.mulf %9, %18 : vector<432x1xf32>
    %21 = arith.subf %19, %20 : vector<432x1xf32>
    %22 = vector.broadcast %18 : vector<432x1xf32> to vector<432x784xf32>
    %23 = arith.mulf %2, %22 : vector<432x784xf32>
    %24 = vector.broadcast %21 : vector<432x1xf32> to vector<432x784xf32>
    %25 = arith.addf %23, %24 : vector<432x784xf32>
    %c0_12 = arith.constant 0 : index
    %c0_13 = arith.constant 0 : index
    %26 = vector.load %arg5[%c0_12, %c0_13] : memref<432x784xf32, #tpu.memory_space<vmem>>, vector<432x784xf32>
    tpu.vector_store %arg5[%c0_12, %c0_13], %25 {strides = array<i32>} : memref<432x784xf32, #tpu.memory_space<vmem>>, vector<432x784xf32>,
    return
  }
  func.func @transform_0(%arg0: i32) -> (i32, i32) {
    %c0_i32 = arith.constant 0 : i32
    %c0_i32_0 = arith.constant 0 : i32
    %c0_i32_1 = arith.constant 0 : i32
    return %c0_i32, %c0_i32_0 : i32, i32
  }
  func.func @transform_1(%arg0: i32) -> (i32, i32) {
    %c0_i32 = arith.constant 0 : i32
    %c0_i32_0 = arith.constant 0 : i32
    %c0_i32_1 = arith.constant 0 : i32
    return %c0_i32, %c0_i32_0 : i32, i32
  }
  func.func @transform_2(%arg0: i32) -> (i32, i32) {
    %c0_i32 = arith.constant 0 : i32
    %c0_i32_0 = arith.constant 0 : i32
    %c0_i32_1 = arith.constant 0 : i32
    return %c0_i32, %c0_i32_0 : i32, i32
  }
  func.func @transform_3(%arg0: i32) -> (i32, i32) {
    %c0_i32 = arith.constant 0 : i32
    %c0_i32_0 = arith.constant 0 : i32
    %c0_i32_1 = arith.constant 0 : i32
    return %c0_i32, %c0_i32_0 : i32, i32
  }
  func.func @transform_4(%arg0: i32) -> (i32, i32) {
    %c0_i32 = arith.constant 0 : i32
    %c0_i32_0 = arith.constant 0 : i32
    %c0_i32_1 = arith.constant 0 : i32
    return %c0_i32, %c0_i32_0 : i32, i32
  }
}

</mosaic_0001>

<bundles_post_ra>
// kernel: tpu_custom_call.1
= control target key start
LH: loop header
LB: loop body
LE: loop exit
PB: predicated region body
PF: predicated region fallthrough
CT: control target
= control target key end

     0   :  { %9 = vsyncpa [#allocation3], 0  ;;  %s10713_s0 = inlined_call_operand.hbm [shape: bf16[72,784], index: 0, kind: input, shape index: {}]   ;;  %s10714_s1 = inlined_call_operand.vmem [shape: bf16[432,72], index: 1, kind: input, shape index: {}]   ;;  %s10715_s2 = inlined_call_operand.vmem [shape: f32[432,1], index: 2, kind: input, shape index: {}]   ;;  %s10716_s3 = inlined_call_operand.vmem [shape: f32[432,1], index: 3, kind: input, shape index: {}]   ;;  %s10717_s4 = inlined_call_operand.hbm [shape: f32[432,784], index: 4, kind: output, shape index: {}]  }
   0x1   :  { %10 = vsyncpa [#allocation4], 0  ;;  %s15_s17 = sshll.u32 %s10713_s0, 4  ;;  %s6321_s18 = smov [#allocation2]   ;;  %s16_s17 = int_to_ptr.hbm [resolvable:$true] %s15_s17 }
   0x2   :  { %s17_s19 = sshll.u32 %s6321_s18, 4  ;;  %s6322_s20 = smov 448   ;;  %s18_s19 = int_to_ptr.vmem [resolvable:$true] %s17_s19 }
   0x3   :  { %s6323_s21 = smov 28  }
   0x4   :  { %23 = dma.hbm_to_vmem [thread:$0]  %s16_s17, 4032, %s18_s19, [#allocation3], %s6322_s20, %s6322_s20, %s6323_s21  }
   0x5   :  { %6317 = dma.done.wait [#allocation3], 4032  }
   0x6   :  { %6318 = vsyncadd [#allocation3], 4294963264  ;;  %v121_v0 = vld [vmem:[#allocation2 + $0xe0] sm:$0xff]  ;;  %v6356_v1 = vld [vmem:[#allocation2 + $0xe8] sm:$0xff]  ;;  %vm504_vm0 = vcmask 1043456   ;;  %vm422_vm1 = vcmask 588800  }
   0x7   :  { %v352_v2 = vunpack.c.l.b16 %v121_v0  ;;  %v353_v3 = vunpack.c.h.b16 %v121_v0  ;;  %v354_v4 = vunpack.c.l.b16 %v6356_v1  ;;  %v5852_v8 = vld [vmem:[#allocation2 + $0xa8] sm:$0xf]  ;;  %v6118_v9 = vld [vmem:[#allocation2 + $0xc0] sm:$0xf0]  ;;  %v6115_v10 = vld [vmem:[#allocation2 + $0xac] sm:$0xf] }
   0x8   :  { %v5854_v11 = vld [vmem:[#allocation2 + $0xc4] sm:$0xf0]  ;;  %v5860_v12 = vld [vmem:[#allocation2 + $0xb0] sm:$0xf]  ;;  %v6119_v13 = vld [vmem:[#allocation2 + $0xc8] sm:$0xf0]  ;;  %v5853_v17 = vor.u32 %v6118_v9, %v5852_v8 }
   0x9   :  { %v387_v5 = vpack.c.b16 %v352_v2, %v352_v2  ;;  %v388_v6 = vpack.c.b16 %v353_v3, %v353_v3  ;;  %v389_v7 = vpack.c.b16 %v354_v4, %v354_v4  ;;  %v6368_v18 = vor.u32 %v6115_v10, %v5854_v11  ;;  %v5824_v20 = vld [vmem:[#allocation2 + $0x70] sm:$0xf]  ;;  %v6111_v21 = vld [vmem:[#allocation2 + $0x88] sm:$0xf0]  ;;  %v6108_v22 = vld [vmem:[#allocation2 + $0x74] sm:$0xf] }
   0xa   :  { %v6370_v19 = vor.u32 %v6119_v13, %v5860_v12  ;;  %v5826_v23 = vld [vmem:[#allocation2 + $0x8c] sm:$0xf0]  ;;  %v5832_v24 = vld [vmem:[#allocation2 + $0x78] sm:$0xf]  ;;  %v6112_v25 = vld [vmem:[#allocation2 + $0x90] sm:$0xf0]  ;;  %v5825_v26 = vor.u32 %v6111_v21, %v5824_v20 }
   0xb   :  { %v506_v14 = vsel %vm504_vm0, %v387_v5, 0  ;;  %v6361_v15 = vsel %vm504_vm0, %v388_v6, 0  ;;  %v6364_v16 = vsel %vm504_vm0, %v389_v7, 0  ;;  %v124_v27 = vld [vmem:[#allocation2 + $0xf8] sm:$0xf]  ;;  %v123_v28 = vld [vmem:[#allocation2 + $0xf0] sm:$0xff]  ;;  %v5829_v29 = vor.u32 %v6108_v22, %v5826_v23 }
   0xc   :  { %529 = vmatpush.bf16.msra.mxu0 %v506_v14  ;;  %6122 = vmatpush.bf16.msra.mxu3 %v506_v14  ;;  %v5833_v30 = vor.u32 %v6112_v25, %v5832_v24  ;;  %v5796_v31 = vld [vmem:[#allocation2 + $0x38] sm:$0xf]  ;;  %v6104_v32 = vld [vmem:[#allocation2 + $0x50] sm:$0xf0]  ;;  %v6101_v33 = vld [vmem:[#allocation2 + $0x3c] sm:$0xf]  ;;  %v358_v37 = vunpack.c.l.b16 %v124_v27  ;;  %v356_v38 = vunpack.c.l.b16 %v123_v28  ;;  %v357_v48 = vunpack.c.h.b16 %v123_v28 }
   0xd   :  { %673 = vmatpush.bf16.msra.mxu1 %v6361_v15  ;;  %817 = vmatpush.bf16.msra.mxu2 %v6364_v16  ;;  %v5798_v34 = vld [vmem:[#allocation2 + $0x54] sm:$0xf0]  ;;  %v5804_v35 = vld [vmem:[#allocation2 + $0x40] sm:$0xf]  ;;  %v6105_v36 = vld [vmem:[#allocation2 + $0x58] sm:$0xf0]  ;;  %v5797_v39 = vor.u32 %v6104_v32, %v5796_v31 }
   0xe   :  { %v5801_v40 = vor.u32 %v6101_v33, %v5798_v34  ;;  %v5805_v41 = vor.u32 %v6105_v36, %v5804_v35  ;;  %v5768_v42 = vld [vmem:[#allocation2] sm:$0xf]  ;;  %v6097_v43 = vld [vmem:[#allocation2 + $0x18] sm:$0xf0]  ;;  %v6094_v44 = vld [vmem:[#allocation2 + $0x4] sm:$0xf]  ;;  %v393_v49 = vpack.c.b16 %v358_v37, %v358_v37  ;;  %v391_v50 = vpack.c.b16 %v356_v38, %v356_v38 }
   0xf   :  { %v5770_v45 = vld [vmem:[#allocation2 + $0x1c] sm:$0xf0]  ;;  %v5776_v46 = vld [vmem:[#allocation2 + $0x8] sm:$0xf]  ;;  %v6098_v47 = vld [vmem:[#allocation2 + $0x20] sm:$0xf0]  ;;  %v5769_v51 = vor.u32 %v6097_v43, %v5768_v42  ;;  %v392_v54 = vpack.c.b16 %v357_v48, %v357_v48 }
  0x10   :  { %530 = vmatpush.bf16.msra.mxu0 %v5853_v17  ;;  %6123 = vmatpush.bf16.msra.mxu3 %v5853_v17  ;;  %v5773_v52 = vor.u32 %v6094_v44, %v5770_v45  ;;  %v5777_v53 = vor.u32 %v6098_v47, %v5776_v46  ;;  %v6377_v55 = vld [vmem:[%s10714_s1] sm:$0xff]  ;;  %v6382_v56 = vld [vmem:[%s10714_s1 + $0xa8] sm:$0xff]  ;;  %v524_v57 = vsel %vm504_vm0, %v393_v49, 0  ;;  %v518_v58 = vsel %vm504_vm0, %v391_v50, 0  ;;  %v6405_v61 = vld [vmem:[%s10714_s1 + $0xb0] sm:$0xff]  ;;  %s5645_s17 = sshll.u32 %s10717_s4, 4  ;;  %s5646_s17 = int_to_ptr.hbm [resolvable:$true] %s5645_s17 }
  0x11   :  { %674 = vmatpush.bf16.msra.mxu1 %v6368_v18  ;;  %818 = vmatpush.bf16.msra.mxu2 %v6370_v19  ;;  %v521_v59 = vsel %vm504_vm0, %v392_v54, 0  ;;  %v6400_v60 = vld [vmem:[%s10714_s1 + $0x8] sm:$0xff]  ;;  %v6420_v62 = vld [vmem:[%s10714_s1 + $0x10] sm:$0xff]  ;;  %v6425_v63 = vld [vmem:[%s10714_s1 + $0xb8] sm:$0xff]  ;;  %vm1539_vm2 = vcmask 130048   ;;  %s6326_s18 = smov 896  }
  0x12   :  { %v5876_v0 = vld [vmem:[#allocation2 + $0xc0] sm:$0xf]  ;;  %v6121_v2 = vld [vmem:[#allocation2 + $0xd8] sm:$0xf0]  ;;  %v5868_v3 = vld [vmem:[#allocation2 + $0xb8] sm:$0xf] }
  0x13   :  { %v5877_v4 = vor.u32 %v6121_v2, %v5876_v0  ;;  %v6120_v5 = vld [vmem:[#allocation2 + $0xd0] sm:$0xf0]  ;;  %v6117_v6 = vld [vmem:[#allocation2 + $0xbc] sm:$0xf]  ;;  %v5870_v7 = vld [vmem:[#allocation2 + $0xd4] sm:$0xf0] }
  0x14   :  { %531 = vmatpush.bf16.msra.mxu0 %v5825_v26  ;;  %6124 = vmatpush.bf16.msra.mxu3 %v5825_v26  ;;  %v5869_v8 = vor.u32 %v6120_v5, %v5868_v3  ;;  %v5873_v9 = vor.u32 %v6117_v6, %v5870_v7  ;;  %v6438_v10 = vld [vmem:[%s10714_s1 + $0x18] sm:$0xff]  ;;  %v6443_v11 = vld [vmem:[%s10714_s1 + $0xc0] sm:$0xff]  ;;  %v6461_v13 = vld [vmem:[%s10714_s1 + $0xc8] sm:$0xff]  ;;  %s6327_s19 = smov 56  }
  0x15   :  { %675 = vmatpush.bf16.msra.mxu1 %v5829_v29  ;;  %819 = vmatpush.bf16.msra.mxu2 %v5833_v30  ;;  %v6456_v12 = vld [vmem:[%s10714_s1 + $0x20] sm:$0xff]  ;;  %v6474_v14 = vld [vmem:[%s10714_s1 + $0x28] sm:$0xff]  ;;  %v6113_v21 = vld [vmem:[#allocation2 + $0x98] sm:$0xf0] }
  0x16   :  { %v5848_v17 = vld [vmem:[#allocation2 + $0x88] sm:$0xf]  ;;  %v6505_v23 = vld [vmem:[%s10714_s1 + $0x38] sm:$0xff]  ;;  %v6110_v24 = vld [vmem:[#allocation2 + $0x84] sm:$0xf] }
  0x17   :  { %v5842_v25 = vld [vmem:[#allocation2 + $0x9c] sm:$0xf0]  ;;  %v6547_v36 = vld [vmem:[%s10714_s1 + $0x48] sm:$0xff]  ;;  %v6576_v45 = vld [vmem:[%s10714_s1 + $0x50] sm:$0xff] }
  0x18   :  { %532 = vmatpush.bf16.msra.mxu0 %v5797_v39  ;;  %6125 = vmatpush.bf16.msra.mxu3 %v5797_v39  ;;  %v5845_v26 = vor.u32 %v6110_v24, %v5842_v25  ;;  %v6518_v27 = vld [vmem:[%s10714_s1 + $0x40] sm:$0xff]  ;;  %v5812_v3 = vld [vmem:[#allocation2 + $0x48] sm:$0xf]  ;;  %v6103_v5 = vld [vmem:[#allocation2 + $0x4c] sm:$0xf] }
  0x19   :  { %676 = vmatpush.bf16.msra.mxu1 %v5801_v40  ;;  %820 = vmatpush.bf16.msra.mxu2 %v5805_v41  ;;  %v5814_v7 = vld [vmem:[#allocation2 + $0x64] sm:$0xf0] }
  0x1c   :  { %533 = vmatpush.bf16.msra.mxu0 %v5769_v51  ;;  %6126 = vmatpush.bf16.msra.mxu3 %v5769_v51 }
  0x1d   :  { %677 = vmatpush.bf16.msra.mxu1 %v5773_v52  ;;  %821 = vmatpush.bf16.msra.mxu2 %v5777_v53 }
  0x1f   :  { %5878 = vmatmul.msk.bf16.vlgmr.msra.gmra.mxu0 %vm422_vm1, %v6377_v55  ;;  %5899 = vmatmul.msk.bf16.vlgmr.msra.gmra.mxu3 %vm422_vm1, %v6382_v56 }
  0x20   :  { %1105 = vmatpush.bf16.msrb.mxu0 %v518_v58  ;;  %5905 = vmatmul.msk.bf16.vlgmr.msra.gmra.mxu1 %vm422_vm1, %v6377_v55 }
  0x21   :  { %1393 = vmatpush.bf16.msrb.mxu2 %v524_v57  ;;  %1249 = vmatpush.bf16.msrb.mxu1 %v521_v59  ;;  %v6605_v59 = vld [vmem:[%s10714_s1 + $0x58] sm:$0xff] }
  0x22   :  { %5932 = vmatmul.msk.bf16.vlgmr.msra.gmra.mxu2 %vm422_vm1, %v6377_v55  ;;  %6127 = vmatpush.bf16.msrb.mxu3 %v6361_v15  ;;  %v6479_v15 = vld [vmem:[%s10714_s1 + $0xd0] sm:$0xff] }
  0x24   :  { %1106 = vmatpush.bf16.msrb.mxu0 %v5869_v8 }
  0x25   :  { %1394 = vmatpush.bf16.msrb.mxu2 %v5877_v4  ;;  %1250 = vmatpush.bf16.msrb.mxu1 %v5873_v9  ;;  %v6106_v4 = vld [vmem:[#allocation2 + $0x60] sm:$0xf0]  ;;  %v5817_v9 = vor.u32 %v6103_v5, %v5814_v7 }
  0x26   :  { %6128 = vmatpush.bf16.msrb.mxu3 %v6368_v18  ;;  %v6114_v18 = vld [vmem:[#allocation2 + $0xa0] sm:$0xf0]  ;;  %v5813_v6 = vor.u32 %v6106_v4, %v5812_v3  ;;  %v355_v3 = vunpack.c.h.b16 %v6356_v1 }
  0x27   :  { %v5849_v20 = vor.u32 %v6114_v18, %v5848_v17 }
  0x29   :  { %1395 = vmatpush.bf16.msrb.mxu2 %v5849_v20  ;;  %1251 = vmatpush.bf16.msrb.mxu1 %v5845_v26 }
  0x2a   :  { %6129 = vmatpush.bf16.msrb.mxu3 %v5829_v29 }
  0x2d   :  { %1252 = vmatpush.bf16.msrb.mxu1 %v5817_v9  ;;  %v390_v9 = vpack.c.b16 %v355_v3, %v355_v3 }
  0x2e   :  { %6130 = vmatpush.bf16.msrb.mxu3 %v5801_v40 }
  0x2f   :  { %5879 = vmatmul.msk.bf16.gmra.mxu0 %vm422_vm1, %v6400_v60  ;;  %5900 = vmatmul.msk.bf16.gmra.mxu3 %vm422_vm1, %v6405_v61  ;;  %v515_v1 = vsel %vm504_vm0, %v390_v9, 0 }
  0x30   :  { %5906 = vmatmul.msk.bf16.gmra.mxu1 %vm422_vm1, %v6400_v60 }
  0x32   :  { %5933 = vmatmul.msk.bf16.gmra.mxu2 %vm422_vm1, %v6400_v60  ;;  %6131 = vmatpush.bf16.msrb.mxu3 %v5773_v52  ;;  %v5820_v52 = vld [vmem:[#allocation2 + $0x50] sm:$0xf] }
  0x36   :  { %6132 = vmatpush.bf16.msra.mxu3 %v6364_v16  ;;  %v6492_v16 = vld [vmem:[%s10714_s1 + $0x30] sm:$0xff] }
  0x3a   :  { %6133 = vmatpush.bf16.msra.mxu3 %v6370_v19  ;;  %v5840_v19 = vld [vmem:[#allocation2 + $0x80] sm:$0xf] }
  0x3b   :  { %v5841_v22 = vor.u32 %v6113_v21, %v5840_v19 }
  0x3d   :  { %1107 = vmatpush.bf16.msrb.mxu0 %v5841_v22  ;;  %v6634_v22 = vld [vmem:[%s10714_s1 + $0x60] sm:$0xff] }
  0x3e   :  { %6134 = vmatpush.bf16.msra.mxu3 %v5833_v30 }
  0x3f   :  { %5880 = vmatmul.msk.bf16.gmra.mxu0 %vm422_vm1, %v6420_v62  ;;  %5901 = vmatmul.msk.bf16.gmra.mxu3 %vm422_vm1, %v6425_v63 }
  0x40   :  { %5907 = vmatmul.msk.bf16.gmra.mxu1 %vm422_vm1, %v6420_v62 }
  0x41   :  { %1108 = vmatpush.bf16.msrb.mxu0 %v5813_v6 }
  0x42   :  { %6135 = vmatpush.bf16.msra.mxu3 %v5805_v41  ;;  %5934 = vmatmul.msk.bf16.gmra.mxu2 %vm422_vm1, %v6420_v62 }
  0x46   :  { %6136 = vmatpush.bf16.msra.mxu3 %v5777_v53  ;;  %v6107_v53 = vld [vmem:[#allocation2 + $0x68] sm:$0xf0] }
  0x47   :  { %v5821_v54 = vor.u32 %v6107_v53, %v5820_v52 }
  0x49   :  { %1396 = vmatpush.bf16.msrb.mxu2 %v5821_v54 }
  0x4f   :  { %5881 = vmatmul.msk.bf16.gmra.mxu0 %vm422_vm1, %v6438_v10  ;;  %5902 = vmatmul.msk.bf16.gmra.mxu3 %vm422_vm1, %v6443_v11 }
  0x50   :  { %5908 = vmatmul.msk.bf16.gmra.mxu1 %vm422_vm1, %v6438_v10 }
  0x52   :  { %5935 = vmatmul.msk.bf16.gmra.mxu2 %vm422_vm1, %v6438_v10 }
  0x5f   :  { %5882 = vmatmul.msk.bf16.gmra.mxu0 %vm422_vm1, %v6456_v12  ;;  %5903 = vmatmul.msk.bf16.gmra.mxu3 %vm422_vm1, %v6461_v13 }
  0x60   :  { %5909 = vmatmul.msk.bf16.gmra.mxu1 %vm422_vm1, %v6456_v12 }
  0x62   :  { %5936 = vmatmul.msk.bf16.gmra.mxu2 %vm422_vm1, %v6456_v12 }
  0x6f   :  { %5883 = vmatmul.msk.bf16.gmra.mxu0 %vm422_vm1, %v6474_v14  ;;  %5904 = vmatmul.msk.bf16.gmra.mxu3 %vm422_vm1, %v6479_v15 }
  0x70   :  { %5910 = vmatmul.msk.bf16.gmra.mxu1 %vm422_vm1, %v6474_v14 }
  0x72   :  { %5937 = vmatmul.msk.bf16.gmra.mxu2 %vm422_vm1, %v6474_v14 }
  0x7f   :  { %5884 = vmatmul.msk.bf16.gmra.mxu0 %vm422_vm1, %v6492_v16  ;;  %5926 = vmatmul.msk.bf16.vlgmr.msrb.gmra.mxu3 %vm422_vm1, %v6382_v56 }
  0x80   :  { %5911 = vmatmul.msk.bf16.gmra.mxu1 %vm422_vm1, %v6492_v16  ;;  %961 = vmatpush.bf16.msrb.mxu3 %v515_v1  ;;  %v6116_v1 = vld [vmem:[#allocation2 + $0xb4] sm:$0xf] }
  0x82   :  { %5938 = vmatmul.msk.bf16.gmra.mxu2 %vm422_vm1, %v6492_v16 }
  0x8f   :  { %5885 = vmatmul.msk.bf16.gmra.mxu0 %vm422_vm1, %v6505_v23  ;;  %5927 = vmatmul.msk.bf16.gmra.mxu3 %vm422_vm1, %v6405_v61 }
  0x90   :  { %5912 = vmatmul.msk.bf16.gmra.mxu1 %vm422_vm1, %v6505_v23 }
  0x92   :  { %5939 = vmatmul.msk.bf16.gmra.mxu2 %vm422_vm1, %v6505_v23 }
  0x9c   :  { %v6520_v28 = vpop.f32.mrf.mxu0 }
  0x9d   :  { %11204 = vst [vmem:[#allocation8_spill] sm:$0xff] %v6520_v28  ;;  %v6522_v29 = vpop.f32.mrf.mxu1 }
  0x9e   :  { %11205 = vst [vmem:[#allocation9_spill] sm:$0xff] %v6522_v29 }
  0x9f   :  { %5886 = vmatmul.msk.bf16.gmra.mxu0 %vm422_vm1, %v6518_v27  ;;  %5928 = vmatmul.msk.bf16.gmra.mxu3 %vm422_vm1, %v6425_v63 }
  0xa0   :  { %5913 = vmatmul.msk.bf16.gmra.mxu1 %vm422_vm1, %v6518_v27 }
  0xa2   :  { %5940 = vmatmul.msk.bf16.gmra.mxu2 %vm422_vm1, %v6518_v27  ;;  %v6532_v30 = vpop.f32.mrf.mxu3 }
  0xa3   :  { %11206 = vst [vmem:[#allocation10_spill] sm:$0xff] %v6532_v30 }
  0xa4   :  { %v6536_v32 = vpop.f32.mrf.mxu0 }
  0xa5   :  { %v6534_v31 = vpop.f32.mrf.mxu2  ;;  %v6538_v33 = vpop.f32.mrf.mxu1 }
  0xa6   :  { %11207 = vst [vmem:[#allocation11_spill] sm:$0xff] %v6534_v31 }
  0xaa   :  { %v6540_v34 = vpop.f32.mrf.mxu3 }
  0xab   :  { %11208 = vst [vmem:[#allocation12_spill] sm:$0xff] %v6540_v34 }
  0xac   :  { %v6549_v37 = vpop.f32.mrf.mxu0 }
  0xad   :  { %v6542_v35 = vpop.f32.mrf.mxu2  ;;  %11209 = vst [vmem:[#allocation13_spill] sm:$0xff] %v6549_v37  ;;  %v6551_v38 = vpop.f32.mrf.mxu1 }
  0xae   :  { %11210 = vst [vmem:[#allocation14_spill] sm:$0xff] %v6551_v38 }
  0xaf   :  { %5887 = vmatmul.msk.bf16.gmra.mxu0 %vm422_vm1, %v6547_v36  ;;  %5929 = vmatmul.msk.bf16.gmra.mxu3 %vm422_vm1, %v6443_v11 }
  0xb0   :  { %5914 = vmatmul.msk.bf16.gmra.mxu1 %vm422_vm1, %v6547_v36 }
  0xb2   :  { %5941 = vmatmul.msk.bf16.gmra.mxu2 %vm422_vm1, %v6547_v36  ;;  %v6561_v39 = vpop.f32.mrf.mxu3 }
  0xb3   :  { %11211 = vst [vmem:[#allocation15_spill] sm:$0xff] %v6561_v39 }
  0xb4   :  { %v6565_v41 = vpop.f32.mrf.mxu0 }
  0xb5   :  { %v6563_v40 = vpop.f32.mrf.mxu2  ;;  %11213 = vst [vmem:[#allocation17_spill] sm:$0xff] %v6565_v41  ;;  %v6567_v42 = vpop.f32.mrf.mxu1 }
  0xb6   :  { %11212 = vst [vmem:[#allocation16_spill] sm:$0xff] %v6563_v40 }
  0xb7   :  { %11214 = vst [vmem:[#allocation18_spill] sm:$0xff] %v6567_v42 }
  0xba   :  { %v6569_v43 = vpop.f32.mrf.mxu3 }
  0xbb   :  { %11215 = vst [vmem:[#allocation19_spill] sm:$0xff] %v6569_v43 }
  0xbc   :  { %v6578_v46 = vpop.f32.mrf.mxu0 }
  0xbd   :  { %v6571_v44 = vpop.f32.mrf.mxu2  ;;  %11216 = vst [vmem:[#allocation20_spill] sm:$0xff] %v6578_v46  ;;  %v6580_v47 = vpop.f32.mrf.mxu1 }
  0xbe   :  { %11217 = vst [vmem:[#allocation21_spill] sm:$0xff] %v6580_v47 }
  0xbf   :  { %5888 = vmatmul.msk.bf16.gmra.mxu0 %vm422_vm1, %v6576_v45  ;;  %5930 = vmatmul.msk.bf16.gmra.mxu3 %vm422_vm1, %v6461_v13 }
  0xc0   :  { %5915 = vmatmul.msk.bf16.gmra.mxu1 %vm422_vm1, %v6576_v45 }
  0xc2   :  { %5942 = vmatmul.msk.bf16.gmra.mxu2 %vm422_vm1, %v6576_v45  ;;  %v6590_v48 = vpop.f32.mrf.mxu3 }
  0xc3   :  { %11218 = vst [vmem:[#allocation22_spill] sm:$0xff] %v6590_v48  ;;  %v6694_v48 = vld [vmem:[%s10714_s1 + $0x70] sm:$0xff] }
  0xc4   :  { %v6594_v50 = vpop.f32.mrf.mxu0 }
  0xc5   :  { %v6592_v49 = vpop.f32.mrf.mxu2  ;;  %11220 = vst [vmem:[#allocation24_spill] sm:$0xff] %v6594_v50  ;;  %v6596_v51 = vpop.f32.mrf.mxu1 }
  0xc6   :  { %11219 = vst [vmem:[#allocation23_spill] sm:$0xff] %v6592_v49 }
  0xc7   :  { %11221 = vst [vmem:[#allocation25_spill] sm:$0xff] %v6596_v51 }
  0xca   :  { %v6598_v57 = vpop.f32.mrf.mxu3 }
  0xcb   :  { %11222 = vst [vmem:[#allocation26_spill] sm:$0xff] %v6598_v57 }
  0xcc   :  { %v6607_v0 = vpop.f32.mrf.mxu0 }
  0xcd   :  { %v6600_v58 = vpop.f32.mrf.mxu2  ;;  %11224 = vst [vmem:[#allocation28_spill] sm:$0xff] %v6607_v0  ;;  %v6609_v2 = vpop.f32.mrf.mxu1 }
  0xce   :  { %11223 = vst [vmem:[#allocation27_spill] sm:$0xff] %v6600_v58 }
  0xcf   :  { %11225 = vst [vmem:[#allocation29_spill] sm:$0xff] %v6609_v2  ;;  %5889 = vmatmul.msk.bf16.gmra.mxu0 %vm422_vm1, %v6605_v59  ;;  %5931 = vmatmul.msk.bf16.gmra.mxu3 %vm422_vm1, %v6479_v15 }
  0xd0   :  { %5916 = vmatmul.msk.bf16.gmra.mxu1 %vm422_vm1, %v6605_v59 }
  0xd2   :  { %5943 = vmatmul.msk.bf16.gmra.mxu2 %vm422_vm1, %v6605_v59  ;;  %v6619_v8 = vpop.f32.mrf.mxu3 }
  0xd3   :  { %11226 = vst [vmem:[#allocation30_spill] sm:$0xff] %v6619_v8 }
  0xd4   :  { %v6623_v18 = vpop.f32.mrf.mxu0 }
  0xd5   :  { %v6621_v17 = vpop.f32.mrf.mxu2  ;;  %11228 = vst [vmem:[#allocation32_spill] sm:$0xff] %v6623_v18  ;;  %v6625_v19 = vpop.f32.mrf.mxu1 }
  0xd6   :  { %11227 = vst [vmem:[#allocation31_spill] sm:$0xff] %v6621_v17 }
  0xd7   :  { %11229 = vst [vmem:[#allocation33_spill] sm:$0xff] %v6625_v19 }
  0xda   :  { %v6627_v20 = vpop.f32.mrf.mxu3 }
  0xdb   :  { %11230 = vst [vmem:[#allocation34_spill] sm:$0xff] %v6627_v20 }
  0xdc   :  { %v6636_v24 = vpop.f32.mrf.mxu0 }
  0xdd   :  { %v6629_v21 = vpop.f32.mrf.mxu2  ;;  %11232 = vst [vmem:[#allocation36_spill] sm:$0xff] %v6636_v24  ;;  %v6638_v25 = vpop.f32.mrf.mxu1 }
  0xde   :  { %11231 = vst [vmem:[#allocation35_spill] sm:$0xff] %v6629_v21 }
  0xdf   :  { %11233 = vst [vmem:[#allocation37_spill] sm:$0xff] %v6638_v25  ;;  %5890 = vmatmul.msk.bf16.gmra.mxu0 %vm422_vm1, %v6634_v22  ;;  %5953 = vmatmul.msk.bf16.vlgmr.msra.gmra.mxu3 %vm422_vm1, %v6382_v56  ;;  %v6664_v56 = vld [vmem:[%s10714_s1 + $0x68] sm:$0xff] }
  0xe0   :  { %5917 = vmatmul.msk.bf16.gmra.mxu1 %vm422_vm1, %v6634_v22 }
  0xe2   :  { %5944 = vmatmul.msk.bf16.gmra.mxu2 %vm422_vm1, %v6634_v22  ;;  %v6648_v26 = vpop.f32.mrf.mxu3 }
  0xe3   :  { %11234 = vst [vmem:[#allocation38_spill] sm:$0xff] %v6648_v26 }
  0xe4   :  { %v6652_v53 = vpop.f32.mrf.mxu0 }
  0xe5   :  { %v6650_v52 = vpop.f32.mrf.mxu2  ;;  %11236 = vst [vmem:[#allocation40_spill] sm:$0xff] %v6652_v53  ;;  %v6654_v54 = vpop.f32.mrf.mxu1 }
  0xe6   :  { %11235 = vst [vmem:[#allocation39_spill] sm:$0xff] %v6650_v52 }
  0xe7   :  { %11237 = vst [vmem:[#allocation41_spill] sm:$0xff] %v6654_v54 }
  0xea   :  { %v6657_v4 = vpop.f32.mrf.mxu3 }
  0xeb   :  { %11238 = vst [vmem:[#allocation42_spill] sm:$0xff] %v6657_v4 }
  0xec   :  { %v6666_v6 = vpop.f32.mrf.mxu0 }
  0xed   :  { %v6659_v5 = vpop.f32.mrf.mxu2  ;;  %11240 = vst [vmem:[#allocation44_spill] sm:$0xff] %v6666_v6  ;;  %v6668_v7 = vpop.f32.mrf.mxu1 }
  0xee   :  { %11239 = vst [vmem:[#allocation43_spill] sm:$0xff] %v6659_v5 }
  0xef   :  { %11241 = vst [vmem:[#allocation45_spill] sm:$0xff] %v6668_v7  ;;  %5891 = vmatmul.msk.bf16.gmra.mxu0 %vm422_vm1, %v6664_v56  ;;  %5954 = vmatmul.msk.bf16.gmra.mxu3 %vm422_vm1, %v6405_v61 }
  0xf0   :  { %5918 = vmatmul.msk.bf16.gmra.mxu1 %vm422_vm1, %v6664_v56 }
  0xf2   :  { %5945 = vmatmul.msk.bf16.gmra.mxu2 %vm422_vm1, %v6664_v56  ;;  %v6679_v26 = vpop.f32.mrf.mxu3 }
  0xf3   :  { %11242 = vst [vmem:[#allocation46_spill] sm:$0xff] %v6679_v26 }
  0xf4   :  { %v6683_v3 = vpop.f32.mrf.mxu0 }
  0xf5   :  { %v6681_v57 = vpop.f32.mrf.mxu2  ;;  %11244 = vst [vmem:[#allocation48_spill] sm:$0xff] %v6683_v3  ;;  %v6685_v39 = vpop.f32.mrf.mxu1  ;;  %v5786_v3 = vld [vmem:[#allocation2 + $0x2c] sm:$0xf0] }
  0xf6   :  { %11243 = vst [vmem:[#allocation47_spill] sm:$0xff] %v6681_v57 }
  0xf7   :  { %11245 = vst [vmem:[#allocation49_spill] sm:$0xff] %v6685_v39  ;;  %v6096_v39 = vld [vmem:[#allocation2 + $0x14] sm:$0xf] }
  0xf8   :  { %v5789_v57 = vor.u32 %v6096_v39, %v5786_v3 }
  0xfa   :  { %v6687_v20 = vpop.f32.mrf.mxu3  ;;  %1253 = vmatpush.bf16.msrb.mxu1 %v5789_v57 }
  0xfb   :  { %11246 = vst [vmem:[#allocation50_spill] sm:$0xff] %v6687_v20  ;;  %v5862_v20 = vld [vmem:[#allocation2 + $0xcc] sm:$0xf0] }
  0xfc   :  { %v6696_v4 = vpop.f32.mrf.mxu0  ;;  %v5865_v26 = vor.u32 %v6116_v1, %v5862_v20  ;;  %v6100_v1 = vld [vmem:[#allocation2 + $0x30] sm:$0xf0] }
  0xfd   :  { %v6689_v61 = vpop.f32.mrf.mxu2  ;;  %11248 = vst [vmem:[#allocation52_spill] sm:$0xff] %v6696_v4  ;;  %v6698_v9 = vpop.f32.mrf.mxu1  ;;  %v6723_v4 = vld [vmem:[%s10714_s1 + $0x78] sm:$0xff] }
  0xfe   :  { %11247 = vst [vmem:[#allocation51_spill] sm:$0xff] %v6689_v61  ;;  %962 = vmatpush.bf16.msrb.mxu3 %v5865_v26  ;;  %v5792_v26 = vld [vmem:[#allocation2 + $0x18] sm:$0xf] }
  0xff   :  { %11249 = vst [vmem:[#allocation53_spill] sm:$0xff] %v6698_v9  ;;  %5892 = vmatmul.msk.bf16.gmra.mxu0 %vm422_vm1, %v6694_v48  ;;  %5955 = vmatmul.msk.bf16.gmra.mxu3 %vm422_vm1, %v6425_v63 }
 0x100   :  { %5919 = vmatmul.msk.bf16.gmra.mxu1 %vm422_vm1, %v6694_v48 }
 0x102   :  { %5946 = vmatmul.msk.bf16.gmra.mxu2 %vm422_vm1, %v6694_v48  ;;  %v6708_v34 = vpop.f32.mrf.mxu3 }
 0x103   :  { %11250 = vst [vmem:[#allocation54_spill] sm:$0xff] %v6708_v34  ;;  %v5793_v34 = vor.u32 %v6100_v1, %v5792_v26  ;;  %v6102_v26 = vld [vmem:[#allocation2 + $0x44] sm:$0xf]  ;;  %v5806_v1 = vld [vmem:[#allocation2 + $0x5c] sm:$0xf0] }
 0x104   :  { %v6712_v43 = vpop.f32.mrf.mxu0  ;;  %v5809_v5 = vor.u32 %v6102_v26, %v5806_v1 }
 0x105   :  { %v6710_v8 = vpop.f32.mrf.mxu2  ;;  %11252 = vst [vmem:[#allocation56_spill] sm:$0xff] %v6712_v43  ;;  %v6714_v30 = vpop.f32.mrf.mxu1  ;;  %1397 = vmatpush.bf16.msrb.mxu2 %v5793_v34  ;;  %v6752_v34 = vld [vmem:[%s10714_s1 + $0x80] sm:$0xff] }
 0x106   :  { %11251 = vst [vmem:[#allocation55_spill] sm:$0xff] %v6710_v8 }
 0x107   :  { %11253 = vst [vmem:[#allocation57_spill] sm:$0xff] %v6714_v30  ;;  %v5834_v30 = vld [vmem:[#allocation2 + $0x94] sm:$0xf0] }
 0x10a   :  { %v6716_v9 = vpop.f32.mrf.mxu3 }
 0x10b   :  { %11254 = vst [vmem:[#allocation58_spill] sm:$0xff] %v6716_v9  ;;  %v5784_v9 = vld [vmem:[#allocation2 + $0x10] sm:$0xf] }
 0x10c   :  { %v6725_v61 = vpop.f32.mrf.mxu0 }
 0x10d   :  { %v6718_v63 = vpop.f32.mrf.mxu2  ;;  %11256 = vst [vmem:[#allocation60_spill] sm:$0xff] %v6725_v61  ;;  %v6727_v20 = vpop.f32.mrf.mxu1  ;;  %v6109_v61 = vld [vmem:[#allocation2 + $0x7c] sm:$0xf] }
 0x10e   :  { %11255 = vst [vmem:[#allocation59_spill] sm:$0xff] %v6718_v63  ;;  %v6099_v63 = vld [vmem:[#allocation2 + $0x28] sm:$0xf0]  ;;  %v5837_v8 = vor.u32 %v6109_v61, %v5834_v30  ;;  %v5778_v61 = vld [vmem:[#allocation2 + $0x24] sm:$0xf0] }
 0x10f   :  { %11257 = vst [vmem:[#allocation61_spill] sm:$0xff] %v6727_v20  ;;  %5893 = vmatmul.msk.bf16.gmra.mxu0 %vm422_vm1, %v6723_v4  ;;  %5956 = vmatmul.msk.bf16.gmra.mxu3 %vm422_vm1, %v6443_v11  ;;  %v5785_v43 = vor.u32 %v6099_v63, %v5784_v9  ;;  %v6095_v30 = vld [vmem:[#allocation2 + $0xc] sm:$0xf] }
 0x110   :  { %5920 = vmatmul.msk.bf16.gmra.mxu1 %vm422_vm1, %v6723_v4  ;;  %963 = vmatpush.bf16.msrb.mxu3 %v5837_v8  ;;  %v5781_v39 = vor.u32 %v6095_v30, %v5778_v61 }
 0x111   :  { %1109 = vmatpush.bf16.msrb.mxu0 %v5785_v43 }
 0x112   :  { %5947 = vmatmul.msk.bf16.gmra.mxu2 %vm422_vm1, %v6723_v4  ;;  %v6737_v20 = vpop.f32.mrf.mxu3 }
 0x113   :  { %11258 = vst [vmem:[#allocation62_spill] sm:$0xff] %v6737_v20 }
 0x114   :  { %v6741_v7 = vpop.f32.mrf.mxu0  ;;  %964 = vmatpush.bf16.msrb.mxu3 %v5809_v5 }
 0x115   :  { %v6739_v11 = vpop.f32.mrf.mxu2  ;;  %11260 = vst [vmem:[#allocation64_spill] sm:$0xff] %v6741_v7  ;;  %v6743_v6 = vpop.f32.mrf.mxu1  ;;  %v1553_v7 = vadd.f32 %v6551_v38, %v6549_v37 }
 0x116   :  { %11259 = vst [vmem:[#allocation63_spill] sm:$0xff] %v6739_v11 }
 0x117   :  { %11261 = vst [vmem:[#allocation65_spill] sm:$0xff] %v6743_v6 }
 0x118   :  { %965 = vmatpush.bf16.msrb.mxu3 %v5781_v39 }
 0x11a   :  { %v6745_v20 = vpop.f32.mrf.mxu3 }
 0x11b   :  { %11262 = vst [vmem:[#allocation66_spill] sm:$0xff] %v6745_v20 }
 0x11c   :  { %v6754_v43 = vpop.f32.mrf.mxu0 }
 0x11d   :  { %v6747_v9 = vpop.f32.mrf.mxu2  ;;  %11264 = vst [vmem:[#allocation68_spill] sm:$0xff] %v6754_v43  ;;  %v6756_v8 = vpop.f32.mrf.mxu1 }
 0x11e   :  { %11263 = vst [vmem:[#allocation67_spill] sm:$0xff] %v6747_v9 }
 0x11f   :  { %11265 = vst [vmem:[#allocation69_spill] sm:$0xff] %v6756_v8  ;;  %5894 = vmatmul.msk.bf16.gmra.mxu0 %vm422_vm1, %v6752_v34  ;;  %5957 = vmatmul.msk.bf16.gmra.mxu3 %vm422_vm1, %v6461_v13  ;;  %v6781_v13 = vld [vmem:[%s10714_s1 + $0x88] sm:$0xff] }
 0x120   :  { %5921 = vmatmul.msk.bf16.gmra.mxu1 %vm422_vm1, %v6752_v34 }
 0x122   :  { %5948 = vmatmul.msk.bf16.gmra.mxu2 %vm422_vm1, %v6752_v34  ;;  %v6766_v57 = vpop.f32.mrf.mxu3 }
 0x123   :  { %11266 = vst [vmem:[#allocation70_spill] sm:$0xff] %v6766_v57 }
 0x124   :  { %v6770_v3 = vpop.f32.mrf.mxu0 }
 0x125   :  { %v6768_v5 = vpop.f32.mrf.mxu2  ;;  %11268 = vst [vmem:[#allocation72_spill] sm:$0xff] %v6770_v3  ;;  %v6772_v63 = vpop.f32.mrf.mxu1 }
 0x126   :  { %11267 = vst [vmem:[#allocation71_spill] sm:$0xff] %v6768_v5  ;;  %v2036_v5 = vmul.f32 %v6551_v38, %v6551_v38 }
 0x127   :  { %11269 = vst [vmem:[#allocation73_spill] sm:$0xff] %v6772_v63 }
 0x12a   :  { %v6774_v26 = vpop.f32.mrf.mxu3 }
 0x12b   :  { %11270 = vst [vmem:[#allocation74_spill] sm:$0xff] %v6774_v26 }
 0x12c   :  { %v6783_v30 = vpop.f32.mrf.mxu0 }
 0x12d   :  { %v6776_v1 = vpop.f32.mrf.mxu2  ;;  %11272 = vst [vmem:[#allocation76_spill] sm:$0xff] %v6783_v30  ;;  %v6785_v61 = vpop.f32.mrf.mxu1 }
 0x12e   :  { %11271 = vst [vmem:[#allocation75_spill] sm:$0xff] %v6776_v1 }
 0x12f   :  { %11273 = vst [vmem:[#allocation77_spill] sm:$0xff] %v6785_v61  ;;  %5895 = vmatmul.msk.bf16.gmra.mxu0 %vm422_vm1, %v6781_v13  ;;  %5958 = vmatmul.msk.bf16.gmra.mxu3 %vm422_vm1, %v6479_v15  ;;  %v6085_v15 = vld [vmem:[%s10714_s1 + $0x90] sm:$0xff] }
 0x130   :  { %5922 = vmatmul.msk.bf16.gmra.mxu1 %vm422_vm1, %v6781_v13 }
 0x132   :  { %5949 = vmatmul.msk.bf16.gmra.mxu2 %vm422_vm1, %v6781_v13  ;;  %v6795_v39 = vpop.f32.mrf.mxu3 }
 0x133   :  { %11274 = vst [vmem:[#allocation78_spill] sm:$0xff] %v6795_v39 }
 0x134   :  { %v6799_v57 = vpop.f32.mrf.mxu0 }
 0x135   :  { %v6797_v26 = vpop.f32.mrf.mxu2  ;;  %11276 = vst [vmem:[#allocation80_spill] sm:$0xff] %v6799_v57  ;;  %v6801_v20 = vpop.f32.mrf.mxu1 }
 0x136   :  { %11275 = vst [vmem:[#allocation79_spill] sm:$0xff] %v6797_v26 }
 0x137   :  { %11277 = vst [vmem:[#allocation81_spill] sm:$0xff] %v6801_v20 }
 0x13a   :  { %v6803_v61 = vpop.f32.mrf.mxu3 }
 0x13b   :  { %11278 = vst [vmem:[#allocation82_spill] sm:$0xff] %v6803_v61 }
 0x13c   :  { %v6810_v1 = vpop.f32.mrf.mxu0 }
 0x13d   :  { %v6805_v30 = vpop.f32.mrf.mxu2  ;;  %11280 = vst [vmem:[#allocation84_spill] sm:$0xff] %v6810_v1  ;;  %v6812_v63 = vpop.f32.mrf.mxu1  ;;  %v6086_v1 = vld [vmem:[%s10714_s1 + $0x98] sm:$0xff] }
 0x13e   :  { %11279 = vst [vmem:[#allocation83_spill] sm:$0xff] %v6805_v30 }
 0x13f   :  { %11281 = vst [vmem:[#allocation85_spill] sm:$0xff] %v6812_v63  ;;  %5896 = vmatmul.msk.bf16.gmra.mxu0 %vm422_vm1, %v6085_v15  ;;  %5959 = vmatmul.msk.bf16.vlgmr.msrb.gmra.mxu3 %vm422_vm1, %v6377_v55 }
 0x140   :  { %5923 = vmatmul.msk.bf16.gmra.mxu1 %vm422_vm1, %v6085_v15 }
 0x142   :  { %5950 = vmatmul.msk.bf16.gmra.mxu2 %vm422_vm1, %v6085_v15  ;;  %v6819_v61 = vpop.f32.mrf.mxu3 }
 0x143   :  { %11282 = vst [vmem:[#allocation86_spill] sm:$0xff] %v6819_v61 }
 0x144   :  { %v6823_v30 = vpop.f32.mrf.mxu0 }
 0x145   :  { %v6821_v39 = vpop.f32.mrf.mxu2  ;;  %11284 = vst [vmem:[#allocation88_spill] sm:$0xff] %v6823_v30  ;;  %v6825_v20 = vpop.f32.mrf.mxu1 }
 0x146   :  { %11283 = vst [vmem:[#allocation87_spill] sm:$0xff] %v6821_v39 }
 0x147   :  { %11285 = vst [vmem:[#allocation89_spill] sm:$0xff] %v6825_v20  ;;  %v6087_v20 = vld [vmem:[%s10714_s1 + $0xa0] sm:$0xff] }
 0x14a   :  { %v6827_v57 = vpop.f32.mrf.mxu3 }
 0x14b   :  { %11286 = vst [vmem:[#allocation90_spill] sm:$0xff] %v6827_v57 }
 0x14c   :  { %v6834_v26 = vpop.f32.mrf.mxu0 }
 0x14d   :  { %v6829_v63 = vpop.f32.mrf.mxu2  ;;  %11288 = vst [vmem:[#allocation92_spill] sm:$0xff] %v6834_v26  ;;  %v6836_v3 = vpop.f32.mrf.mxu1 }
 0x14e   :  { %11287 = vst [vmem:[#allocation91_spill] sm:$0xff] %v6829_v63 }
 0x14f   :  { %11289 = vst [vmem:[#allocation93_spill] sm:$0xff] %v6836_v3  ;;  %5897 = vmatmul.msk.bf16.gmra.mxu0 %vm422_vm1, %v6086_v1  ;;  %5960 = vmatmul.msk.bf16.gmra.mxu3 %vm422_vm1, %v6400_v60 }
 0x150   :  { %5924 = vmatmul.msk.bf16.gmra.mxu1 %vm422_vm1, %v6086_v1 }
 0x152   :  { %5951 = vmatmul.msk.bf16.gmra.mxu2 %vm422_vm1, %v6086_v1  ;;  %v6843_v15 = vpop.f32.mrf.mxu3 }
 0x153   :  { %11290 = vst [vmem:[#allocation94_spill] sm:$0xff] %v6843_v15 }
 0x154   :  { %v6847_v57 = vpop.f32.mrf.mxu0 }
 0x155   :  { %v6845_v61 = vpop.f32.mrf.mxu2  ;;  %11292 = vst [vmem:[#allocation96_spill] sm:$0xff] %v6847_v57  ;;  %v6849_v63 = vpop.f32.mrf.mxu1 }
 0x156   :  { %11291 = vst [vmem:[#allocation95_spill] sm:$0xff] %v6845_v61 }
 0x157   :  { %11293 = vst [vmem:[#allocation97_spill] sm:$0xff] %v6849_v63 }
 0x15a   :  { %v6851_v26 = vpop.f32.mrf.mxu3 }
 0x15b   :  { %11294 = vst [vmem:[#allocation98_spill] sm:$0xff] %v6851_v26 }
 0x15c   :  { %v6858_v30 = vpop.f32.mrf.mxu0 }
 0x15d   :  { %v6853_v3 = vpop.f32.mrf.mxu2  ;;  %11296 = vst [vmem:[#allocation100_spill] sm:$0xff] %v6858_v30  ;;  %v6860_v39 = vpop.f32.mrf.mxu1 }
 0x15e   :  { %11295 = vst [vmem:[#allocation99_spill] sm:$0xff] %v6853_v3 }
 0x15f   :  { %11297 = vst [vmem:[#allocation101_spill] sm:$0xff] %v6860_v39  ;;  %5898 = vmatmul.msk.bf16.gmra.mxu0 %vm422_vm1, %v6087_v20  ;;  %5961 = vmatmul.msk.bf16.gmra.mxu3 %vm422_vm1, %v6420_v62 }
 0x160   :  { %5925 = vmatmul.msk.bf16.gmra.mxu1 %vm422_vm1, %v6087_v20 }
 0x162   :  { %5952 = vmatmul.msk.bf16.gmra.mxu2 %vm422_vm1, %v6087_v20  ;;  %v6867_v1 = vpop.f32.mrf.mxu3 }
 0x163   :  { %11298 = vst [vmem:[#allocation102_spill] sm:$0xff] %v6867_v1 }
 0x164   :  { %v6871_v15 = vpop.f32.mrf.mxu0 }
 0x165   :  { %v6869_v26 = vpop.f32.mrf.mxu2  ;;  %11300 = vst [vmem:[#allocation104_spill] sm:$0xff] %v6871_v15  ;;  %v6873_v61 = vpop.f32.mrf.mxu1 }
 0x166   :  { %11299 = vst [vmem:[#allocation103_spill] sm:$0xff] %v6869_v26  ;;  %v2029_v26 = vmul.f32 %v6538_v33, %v6538_v33 }
 0x167   :  { %11301 = vst [vmem:[#allocation105_spill] sm:$0xff] %v6873_v61 }
 0x16a   :  { %v6875_v30 = vpop.f32.mrf.mxu3 }
 0x16b   :  { %11302 = vst [vmem:[#allocation106_spill] sm:$0xff] %v6875_v30 }
 0x16c   :  { %v6879_v3 = vpop.f32.mrf.mxu0 }
 0x16d   :  { %v6877_v39 = vpop.f32.mrf.mxu2  ;;  %11304 = vst [vmem:[#allocation108_spill] sm:$0xff] %v6879_v3  ;;  %v6881_v63 = vpop.f32.mrf.mxu1 }
 0x16e   :  { %11303 = vst [vmem:[#allocation107_spill] sm:$0xff] %v6877_v39 }
 0x16f   :  { %11305 = vst [vmem:[#allocation109_spill] sm:$0xff] %v6881_v63  ;;  %5962 = vmatmul.msk.bf16.gmra.mxu3 %vm422_vm1, %v6438_v10  ;;  %5986 = vmatmul.msk.bf16.vlgmr.msrb.gmra.mxu0 %vm422_vm1, %v6377_v55 }
 0x170   :  { %6013 = vmatmul.msk.bf16.vlgmr.msrb.gmra.mxu1 %vm422_vm1, %v6377_v55 }
 0x172   :  { %6040 = vmatmul.msk.bf16.vlgmr.msrb.gmra.mxu2 %vm422_vm1, %v6377_v55  ;;  %v6891_v20 = vpop.f32.mrf.mxu3 }
 0x173   :  { %11306 = vst [vmem:[#allocation110_spill] sm:$0xff] %v6891_v20 }
 0x174   :  { %v6895_v1 = vpop.f32.mrf.mxu0 }
 0x175   :  { %v6893_v30 = vpop.f32.mrf.mxu2  ;;  %11308 = vst [vmem:[#allocation112_spill] sm:$0xff] %v6895_v1  ;;  %v6897_v39 = vpop.f32.mrf.mxu1  ;;  %v2028_v1 = vmul.f32 %v6536_v32, %v6536_v32 }
 0x176   :  { %11307 = vst [vmem:[#allocation111_spill] sm:$0xff] %v6893_v30 }
 0x177   :  { %11309 = vst [vmem:[#allocation113_spill] sm:$0xff] %v6897_v39 }
 0x17a   :  { %v6899_v61 = vpop.f32.mrf.mxu3 }
 0x17b   :  { %11310 = vst [vmem:[#allocation114_spill] sm:$0xff] %v6899_v61 }
 0x17c   :  { %v6903_v63 = vpop.f32.mrf.mxu0 }
 0x17d   :  { %v6901_v15 = vpop.f32.mrf.mxu2  ;;  %11312 = vst [vmem:[#allocation116_spill] sm:$0xff] %v6903_v63  ;;  %v6905_v3 = vpop.f32.mrf.mxu1 }
 0x17e   :  { %11311 = vst [vmem:[#allocation115_spill] sm:$0xff] %v6901_v15 }
 0x17f   :  { %11313 = vst [vmem:[#allocation117_spill] sm:$0xff] %v6905_v3  ;;  %5963 = vmatmul.msk.bf16.gmra.mxu3 %vm422_vm1, %v6456_v12  ;;  %5987 = vmatmul.msk.bf16.gmra.mxu0 %vm422_vm1, %v6400_v60 }
 0x180   :  { %6014 = vmatmul.msk.bf16.gmra.mxu1 %vm422_vm1, %v6400_v60 }
 0x182   :  { %6041 = vmatmul.msk.bf16.gmra.mxu2 %vm422_vm1, %v6400_v60  ;;  %v6915_v55 = vpop.f32.mrf.mxu3 }
 0x183   :  { %11314 = vst [vmem:[#allocation118_spill] sm:$0xff] %v6915_v55 }
 0x184   :  { %v6919_v61 = vpop.f32.mrf.mxu0 }
 0x185   :  { %v6917_v20 = vpop.f32.mrf.mxu2  ;;  %11316 = vst [vmem:[#allocation120_spill] sm:$0xff] %v6919_v61  ;;  %v6921_v63 = vpop.f32.mrf.mxu1 }
 0x186   :  { %11315 = vst [vmem:[#allocation119_spill] sm:$0xff] %v6917_v20 }
 0x187   :  { %11317 = vst [vmem:[#allocation121_spill] sm:$0xff] %v6921_v63 }
 0x18a   :  { %v6923_v3 = vpop.f32.mrf.mxu3 }
 0x18b   :  { %11318 = vst [vmem:[#allocation122_spill] sm:$0xff] %v6923_v3 }
 0x18c   :  { %v6927_v15 = vpop.f32.mrf.mxu0 }
 0x18d   :  { %v6925_v30 = vpop.f32.mrf.mxu2  ;;  %11320 = vst [vmem:[#allocation124_spill] sm:$0xff] %v6927_v15  ;;  %v6929_v39 = vpop.f32.mrf.mxu1  ;;  %v2023_v15 = vmul.f32 %v6534_v31, %v6534_v31 }
 0x18e   :  { %11319 = vst [vmem:[#allocation123_spill] sm:$0xff] %v6925_v30 }
 0x18f   :  { %11321 = vst [vmem:[#allocation125_spill] sm:$0xff] %v6929_v39  ;;  %5964 = vmatmul.msk.bf16.gmra.mxu3 %vm422_vm1, %v6474_v14  ;;  %5988 = vmatmul.msk.bf16.gmra.mxu0 %vm422_vm1, %v6420_v62 }
 0x190   :  { %6015 = vmatmul.msk.bf16.gmra.mxu1 %vm422_vm1, %v6420_v62 }
 0x192   :  { %6042 = vmatmul.msk.bf16.gmra.mxu2 %vm422_vm1, %v6420_v62  ;;  %v6939_v60 = vpop.f32.mrf.mxu3 }
 0x193   :  { %11322 = vst [vmem:[#allocation126_spill] sm:$0xff] %v6939_v60 }
 0x194   :  { %v6943_v55 = vpop.f32.mrf.mxu0 }
 0x195   :  { %v6941_v3 = vpop.f32.mrf.mxu2  ;;  %11324 = vst [vmem:[#allocation128_spill] sm:$0xff] %v6943_v55  ;;  %v6945_v30 = vpop.f32.mrf.mxu1 }
 0x196   :  { %11323 = vst [vmem:[#allocation127_spill] sm:$0xff] %v6941_v3 }
 0x197   :  { %11325 = vst [vmem:[#allocation129_spill] sm:$0xff] %v6945_v30 }
 0x19a   :  { %v6947_v63 = vpop.f32.mrf.mxu3 }
 0x19b   :  { %11326 = vst [vmem:[#allocation130_spill] sm:$0xff] %v6947_v63 }
 0x19c   :  { %v6951_v20 = vpop.f32.mrf.mxu0 }
 0x19d   :  { %v6949_v61 = vpop.f32.mrf.mxu2  ;;  %11328 = vst [vmem:[#allocation132_spill] sm:$0xff] %v6951_v20  ;;  %v6953_v39 = vpop.f32.mrf.mxu1 }
 0x19e   :  { %11327 = vst [vmem:[#allocation131_spill] sm:$0xff] %v6949_v61 }
 0x19f   :  { %11329 = vst [vmem:[#allocation133_spill] sm:$0xff] %v6953_v39  ;;  %5965 = vmatmul.msk.bf16.gmra.mxu3 %vm422_vm1, %v6492_v16  ;;  %5989 = vmatmul.msk.bf16.gmra.mxu0 %vm422_vm1, %v6438_v10 }
 0x1a0   :  { %6016 = vmatmul.msk.bf16.gmra.mxu1 %vm422_vm1, %v6438_v10 }
 0x1a2   :  { %6043 = vmatmul.msk.bf16.gmra.mxu2 %vm422_vm1, %v6438_v10  ;;  %v6963_v62 = vpop.f32.mrf.mxu3 }
 0x1a3   :  { %11330 = vst [vmem:[#allocation134_spill] sm:$0xff] %v6963_v62 }
 0x1a4   :  { %v6967_v60 = vpop.f32.mrf.mxu0 }
 0x1a5   :  { %v6965_v63 = vpop.f32.mrf.mxu2  ;;  %11332 = vst [vmem:[#allocation136_spill] sm:$0xff] %v6967_v60  ;;  %v6969_v20 = vpop.f32.mrf.mxu1 }
 0x1a6   :  { %11331 = vst [vmem:[#allocation135_spill] sm:$0xff] %v6965_v63 }
 0x1a7   :  { %11333 = vst [vmem:[#allocation137_spill] sm:$0xff] %v6969_v20 }
 0x1aa   :  { %v6971_v39 = vpop.f32.mrf.mxu3 }
 0x1ab   :  { %11334 = vst [vmem:[#allocation138_spill] sm:$0xff] %v6971_v39 }
 0x1ac   :  { %v6975_v30 = vpop.f32.mrf.mxu0 }
 0x1ad   :  { %v6973_v61 = vpop.f32.mrf.mxu2  ;;  %11336 = vst [vmem:[#allocation140_spill] sm:$0xff] %v6975_v30  ;;  %v6977_v55 = vpop.f32.mrf.mxu1 }
 0x1ae   :  { %11335 = vst [vmem:[#allocation139_spill] sm:$0xff] %v6973_v61 }
 0x1af   :  { %11337 = vst [vmem:[#allocation141_spill] sm:$0xff] %v6977_v55  ;;  %5966 = vmatmul.msk.bf16.gmra.mxu3 %vm422_vm1, %v6505_v23  ;;  %5990 = vmatmul.msk.bf16.gmra.mxu0 %vm422_vm1, %v6456_v12 }
 0x1b0   :  { %6017 = vmatmul.msk.bf16.gmra.mxu1 %vm422_vm1, %v6456_v12 }
 0x1b2   :  { %6044 = vmatmul.msk.bf16.gmra.mxu2 %vm422_vm1, %v6456_v12  ;;  %v6987_v10 = vpop.f32.mrf.mxu3 }
 0x1b3   :  { %11338 = vst [vmem:[#allocation142_spill] sm:$0xff] %v6987_v10 }
 0x1b4   :  { %v6991_v39 = vpop.f32.mrf.mxu0 }
 0x1b5   :  { %v6989_v62 = vpop.f32.mrf.mxu2  ;;  %11340 = vst [vmem:[#allocation144_spill] sm:$0xff] %v6991_v39  ;;  %v6993_v30 = vpop.f32.mrf.mxu1 }
 0x1b6   :  { %11339 = vst [vmem:[#allocation143_spill] sm:$0xff] %v6989_v62 }
 0x1b7   :  { %11341 = vst [vmem:[#allocation145_spill] sm:$0xff] %v6993_v30 }
 0x1ba   :  { %v6995_v55 = vpop.f32.mrf.mxu3 }
 0x1bb   :  { %11342 = vst [vmem:[#allocation146_spill] sm:$0xff] %v6995_v55 }
 0x1bc   :  { %v6999_v61 = vpop.f32.mrf.mxu0 }
 0x1bd   :  { %v6997_v63 = vpop.f32.mrf.mxu2  ;;  %11344 = vst [vmem:[#allocation148_spill] sm:$0xff] %v6999_v61  ;;  %v7001_v20 = vpop.f32.mrf.mxu1 }
 0x1be   :  { %11343 = vst [vmem:[#allocation147_spill] sm:$0xff] %v6997_v63 }
 0x1bf   :  { %11345 = vst [vmem:[#allocation149_spill] sm:$0xff] %v7001_v20  ;;  %5967 = vmatmul.msk.bf16.gmra.mxu3 %vm422_vm1, %v6518_v27  ;;  %5991 = vmatmul.msk.bf16.gmra.mxu0 %vm422_vm1, %v6474_v14 }
 0x1c0   :  { %6018 = vmatmul.msk.bf16.gmra.mxu1 %vm422_vm1, %v6474_v14 }
 0x1c2   :  { %6045 = vmatmul.msk.bf16.gmra.mxu2 %vm422_vm1, %v6474_v14  ;;  %v7011_v12 = vpop.f32.mrf.mxu3 }
 0x1c3   :  { %11346 = vst [vmem:[#allocation150_spill] sm:$0xff] %v7011_v12 }
 0x1c4   :  { %v7015_v10 = vpop.f32.mrf.mxu0 }
 0x1c5   :  { %v7013_v55 = vpop.f32.mrf.mxu2  ;;  %11348 = vst [vmem:[#allocation152_spill] sm:$0xff] %v7015_v10  ;;  %v7017_v63 = vpop.f32.mrf.mxu1 }
 0x1c6   :  { %11347 = vst [vmem:[#allocation151_spill] sm:$0xff] %v7013_v55 }
 0x1c7   :  { %11349 = vst [vmem:[#allocation153_spill] sm:$0xff] %v7017_v63 }
 0x1ca   :  { %v7019_v30 = vpop.f32.mrf.mxu3 }
 0x1cb   :  { %v2031_v57 = vmul.f32 %v7019_v30, %v7019_v30 }
 0x1cc   :  { %v7023_v62 = vpop.f32.mrf.mxu0 }
 0x1cd   :  { %v7021_v39 = vpop.f32.mrf.mxu2  ;;  %11351 = vst [vmem:[#allocation155_spill] sm:$0xff] %v7023_v62  ;;  %v7025_v20 = vpop.f32.mrf.mxu1 }
 0x1ce   :  { %11350 = vst [vmem:[#allocation154_spill] sm:$0xff] %v7021_v39 }
 0x1cf   :  { %11352 = vst [vmem:[#allocation156_spill] sm:$0xff] %v7025_v20  ;;  %5968 = vmatmul.msk.bf16.gmra.mxu3 %vm422_vm1, %v6547_v36  ;;  %5992 = vmatmul.msk.bf16.gmra.mxu0 %vm422_vm1, %v6492_v16 }
 0x1d0   :  { %6019 = vmatmul.msk.bf16.gmra.mxu1 %vm422_vm1, %v6492_v16 }
 0x1d2   :  { %6046 = vmatmul.msk.bf16.gmra.mxu2 %vm422_vm1, %v6492_v16  ;;  %v7035_v14 = vpop.f32.mrf.mxu3 }
 0x1d3   :  { %11353 = vst [vmem:[#allocation157_spill] sm:$0xff] %v7035_v14 }
 0x1d4   :  { %v7039_v39 = vpop.f32.mrf.mxu0 }
 0x1d5   :  { %v7037_v63 = vpop.f32.mrf.mxu2  ;;  %11355 = vst [vmem:[#allocation159_spill] sm:$0xff] %v7039_v39  ;;  %v7041_v62 = vpop.f32.mrf.mxu1  ;;  %v2022_v39 = vmul.f32 %v6522_v29, %v6522_v29 }
 0x1d6   :  { %11354 = vst [vmem:[#allocation158_spill] sm:$0xff] %v7037_v63 }
 0x1d7   :  { %11356 = vst [vmem:[#allocation160_spill] sm:$0xff] %v7041_v62  ;;  %v2021_v62 = vmul.f32 %v6520_v28, %v6520_v28 }
 0x1d9   :  { %v2399_v3 = vadd.f32 %v2022_v39, %v2021_v62  ;;  %v2030_v39 = vmul.f32 %v6542_v35, %v6542_v35 }
 0x1da   :  { %v7045_v10 = vpop.f32.mrf.mxu3 }
 0x1db   :  { %v2400_v62 = vadd.f32 %v2399_v3, %v2023_v15 }
 0x1dc   :  { %v7047_v55 = vpop.f32.mrf.mxu0 }
 0x1dd   :  { %v7043_v20 = vpop.f32.mrf.mxu2  ;;  %11358 = vst [vmem:[#allocation162_spill] sm:$0xff] %v7047_v55  ;;  %v7049_v61 = vpop.f32.mrf.mxu1 }
 0x1de   :  { %11357 = vst [vmem:[#allocation161_spill] sm:$0xff] %v7043_v20 }
 0x1df   :  { %11359 = vst [vmem:[#allocation163_spill] sm:$0xff] %v7049_v61  ;;  %5969 = vmatmul.msk.bf16.gmra.mxu3 %vm422_vm1, %v6576_v45  ;;  %5993 = vmatmul.msk.bf16.gmra.mxu0 %vm422_vm1, %v6505_v23  ;;  %v1534_v61 = vadd.f32 %v6522_v29, %v6520_v28 }
 0x1e0   :  { %6020 = vmatmul.msk.bf16.gmra.mxu1 %vm422_vm1, %v6505_v23 }
 0x1e1   :  { %v1535_v60 = vadd.f32 %v1534_v61, %v6534_v31 }
 0x1e2   :  { %6047 = vmatmul.msk.bf16.gmra.mxu2 %vm422_vm1, %v6505_v23  ;;  %v7065_v55 = vpop.f32.mrf.mxu3 }
 0x1e3   :  { %11363 = vst [vmem:[#allocation167_spill] sm:$0xff] %v7065_v55 }
 0x1e4   :  { %v7061_v63 = vpop.f32.mrf.mxu0 }
 0x1e5   :  { %v7059_v16 = vpop.f32.mrf.mxu2  ;;  %11361 = vst [vmem:[#allocation165_spill] sm:$0xff] %v7061_v63  ;;  %v7063_v20 = vpop.f32.mrf.mxu1  ;;  %v1536_v63 = vadd.f32 %v1535_v60, %v7011_v12 }
 0x1e6   :  { %11360 = vst [vmem:[#allocation164_spill] sm:$0xff] %v7059_v16 }
 0x1e7   :  { %11362 = vst [vmem:[#allocation166_spill] sm:$0xff] %v7063_v20 }
 0x1ea   :  { %v7092_v60 = vpop.f32.mrf.mxu3 }
 0x1eb   :  { %11366 = vst [vmem:[#allocation170_spill] sm:$0xff] %v7092_v60 }
 0x1ec   :  { %v7076_v16 = vpop.f32.mrf.mxu0 }
 0x1ed   :  { %v7074_v23 = vpop.f32.mrf.mxu2  ;;  %11365 = vst [vmem:[#allocation169_spill] sm:$0xff] %v7076_v16  ;;  %v7079_v20 = vpop.f32.mrf.mxu1  ;;  %v1537_v61 = vadd.f32 %v1536_v63, %v7076_v16  ;;  %v2024_v63 = vmul.f32 %v7011_v12, %v7011_v12  ;;  %v2025_v31 = vmul.f32 %v7076_v16, %v7076_v16 }
 0x1ee   :  { %11364 = vst [vmem:[#allocation168_spill] sm:$0xff] %v7074_v23  ;;  %v2408_v23 = vadd.f32 %v2029_v26, %v2028_v1  ;;  %v2026_v43 = vmul.f32 %v7079_v20, %v7079_v20 }
 0x1ef   :  { %5970 = vmatmul.msk.bf16.gmra.mxu3 %vm422_vm1, %v6605_v59  ;;  %5994 = vmatmul.msk.bf16.gmra.mxu0 %vm422_vm1, %v6518_v27  ;;  %v1538_v28 = vadd.f32 %v1537_v61, %v7079_v20  ;;  %v2401_v15 = vadd.f32 %v2400_v62, %v2024_v63  ;;  %v1544_v63 = vadd.f32 %v6538_v33, %v6536_v32 }
 0x1f0   :  { %6021 = vmatmul.msk.bf16.gmra.mxu1 %vm422_vm1, %v6518_v27  ;;  %v2409_v26 = vadd.f32 %v2408_v23, %v2030_v39  ;;  %v2037_v39 = vmul.f32 %v6563_v40, %v6563_v40 }
 0x1f1   :  { %v2402_v9 = vadd.f32 %v2401_v15, %v2025_v31  ;;  %v2038_v31 = vmul.f32 %v7035_v14, %v7035_v14 }
 0x1f2   :  { %6048 = vmatmul.msk.bf16.gmra.mxu2 %vm422_vm1, %v6518_v27  ;;  %v2035_v27 = vmul.f32 %v6549_v37, %v6549_v37  ;;  %v2410_v6 = vadd.f32 %v2409_v26, %v2031_v57  ;;  %v7131_v62 = vpop.f32.mrf.mxu3 }
 0x1f3   :  { %11370 = vst [vmem:[#allocation174_spill] sm:$0xff] %v7131_v62  ;;  %v2403_v57 = vadd.f32 %v2402_v9, %v2026_v43  ;;  %v2042_v43 = vmul.f32 %v6565_v41, %v6565_v41 }
 0x1f4   :  { %v7113_v12 = vpop.f32.mrf.mxu0  ;;  %v2417_v23 = vadd.f32 %v2036_v5, %v2035_v27  ;;  %v1554_v27 = vadd.f32 %v1553_v7, %v6563_v40  ;;  %v2043_v7 = vmul.f32 %v6567_v42, %v6567_v42 }
 0x1f5   :  { %v7106_v29 = vpop.f32.mrf.mxu2  ;;  %11368 = vst [vmem:[#allocation172_spill] sm:$0xff] %v7113_v12  ;;  %v2032_v1 = vmul.f32 %v7113_v12, %v7113_v12  ;;  %v7119_v16 = vpop.f32.mrf.mxu1 }
 0x1f6   :  { %11367 = vst [vmem:[#allocation171_spill] sm:$0xff] %v7106_v29  ;;  %v1540_v3 = vsel %vm1539_vm2, %v7106_v29, 0.0  ;;  %v2027_v61 = vmul.f32 %v7106_v29, %v7106_v29  ;;  %v1545_v29 = vadd.f32 %v1544_v63, %v6542_v35  ;;  %v2033_v5 = vmul.f32 %v7119_v16, %v7119_v16 }
 0x1f7   :  { %11369 = vst [vmem:[#allocation173_spill] sm:$0xff] %v7119_v16  ;;  %v1541_v8 = vadd.f32 %v1540_v3, %v1538_v28  ;;  %v2411_v28 = vadd.f32 %v2410_v6, %v2032_v1  ;;  %v2418_v26 = vadd.f32 %v2417_v23, %v2037_v39  ;;  %v1555_v23 = vadd.f32 %v1554_v27, %v7035_v14 }
 0x1f8   :  { %v2404_v3 = vsel %vm1539_vm2, %v2027_v61, 0.0  ;;  %v1546_v1 = vadd.f32 %v1545_v29, %v7019_v30  ;;  %v1562_v27 = vadd.f32 %v6567_v42, %v6565_v41 }
 0x1f9   :  { %1542 = vadd.xlane.f32.xlu0 %v1541_v8  ;;  %v2405_v38 = vadd.f32 %v2404_v3, %v2403_v57  ;;  %v2412_v9 = vadd.f32 %v2411_v28, %v2033_v5  ;;  %v2419_v40 = vadd.f32 %v2418_v26, %v2038_v31  ;;  %v2044_v28 = vmul.f32 %v6571_v44, %v6571_v44 }
 0x1fa   :  { %v1547_v37 = vadd.f32 %v1546_v1, %v7113_v12  ;;  %v2426_v57 = vadd.f32 %v2043_v7, %v2042_v43  ;;  %v2049_v26 = vmul.f32 %v6578_v46, %v6578_v46  ;;  %v1563_v42 = vadd.f32 %v1562_v27, %v6571_v44 }
 0x1fb   :  { %v2051_v12 = vmul.f32 %v6592_v49, %v6592_v49  ;;  %v2052_v27 = vmul.f32 %v7065_v55, %v7065_v55 }
 0x1fc   :  { %v7142_v15 = vpop.f32.mrf.mxu0 }
 0x1fd   :  { %v7137_v8 = vpop.f32.mrf.mxu2  ;;  %11372 = vst [vmem:[#allocation176_spill] sm:$0xff] %v7142_v15  ;;  %v2039_v61 = vmul.f32 %v7142_v15, %v7142_v15  ;;  %v7149_v63 = vpop.f32.mrf.mxu1  ;;  %v1556_v3 = vadd.f32 %v1555_v23, %v7142_v15  ;;  %v1571_v15 = vadd.f32 %v6580_v47, %v6578_v46 }
 0x1fe   :  { %11371 = vst [vmem:[#allocation175_spill] sm:$0xff] %v7137_v8  ;;  %v2034_v6 = vmul.f32 %v7137_v8, %v7137_v8  ;;  %v1549_v5 = vsel %vm1539_vm2, %v7137_v8, 0.0 }
 0x1ff   :  { %5971 = vmatmul.msk.bf16.gmra.mxu3 %vm422_vm1, %v6634_v22  ;;  %5995 = vmatmul.msk.bf16.gmra.mxu0 %vm422_vm1, %v6547_v36  ;;  %v2420_v31 = vadd.f32 %v2419_v40, %v2039_v61  ;;  %v2050_v40 = vmul.f32 %v6580_v47, %v6580_v47  ;;  %v7184_v61 = vpop.f32.mrf.mxu3 }
 0x200   :  { %v2413_v39 = vsel %vm1539_vm2, %v2034_v6, 0.0  ;;  %6022 = vmatmul.msk.bf16.gmra.mxu1 %vm422_vm1, %v6547_v36  ;;  %v2045_v6 = vmul.f32 %v7045_v10, %v7045_v10  ;;  %11374 = vst [vmem:[#allocation178_spill] sm:$0xff] %v7184_v61 }
 0x201   :  { %2406 = vadd.xlane.f32.xlu0 %v2405_v38  ;;  %v2414_v29 = vadd.f32 %v2413_v39, %v2412_v9  ;;  %v2040_v38 = vmul.f32 %v7149_v63, %v7149_v63  ;;  %v1548_v9 = vadd.f32 %v1547_v37, %v7119_v16  ;;  %v2435_v16 = vadd.f32 %v2050_v40, %v2049_v26 }
 0x202   :  { %6049 = vmatmul.msk.bf16.gmra.mxu2 %vm422_vm1, %v6547_v36  ;;  %v2427_v36 = vadd.f32 %v2426_v57, %v2044_v28  ;;  %v1557_v57 = vadd.f32 %v1556_v3, %v7149_v63 }
 0x203   :  { %2415 = vadd.xlane.f32.xlu1 %v2414_v29  ;;  %v1550_v37 = vadd.f32 %v1549_v5, %v1548_v9  ;;  %v2421_v28 = vadd.f32 %v2420_v31, %v2040_v38  ;;  %v1564_v5 = vadd.f32 %v1563_v42, %v7045_v10  ;;  %v1572_v31 = vadd.f32 %v1571_v15, %v6592_v49 }
 0x204   :  { %v7186_v43 = vpop.f32.mrf.mxu0  ;;  %v2436_v26 = vadd.f32 %v2435_v16, %v2051_v12 }
 0x205   :  { %v7179_v1 = vpop.f32.mrf.mxu2  ;;  %v2046_v39 = vmul.f32 %v7186_v43, %v7186_v43  ;;  %v7194_v29 = vpop.f32.mrf.mxu1  ;;  %v1565_v38 = vadd.f32 %v1564_v5, %v7186_v43 }
 0x206   :  { %11373 = vst [vmem:[#allocation177_spill] sm:$0xff] %v7179_v1  ;;  %v2041_v7 = vmul.f32 %v7179_v1, %v7179_v1  ;;  %v1558_v23 = vsel %vm1539_vm2, %v7179_v1, 0.0  ;;  %v2428_v1 = vadd.f32 %v2427_v36, %v2045_v6 }
 0x207   :  { %v1559_v8 = vadd.f32 %v1558_v23, %v1557_v57  ;;  %v7223_v40 = vpop.f32.mrf.mxu3  ;;  %v1566_v16 = vadd.f32 %v1565_v38, %v7194_v29 }
 0x208   :  { %v2422_v41 = vsel %vm1539_vm2, %v2041_v7, 0.0  ;;  %v2429_v3 = vadd.f32 %v2428_v1, %v2046_v39  ;;  %11377 = vst [vmem:[#allocation181_spill] sm:$0xff] %v7223_v40  ;;  %v2437_v7 = vadd.f32 %v2436_v26, %v2052_v27  ;;  %v2057_v26 = vmul.f32 %v6596_v51, %v6596_v51 }
 0x209   :  { %1551 = vadd.xlane.f32.xlu0 %v1550_v37  ;;  %v2423_v14 = vadd.f32 %v2422_v41, %v2421_v28  ;;  %v2047_v41 = vmul.f32 %v7194_v29, %v7194_v29  ;;  %v1580_v28 = vadd.f32 %v6596_v51, %v6594_v50 }
 0x20b   :  { %2424 = vadd.xlane.f32.xlu2 %v2423_v14  ;;  %1560 = vadd.xlane.f32.xlu1 %v1559_v8  ;;  %v1573_v14 = vadd.f32 %v1572_v31, %v7065_v55  ;;  %v2430_v1 = vadd.f32 %v2429_v3, %v2047_v41  ;;  %v2056_v31 = vmul.f32 %v6594_v50, %v6594_v50 }
 0x20c   :  { %v7212_v6 = vpop.f32.mrf.mxu0 }
 0x20d   :  { %v7208_v9 = vpop.f32.mrf.mxu2  ;;  %11375 = vst [vmem:[#allocation179_spill] sm:$0xff] %v7212_v6  ;;  %v2053_v8 = vmul.f32 %v7212_v6, %v7212_v6  ;;  %v7219_v15 = vpop.f32.mrf.mxu1  ;;  %v1574_v23 = vadd.f32 %v1573_v14, %v7212_v6 }
 0x20e   :  { %v2048_v42 = vmul.f32 %v7208_v9, %v7208_v9  ;;  %11376 = vst [vmem:[#allocation180_spill] sm:$0xff] %v7219_v15  ;;  %v1567_v36 = vsel %vm1539_vm2, %v7208_v9, 0.0  ;;  %v2054_v57 = vmul.f32 %v7219_v15, %v7219_v15 }
 0x20f   :  { %5972 = vmatmul.msk.bf16.gmra.mxu3 %vm422_vm1, %v6664_v56  ;;  %5996 = vmatmul.msk.bf16.gmra.mxu0 %vm422_vm1, %v6576_v45  ;;  %v1568_v37 = vadd.f32 %v1567_v36, %v1566_v16  ;;  %v2438_v5 = vadd.f32 %v2437_v7, %v2053_v8  ;;  %v1581_v56 = vadd.f32 %v1580_v28, %v6600_v58 }
 0x210   :  { %v2431_v12 = vsel %vm1539_vm2, %v2048_v42, 0.0  ;;  %6023 = vmatmul.msk.bf16.gmra.mxu1 %vm422_vm1, %v6576_v45  ;;  %v1575_v38 = vadd.f32 %v1574_v23, %v7219_v15  ;;  %v1589_v16 = vadd.f32 %v6609_v2, %v6607_v0  ;;  %v2059_v28 = vmul.f32 %v7092_v60, %v7092_v60 }
 0x211   :  { %v2432_v39 = vadd.f32 %v2431_v12, %v2430_v1  ;;  %v1582_v42 = vadd.f32 %v1581_v56, %v7092_v60  ;;  %v2439_v1 = vadd.f32 %v2438_v5, %v2054_v57  ;;  %v2058_v12 = vmul.f32 %v6600_v58, %v6600_v58 }
 0x212   :  { %6050 = vmatmul.msk.bf16.gmra.mxu2 %vm422_vm1, %v6576_v45  ;;  %v2063_v57 = vmul.f32 %v6607_v0, %v6607_v0  ;;  %v2064_v5 = vmul.f32 %v6609_v2, %v6609_v2 }
 0x213   :  { %2433 = vadd.xlane.f32.xlu0 %v2432_v39  ;;  %1569 = vadd.xlane.f32.xlu1 %v1568_v37  ;;  %v7263_v39 = vpop.f32.mrf.mxu3  ;;  %v2444_v37 = vadd.f32 %v2057_v26, %v2056_v31 }
 0x214   :  { %v7248_v41 = vpop.f32.mrf.mxu0  ;;  %11381 = vst [vmem:[#allocation185_spill] sm:$0xff] %v7263_v39 }
 0x215   :  { %v7241_v3 = vpop.f32.mrf.mxu2  ;;  %11379 = vst [vmem:[#allocation183_spill] sm:$0xff] %v7248_v41  ;;  %v7255_v14 = vpop.f32.mrf.mxu1  ;;  %v1583_v23 = vadd.f32 %v1582_v42, %v7248_v41  ;;  %v2445_v56 = vadd.f32 %v2444_v37, %v2058_v12 }
 0x216   :  { %11378 = vst [vmem:[#allocation182_spill] sm:$0xff] %v7241_v3  ;;  %v2055_v27 = vmul.f32 %v7241_v3, %v7241_v3  ;;  %v1576_v45 = vsel %vm1539_vm2, %v7241_v3, 0.0 }
 0x217   :  { %11380 = vst [vmem:[#allocation184_spill] sm:$0xff] %v7255_v14  ;;  %v1577_v8 = vadd.f32 %v1576_v45, %v1575_v38  ;;  %v1590_v38 = vadd.f32 %v1589_v16, %v6621_v17  ;;  %v1584_v31 = vadd.f32 %v1583_v23, %v7255_v14  ;;  %v2446_v12 = vadd.f32 %v2445_v56, %v2059_v28 }
 0x218   :  { %v2440_v36 = vsel %vm1539_vm2, %v2055_v27, 0.0  ;;  %v2060_v27 = vmul.f32 %v7248_v41, %v7248_v41  ;;  %v2065_v16 = vmul.f32 %v6621_v17, %v6621_v17  ;;  %v1598_v28 = vadd.f32 %v6625_v19, %v6623_v18 }
 0x219   :  { %1578 = vadd.xlane.f32.xlu2 %v1577_v8  ;;  %v2441_v7 = vadd.f32 %v2440_v36, %v2439_v1  ;;  %v1591_v8 = vadd.f32 %v1590_v38, %v7131_v62 }
 0x21a   :  { %v2447_v2 = vadd.f32 %v2446_v12, %v2060_v27  ;;  %v1599_v27 = vadd.f32 %v1598_v28, %v6629_v21  ;;  %v2071_v12 = vmul.f32 %v6625_v19, %v6625_v19 }
 0x21b   :  { %2442 = vadd.xlane.f32.xlu1 %v2441_v7  ;;  %v2453_v7 = vadd.f32 %v2064_v5, %v2063_v57  ;;  %v2066_v57 = vmul.f32 %v7131_v62, %v7131_v62  ;;  %v2061_v5 = vmul.f32 %v7255_v14, %v7255_v14  ;;  %v7303_v56 = vpop.f32.mrf.mxu3 }
 0x21c   :  { %v7277_v26 = vpop.f32.mrf.mxu0  ;;  %11385 = vst [vmem:[#allocation189_spill] sm:$0xff] %v7303_v56  ;;  %v1600_v28 = vadd.f32 %v1599_v27, %v7184_v61 }
 0x21d   :  { %v7274_v45 = vpop.f32.mrf.mxu2  ;;  %11383 = vst [vmem:[#allocation187_spill] sm:$0xff] %v7277_v26  ;;  %v7282_v1 = vpop.f32.mrf.mxu1  ;;  %v1592_v23 = vadd.f32 %v1591_v8, %v7277_v26  ;;  %v2448_v8 = vadd.f32 %v2447_v2, %v2061_v5  ;;  %v1607_v5 = vadd.f32 %v6638_v25, %v6636_v24 }
 0x21e   :  { %11382 = vst [vmem:[#allocation186_spill] sm:$0xff] %v7274_v45  ;;  %v1585_v42 = vsel %vm1539_vm2, %v7274_v45, 0.0  ;;  %v2062_v37 = vmul.f32 %v7274_v45, %v7274_v45  ;;  %v2068_v0 = vmul.f32 %v7282_v1, %v7282_v1 }
 0x21f   :  { %11384 = vst [vmem:[#allocation188_spill] sm:$0xff] %v7282_v1  ;;  %v1586_v36 = vadd.f32 %v1585_v42, %v1584_v31  ;;  %5973 = vmatmul.msk.bf16.gmra.mxu3 %vm422_vm1, %v6694_v48  ;;  %5997 = vmatmul.msk.bf16.gmra.mxu0 %vm422_vm1, %v6605_v59  ;;  %v2454_v48 = vadd.f32 %v2453_v7, %v2065_v16 }
 0x220   :  { %6024 = vmatmul.msk.bf16.gmra.mxu1 %vm422_vm1, %v6605_v59  ;;  %v2449_v38 = vsel %vm1539_vm2, %v2062_v37, 0.0  ;;  %v2067_v31 = vmul.f32 %v7277_v26, %v7277_v26 }
 0x221   :  { %1587 = vadd.xlane.f32.xlu2 %v1586_v36  ;;  %v1593_v36 = vadd.f32 %v1592_v23, %v7282_v1  ;;  %v2455_v37 = vadd.f32 %v2454_v48, %v2066_v57  ;;  %v2450_v62 = vadd.f32 %v2449_v38, %v2448_v8  ;;  %v2072_v23 = vmul.f32 %v6629_v21, %v6629_v21 }
 0x222   :  { %6051 = vmatmul.msk.bf16.gmra.mxu2 %vm422_vm1, %v6605_v59  ;;  %v2070_v59 = vmul.f32 %v6623_v18, %v6623_v18  ;;  %v2073_v38 = vmul.f32 %v7184_v61, %v7184_v61  ;;  %v1608_v1 = vadd.f32 %v1607_v5, %v6650_v52  ;;  %v7794_v18 = vld [vmem:[%s10714_s1 + $0xb0] sm:$0xff] }
 0x223   :  { %v2456_v57 = vadd.f32 %v2455_v37, %v2067_v31  ;;  %v7345_v37 = vpop.f32.mrf.mxu3 }
 0x224   :  { %v7316_v7 = vpop.f32.mrf.mxu0  ;;  %v2462_v27 = vadd.f32 %v2071_v12, %v2070_v59  ;;  %11390 = vst [vmem:[#allocation194_spill] sm:$0xff] %v7345_v37 }
 0x225   :  { %v7309_v42 = vpop.f32.mrf.mxu2  ;;  %11387 = vst [vmem:[#allocation191_spill] sm:$0xff] %v7316_v7  ;;  %v7321_v26 = vpop.f32.mrf.mxu1  ;;  %v1601_v48 = vadd.f32 %v1600_v28, %v7316_v7  ;;  %v2457_v59 = vadd.f32 %v2456_v57, %v2068_v0  ;;  %v2079_v0 = vmul.f32 %v6650_v52, %v6650_v52 }
 0x226   :  { %11386 = vst [vmem:[#allocation190_spill] sm:$0xff] %v7309_v42  ;;  %v1594_v16 = vsel %vm1539_vm2, %v7309_v42, 0.0  ;;  %v2069_v17 = vmul.f32 %v7309_v42, %v7309_v42  ;;  %v2463_v8 = vadd.f32 %v2462_v27, %v2072_v23  ;;  %v1609_v23 = vadd.f32 %v1608_v1, %v7223_v40 }
 0x227   :  { %11388 = vst [vmem:[#allocation192_spill] sm:$0xff] %v7321_v26  ;;  %v1595_v2 = vadd.f32 %v1594_v16, %v1593_v36  ;;  %v2077_v36 = vmul.f32 %v6636_v24, %v6636_v24  ;;  %v2078_v16 = vmul.f32 %v6638_v25, %v6638_v25  ;;  %v1602_v12 = vadd.f32 %v1601_v48, %v7321_v26 }
 0x228   :  { %v2458_v42 = vsel %vm1539_vm2, %v2069_v17, 0.0  ;;  %v2464_v25 = vadd.f32 %v2463_v8, %v2073_v38  ;;  %v1616_v1 = vadd.f32 %v6654_v54, %v6652_v53  ;;  %v11393_v8 = vld [vmem:[#allocation43_spill] sm:$0xff] }
 0x229   :  { %2451 = vadd.xlane.f32.xlu2 %v2450_v62  ;;  %1596 = vadd.xlane.f32.xlu0 %v1595_v2  ;;  %v2074_v62 = vmul.f32 %v7316_v7, %v7316_v7  ;;  %v2459_v5 = vadd.f32 %v2458_v42, %v2457_v59  ;;  %v2471_v24 = vadd.f32 %v2078_v16, %v2077_v36 }
 0x22a   :  { %v2080_v42 = vmul.f32 %v7223_v40, %v7223_v40  ;;  %v1617_v36 = vadd.f32 %v1616_v1, %v11393_v8  ;;  %v11397_v1 = vld [vmem:[#allocation44_spill] sm:$0xff]  ;;  %v11400_v40 = vld [vmem:[#allocation47_spill] sm:$0xff] }
 0x22b   :  { %v2465_v7 = vadd.f32 %v2464_v25, %v2074_v62  ;;  %v2075_v25 = vmul.f32 %v7321_v26, %v7321_v26  ;;  %v2472_v38 = vadd.f32 %v2471_v24, %v2079_v0 }
 0x22c   :  { %v7347_v28 = vpop.f32.mrf.mxu0 }
 0x22d   :  { %v7342_v31 = vpop.f32.mrf.mxu2  ;;  %11391 = vst [vmem:[#allocation195_spill] sm:$0xff] %v7347_v28  ;;  %v7352_v17 = vpop.f32.mrf.mxu1  ;;  %v1610_v48 = vadd.f32 %v1609_v23, %v7347_v28  ;;  %v2081_v16 = vmul.f32 %v7347_v28, %v7347_v28  ;;  %v2466_v59 = vadd.f32 %v2465_v7, %v2075_v25  ;;  %v11398_v25 = vld [vmem:[#allocation45_spill] sm:$0xff] }
 0x22e   :  { %11389 = vst [vmem:[#allocation193_spill] sm:$0xff] %v7342_v31  ;;  %v1603_v2 = vsel %vm1539_vm2, %v7342_v31, 0.0  ;;  %v2076_v57 = vmul.f32 %v7342_v31, %v7342_v31  ;;  %v7395_v28 = vpop.f32.mrf.mxu3 }
 0x22f   :  { %11392 = vst [vmem:[#allocation196_spill] sm:$0xff] %v7352_v17  ;;  %v1604_v27 = vadd.f32 %v1603_v2, %v1602_v12  ;;  %5974 = vmatmul.msk.bf16.gmra.mxu3 %vm422_vm1, %v6723_v4  ;;  %5998 = vmatmul.msk.bf16.gmra.mxu0 %vm422_vm1, %v6634_v22  ;;  %v1611_v12 = vadd.f32 %v1610_v48, %v7352_v17 }
 0x230   :  { %6025 = vmatmul.msk.bf16.gmra.mxu1 %vm422_vm1, %v6634_v22  ;;  %v2467_v4 = vsel %vm1539_vm2, %v2076_v57, 0.0  ;;  %v2084_v2 = vmul.f32 %v6652_v53, %v6652_v53  ;;  %v2086_v48 = vmul.f32 %v11393_v8, %v11393_v8  ;;  %v1625_v53 = vadd.f32 %v11398_v25, %v11397_v1  ;;  %11399 = vst [vmem:[#allocation200_spill] sm:$0xff] %v7395_v28 }
 0x231   :  { %2460 = vadd.xlane.f32.xlu0 %v2459_v5  ;;  %1605 = vadd.xlane.f32.xlu1 %v1604_v27  ;;  %v2473_v5 = vadd.f32 %v2472_v38, %v2080_v42  ;;  %v1618_v27 = vadd.f32 %v1617_v36, %v7263_v39  ;;  %v2468_v57 = vadd.f32 %v2467_v4, %v2466_v59 }
 0x232   :  { %6052 = vmatmul.msk.bf16.gmra.mxu2 %vm422_vm1, %v6634_v22  ;;  %v2085_v22 = vmul.f32 %v6654_v54, %v6654_v54  ;;  %v2082_v42 = vmul.f32 %v7352_v17, %v7352_v17  ;;  %v2087_v59 = vmul.f32 %v7263_v39, %v7263_v39  ;;  %v2092_v8 = vmul.f32 %v11398_v25, %v11398_v25 }
 0x233   :  { %v2474_v38 = vadd.f32 %v2473_v5, %v2081_v16  ;;  %v1626_v17 = vadd.f32 %v1625_v53, %v11400_v40 }
 0x234   :  { %v7384_v23 = vpop.f32.mrf.mxu0  ;;  %v2480_v36 = vadd.f32 %v2085_v22, %v2084_v2 }
 0x235   :  { %v7377_v62 = vpop.f32.mrf.mxu2  ;;  %11395 = vst [vmem:[#allocation198_spill] sm:$0xff] %v7384_v23  ;;  %v7389_v0 = vpop.f32.mrf.mxu1  ;;  %v1619_v4 = vadd.f32 %v1618_v27, %v7384_v23  ;;  %v2088_v16 = vmul.f32 %v7384_v23, %v7384_v23  ;;  %v2475_v2 = vadd.f32 %v2474_v38, %v2082_v42  ;;  %v2093_v23 = vmul.f32 %v11400_v40, %v11400_v40 }
 0x236   :  { %11394 = vst [vmem:[#allocation197_spill] sm:$0xff] %v7377_v62  ;;  %v1612_v24 = vsel %vm1539_vm2, %v7377_v62, 0.0  ;;  %v2083_v54 = vmul.f32 %v7377_v62, %v7377_v62  ;;  %v7427_v52 = vpop.f32.mrf.mxu3 }
 0x237   :  { %11396 = vst [vmem:[#allocation199_spill] sm:$0xff] %v7389_v0  ;;  %v1613_v7 = vadd.f32 %v1612_v24, %v1611_v12  ;;  %v2481_v12 = vadd.f32 %v2480_v36, %v2086_v48  ;;  %v2091_v24 = vmul.f32 %v11397_v1, %v11397_v1  ;;  %v1620_v22 = vadd.f32 %v1619_v4, %v7389_v0 }
 0x238   :  { %v2476_v62 = vsel %vm1539_vm2, %v2083_v54, 0.0  ;;  %11404 = vst [vmem:[#allocation204_spill] sm:$0xff] %v7427_v52 }
 0x239   :  { %2469 = vadd.xlane.f32.xlu1 %v2468_v57  ;;  %1614 = vadd.xlane.f32.xlu2 %v1613_v7  ;;  %v1627_v7 = vadd.f32 %v1626_v17, %v7303_v56  ;;  %v2477_v54 = vadd.f32 %v2476_v62, %v2475_v2  ;;  %v2482_v53 = vadd.f32 %v2481_v12, %v2087_v59  ;;  %v6255_v17 = vld [vmem:[%s10714_s1 + $0x68] sm:$0xff]  ;;  %v11406_v62 = vld [vmem:[#allocation49_spill] sm:$0xff] }
 0x23a   :  { %v2489_v39 = vadd.f32 %v2092_v8, %v2091_v24  ;;  %v11405_v8 = vld [vmem:[#allocation48_spill] sm:$0xff]  ;;  %v2094_v12 = vmul.f32 %v7303_v56, %v7303_v56  ;;  %v2089_v24 = vmul.f32 %v7389_v0, %v7389_v0  ;;  %v11407_v2 = vld [vmem:[#allocation51_spill] sm:$0xff] }
 0x23b   :  { %v2483_v4 = vadd.f32 %v2482_v53, %v2088_v16  ;;  %v1634_v59 = vadd.f32 %v11406_v62, %v11405_v8  ;;  %v2098_v53 = vmul.f32 %v11405_v8, %v11405_v8  ;;  %v11412_v8 = vld [vmem:[#allocation53_spill] sm:$0xff] }
 0x23c   :  { %v7415_v27 = vpop.f32.mrf.mxu0 }
 0x23d   :  { %v7412_v5 = vpop.f32.mrf.mxu2  ;;  %11402 = vst [vmem:[#allocation202_spill] sm:$0xff] %v7415_v27  ;;  %v7420_v48 = vpop.f32.mrf.mxu1  ;;  %v1628_v38 = vadd.f32 %v1627_v7, %v7415_v27 }
 0x23e   :  { %11401 = vst [vmem:[#allocation201_spill] sm:$0xff] %v7412_v5  ;;  %v1621_v57 = vsel %vm1539_vm2, %v7412_v5, 0.0  ;;  %v2090_v42 = vmul.f32 %v7412_v5, %v7412_v5  ;;  %v2096_v56 = vmul.f32 %v7420_v48, %v7420_v48 }
 0x23f   :  { %11403 = vst [vmem:[#allocation203_spill] sm:$0xff] %v7420_v48  ;;  %v1622_v36 = vadd.f32 %v1621_v57, %v1620_v22  ;;  %5975 = vmatmul.msk.bf16.gmra.mxu3 %vm422_vm1, %v6752_v34  ;;  %5999 = vmatmul.msk.bf16.gmra.mxu0 %vm422_vm1, %v6255_v17  ;;  %v2490_v34 = vadd.f32 %v2489_v39, %v2093_v23 }
 0x240   :  { %6026 = vmatmul.msk.bf16.gmra.mxu1 %vm422_vm1, %v6255_v17  ;;  %v2485_v16 = vsel %vm1539_vm2, %v2090_v42, 0.0  ;;  %v1635_v22 = vadd.f32 %v1634_v59, %v11407_v2  ;;  %v2095_v57 = vmul.f32 %v7415_v27, %v7415_v27 }
 0x241   :  { %2478 = vadd.xlane.f32.xlu2 %v2477_v54  ;;  %1623 = vadd.xlane.f32.xlu0 %v1622_v36  ;;  %v2484_v54 = vadd.f32 %v2483_v4, %v2089_v24  ;;  %v1629_v36 = vadd.f32 %v1628_v38, %v7420_v48  ;;  %v2491_v23 = vadd.f32 %v2490_v34, %v2094_v12  ;;  %v11411_v24 = vld [vmem:[#allocation52_spill] sm:$0xff] }
 0x242   :  { %6053 = vmatmul.msk.bf16.gmra.mxu2 %vm422_vm1, %v6255_v17  ;;  %v2099_v17 = vmul.f32 %v11406_v62, %v11406_v62  ;;  %v1636_v42 = vadd.f32 %v1635_v22, %v7345_v37  ;;  %v2100_v38 = vmul.f32 %v11407_v2, %v11407_v2  ;;  %v1643_v27 = vadd.f32 %v11412_v8, %v11411_v24  ;;  %v7476_v2 = vpop.f32.mrf.mxu3 }
 0x243   :  { %v2486_v0 = vadd.f32 %v2485_v16, %v2484_v54  ;;  %v2492_v12 = vadd.f32 %v2491_v23, %v2095_v57  ;;  %v2101_v16 = vmul.f32 %v7345_v37, %v7345_v37  ;;  %11413 = vst [vmem:[#allocation208_spill] sm:$0xff] %v7476_v2 }
 0x244   :  { %v7454_v5 = vpop.f32.mrf.mxu0  ;;  %v2498_v22 = vadd.f32 %v2099_v17, %v2098_v53 }
 0x245   :  { %v7447_v7 = vpop.f32.mrf.mxu2  ;;  %11409 = vst [vmem:[#allocation206_spill] sm:$0xff] %v7454_v5  ;;  %v7459_v59 = vpop.f32.mrf.mxu1  ;;  %v1637_v34 = vadd.f32 %v1636_v42, %v7454_v5  ;;  %v2102_v57 = vmul.f32 %v7454_v5, %v7454_v5  ;;  %v2493_v17 = vadd.f32 %v2492_v12, %v2096_v56 }
 0x246   :  { %11408 = vst [vmem:[#allocation205_spill] sm:$0xff] %v7447_v7  ;;  %v1630_v39 = vsel %vm1539_vm2, %v7447_v7, 0.0  ;;  %v2097_v62 = vmul.f32 %v7447_v7, %v7447_v7  ;;  %v2499_v54 = vadd.f32 %v2498_v22, %v2100_v38 }
 0x247   :  { %11410 = vst [vmem:[#allocation207_spill] sm:$0xff] %v7459_v59  ;;  %v1631_v4 = vadd.f32 %v1630_v39, %v1629_v36  ;;  %v2105_v36 = vmul.f32 %v11411_v24, %v11411_v24  ;;  %v2106_v39 = vmul.f32 %v11412_v8, %v11412_v8  ;;  %v1638_v23 = vadd.f32 %v1637_v34, %v7459_v59 }
 0x248   :  { %v2494_v7 = vsel %vm1539_vm2, %v2097_v62, 0.0 }
 0x249   :  { %2487 = vadd.xlane.f32.xlu0 %v2486_v0  ;;  %1632 = vadd.xlane.f32.xlu1 %v1631_v4  ;;  %v11414_v0 = vld [vmem:[#allocation55_spill] sm:$0xff]  ;;  %v2495_v62 = vadd.f32 %v2494_v7, %v2493_v17  ;;  %v2507_v24 = vadd.f32 %v2106_v39, %v2105_v36  ;;  %v6256_v7 = vld [vmem:[%s10714_s1 + $0x70] sm:$0xff]  ;;  %v2108_v39 = vmul.f32 %v7395_v28, %v7395_v28 }
 0x24a   :  { %v1644_v4 = vadd.f32 %v1643_v27, %v11414_v0  ;;  %v2500_v27 = vadd.f32 %v2499_v54, %v2101_v16  ;;  %v2107_v5 = vmul.f32 %v11414_v0, %v11414_v0  ;;  %v11418_v16 = vld [vmem:[#allocation56_spill] sm:$0xff]  ;;  %v11419_v54 = vld [vmem:[#allocation57_spill] sm:$0xff] }
 0x24b   :  { %v1652_v36 = vadd.f32 %v11419_v54, %v11418_v16 }
 0x24c   :  { %v7485_v42 = vpop.f32.mrf.mxu0  ;;  %v1645_v22 = vadd.f32 %v1644_v4, %v7395_v28  ;;  %v2501_v34 = vadd.f32 %v2500_v27, %v2102_v57  ;;  %v11420_v57 = vld [vmem:[#allocation59_spill] sm:$0xff]  ;;  %v2112_v27 = vmul.f32 %v11418_v16, %v11418_v16  ;;  %v11426_v28 = vld [vmem:[#allocation61_spill] sm:$0xff] }
 0x24d   :  { %v7482_v53 = vpop.f32.mrf.mxu2  ;;  %11416 = vst [vmem:[#allocation210_spill] sm:$0xff] %v7485_v42  ;;  %v7490_v37 = vpop.f32.mrf.mxu1  ;;  %v1653_v17 = vadd.f32 %v1652_v36, %v11420_v57 }
 0x24e   :  { %11415 = vst [vmem:[#allocation209_spill] sm:$0xff] %v7482_v53  ;;  %v1639_v38 = vsel %vm1539_vm2, %v7482_v53, 0.0  ;;  %v2104_v56 = vmul.f32 %v7482_v53, %v7482_v53  ;;  %v1646_v12 = vadd.f32 %v1645_v22, %v7485_v42  ;;  %v7522_v53 = vpop.f32.mrf.mxu3  ;;  %v2110_v16 = vmul.f32 %v7490_v37, %v7490_v37 }
 0x24f   :  { %11417 = vst [vmem:[#allocation211_spill] sm:$0xff] %v7490_v37  ;;  %v1640_v8 = vadd.f32 %v1639_v38, %v1638_v23  ;;  %5976 = vmatmul.msk.bf16.gmra.mxu3 %vm422_vm1, %v6781_v13  ;;  %6000 = vmatmul.msk.bf16.gmra.mxu0 %vm422_vm1, %v6256_v7  ;;  %v2508_v13 = vadd.f32 %v2507_v24, %v2107_v5 }
 0x250   :  { %6027 = vmatmul.msk.bf16.gmra.mxu1 %vm422_vm1, %v6256_v7  ;;  %v2503_v4 = vsel %vm1539_vm2, %v2104_v56, 0.0  ;;  %v2109_v23 = vmul.f32 %v7485_v42, %v7485_v42  ;;  %11422 = vst [vmem:[#allocation213_spill] sm:$0xff] %v7522_v53  ;;  %v1654_v36 = vadd.f32 %v1653_v17, %v7427_v52  ;;  %v11425_v42 = vld [vmem:[#allocation60_spill] sm:$0xff] }
 0x251   :  { %2496 = vadd.xlane.f32.xlu1 %v2495_v62  ;;  %1641 = vadd.xlane.f32.xlu2 %v1640_v8  ;;  %v2103_v8 = vmul.f32 %v7459_v59, %v7459_v59  ;;  %v1647_v62 = vadd.f32 %v1646_v12, %v7490_v37  ;;  %v2509_v56 = vadd.f32 %v2508_v13, %v2108_v39 }
 0x252   :  { %6054 = vmatmul.msk.bf16.gmra.mxu2 %vm422_vm1, %v6256_v7  ;;  %v2113_v7 = vmul.f32 %v11419_v54, %v11419_v54  ;;  %v1661_v0 = vadd.f32 %v11426_v28, %v11425_v42 }
 0x253   :  { %v2502_v22 = vadd.f32 %v2501_v34, %v2103_v8  ;;  %v2114_v8 = vmul.f32 %v11420_v57, %v11420_v57  ;;  %v2510_v39 = vadd.f32 %v2509_v56, %v2109_v23 }
 0x254   :  { %v7524_v5 = vpop.f32.mrf.mxu0  ;;  %v2516_v17 = vadd.f32 %v2113_v7, %v2112_v27  ;;  %v1662_v37 = vadd.f32 %v1661_v0, %v6739_v11 }
 0x255   :  { %v7515_v38 = vpop.f32.mrf.mxu2  ;;  %11423 = vst [vmem:[#allocation214_spill] sm:$0xff] %v7524_v5  ;;  %v7529_v59 = vpop.f32.mrf.mxu1  ;;  %v2504_v34 = vadd.f32 %v2503_v4, %v2502_v22  ;;  %v1655_v13 = vadd.f32 %v1654_v36, %v7524_v5  ;;  %v2115_v4 = vmul.f32 %v7427_v52, %v7427_v52  ;;  %v2116_v23 = vmul.f32 %v7524_v5, %v7524_v5 }
 0x256   :  { %11421 = vst [vmem:[#allocation212_spill] sm:$0xff] %v7515_v38  ;;  %v1648_v24 = vsel %vm1539_vm2, %v7515_v38, 0.0  ;;  %v2111_v54 = vmul.f32 %v7515_v38, %v7515_v38  ;;  %v2517_v22 = vadd.f32 %v2516_v17, %v2114_v8  ;;  %v2511_v27 = vadd.f32 %v2510_v39, %v2110_v16  ;;  %v7562_v5 = vpop.f32.mrf.mxu3 }
 0x257   :  { %11424 = vst [vmem:[#allocation215_spill] sm:$0xff] %v7529_v59  ;;  %v1649_v12 = vadd.f32 %v1648_v24, %v1647_v62  ;;  %v2119_v62 = vmul.f32 %v11425_v42, %v11425_v42  ;;  %v2120_v24 = vmul.f32 %v11426_v28, %v11426_v28  ;;  %v1656_v7 = vadd.f32 %v1655_v13, %v7529_v59 }
 0x258   :  { %v2512_v38 = vsel %vm1539_vm2, %v2111_v54, 0.0  ;;  %v2518_v0 = vadd.f32 %v2517_v22, %v2115_v4  ;;  %v2121_v42 = vmul.f32 %v6739_v11, %v6739_v11  ;;  %11430 = vst [vmem:[#allocation219_spill] sm:$0xff] %v7562_v5  ;;  %v11431_v4 = vld [vmem:[#allocation64_spill] sm:$0xff]  ;;  %v11432_v22 = vld [vmem:[#allocation65_spill] sm:$0xff] }
 0x259   :  { %2505 = vadd.xlane.f32.xlu2 %v2504_v34  ;;  %1650 = vadd.xlane.f32.xlu0 %v1649_v12  ;;  %v1663_v12 = vadd.f32 %v1662_v37, %v7476_v2  ;;  %v2513_v54 = vadd.f32 %v2512_v38, %v2511_v27  ;;  %v2525_v28 = vadd.f32 %v2120_v24, %v2119_v62  ;;  %v7570_v37 = vld [vmem:[%s10714_s1 + $0x90] sm:$0xff]  ;;  %v6258_v38 = vld [vmem:[%s10714_s1 + $0x78] sm:$0xff] }
 0x25a   :  { %v2519_v13 = vadd.f32 %v2518_v0, %v2116_v23  ;;  %v1670_v62 = vadd.f32 %v11432_v22, %v11431_v4  ;;  %v2122_v24 = vmul.f32 %v7476_v2, %v7476_v2  ;;  %v2117_v23 = vmul.f32 %v7529_v59, %v7529_v59 }
 0x25b   :  { %v2526_v27 = vadd.f32 %v2525_v28, %v2121_v42  ;;  %v2126_v11 = vmul.f32 %v11431_v4, %v11431_v4 }
 0x25c   :  { %v7553_v36 = vpop.f32.mrf.mxu0  ;;  %v2520_v0 = vadd.f32 %v2519_v13, %v2117_v23 }
 0x25d   :  { %v7550_v56 = vpop.f32.mrf.mxu2  ;;  %11428 = vst [vmem:[#allocation217_spill] sm:$0xff] %v7553_v36  ;;  %v7558_v8 = vpop.f32.mrf.mxu1  ;;  %v1664_v39 = vadd.f32 %v1663_v12, %v7553_v36  ;;  %v2527_v42 = vadd.f32 %v2526_v27, %v2122_v24  ;;  %v11437_v27 = vld [vmem:[#allocation68_spill] sm:$0xff] }
 0x25e   :  { %11427 = vst [vmem:[#allocation216_spill] sm:$0xff] %v7550_v56  ;;  %v1657_v34 = vsel %vm1539_vm2, %v7550_v56, 0.0  ;;  %v2118_v16 = vmul.f32 %v7550_v56, %v7550_v56  ;;  %v7613_v52 = vpop.f32.mrf.mxu3 }
 0x25f   :  { %11429 = vst [vmem:[#allocation218_spill] sm:$0xff] %v7558_v8  ;;  %v1658_v17 = vadd.f32 %v1657_v34, %v1656_v7  ;;  %5977 = vmatmul.msk.bf16.gmra.mxu3 %vm422_vm1, %v7570_v37  ;;  %6001 = vmatmul.msk.bf16.gmra.mxu0 %vm422_vm1, %v6258_v38  ;;  %v11433_v34 = vld [vmem:[#allocation67_spill] sm:$0xff]  ;;  %v1665_v2 = vadd.f32 %v1664_v39, %v7558_v8 }
 0x260   :  { %6028 = vmatmul.msk.bf16.gmra.mxu1 %vm422_vm1, %v6258_v38  ;;  %v2521_v7 = vsel %vm1539_vm2, %v2118_v16, 0.0  ;;  %v1671_v12 = vadd.f32 %v1670_v62, %v11433_v34  ;;  %v2128_v39 = vmul.f32 %v11433_v34, %v11433_v34  ;;  %11439 = vst [vmem:[#allocation223_spill] sm:$0xff] %v7613_v52 }
 0x261   :  { %2514 = vadd.xlane.f32.xlu0 %v2513_v54  ;;  %1659 = vadd.xlane.f32.xlu1 %v1658_v17  ;;  %v2123_v54 = vmul.f32 %v7553_v36, %v7553_v36  ;;  %v2522_v36 = vadd.f32 %v2521_v7, %v2520_v0  ;;  %v2129_v7 = vmul.f32 %v7522_v53, %v7522_v53 }
 0x262   :  { %6055 = vmatmul.msk.bf16.gmra.mxu2 %vm422_vm1, %v6258_v38  ;;  %v2127_v38 = vmul.f32 %v11432_v22, %v11432_v22  ;;  %v1672_v16 = vadd.f32 %v1671_v12, %v7522_v53  ;;  %v2124_v22 = vmul.f32 %v7558_v8, %v7558_v8  ;;  %v11438_v12 = vld [vmem:[#allocation69_spill] sm:$0xff] }
 0x263   :  { %v2528_v4 = vadd.f32 %v2527_v42, %v2123_v54  ;;  %v1679_v59 = vadd.f32 %v11438_v12, %v11437_v27 }
 0x264   :  { %v7597_v56 = vpop.f32.mrf.mxu0 }
 0x265   :  { %v7590_v17 = vpop.f32.mrf.mxu2  ;;  %11435 = vst [vmem:[#allocation221_spill] sm:$0xff] %v7597_v56  ;;  %v7602_v62 = vpop.f32.mrf.mxu1  ;;  %v1673_v24 = vadd.f32 %v1672_v16, %v7597_v56  ;;  %v2529_v54 = vadd.f32 %v2528_v4, %v2124_v22  ;;  %v2133_v16 = vmul.f32 %v11437_v27, %v11437_v27 }
 0x266   :  { %11434 = vst [vmem:[#allocation220_spill] sm:$0xff] %v7590_v17  ;;  %v1666_v28 = vsel %vm1539_vm2, %v7590_v17, 0.0  ;;  %v2125_v23 = vmul.f32 %v7590_v17, %v7590_v17 }
 0x267   :  { %11436 = vst [vmem:[#allocation222_spill] sm:$0xff] %v7602_v62  ;;  %v1667_v13 = vadd.f32 %v1666_v28, %v1665_v2  ;;  %v2534_v2 = vadd.f32 %v2127_v38, %v2126_v11  ;;  %v1674_v42 = vadd.f32 %v1673_v24, %v7602_v62  ;;  %v2134_v11 = vmul.f32 %v11438_v12, %v11438_v12  ;;  %v11441_v38 = vld [vmem:[#allocation71_spill] sm:$0xff] }
 0x268   :  { %v2530_v28 = vsel %vm1539_vm2, %v2125_v23, 0.0  ;;  %v1680_v8 = vadd.f32 %v1679_v59, %v11441_v38  ;;  %v2135_v27 = vmul.f32 %v11441_v38, %v11441_v38 }
 0x269   :  { %2523 = vadd.xlane.f32.xlu1 %v2522_v36  ;;  %1668 = vadd.xlane.f32.xlu2 %v1667_v13  ;;  %v2535_v17 = vadd.f32 %v2534_v2, %v2128_v39  ;;  %v2130_v36 = vmul.f32 %v7597_v56, %v7597_v56  ;;  %v2531_v23 = vadd.f32 %v2530_v28, %v2529_v54 }
 0x26a   :  { %v1681_v4 = vadd.f32 %v1680_v8, %v7562_v5  ;;  %v2543_v12 = vadd.f32 %v2134_v11, %v2133_v16  ;;  %v7645_v8 = vld [vmem:[%s10714_s1 + $0x98] sm:$0xff]  ;;  %v7663_v16 = vpop.f32.mrf.mxu3 }
 0x26b   :  { %v2536_v56 = vadd.f32 %v2535_v17, %v2129_v7  ;;  %v6260_v17 = vld [vmem:[%s10714_s1 + $0x80] sm:$0xff]  ;;  %v11445_v7 = vld [vmem:[#allocation73_spill] sm:$0xff]  ;;  %11446 = vst [vmem:[#allocation227_spill] sm:$0xff] %v7663_v16 }
 0x26c   :  { %v1543_v0 = vpop.xlane.xlu0 %1542  ;;  %v7628_v53 = vpop.f32.mrf.mxu0  ;;  %v2544_v38 = vadd.f32 %v2543_v12, %v2135_v27 }
 0x26d   :  { %v7620_v13 = vpop.f32.mrf.mxu2  ;;  %11442 = vst [vmem:[#allocation225_spill] sm:$0xff] %v7628_v53  ;;  %v7633_v22 = vpop.f32.mrf.mxu1  ;;  %v7637_v34 = vmul.f32 0.0012755102, %v1543_v0  ;;  %v2537_v59 = vadd.f32 %v2536_v56, %v2130_v36  ;;  %v1682_v28 = vadd.f32 %v1681_v4, %v7628_v53  ;;  %v11444_v56 = vld [vmem:[#allocation72_spill] sm:$0xff]  ;;  %v2131_v36 = vmul.f32 %v7602_v62, %v7602_v62 }
 0x26e   :  { %11440 = vst [vmem:[#allocation224_spill] sm:$0xff] %v7620_v13  ;;  %v1675_v39 = vsel %vm1539_vm2, %v7620_v13, 0.0  ;;  %v2132_v24 = vmul.f32 %v7620_v13, %v7620_v13  ;;  %v1688_v0 = vadd.f32 %v11445_v7, %v11444_v56  ;;  %v2140_v54 = vmul.f32 %v11444_v56, %v11444_v56 }
 0x26f   :  { %v1676_v2 = vadd.f32 %v1675_v39, %v1674_v42  ;;  %11443 = vst [vmem:[#allocation226_spill] sm:$0xff] %v7633_v22  ;;  %5978 = vmatmul.msk.bf16.gmra.mxu3 %vm422_vm1, %v7645_v8  ;;  %6002 = vmatmul.msk.bf16.gmra.mxu0 %vm422_vm1, %v6260_v17  ;;  %v2136_v42 = vmul.f32 %v7562_v5, %v7562_v5 }
 0x270   :  { %6029 = vmatmul.msk.bf16.gmra.mxu1 %vm422_vm1, %v6260_v17  ;;  %v2539_v39 = vsel %vm1539_vm2, %v2132_v24, 0.0  ;;  %v2993_v4 = vmul.f32 %v7637_v34, %v7637_v34  ;;  %v2538_v62 = vadd.f32 %v2537_v59, %v2131_v36  ;;  %v2137_v56 = vmul.f32 %v7628_v53, %v7628_v53 }
 0x271   :  { %2532 = vadd.xlane.f32.xlu2 %v2531_v23  ;;  %1677 = vadd.xlane.f32.xlu0 %v1676_v2  ;;  %v11447_v23 = vld [vmem:[#allocation75_spill] sm:$0xff]  ;;  %v1683_v48 = vadd.f32 %v1682_v28, %v7633_v22  ;;  %v2545_v27 = vadd.f32 %v2544_v38, %v2136_v42  ;;  %v11452_v42 = vld [vmem:[#allocation77_spill] sm:$0xff] }
 0x272   :  { %6056 = vmatmul.msk.bf16.gmra.mxu2 %vm422_vm1, %v6260_v17  ;;  %v1689_v2 = vadd.f32 %v1688_v0, %v11447_v23  ;;  %v2141_v0 = vmul.f32 %v11445_v7, %v11445_v7  ;;  %v2540_v59 = vadd.f32 %v2539_v39, %v2538_v62  ;;  %v2142_v36 = vmul.f32 %v11447_v23, %v11447_v23 }
 0x273   :  { %v2138_v7 = vmul.f32 %v7633_v22, %v7633_v22  ;;  %v2546_v62 = vadd.f32 %v2545_v27, %v2137_v56 }
 0x274   :  { %v2407_v11 = vpop.xlane.xlu0 %2406  ;;  %v7675_v5 = vpop.f32.mrf.mxu0  ;;  %v2552_v38 = vadd.f32 %v2141_v0, %v2140_v54 }
 0x275   :  { %v2939_v17 = vmul.f32 0.0012755102, %v2407_v11  ;;  %v7669_v13 = vpop.f32.mrf.mxu2  ;;  %11449 = vst [vmem:[#allocation229_spill] sm:$0xff] %v7675_v5  ;;  %v1690_v11 = vadd.f32 %v1689_v2, %v7613_v52  ;;  %v7692_v1 = vpop.f32.mrf.mxu1  ;;  %v6324_v2 = vmov 0  }
 0x276   :  { %11448 = vst [vmem:[#allocation228_spill] sm:$0xff] %v7669_v13  ;;  %v7673_v57 = vpop.xlane.xlu1 %2415  ;;  %v1684_v24 = vsel %vm1539_vm2, %v7669_v13, 0.0  ;;  %v2139_v28 = vmul.f32 %v7669_v13, %v7669_v13  ;;  %6145 = vset.pattern.permute.xlu1 %v6324_v2  ;;  %6144 = vset.pattern.permute.xlu0 %v6324_v2  ;;  %v7705_v0 = vpop.f32.mrf.mxu3 }
 0x277   :  { %v3047_v40 = vsub.f32 %v2939_v17, %v2993_v4  ;;  %v1685_v12 = vadd.f32 %v1684_v24, %v1683_v48  ;;  %v1691_v25 = vadd.f32 %v1690_v11, %v7675_v5  ;;  %11450 = vst [vmem:[#allocation230_spill] sm:$0xff] %v7692_v1  ;;  %v2143_v48 = vmul.f32 %v7613_v52, %v7613_v52 }
 0x278   :  { %v2553_v4 = vadd.f32 %v2552_v38, %v2142_v36  ;;  %v2144_v17 = vmul.f32 %v7675_v5, %v7675_v5  ;;  %v2548_v56 = vsel %vm1539_vm2, %v2139_v28, 0.0  ;;  %6146 = vset.pattern.permute.xlu2 %v6324_v2  ;;  %11454 = vst [vmem:[#allocation232_spill] sm:$0xff] %v7705_v0  ;;  %v2547_v11 = vadd.f32 %v2546_v62, %v2138_v7  ;;  %v11456_v38 = vld [vmem:[#allocation79_spill] sm:$0xff] }
 0x279   :  { %v7685_v53 = vadd.f32 1e-05, %v3047_v40  ;;  %2541 = vadd.xlane.f32.xlu0 %v2540_v59  ;;  %1686 = vadd.xlane.f32.xlu1 %v1685_v12  ;;  %v11451_v40 = vld [vmem:[#allocation76_spill] sm:$0xff]  ;;  %v1692_v54 = vadd.f32 %v1691_v25, %v7692_v1  ;;  %v7719_v62 = vld [vmem:[%s10714_s1 + $0xa0] sm:$0xff] }
 0x27a   :  { %v1697_v39 = vadd.f32 %v11452_v42, %v11451_v40  ;;  %v2554_v36 = vadd.f32 %v2553_v4, %v2143_v48  ;;  %v2549_v23 = vadd.f32 %v2548_v56, %v2547_v11 }
 0x27b   :  { %6147 = vrsqrt.f32 %v7685_v53  ;;  %vm3215_vm4 = vweird.f32 %v7685_v53 }
 0x27c   :  { %v7709_v27 = vpop.f32.mrf.mxu0  ;;  %v1698_v52 = vadd.f32 %v1697_v39, %v11456_v38  ;;  %v2555_v25 = vadd.f32 %v2554_v36, %v2144_v17  ;;  %v6262_v39 = vld [vmem:[%s10714_s1 + $0x88] sm:$0xff]  ;;  %v1552_v19 = vpop.xlane.xlu0 %1551 }
 0x27d   :  { %v7701_v24 = vpop.f32.mrf.mxu2  ;;  %11455 = vst [vmem:[#allocation233_spill] sm:$0xff] %v7709_v27  ;;  %v7733_v17 = vpop.f32.mrf.mxu1 }
 0x27e   :  { %11453 = vst [vmem:[#allocation231_spill] sm:$0xff] %v7701_v24  ;;  %v1693_v59 = vsel %vm1539_vm2, %v7701_v24, 0.0  ;;  %v1561_v5 = vpop.xlane.xlu1 %1560  ;;  %v2146_v28 = vmul.f32 %v7701_v24, %v7701_v24  ;;  %v1699_v2 = vadd.f32 %v1698_v52, %v7663_v16  ;;  %v2145_v52 = vmul.f32 %v7692_v1, %v7692_v1  ;;  %v2425_v11 = vpop.xlane.xlu2 %2424 }
 0x27f   :  { %v1694_v12 = vadd.f32 %v1693_v59, %v1692_v54  ;;  %5979 = vmatmul.msk.bf16.gmra.mxu3 %vm422_vm1, %v7719_v62  ;;  %v7723_v48 = vmul.f32 0.0012755102, %v1561_v5  ;;  %6003 = vmatmul.msk.bf16.gmra.mxu0 %vm422_vm1, %v6262_v39  ;;  %11457 = vst [vmem:[#allocation234_spill] sm:$0xff] %v7733_v17  ;;  %v7741_v24 = vpop.f32.mrf.mxu3  ;;  %v2941_v22 = vmul.f32 0.0012755102, %v2425_v11  ;;  %v2152_v50 = vmul.f32 %v7733_v17, %v7733_v17 }
 0x280   :  { %v1700_v4 = vadd.f32 %v1699_v2, %v7709_v27  ;;  %6030 = vmatmul.msk.bf16.gmra.mxu1 %vm422_vm1, %v6262_v39  ;;  %v2557_v5 = vsel %vm1539_vm2, %v2146_v28, 0.0  ;;  %v2556_v56 = vadd.f32 %v2555_v25, %v2145_v52  ;;  %11459 = vst [vmem:[#allocation236_spill] sm:$0xff] %v7741_v24 }
 0x281   :  { %v6148_v13 = vpop.eup %6147  ;;  %1695 = vadd.xlane.f32.xlu2 %v1694_v12  ;;  %2550 = vadd.xlane.f32.xlu1 %v2549_v23  ;;  %v2995_v12 = vmul.f32 %v7723_v48, %v7723_v48 }
 0x282   :  { %v3210_v7 = vmul.f32 %v6148_v13, %v7685_v53  ;;  %6057 = vmatmul.msk.bf16.gmra.mxu2 %vm422_vm1, %v6262_v39  ;;  %v2558_v36 = vadd.f32 %v2557_v5, %v2556_v56  ;;  %v1701_v2 = vadd.f32 %v1700_v4, %v7733_v17  ;;  %vm3216_vm3 = vweird.f32 %v6148_v13  ;;  %v11462_v5 = vld [vmem:[#allocation85_spill] sm:$0xff]  ;;  %v3101_v4 = vld [vmem:[%s10715_s2] sm:$0xff] }
 0x283   :  { %v3049_v52 = vsub.f32 %v2941_v22, %v2995_v12  ;;  %vm3217_vm5 = vmor %vm3215_vm4, %vm3216_vm3 }
 0x284   :  { %v3211_v23 = vmul.f32 %v6148_v13, %v3210_v7  ;;  %v7743_v1 = vpop.f32.mrf.mxu0 }
 0x285   :  { %v7737_v59 = vpop.f32.mrf.mxu2  ;;  %11460 = vst [vmem:[#allocation237_spill] sm:$0xff] %v7743_v1 }
 0x286   :  { %v3212_v54 = vmul.f32 0.5, %v3211_v23  ;;  %11458 = vst [vmem:[#allocation235_spill] sm:$0xff] %v7737_v59  ;;  %v1702_v28 = vsel %vm1539_vm2, %v7737_v59, 0.0  ;;  %v11461_v23 = vld [vmem:[#allocation84_spill] sm:$0xff]  ;;  %v2434_v14 = vpop.xlane.xlu0 %2433 }
 0x287   :  { %v1703_v25 = vadd.f32 %v1702_v28, %v1701_v2  ;;  %v1715_v56 = vadd.f32 %v11462_v5, %v11461_v23  ;;  %v11465_v2 = vld [vmem:[#allocation87_spill] sm:$0xff]  ;;  %v7759_v12 = vpop.f32.mrf.mxu3  ;;  %v2161_v6 = vmul.f32 %v11461_v23, %v11461_v23 }
 0x288   :  { %v3213_v7 = vsub.f32 1.5, %v3212_v54  ;;  %v7751_v54 = vpop.f32.mrf.mxu1  ;;  %11466 = vst [vmem:[#allocation240_spill] sm:$0xff] %v7759_v12  ;;  %v7766_v28 = vld [vmem:[%s10714_s1 + $0xa8] sm:$0xff] }
 0x289   :  { %2559 = vadd.xlane.f32.xlu2 %v2558_v36  ;;  %1704 = vadd.xlane.f32.xlu0 %v1703_v25  ;;  %11463 = vst [vmem:[#allocation238_spill] sm:$0xff] %v7751_v54  ;;  %v3157_v36 = vadd.f32 1e-05, %v3049_v52  ;;  %v3803_v52 = vld [vmem:[%s10716_s3] sm:$0xff] }
 0x28a   :  { %v3214_v39 = vmul.f32 %v6148_v13, %v3213_v7  ;;  %v1716_v7 = vadd.f32 %v1715_v56, %v11465_v2 }
 0x28b   :  { %6149 = vrsqrt.f32 %v3157_v36  ;;  %vm3235_vm7 = vweird.f32 %v3157_v36 }
 0x28c   :  { %v3218_v11 = vsel %vm3217_vm5, %v6148_v13, %v3214_v39  ;;  %v7761_v53 = vpop.f32.mrf.mxu0  ;;  %v1717_v25 = vadd.f32 %v1716_v7, %v7741_v24 }
 0x28d   :  { %v7753_v31 = vpop.f32.mrf.mxu2  ;;  %v3749_v22 = vmul.f32 %v3218_v11, %v3101_v4  ;;  %11467 = vst [vmem:[#allocation241_spill] sm:$0xff] %v7761_v53 }
 0x28e   :  { %11464 = vst [vmem:[#allocation239_spill] sm:$0xff] %v7753_v31  ;;  %v1718_v13 = vadd.f32 %v1717_v25, %v7761_v53 }
 0x28f   :  { %5980 = vmatmul.msk.bf16.gmra.mxu3 %vm422_vm1, %v7766_v28  ;;  %6004 = vmatmul.msk.bf16.gmra.mxu0 %vm422_vm1, %v7570_v37  ;;  %v3857_v39 = vmul.f32 %v3749_v22, %v7637_v34  ;;  %v7789_v25 = vpop.f32.mrf.mxu3 }
 0x290   :  { %6031 = vmatmul.msk.bf16.gmra.mxu1 %vm422_vm1, %v7570_v37  ;;  %v7784_v4 = vpop.f32.mrf.mxu1  ;;  %11470 = vst [vmem:[#allocation244_spill] sm:$0xff] %v7789_v25 }
 0x291   :  { %11469 = vst [vmem:[#allocation243_spill] sm:$0xff] %v7784_v4  ;;  %v6150_v11 = vpop.eup %6149  ;;  %v1719_v7 = vadd.f32 %v1718_v13, %v7784_v4  ;;  %v3911_v26 = vsub.f32 %v3803_v52, %v3857_v39  ;;  %v2940_v52 = vmul.f32 0.0012755102, %v7673_v57 }
 0x292   :  { %6058 = vmatmul.msk.bf16.gmra.mxu2 %vm422_vm1, %v7570_v37  ;;  %v3230_v34 = vmul.f32 %v6150_v11, %v3157_v36  ;;  %vm3236_vm6 = vweird.f32 %v6150_v11  ;;  %v2147_v36 = vmul.f32 %v11451_v40, %v11451_v40 }
 0x293   :  { %vm3237_vm8 = vmor %vm3235_vm7, %vm3236_vm6 }
 0x294   :  { %v3231_v21 = vmul.f32 %v6150_v11, %v3230_v34 }
 0x295   :  { %v7782_v56 = vpop.f32.mrf.mxu2 }
 0x296   :  { %11468 = vst [vmem:[#allocation242_spill] sm:$0xff] %v7782_v56  ;;  %v1720_v61 = vsel %vm1539_vm2, %v7782_v56, 0.0 }
 0x297   :  { %v1721_v37 = vadd.f32 %v1720_v61, %v1719_v7  ;;  %v7802_v61 = vmul.f32 0.0012755102, %v1552_v19  ;;  %v3103_v19 = vld [vmem:[%s10715_s2 + $0x10] sm:$0xff] }
 0x298   :  { %v7888_v17 = vpop.f32.mrf.mxu1 }
 0x299   :  { %1722 = vadd.xlane.f32.xlu2 %v1721_v37  ;;  %v2994_v13 = vmul.f32 %v7802_v61, %v7802_v61  ;;  %11480 = vst [vmem:[#allocation251_spill] sm:$0xff] %v7888_v17 }
 0x29a   :  { %4615 = vperm.xlu1 %6145, %v3911_v26   ;;  %v3232_v26 = vmul.f32 0.5, %v3231_v21 }
 0x29b   :  { %v3048_v7 = vsub.f32 %v2940_v52, %v2994_v13  ;;  %v11473_v13 = vld [vmem:[#allocation80_spill] sm:$0xff] }
 0x29c   :  { %v3233_v39 = vsub.f32 1.5, %v3232_v26  ;;  %v7821_v26 = vld [vmem:[%s10714_s1 + $0xb8] sm:$0xff]  ;;  %v7864_v3 = vpop.xlane.xlu0 %1596 }
 0x29d   :  { %3967 = vperm.xlu0 %6144, %v3749_v22   ;;  %v7806_v22 = vpop.f32.mrf.mxu3  ;;  %v7811_v34 = vadd.f32 1e-05, %v3048_v7  ;;  %v11475_v7 = vld [vmem:[#allocation83_spill] sm:$0xff] }
 0x29e   :  { %11471 = vst [vmem:[#allocation245_spill] sm:$0xff] %v7806_v22  ;;  %v3234_v37 = vmul.f32 %v6150_v11, %v3233_v39  ;;  %v11474_v39 = vld [vmem:[#allocation81_spill] sm:$0xff] }
 0x29f   :  { %5981 = vmatmul.msk.bf16.gmra.mxu3 %vm422_vm1, %v7794_v18  ;;  %6005 = vmatmul.msk.bf16.gmra.mxu0 %vm422_vm1, %v7645_v8  ;;  %6151 = vrsqrt.f32 %v7811_v34  ;;  %v1706_v52 = vadd.f32 %v11474_v39, %v11473_v13  ;;  %vm3225_vm10 = vweird.f32 %v7811_v34 }
 0x2a0   :  { %6032 = vmatmul.msk.bf16.gmra.mxu1 %vm422_vm1, %v7645_v8  ;;  %v3238_v21 = vsel %vm3237_vm8, %v6150_v11, %v3234_v37  ;;  %v2148_v11 = vmul.f32 %v11452_v42, %v11452_v42  ;;  %v2150_v42 = vmul.f32 %v7663_v16, %v7663_v16 }
 0x2a1   :  { %v7825_v57 = vmul.f32 %v3238_v21, %v3103_v19  ;;  %v1707_v37 = vadd.f32 %v1706_v52, %v11475_v7  ;;  %v1570_v19 = vpop.xlane.xlu1 %1569 }
 0x2a2   :  { %6059 = vmatmul.msk.bf16.gmra.mxu2 %vm422_vm1, %v7645_v8  ;;  %v2561_v45 = vadd.f32 %v2148_v11, %v2147_v36  ;;  %v2151_v36 = vmul.f32 %v7709_v27, %v7709_v27 }
 0x2a3   :  { %v1708_v40 = vadd.f32 %v1707_v37, %v7705_v0  ;;  %v2153_v37 = vmul.f32 %v7737_v59, %v7737_v59 }
 0x2a4   :  { %v7896_v55 = vpop.xlane.xlu0 %2460 }
 0x2a5   :  { %v7816_v8 = vpop.f32.mrf.mxu3  ;;  %v7842_v21 = vpop.eup %6151  ;;  %v1709_v52 = vadd.f32 %v1708_v40, %v7743_v1 }
 0x2a6   :  { %11472 = vst [vmem:[#allocation246_spill] sm:$0xff] %v7816_v8  ;;  %v3220_v60 = vmul.f32 %v7842_v21, %v7811_v34  ;;  %v7875_v40 = vpop.f32.mrf.mxu0  ;;  %vm3226_vm9 = vweird.f32 %v7842_v21  ;;  %v2165_v34 = vmul.f32 %v7761_v53, %v7761_v53  ;;  %v2166_v53 = vmul.f32 %v7784_v4, %v7784_v4  ;;  %v1579_v4 = vpop.xlane.xlu2 %1578 }
 0x2a7   :  { %v1710_v16 = vadd.f32 %v1709_v52, %v7751_v54  ;;  %11477 = vst [vmem:[#allocation248_spill] sm:$0xff] %v7875_v40  ;;  %v7883_v52 = vpop.f32.mrf.mxu2  ;;  %vm3227_vm11 = vmor %vm3225_vm10, %vm3226_vm9 }
 0x2a8   :  { %v3221_v51 = vmul.f32 %v7842_v21, %v3220_v60  ;;  %11479 = vst [vmem:[#allocation250_spill] sm:$0xff] %v7883_v52 }
 0x2a9   :  { %v7873_v60 = vpop.xlane.xlu1 %2442 }
 0x2aa   :  { %v3222_v59 = vmul.f32 0.5, %v3221_v51 }
 0x2ac   :  { %v3223_v15 = vsub.f32 1.5, %v3222_v59 }
 0x2ad   :  { %v7846_v41 = vpop.f32.mrf.mxu3 }
 0x2ae   :  { %11476 = vst [vmem:[#allocation247_spill] sm:$0xff] %v7846_v41 }
 0x2af   :  { %5982 = vmatmul.msk.bf16.gmra.mxu3 %vm422_vm1, %v7821_v26  ;;  %6006 = vmatmul.msk.bf16.gmra.mxu0 %vm422_vm1, %v7719_v62 }
 0x2b0   :  { %6033 = vmatmul.msk.bf16.gmra.mxu1 %vm422_vm1, %v7719_v62 }
 0x2b1   :  { %3977 = vperm.xlu2 %6146, %v7825_v57   ;;  %v7898_v51 = vpop.xlane.xlu1 %1605 }
 0x2b2   :  { %6060 = vmatmul.msk.bf16.gmra.mxu2 %vm422_vm1, %v7719_v62  ;;  %v2149_v62 = vmul.f32 %v11456_v38, %v11456_v38  ;;  %v1711_v38 = vsel %vm1539_vm2, %v7753_v31, 0.0 }
 0x2b4   :  { %v2562_v58 = vadd.f32 %v2561_v45, %v2149_v62  ;;  %v7869_v45 = vld [vmem:[%s10714_s1 + $0xc0] sm:$0xff] }
 0x2b5   :  { %v7881_v62 = vpop.f32.mrf.mxu3 }
 0x2b6   :  { %v2563_v11 = vadd.f32 %v2562_v58, %v2150_v42  ;;  %v1712_v42 = vadd.f32 %v1711_v38, %v1710_v16  ;;  %11478 = vst [vmem:[#allocation249_spill] sm:$0xff] %v7881_v62  ;;  %v2162_v16 = vmul.f32 %v11462_v5, %v11462_v5  ;;  %v7894_v38 = vmul.f32 0.0012755102, %v1570_v19 }
 0x2b7   :  { %v2164_v19 = vmul.f32 %v7741_v24, %v7741_v24  ;;  %v2158_v62 = vmul.f32 %v7743_v1, %v7743_v1 }
 0x2b8   :  { %v2564_v58 = vadd.f32 %v2563_v11, %v2151_v36  ;;  %v2566_v36 = vsel %vm1539_vm2, %v2153_v37, 0.0  ;;  %v2579_v59 = vadd.f32 %v2162_v16, %v2161_v6  ;;  %v2163_v37 = vmul.f32 %v11465_v2, %v11465_v2  ;;  %v3102_v6 = vld [vmem:[%s10715_s2 + $0x8] sm:$0xff] }
 0x2b9   :  { %v2942_v16 = vmul.f32 0.0012755102, %v2434_v14  ;;  %v7926_v2 = vld [vmem:[%s10714_s1 + $0xc8] sm:$0xff]  ;;  %v7942_v24 = vpop.xlane.xlu1 %2469 }
 0x2ba   :  { %v2565_v11 = vadd.f32 %v2564_v58, %v2152_v50  ;;  %v7902_v50 = vpop.f32.mrf.mxu0 }
 0x2bb   :  { %11481 = vst [vmem:[#allocation252_spill] sm:$0xff] %v7902_v50 }
 0x2bc   :  { %v2567_v27 = vadd.f32 %v2566_v36, %v2565_v11  ;;  %v2580_v11 = vadd.f32 %v2579_v59, %v2163_v37  ;;  %v7934_v59 = vpop.xlane.xlu0 %1623  ;;  %v2167_v37 = vmul.f32 %v7782_v56, %v7782_v56 }
 0x2bd   :  { %v7906_v58 = vpop.f32.mrf.mxu3  ;;  %11485 = vst [vmem:[#allocation256_spill] sm:$0xff] %v7934_v59 }
 0x2be   :  { %11482 = vst [vmem:[#allocation253_spill] sm:$0xff] %v7906_v58 }
 0x2bf   :  { %5983 = vmatmul.msk.bf16.gmra.mxu3 %vm422_vm1, %v7869_v45  ;;  %6007 = vmatmul.msk.bf16.gmra.mxu0 %vm422_vm1, %v7766_v28 }
 0x2c0   :  { %6034 = vmatmul.msk.bf16.gmra.mxu1 %vm422_vm1, %v7766_v28 }
 0x2c2   :  { %6061 = vmatmul.msk.bf16.gmra.mxu2 %vm422_vm1, %v7766_v28  ;;  %v3224_v28 = vmul.f32 %v7842_v21, %v3223_v15  ;;  %v2996_v15 = vmul.f32 %v7894_v38, %v7894_v38  ;;  %v7944_v23 = vpop.f32.mrf.mxu0 }
 0x2c3   :  { %11486 = vst [vmem:[#allocation257_spill] sm:$0xff] %v7944_v23 }
 0x2c4   :  { %1713 = vadd.xlane.f32.xlu1 %v1712_v42  ;;  %v7908_v42 = vpop.f32.mrf.mxu2  ;;  %v3228_v36 = vsel %vm3227_vm11, %v7842_v21, %v3224_v28  ;;  %v2581_v21 = vadd.f32 %v2580_v11, %v2164_v19  ;;  %v3050_v14 = vsub.f32 %v2942_v16, %v2996_v15  ;;  %v3804_v16 = vld [vmem:[%s10716_s3 + $0x8] sm:$0xff]  ;;  %v7957_v49 = vpop.xlane.xlu0 %2487 }
 0x2c5   :  { %11483 = vst [vmem:[#allocation254_spill] sm:$0xff] %v7908_v42  ;;  %v3750_v28 = vmul.f32 %v3228_v36, %v3102_v6  ;;  %v7947_v15 = vpop.f32.mrf.mxu3 }
 0x2c6   :  { %v2582_v5 = vadd.f32 %v2581_v21, %v2165_v34  ;;  %v3158_v6 = vadd.f32 1e-05, %v3050_v14  ;;  %11487 = vst [vmem:[#allocation258_spill] sm:$0xff] %v7947_v15 }
 0x2c7   :  { %2568 = vadd.xlane.f32.xlu0 %v2567_v27  ;;  %v7911_v27 = vpop.f32.mrf.mxu1  ;;  %v3858_v19 = vmul.f32 %v3750_v28, %v7802_v61  ;;  %11490 = vst [vmem:[#allocation261_spill] sm:$0xff] %v7957_v49  ;;  %v7959_v61 = vpop.xlane.xlu1 %1632  ;;  %v2943_v49 = vmul.f32 0.0012755102, %v7873_v60 }
 0x2c8   :  { %11484 = vst [vmem:[#allocation255_spill] sm:$0xff] %v7911_v27  ;;  %v2583_v56 = vadd.f32 %v2582_v5, %v2166_v53  ;;  %6153 = vrsqrt.f32 %v3158_v6  ;;  %v7970_v5 = vld [vmem:[%s10714_s1 + $0xd0] sm:$0xff]  ;;  %vm3245_vm13 = vweird.f32 %v3158_v6 }
 0x2c9   :  { %v3912_v21 = vsub.f32 %v3804_v16, %v3858_v19 }
 0x2ca   :  { %v7961_v14 = vpop.f32.mrf.mxu0 }
 0x2cb   :  { %11491 = vst [vmem:[#allocation262_spill] sm:$0xff] %v7961_v14 }
 0x2cc   :  { %v7949_v36 = vpop.f32.mrf.mxu2  ;;  %v7984_v19 = vpop.xlane.xlu0 %1650 }
 0x2cd   :  { %11488 = vst [vmem:[#allocation259_spill] sm:$0xff] %v7949_v36 }
 0x2ce   :  { %v6154_v15 = vpop.eup %6153  ;;  %11495 = vst [vmem:[#allocation266_spill] sm:$0xff] %v7984_v19  ;;  %v3859_v19 = vmul.f32 %v7825_v57, %v7723_v48 }
 0x2cf   :  { %5984 = vmatmul.msk.bf16.gmra.mxu3 %vm422_vm1, %v7926_v2  ;;  %6008 = vmatmul.msk.bf16.gmra.mxu0 %vm422_vm1, %v7794_v18  ;;  %v7951_v11 = vpop.f32.mrf.mxu1  ;;  %vm3246_vm12 = vweird.f32 %v6154_v15 }
 0x2d0   :  { %6035 = vmatmul.msk.bf16.gmra.mxu1 %vm422_vm1, %v7794_v18  ;;  %11489 = vst [vmem:[#allocation260_spill] sm:$0xff] %v7951_v11  ;;  %vm3247_vm14 = vmor %vm3245_vm13, %vm3246_vm12 }
 0x2d2   :  { %6062 = vmatmul.msk.bf16.gmra.mxu2 %vm422_vm1, %v7794_v18  ;;  %v2584_v18 = vsel %vm1539_vm2, %v2167_v37, 0.0  ;;  %v7963_v37 = vpop.f32.mrf.mxu3 }
 0x2d3   :  { %v2585_v34 = vadd.f32 %v2584_v18, %v2583_v56  ;;  %11492 = vst [vmem:[#allocation263_spill] sm:$0xff] %v7963_v37  ;;  %v3240_v56 = vmul.f32 %v6154_v15, %v3158_v6  ;;  %v7986_v18 = vpop.xlane.xlu1 %2496 }
 0x2d4   :  { %v7965_v47 = vpop.f32.mrf.mxu2 }
 0x2d5   :  { %11493 = vst [vmem:[#allocation264_spill] sm:$0xff] %v7965_v47  ;;  %v3241_v16 = vmul.f32 %v6154_v15, %v3240_v56  ;;  %v8003_v56 = vpop.xlane.xlu0 %2514 }
 0x2d6   :  { %11499 = vst [vmem:[#allocation270_spill] sm:$0xff] %v8003_v56 }
 0x2d7   :  { %v7974_v53 = vpop.f32.mrf.mxu1  ;;  %v3242_v46 = vmul.f32 0.5, %v3241_v16  ;;  %v3805_v16 = vld [vmem:[%s10716_s3 + $0x10] sm:$0xff] }
 0x2d8   :  { %11494 = vst [vmem:[#allocation265_spill] sm:$0xff] %v7974_v53  ;;  %v3913_v60 = vsub.f32 %v3805_v16, %v3859_v19 }
 0x2da   :  { %2586 = vadd.xlane.f32.xlu2 %v2585_v34  ;;  %v7988_v34 = vmul.f32 0.0012755102, %v1579_v4 }
 0x2db   :  { %4620 = vperm.xlu0 %6144, %v3912_v21   ;;  %v7990_v21 = vpop.f32.mrf.mxu0  ;;  %v8005_v4 = vpop.xlane.xlu1 %1659 }
 0x2dc   :  { %11496 = vst [vmem:[#allocation267_spill] sm:$0xff] %v7990_v21  ;;  %v7992_v37 = vpop.f32.mrf.mxu2  ;;  %v3243_v21 = vsub.f32 1.5, %v3242_v46 }
 0x2dd   :  { %3972 = vperm.xlu1 %6145, %v3750_v28   ;;  %v7982_v28 = vpop.xlane.xlu2 %1587  ;;  %11497 = vst [vmem:[#allocation268_spill] sm:$0xff] %v7992_v37 }
 0x2de   :  { %11500 = vst [vmem:[#allocation271_spill] sm:$0xff] %v8005_v4  ;;  %v3244_v48 = vmul.f32 %v6154_v15, %v3243_v21  ;;  %v3104_v21 = vld [vmem:[%s10715_s2 + $0x18] sm:$0xff] }
 0x2df   :  { %5985 = vmatmul.msk.bf16.gmra.mxu3 %vm422_vm1, %v7970_v5  ;;  %6009 = vmatmul.msk.bf16.gmra.mxu0 %vm422_vm1, %v7821_v26  ;;  %v7994_v41 = vpop.f32.mrf.mxu1  ;;  %v11506_v4 = vld [vmem:[#allocation89_spill] sm:$0xff] }
 0x2e0   :  { %6036 = vmatmul.msk.bf16.gmra.mxu1 %vm422_vm1, %v7821_v26  ;;  %11498 = vst [vmem:[#allocation269_spill] sm:$0xff] %v7994_v41 }
 0x2e2   :  { %6063 = vmatmul.msk.bf16.gmra.mxu2 %vm422_vm1, %v7821_v26  ;;  %v2997_v26 = vmul.f32 %v7988_v34, %v7988_v34 }
 0x2e3   :  { %v8016_v57 = vpop.f32.mrf.mxu0  ;;  %v8040_v6 = vpop.xlane.xlu1 %2523 }
 0x2e4   :  { %v3051_v41 = vsub.f32 %v2943_v49, %v2997_v26  ;;  %11501 = vst [vmem:[#allocation272_spill] sm:$0xff] %v8016_v57  ;;  %v8020_v56 = vpop.f32.mrf.mxu2  ;;  %v2154_v49 = vmul.f32 %v11473_v13, %v11473_v13  ;;  %v2155_v26 = vmul.f32 %v11474_v39, %v11474_v39  ;;  %v11505_v13 = vld [vmem:[#allocation88_spill] sm:$0xff] }
 0x2e5   :  { %v7999_v59 = vpop.xlane.xlu2 %2451  ;;  %11502 = vst [vmem:[#allocation273_spill] sm:$0xff] %v8020_v56  ;;  %v1724_v37 = vadd.f32 %v11506_v4, %v11505_v13 }
 0x2e6   :  { %v8018_v46 = vadd.f32 1e-05, %v3051_v41  ;;  %v2156_v41 = vmul.f32 %v11475_v7, %v11475_v7  ;;  %11507 = vst [vmem:[#allocation276_spill] sm:$0xff] %v8040_v6  ;;  %v2570_v39 = vadd.f32 %v2155_v26, %v2154_v49 }
 0x2e7   :  { %v8028_v16 = vpop.f32.mrf.mxu1 }
 0x2e8   :  { %11503 = vst [vmem:[#allocation274_spill] sm:$0xff] %v8028_v16  ;;  %6155 = vrsqrt.f32 %v8018_v46  ;;  %v2157_v16 = vmul.f32 %v7705_v0, %v7705_v0  ;;  %v2571_v7 = vadd.f32 %v2570_v39, %v2156_v41  ;;  %vm3255_vm15 = vweird.f32 %v8018_v46 }
 0x2ea   :  { %v2572_v26 = vadd.f32 %v2571_v7, %v2157_v16  ;;  %v2171_v7 = vmul.f32 %v7759_v12, %v7759_v12 }
 0x2eb   :  { %v8055_v49 = vpop.f32.mrf.mxu0 }
 0x2ec   :  { %11509 = vst [vmem:[#allocation277_spill] sm:$0xff] %v8055_v49  ;;  %v8061_v41 = vpop.f32.mrf.mxu2  ;;  %v8074_v0 = vpop.xlane.xlu1 %1686 }
 0x2ed   :  { %v8026_v19 = vpop.xlane.xlu2 %1614  ;;  %11510 = vst [vmem:[#allocation278_spill] sm:$0xff] %v8061_v41 }
 0x2ee   :  { %11513 = vst [vmem:[#allocation281_spill] sm:$0xff] %v8074_v0 }
 0x2ef   :  { %6010 = vmatmul.msk.bf16.gmra.mxu0 %vm422_vm1, %v7869_v45 }
 0x2f0   :  { %6037 = vmatmul.msk.bf16.gmra.mxu1 %vm422_vm1, %v7869_v45 }
 0x2f2   :  { %6064 = vmatmul.msk.bf16.gmra.mxu2 %vm422_vm1, %v7869_v45  ;;  %4625 = vperm.xlu2 %6146, %v3913_v60   ;;  %v8030_v45 = vpop.xlane.xlu0 %1677  ;;  %v3248_v60 = vsel %vm3247_vm14, %v6154_v15, %v3244_v48  ;;  %v2168_v15 = vmul.f32 %v11505_v13, %v11505_v13  ;;  %v2169_v48 = vmul.f32 %v11506_v4, %v11506_v4 }
 0x2f3   :  { %11504 = vst [vmem:[#allocation275_spill] sm:$0xff] %v8030_v45  ;;  %v11508_v45 = vld [vmem:[#allocation91_spill] sm:$0xff]  ;;  %v8045_v57 = vmul.f32 %v3248_v60, %v3104_v21  ;;  %v2160_v60 = vmul.f32 %v7753_v31, %v7753_v31  ;;  %v2573_v13 = vadd.f32 %v2572_v26, %v2158_v62  ;;  %v1729_v62 = vsel %vm1539_vm2, %v7883_v52, 0.0 }
 0x2f4   :  { %v1725_v56 = vadd.f32 %v1724_v37, %v11508_v45  ;;  %v8057_v37 = vpop.eup %6155  ;;  %v2170_v39 = vmul.f32 %v11508_v45, %v11508_v45  ;;  %v2588_v1 = vadd.f32 %v2169_v48, %v2168_v15  ;;  %v2172_v48 = vmul.f32 %v7875_v40, %v7875_v40 }
 0x2f5   :  { %v8066_v4 = vpop.xlane.xlu2 %2478  ;;  %v3250_v45 = vmul.f32 %v8057_v37, %v8018_v46  ;;  %vm3256_vm0 = vweird.f32 %v8057_v37 }
 0x2f6   :  { %v1726_v6 = vadd.f32 %v1725_v56, %v7759_v12  ;;  %v8068_v56 = vpop.f32.mrf.mxu1  ;;  %v2589_v15 = vadd.f32 %v2588_v1, %v2170_v39  ;;  %v2575_v12 = vsel %vm1539_vm2, %v2160_v60, 0.0  ;;  %vm3257_vm3 = vmor %vm3255_vm15, %vm3256_vm0 }
 0x2f7   :  { %11511 = vst [vmem:[#allocation279_spill] sm:$0xff] %v8068_v56  ;;  %v3251_v56 = vmul.f32 %v8057_v37, %v3250_v45 }
 0x2f8   :  { %v1727_v21 = vadd.f32 %v1726_v6, %v7875_v40  ;;  %v2159_v6 = vmul.f32 %v7751_v54, %v7751_v54  ;;  %v2590_v0 = vadd.f32 %v2589_v15, %v2171_v7  ;;  %v2174_v54 = vmul.f32 %v7883_v52, %v7883_v52  ;;  %v8097_v40 = vpop.f32.mrf.mxu0  ;;  %v11524_v52 = vld [vmem:[#allocation150_spill] sm:$0xff] }
 0x2f9   :  { %11514 = vst [vmem:[#allocation282_spill] sm:$0xff] %v8097_v40  ;;  %v3252_v60 = vmul.f32 0.5, %v3251_v56  ;;  %v8111_v7 = vmul.f32 0.0012755102, %v7982_v28 }
 0x2fa   :  { %3982 = vperm.xlu2 %6146, %v8045_v57   ;;  %v8072_v16 = vpop.xlane.xlu0 %2541  ;;  %v1728_v26 = vadd.f32 %v1727_v21, %v7888_v17  ;;  %v2574_v31 = vadd.f32 %v2573_v13, %v2159_v6  ;;  %v2591_v1 = vadd.f32 %v2590_v0, %v2172_v48  ;;  %v2173_v13 = vmul.f32 %v7888_v17, %v7888_v17  ;;  %v11520_v48 = vld [vmem:[#allocation8_spill] sm:$0xff] }
 0x2fb   :  { %11512 = vst [vmem:[#allocation280_spill] sm:$0xff] %v8072_v16  ;;  %v2998_v56 = vmul.f32 %v8111_v7, %v8111_v7 }
 0x2fc   :  { %v1730_v16 = vadd.f32 %v1729_v62, %v1728_v26  ;;  %v2576_v41 = vadd.f32 %v2575_v12, %v2574_v31  ;;  %v2593_v31 = vsel %vm1539_vm2, %v2174_v54, 0.0  ;;  %v8108_v12 = vpop.xlane.xlu1 %2550  ;;  %v2592_v0 = vadd.f32 %v2591_v1, %v2173_v13  ;;  %v11521_v26 = vld [vmem:[#allocation9_spill] sm:$0xff]  ;;  %v11522_v13 = vld [vmem:[#allocation11_spill] sm:$0xff] }
 0x2fd   :  { %v8095_v39 = vpop.xlane.xlu2 %1641  ;;  %11518 = vst [vmem:[#allocation286_spill] sm:$0xff] %v8108_v12  ;;  %v2944_v62 = vmul.f32 0.0012755102, %v7999_v59 }
 0x2fe   :  { %v8105_v45 = vpop.f32.mrf.mxu1 }
 0x2ff   :  { %6011 = vmatmul.msk.bf16.gmra.mxu0 %vm422_vm1, %v7926_v2  ;;  %11517 = vst [vmem:[#allocation285_spill] sm:$0xff] %v8105_v45 }
 0x300   :  { %6038 = vmatmul.msk.bf16.gmra.mxu1 %vm422_vm1, %v7926_v2  ;;  %v8120_v15 = vpop.f32.mrf.mxu0 }
 0x301   :  { %11519 = vst [vmem:[#allocation287_spill] sm:$0xff] %v8120_v15 }
 0x302   :  { %6065 = vmatmul.msk.bf16.gmra.mxu2 %vm422_vm1, %v7926_v2  ;;  %v8099_v2 = vpop.f32.mrf.mxu2  ;;  %v8101_v21 = vpop.xlane.xlu0 %1704 }
 0x303   :  { %11515 = vst [vmem:[#allocation283_spill] sm:$0xff] %v8099_v2 }
 0x304   :  { %11516 = vst [vmem:[#allocation284_spill] sm:$0xff] %v8101_v21  ;;  %v11525_v21 = vld [vmem:[#allocation169_spill] sm:$0xff] }
 0x305   :  { %1731 = vadd.xlane.f32.xlu0 %v1730_v16  ;;  %v2594_v16 = vadd.f32 %v2593_v31, %v2592_v0  ;;  %v8118_v54 = vpop.xlane.xlu2 %2505  ;;  %v3052_v31 = vsub.f32 %v2944_v62, %v2998_v56 }
 0x307   :  { %2577 = vadd.xlane.f32.xlu1 %v2576_v41  ;;  %v3253_v41 = vsub.f32 1.5, %v3252_v60 }
 0x309   :  { %v3254_v59 = vmul.f32 %v8057_v37, %v3253_v41 }
 0x30a   :  { %v8128_v0 = vpop.f32.mrf.mxu2 }
 0x30b   :  { %11523 = vst [vmem:[#allocation8_spill] sm:$0xff] %v8128_v0  ;;  %v3258_v62 = vsel %vm3257_vm3, %v8057_v37, %v3254_v59  ;;  %v3807_v59 = vld [vmem:[%s10716_s3 + $0x20] sm:$0xff] }
 0x30d   :  { %2595 = vadd.xlane.f32.xlu0 %v2594_v16  ;;  %v4616_v16 = vpop.permute.xlu1 %4615 }
 0x30f   :  { %v3968_v6 = vpop.permute.xlu0 %3967  ;;  %6012 = vmatmul.msk.bf16.gmra.mxu0 %vm422_vm1, %v7970_v5 }
 0x310   :  { %v4235_v28 = vmul.f32 %v3968_v6, %v11520_v48  ;;  %v4236_v1 = vmul.f32 %v3968_v6, %v11521_v26  ;;  %v4237_v60 = vmul.f32 %v3968_v6, %v11522_v13  ;;  %v4238_v17 = vmul.f32 %v3968_v6, %v11524_v52  ;;  %v8135_v48 = vpop.f32.mrf.mxu1  ;;  %v11527_v26 = vld [vmem:[#allocation171_spill] sm:$0xff]  ;;  %6039 = vmatmul.msk.bf16.gmra.mxu1 %vm422_vm1, %v7970_v5 }
 0x311   :  { %v4239_v2 = vmul.f32 %v3968_v6, %v11525_v21  ;;  %v4240_v45 = vmul.f32 %v3968_v6, %v7079_v20  ;;  %11526 = vst [vmem:[#allocation9_spill] sm:$0xff] %v8135_v48  ;;  %v4241_v13 = vmul.f32 %v3968_v6, %v11527_v26  ;;  %v3105_v21 = vld [vmem:[%s10715_s2 + $0x20] sm:$0xff]  ;;  %v11528_v6 = vld [vmem:[#allocation96_spill] sm:$0xff]  ;;  %v3860_v26 = vmul.f32 %v8045_v57, %v7894_v38 }
 0x312   :  { %6066 = vmatmul.msk.bf16.gmra.mxu2 %vm422_vm1, %v7970_v5  ;;  %v4883_v12 = vadd.f32 %v4616_v16, %v4235_v28  ;;  %v4884_v15 = vadd.f32 %v4616_v16, %v4236_v1  ;;  %v4885_v41 = vadd.f32 %v4616_v16, %v4237_v60  ;;  %v4886_v52 = vadd.f32 %v4616_v16, %v4238_v17  ;;  %v11529_v28 = vld [vmem:[#allocation97_spill] sm:$0xff]  ;;  %v11530_v17 = vld [vmem:[#allocation99_spill] sm:$0xff] }
 0x313   :  { %v4887_v20 = vadd.f32 %v4616_v16, %v4239_v2  ;;  %v4888_v56 = vadd.f32 %v4616_v16, %v4240_v45  ;;  %v1742_v1 = vadd.f32 %v11529_v28, %v11528_v6  ;;  %v3160_v5 = vadd.f32 1e-05, %v3052_v31  ;;  %v3806_v45 = vld [vmem:[%s10716_s3 + $0x18] sm:$0xff] }
 0x314   :  { %5261 = vst [vmem:[#allocation5] sm:$0xff] %v4883_v12  ;;  %v4889_v60 = vadd.f32 %v4616_v16, %v4241_v13  ;;  %v8150_v46 = vmul.f32 %v3258_v62, %v3105_v21  ;;  %v8153_v12 = vpop.xlane.xlu2 %1668  ;;  %v3914_v38 = vsub.f32 %v3806_v45, %v3860_v26  ;;  %v1747_v16 = vsel %vm1539_vm2, %v7949_v36, 0.0 }
 0x315   :  { %5262 = vst [vmem:[#allocation5 + $0x8] sm:$0xff] %v4884_v15  ;;  %v1743_v2 = vadd.f32 %v1742_v1, %v11530_v17  ;;  %6157 = vrsqrt.f32 %v3160_v5  ;;  %vm3265_vm4 = vweird.f32 %v3160_v5  ;;  %v8178_v26 = vmul.f32 0.0012755102, %v7898_v51 }
 0x316   :  { %5263 = vst [vmem:[#allocation5 + $0x10] sm:$0xff] %v4885_v41  ;;  %v3861_v15 = vmul.f32 %v8150_v46, %v7988_v34 }
 0x317   :  { %5264 = vst [vmem:[#allocation5 + $0x18] sm:$0xff] %v4886_v52  ;;  %v1744_v37 = vadd.f32 %v1743_v2, %v7806_v22 }
 0x318   :  { %11531 = vst [vmem:[#allocation11_spill] sm:$0xff] %v8153_v12  ;;  %v3915_v57 = vsub.f32 %v3807_v59, %v3861_v15  ;;  %v11535_v15 = vld [vmem:[#allocation92_spill] sm:$0xff]  ;;  %v11536_v59 = vld [vmem:[#allocation93_spill] sm:$0xff] }
 0x319   :  { %5265 = vst [vmem:[#allocation5 + $0x20] sm:$0xff] %v4887_v20  ;;  %v1745_v31 = vadd.f32 %v1744_v37, %v7944_v23  ;;  %v3106_v37 = vld [vmem:[%s10715_s2 + $0x28] sm:$0xff] }
 0x31a   :  { %5266 = vst [vmem:[#allocation5 + $0x28] sm:$0xff] %v4888_v56 }
 0x31b   :  { %5267 = vst.msk [vmem:[#allocation5 + $0x30] sm:$0xff] %vm1539_vm2, %v4889_v60  ;;  %v6158_v13 = vpop.eup %6157  ;;  %v1746_v41 = vadd.f32 %v1745_v31, %v7951_v11  ;;  %v1733_v31 = vadd.f32 %v11536_v59, %v11535_v15 }
 0x31c   :  { %v8171_v52 = vpop.xlane.xlu2 %2532  ;;  %v3260_v34 = vmul.f32 %v6158_v13, %v3160_v5  ;;  %vm3266_vm1 = vweird.f32 %v6158_v13  ;;  %v3000_v5 = vmul.f32 %v8178_v26, %v8178_v26 }
 0x31d   :  { %11532 = vst [vmem:[#allocation150_spill] sm:$0xff] %v8171_v52  ;;  %v1748_v20 = vadd.f32 %v1747_v16, %v1746_v41  ;;  %vm3267_vm5 = vmor %vm3265_vm4, %vm3266_vm1  ;;  %v11537_v16 = vld [vmem:[#allocation100_spill] sm:$0xff]  ;;  %v11538_v41 = vld [vmem:[#allocation101_spill] sm:$0xff] }
 0x31e   :  { %v3261_v21 = vmul.f32 %v6158_v13, %v3260_v34  ;;  %v11540_v34 = vld [vmem:[#allocation95_spill] sm:$0xff] }
 0x320   :  { %4630 = vperm.xlu1 %6145, %v3914_v38   ;;  %v3262_v56 = vmul.f32 0.5, %v3261_v21  ;;  %v2946_v38 = vmul.f32 0.0012755102, %v7942_v24  ;;  %v1734_v21 = vadd.f32 %v1733_v31, %v11540_v34  ;;  %v2190_v24 = vmul.f32 %v11538_v41, %v11538_v41 }
 0x321   :  { %4635 = vperm.xlu0 %6144, %v3915_v57  }
 0x322   :  { %v3263_v1 = vsub.f32 1.5, %v3262_v56  ;;  %v2189_v56 = vmul.f32 %v11537_v16, %v11537_v16 }
 0x323   :  { %1749 = vadd.xlane.f32.xlu2 %v1748_v20  ;;  %v1751_v20 = vadd.f32 %v11538_v41, %v11537_v16 }
 0x324   :  { %v8173_v62 = vpop.xlane.xlu2 %1695  ;;  %v3264_v60 = vmul.f32 %v6158_v13, %v3263_v1  ;;  %v11541_v1 = vld [vmem:[#allocation103_spill] sm:$0xff] }
 0x325   :  { %11533 = vst [vmem:[#allocation169_spill] sm:$0xff] %v8173_v62  ;;  %v2615_v62 = vadd.f32 %v2190_v24, %v2189_v56  ;;  %v2191_v31 = vmul.f32 %v11541_v1, %v11541_v1 }
 0x326   :  { %v3268_v45 = vsel %vm3267_vm5, %v6158_v13, %v3264_v60  ;;  %v3054_v13 = vsub.f32 %v2946_v38, %v3000_v5  ;;  %v1752_v60 = vadd.f32 %v1751_v20, %v11541_v1  ;;  %v2192_v5 = vmul.f32 %v7816_v8, %v7816_v8 }
 0x327   :  { %v8186_v57 = vmul.f32 %v3268_v45, %v3106_v37  ;;  %v1735_v37 = vadd.f32 %v1734_v21, %v7789_v25  ;;  %v1738_v20 = vsel %vm1539_vm2, %v7908_v42, 0.0 }
 0x328   :  { %v1753_v45 = vadd.f32 %v1752_v60, %v7816_v8  ;;  %v2616_v60 = vadd.f32 %v2615_v62, %v2191_v31  ;;  %v2194_v31 = vmul.f32 %v7974_v53, %v7974_v53 }
 0x32a   :  { %v1754_v38 = vadd.f32 %v1753_v45, %v7961_v14  ;;  %v2617_v1 = vadd.f32 %v2616_v60, %v2192_v5 }
 0x32c   :  { %v8175_v2 = vpop.xlane.xlu2 %2559  ;;  %v1755_v8 = vadd.f32 %v1754_v38, %v7974_v53 }
 0x32d   :  { %11534 = vst [vmem:[#allocation171_spill] sm:$0xff] %v8175_v2  ;;  %v1736_v2 = vadd.f32 %v1735_v37, %v7902_v50  ;;  %v1756_v37 = vsel %vm1539_vm2, %v7965_v47, 0.0 }
 0x32e   :  { %v1757_v62 = vadd.f32 %v1756_v37, %v1755_v8 }
 0x32f   :  { %v1737_v21 = vadd.f32 %v1736_v2, %v7911_v27  ;;  %v2195_v2 = vmul.f32 %v7965_v47, %v7965_v47  ;;  %v11546_v47 = vld [vmem:[#allocation173_spill] sm:$0xff] }
 0x331   :  { %v1739_v45 = vadd.f32 %v1738_v20, %v1737_v21  ;;  %v2620_v52 = vsel %vm1539_vm2, %v2195_v2, 0.0 }
 0x334   :  { %v8192_v51 = vpop.xlane.xlu2 %1722 }
 0x335   :  { %11539 = vst [vmem:[#allocation92_spill] sm:$0xff] %v8192_v51  ;;  %v8204_v51 = vadd.f32 1e-05, %v3054_v13  ;;  %v2193_v13 = vmul.f32 %v7961_v14, %v7961_v14 }
 0x337   :  { %6159 = vrsqrt.f32 %v8204_v51  ;;  %v8219_v24 = vpop.xlane.xlu1 %1713  ;;  %v2618_v14 = vadd.f32 %v2617_v1, %v2193_v13  ;;  %v11545_v13 = vld [vmem:[#allocation172_spill] sm:$0xff]  ;;  %vm3285_vm7 = vweird.f32 %v8204_v51 }
 0x338   :  { %11542 = vst [vmem:[#allocation288_spill] sm:$0xff] %v8219_v24 }
 0x339   :  { %v2619_v21 = vadd.f32 %v2618_v14, %v2194_v31 }
 0x33a   :  { %v8224_v41 = vpop.xlane.xlu0 %2568 }
 0x33b   :  { %3992 = vperm.xlu2 %6146, %v8186_v57   ;;  %11543 = vst [vmem:[#allocation289_spill] sm:$0xff] %v8224_v41  ;;  %v2621_v53 = vadd.f32 %v2620_v52, %v2619_v21  ;;  %v11547_v41 = vld [vmem:[#allocation175_spill] sm:$0xff]  ;;  %v11548_v52 = vld [vmem:[#allocation13_spill] sm:$0xff] }
 0x33c   :  { %v8217_v56 = vpop.permute.xlu2 %3977 }
 0x33d   :  { %v8230_v16 = vpop.eup %6159 }
 0x33e   :  { %v3280_v38 = vmul.f32 %v8230_v16, %v8204_v51  ;;  %vm3286_vm6 = vweird.f32 %v8230_v16  ;;  %v3810_v51 = vld [vmem:[%s10716_s3 + $0x38] sm:$0xff] }
 0x33f   :  { %vm3287_vm8 = vmor %vm3285_vm7, %vm3286_vm6 }
 0x34a   :  { %1740 = vadd.xlane.f32.xlu1 %v1739_v45 }
 0x34b   :  { %1758 = vadd.xlane.f32.xlu0 %v1757_v62 }
 0x34d   :  { %v8235_v5 = vpop.xlane.xlu2 %2586  ;;  %v4621_v45 = vpop.permute.xlu0 %4620 }
 0x34e   :  { %11544 = vst [vmem:[#allocation290_spill] sm:$0xff] %v8235_v5 }
 0x34f   :  { %v3973_v20 = vpop.permute.xlu1 %3972 }
 0x350   :  { %v4242_v60 = vmul.f32 %v3973_v20, %v6536_v32  ;;  %v4243_v8 = vmul.f32 %v3973_v20, %v6538_v33  ;;  %v4244_v37 = vmul.f32 %v3973_v20, %v6542_v35  ;;  %v4245_v1 = vmul.f32 %v3973_v20, %v7019_v30 }
 0x351   :  { %v4246_v62 = vmul.f32 %v3973_v20, %v11545_v13  ;;  %v4247_v2 = vmul.f32 %v3973_v20, %v11546_v47  ;;  %v4248_v12 = vmul.f32 %v3973_v20, %v11547_v41  ;;  %v2182_v32 = vmul.f32 %v11528_v6, %v11528_v6  ;;  %v11549_v20 = vld [vmem:[#allocation14_spill] sm:$0xff]  ;;  %v11583_v6 = vld [vmem:[#allocation21_spill] sm:$0xff] }
 0x352   :  { %v4890_v24 = vadd.f32 %v4621_v45, %v4242_v60  ;;  %v4891_v5 = vadd.f32 %v4621_v45, %v4243_v8  ;;  %v4892_v48 = vadd.f32 %v4621_v45, %v4244_v37  ;;  %v2183_v33 = vmul.f32 %v11529_v28, %v11529_v28 }
 0x353   :  { %v3281_v35 = vmul.f32 %v8230_v16, %v3280_v38  ;;  %v4893_v14 = vadd.f32 %v4621_v45, %v4245_v1  ;;  %v4894_v30 = vadd.f32 %v4621_v45, %v4246_v62  ;;  %2622 = vadd.xlane.f32.xlu0 %v2621_v53  ;;  %v4895_v31 = vadd.f32 %v4621_v45, %v4247_v2  ;;  %v11550_v38 = vld [vmem:[#allocation16_spill] sm:$0xff] }
 0x354   :  { %5268 = vst [vmem:[#allocation5 + $0x38] sm:$0xff] %v4890_v24  ;;  %v2184_v47 = vmul.f32 %v11530_v17, %v11530_v17  ;;  %v4249_v41 = vmul.f32 %v8217_v56, %v11548_v52  ;;  %v4250_v21 = vmul.f32 %v8217_v56, %v11549_v20  ;;  %v4896_v60 = vadd.f32 %v4621_v45, %v4248_v12  ;;  %v11552_v52 = vld [vmem:[#allocation176_spill] sm:$0xff] }
 0x355   :  { %5269 = vst [vmem:[#allocation5 + $0x40] sm:$0xff] %v4891_v5  ;;  %v2606_v8 = vadd.f32 %v2183_v33, %v2182_v32  ;;  %v3282_v37 = vmul.f32 0.5, %v3281_v35  ;;  %v4251_v1 = vmul.f32 %v8217_v56, %v11550_v38  ;;  %v4626_v53 = vpop.permute.xlu2 %4625  ;;  %v2185_v24 = vmul.f32 %v7806_v22, %v7806_v22  ;;  %v11551_v5 = vld [vmem:[#allocation157_spill] sm:$0xff] }
 0x356   :  { %5270 = vst [vmem:[#allocation5 + $0x48] sm:$0xff] %v4892_v48  ;;  %v4252_v13 = vmul.f32 %v8217_v56, %v11551_v5  ;;  %v4897_v62 = vadd.f32 %v4626_v53, %v4249_v41  ;;  %v4898_v2 = vadd.f32 %v4626_v53, %v4250_v21  ;;  %v4253_v12 = vmul.f32 %v8217_v56, %v11552_v52 }
 0x357   :  { %5271 = vst [vmem:[#allocation5 + $0x50] sm:$0xff] %v4893_v14  ;;  %v4899_v48 = vadd.f32 %v4626_v53, %v4251_v1  ;;  %v2607_v45 = vadd.f32 %v2606_v8, %v2184_v47  ;;  %v2186_v32 = vmul.f32 %v7944_v23, %v7944_v23  ;;  %v4254_v33 = vmul.f32 %v8217_v56, %v7149_v63  ;;  %v11553_v14 = vld [vmem:[#allocation177_spill] sm:$0xff]  ;;  %v11581_v23 = vld [vmem:[#allocation276_spill] sm:$0xff] }
 0x358   :  { %5272 = vst [vmem:[#allocation5 + $0x58] sm:$0xff] %v4894_v30  ;;  %v4900_v35 = vadd.f32 %v4626_v53, %v4252_v13  ;;  %v4255_v30 = vmul.f32 %v8217_v56, %v11553_v14  ;;  %v4901_v41 = vadd.f32 %v4626_v53, %v4253_v12  ;;  %v3283_v20 = vsub.f32 1.5, %v3282_v37  ;;  %v3108_v1 = vld [vmem:[%s10715_s2 + $0x38] sm:$0xff] }
 0x359   :  { %5273 = vst [vmem:[#allocation5 + $0x60] sm:$0xff] %v4895_v31  ;;  %v4902_v21 = vadd.f32 %v4626_v53, %v4254_v33  ;;  %v2608_v31 = vadd.f32 %v2607_v45, %v2185_v24  ;;  %v2188_v47 = vmul.f32 %v7949_v36, %v7949_v36  ;;  %v2187_v63 = vmul.f32 %v7951_v11, %v7951_v11  ;;  %v11580_v11 = vld [vmem:[#allocation125_spill] sm:$0xff] }
 0x35a   :  { %5274 = vst.msk [vmem:[#allocation5 + $0x68] sm:$0xff] %vm1539_vm2, %v4896_v60  ;;  %v4903_v38 = vadd.f32 %v4626_v53, %v4255_v30  ;;  %v3284_v8 = vmul.f32 %v8230_v16, %v3283_v20  ;;  %v3862_v52 = vmul.f32 %v8186_v57, %v8111_v7  ;;  %v2176_v12 = vmul.f32 %v11536_v59, %v11536_v59 }
 0x35b   :  { %5275 = vst [vmem:[#allocation5 + $0x70] sm:$0xff] %v4897_v62  ;;  %v2609_v60 = vadd.f32 %v2608_v31, %v2186_v32  ;;  %v2611_v56 = vsel %vm1539_vm2, %v2188_v47, 0.0  ;;  %v2178_v7 = vmul.f32 %v7789_v25, %v7789_v25  ;;  %v2181_v30 = vmul.f32 %v7908_v42, %v7908_v42 }
 0x35c   :  { %5276 = vst [vmem:[#allocation5 + $0x78] sm:$0xff] %v4898_v2  ;;  %v3288_v53 = vsel %vm3287_vm8, %v8230_v16, %v3284_v8  ;;  %v2945_v2 = vmul.f32 0.0012755102, %v7896_v55  ;;  %v2177_v55 = vmul.f32 %v11540_v34, %v11540_v34  ;;  %v2952_v22 = vmul.f32 0.0012755102, %v11581_v23  ;;  %v11587_v23 = vld [vmem:[#allocation180_spill] sm:$0xff] }
 0x35d   :  { %5277 = vst [vmem:[#allocation5 + $0x80] sm:$0xff] %v4899_v48  ;;  %v2610_v37 = vadd.f32 %v2609_v60, %v2187_v63  ;;  %v3756_v5 = vmul.f32 %v3288_v53, %v3108_v1  ;;  %v3808_v48 = vld [vmem:[%s10716_s3 + $0x28] sm:$0xff]  ;;  %v2602_v47 = vsel %vm1539_vm2, %v2181_v30, 0.0  ;;  %v11555_v53 = vld [vmem:[#allocation113_spill] sm:$0xff] }
 0x35e   :  { %5278 = vst [vmem:[#allocation5 + $0x88] sm:$0xff] %v4900_v35  ;;  %v3916_v45 = vsub.f32 %v3808_v48, %v3862_v52  ;;  %v2179_v35 = vmul.f32 %v7902_v50, %v7902_v50  ;;  %v11554_v1 = vld [vmem:[#allocation112_spill] sm:$0xff]  ;;  %v11558_v52 = vld [vmem:[#allocation109_spill] sm:$0xff] }
 0x35f   :  { %5279 = vst [vmem:[#allocation5 + $0x90] sm:$0xff] %v4901_v41  ;;  %v2612_v24 = vadd.f32 %v2611_v56, %v2610_v37  ;;  %v3864_v13 = vmul.f32 %v3756_v5, %v8178_v26  ;;  %v2175_v26 = vmul.f32 %v11535_v15, %v11535_v15  ;;  %v2180_v41 = vmul.f32 %v7911_v27, %v7911_v27 }
 0x360   :  { %5280 = vst [vmem:[#allocation5 + $0x98] sm:$0xff] %v4902_v21  ;;  %v8317_v21 = vmul.f32 0.0012755102, %v7959_v61  ;;  %v2210_v61 = vmul.f32 %v11554_v1, %v11554_v1 }
 0x361   :  { %5281 = vst.msk [vmem:[#allocation5 + $0xa0] sm:$0xff] %vm1539_vm2, %v4903_v38  ;;  %v3918_v62 = vsub.f32 %v3810_v51, %v3864_v13  ;;  %v2597_v32 = vadd.f32 %v2176_v12, %v2175_v26  ;;  %v2949_v38 = vmul.f32 0.0012755102, %v7986_v18  ;;  %v2211_v18 = vmul.f32 %v11555_v53, %v11555_v53  ;;  %v11556_v13 = vld [vmem:[#allocation115_spill] sm:$0xff] }
 0x362   :  { %v3003_v60 = vmul.f32 %v8317_v21, %v8317_v21 }
 0x363   :  { %3987 = vperm.xlu1 %6145, %v8150_v46   ;;  %v8289_v46 = vmul.f32 0.0012755102, %v7864_v3  ;;  %v2598_v57 = vadd.f32 %v2597_v32, %v2177_v55  ;;  %v2642_v48 = vadd.f32 %v2211_v18, %v2210_v61  ;;  %v2213_v55 = vmul.f32 %v7906_v58, %v7906_v58 }
 0x364   :  { %2613 = vadd.xlane.f32.xlu2 %v2612_v24  ;;  %v1778_v24 = vadd.f32 %v11555_v53, %v11554_v1 }
 0x365   :  { %v2999_v16 = vmul.f32 %v8289_v46, %v8289_v46  ;;  %v2599_v14 = vadd.f32 %v2598_v57, %v2178_v7  ;;  %v11559_v7 = vld [vmem:[#allocation17_spill] sm:$0xff] }
 0x366   :  { %v1779_v51 = vadd.f32 %v1778_v24, %v11556_v13 }
 0x367   :  { %4002 = vperm.xlu0 %6144, %v3756_v5   ;;  %v3053_v3 = vsub.f32 %v2945_v2, %v2999_v16  ;;  %v2600_v20 = vadd.f32 %v2599_v14, %v2179_v35  ;;  %v3057_v5 = vsub.f32 %v2949_v38, %v3003_v60  ;;  %v3983_v2 = vpop.permute.xlu2 %3982  ;;  %v11557_v16 = vld [vmem:[#allocation108_spill] sm:$0xff]  ;;  %v11560_v35 = vld [vmem:[#allocation18_spill] sm:$0xff] }
 0x368   :  { %v1769_v26 = vadd.f32 %v11558_v52, %v11557_v16  ;;  %v4256_v57 = vmul.f32 %v3983_v2, %v11559_v7  ;;  %v4257_v14 = vmul.f32 %v3983_v2, %v11560_v35  ;;  %v4260_v60 = vmul.f32 %v3983_v2, %v7186_v43  ;;  %v11562_v7 = vld [vmem:[#allocation279_spill] sm:$0xff] }
 0x369   :  { %v8305_v33 = vadd.f32 1e-05, %v3053_v3  ;;  %v2601_v63 = vadd.f32 %v2600_v20, %v2180_v41  ;;  %v2212_v3 = vmul.f32 %v11556_v13, %v11556_v13  ;;  %v8345_v32 = vadd.f32 1e-05, %v3057_v5 }
 0x36a   :  { %v4258_v41 = vmul.f32 %v3983_v2, %v6571_v44  ;;  %v4259_v20 = vmul.f32 %v3983_v2, %v7045_v10  ;;  %v4262_v5 = vmul.f32 %v3983_v2, %v7208_v9  ;;  %v11561_v10 = vld [vmem:[#allocation278_spill] sm:$0xff]  ;;  %v2214_v43 = vmul.f32 %v8055_v49, %v8055_v49 }
 0x36b   :  { %6161 = vrsqrt.f32 %v8305_v33  ;;  %v2603_v37 = vadd.f32 %v2602_v47, %v2601_v63  ;;  %v2216_v9 = vmul.f32 %v11561_v10, %v11561_v10  ;;  %vm3275_vm10 = vweird.f32 %v8305_v33 }
 0x36c   :  { %6163 = vrsqrt.f32 %v8345_v32  ;;  %vm3315_vm13 = vweird.f32 %v8345_v32 }
 0x36f   :  { %4650 = vperm.xlu0 %6144, %v3918_v62   ;;  %v8337_v62 = vmul.f32 0.0012755102, %v8026_v19  ;;  %v2947_v19 = vmul.f32 0.0012755102, %v8066_v4  ;;  %v4261_v4 = vmul.f32 %v3983_v2, %v7194_v29 }
 0x371   :  { %v8319_v31 = vpop.eup %6161  ;;  %v3001_v30 = vmul.f32 %v8337_v62, %v8337_v62 }
 0x372   :  { %v3270_v56 = vmul.f32 %v8319_v31, %v8305_v33  ;;  %vm3276_vm9 = vweird.f32 %v8319_v31 }
 0x373   :  { %v3055_v18 = vsub.f32 %v2947_v19, %v3001_v30  ;;  %v6164_v30 = vpop.eup %6163  ;;  %vm3277_vm11 = vmor %vm3275_vm10, %vm3276_vm9 }
 0x374   :  { %v3271_v12 = vmul.f32 %v8319_v31, %v3270_v56  ;;  %vm3316_vm12 = vweird.f32 %v6164_v30 }
 0x375   :  { %vm3317_vm14 = vmor %vm3315_vm13, %vm3316_vm12 }
 0x376   :  { %v3272_v63 = vmul.f32 0.5, %v3271_v12 }
 0x378   :  { %v3273_v2 = vsub.f32 1.5, %v3272_v63  ;;  %v2647_v63 = vsel %vm1539_vm2, %v2216_v9, 0.0 }
 0x37a   :  { %v8325_v8 = vpop.xlane.xlu1 %2577 }
 0x37c   :  { %4640 = vperm.xlu2 %6146, %v3916_v45   ;;  %v1780_v45 = vadd.f32 %v1779_v51, %v7906_v58  ;;  %v1783_v51 = vsel %vm1539_vm2, %v11561_v10, 0.0  ;;  %v11584_v10 = vld [vmem:[#allocation23_spill] sm:$0xff] }
 0x37d   :  { %v11586_v58 = vld [vmem:[#allocation179_spill] sm:$0xff] }
 0x37e   :  { %v1781_v47 = vadd.f32 %v1780_v45, %v8055_v49  ;;  %v2643_v45 = vadd.f32 %v2642_v48, %v2212_v3  ;;  %v11563_v48 = vld [vmem:[#allocation111_spill] sm:$0xff] }
 0x37f   :  { %v1770_v3 = vadd.f32 %v1769_v26, %v11563_v48 }
 0x380   :  { %v2644_v19 = vadd.f32 %v2643_v45, %v2213_v55  ;;  %v3310_v55 = vmul.f32 %v6164_v30, %v8345_v32  ;;  %v11567_v45 = vld [vmem:[#allocation274_spill] sm:$0xff]  ;;  %v3813_v32 = vld [vmem:[%s10716_s3 + $0x50] sm:$0xff] }
 0x38d   :  { %2604 = vadd.xlane.f32.xlu1 %v2603_v37 }
 0x392   :  { %v4631_v38 = vpop.permute.xlu1 %4630 }
 0x393   :  { %v4904_v56 = vadd.f32 %v4631_v38, %v4256_v57  ;;  %v4905_v37 = vadd.f32 %v4631_v38, %v4257_v14  ;;  %v4906_v61 = vadd.f32 %v4631_v38, %v4258_v41  ;;  %v4907_v24 = vadd.f32 %v4631_v38, %v4259_v20 }
 0x394   :  { %v4908_v44 = vadd.f32 %v4631_v38, %v4260_v60  ;;  %v4909_v12 = vadd.f32 %v4631_v38, %v4261_v4  ;;  %v1782_v57 = vadd.f32 %v1781_v47, %v11562_v7  ;;  %v4910_v35 = vadd.f32 %v4631_v38, %v4262_v5  ;;  %v11564_v38 = vld [vmem:[#allocation249_spill] sm:$0xff] }
 0x395   :  { %5282 = vst [vmem:[#allocation5 + $0xa8] sm:$0xff] %v4904_v56  ;;  %v3163_v14 = vadd.f32 1e-05, %v3055_v18  ;;  %v2215_v41 = vmul.f32 %v11562_v7, %v11562_v7  ;;  %v2645_v20 = vadd.f32 %v2644_v19, %v2214_v43  ;;  %v1771_v47 = vadd.f32 %v1770_v3, %v11564_v38  ;;  %v11565_v56 = vld [vmem:[#allocation272_spill] sm:$0xff]  ;;  %v11566_v5 = vld [vmem:[#allocation273_spill] sm:$0xff] }
 0x396   :  { %5283 = vst [vmem:[#allocation5 + $0xb0] sm:$0xff] %v4905_v37  ;;  %v1784_v29 = vadd.f32 %v1783_v51, %v1782_v57  ;;  %v3274_v60 = vmul.f32 %v8319_v31, %v3273_v2  ;;  %v3809_v19 = vld [vmem:[%s10716_s3 + $0x30] sm:$0xff] }
 0x397   :  { %5284 = vst [vmem:[#allocation5 + $0xb8] sm:$0xff] %v4906_v61  ;;  %6165 = vrsqrt.f32 %v3163_v14  ;;  %v2646_v26 = vadd.f32 %v2645_v20, %v2215_v41  ;;  %v1772_v37 = vadd.f32 %v1771_v47, %v11565_v56  ;;  %v3311_v61 = vmul.f32 %v6164_v30, %v3310_v55  ;;  %v8390_v20 = vpop.xlane.xlu0 %1731 }
 0x398   :  { %5285 = vst [vmem:[#allocation5 + $0xc0] sm:$0xff] %v4907_v24  ;;  %v3107_v24 = vld [vmem:[%s10715_s2 + $0x30] sm:$0xff]  ;;  %v3278_v18 = vsel %vm3277_vm11, %v8319_v31, %v3274_v60  ;;  %vm3295_vm0 = vweird.f32 %v3163_v14 }
 0x399   :  { %5286 = vst [vmem:[#allocation5 + $0xc8] sm:$0xff] %v4908_v44  ;;  %1785 = vadd.xlane.f32.xlu0 %v1784_v29  ;;  %v2648_v4 = vadd.f32 %v2647_v63, %v2646_v26  ;;  %v1774_v44 = vsel %vm1539_vm2, %v11566_v5, 0.0  ;;  %v1773_v43 = vadd.f32 %v1772_v37, %v11567_v45  ;;  %v3312_v57 = vmul.f32 0.5, %v3311_v61 }
 0x39a   :  { %5287 = vst [vmem:[#allocation5 + $0xd0] sm:$0xff] %v4909_v12  ;;  %v3755_v12 = vmul.f32 %v3278_v18, %v3107_v24 }
 0x39b   :  { %5288 = vst.msk [vmem:[#allocation5 + $0xd8] sm:$0xff] %vm1539_vm2, %v4910_v35  ;;  %v1775_v35 = vadd.f32 %v1774_v44, %v1773_v43  ;;  %v3313_v31 = vsub.f32 1.5, %v3312_v57  ;;  %v8413_v44 = vpop.xlane.xlu2 %1749  ;;  %v11570_v43 = vld [vmem:[#allocation261_spill] sm:$0xff] }
 0x39c   :  { %v3863_v29 = vmul.f32 %v3755_v12, %v8289_v46  ;;  %v3111_v46 = vld [vmem:[%s10715_s2 + $0x50] sm:$0xff]  ;;  %11569 = vst [vmem:[#allocation172_spill] sm:$0xff] %v8413_v44 }
 0x39d   :  { %v6166_v51 = vpop.eup %6165  ;;  %v3314_v3 = vmul.f32 %v6164_v30, %v3313_v31 }
 0x39e   :  { %v3290_v33 = vmul.f32 %v6166_v51, %v3163_v14  ;;  %v3917_v2 = vsub.f32 %v3809_v19, %v3863_v29  ;;  %vm3296_vm15 = vweird.f32 %v6166_v51  ;;  %v11568_v14 = vld [vmem:[#allocation256_spill] sm:$0xff] }
 0x39f   :  { %v3318_v47 = vsel %vm3317_vm14, %v6164_v30, %v3314_v3  ;;  %v8396_v26 = vpop.xlane.xlu0 %2595  ;;  %vm3297_vm3 = vmor %vm3295_vm0, %vm3296_vm15 }
 0x3a0   :  { %v3291_v9 = vmul.f32 %v6166_v51, %v3290_v33  ;;  %v3759_v63 = vmul.f32 %v3318_v47, %v3111_v46  ;;  %v11572_v33 = vld [vmem:[#allocation105_spill] sm:$0xff]  ;;  %v11574_v46 = vld [vmem:[#allocation247_spill] sm:$0xff] }
 0x3a1   :  { %2649 = vadd.xlane.f32.xlu0 %v2648_v4  ;;  %v3109_v4 = vld [vmem:[%s10715_s2 + $0x40] sm:$0xff]  ;;  %v2197_v31 = vmul.f32 %v11572_v33, %v11572_v33 }
 0x3a2   :  { %v3292_v41 = vmul.f32 0.5, %v3291_v9  ;;  %v3867_v37 = vmul.f32 %v3759_v63, %v8317_v21  ;;  %v8411_v21 = vmul.f32 0.0012755102, %v11568_v14  ;;  %v11573_v9 = vld [vmem:[#allocation107_spill] sm:$0xff] }
 0x3a4   :  { %v3293_v55 = vsub.f32 1.5, %v3292_v41  ;;  %v3921_v61 = vsub.f32 %v3813_v32, %v3867_v37  ;;  %v3002_v29 = vmul.f32 %v8411_v21, %v8411_v21  ;;  %v2198_v41 = vmul.f32 %v11573_v9, %v11573_v9 }
 0x3a5   :  { %1776 = vadd.xlane.f32.xlu2 %v1775_v35  ;;  %v11571_v35 = vld [vmem:[#allocation104_spill] sm:$0xff]  ;;  %v2199_v32 = vmul.f32 %v11574_v46, %v11574_v46 }
 0x3a6   :  { %3997 = vperm.xlu1 %6145, %v3755_v12   ;;  %v3294_v60 = vmul.f32 %v6166_v51, %v3293_v55  ;;  %v2948_v12 = vmul.f32 0.0012755102, %v11570_v43  ;;  %v2196_v19 = vmul.f32 %v11571_v35, %v11571_v35 }
 0x3a7   :  { %v8408_v18 = vpop.permute.xlu0 %4635 }
 0x3a8   :  { %v3298_v30 = vsel %vm3297_vm3, %v6166_v51, %v3294_v60  ;;  %v1760_v51 = vadd.f32 %v11572_v33, %v11571_v35  ;;  %v3056_v3 = vsub.f32 %v2948_v12, %v3002_v29  ;;  %v2204_v60 = vmul.f32 %v11558_v52, %v11558_v52  ;;  %v8443_v12 = vpop.permute.xlu2 %3992  ;;  %v11577_v52 = vld [vmem:[#allocation124_spill] sm:$0xff] }
 0x3a9   :  { %v8405_v24 = vmul.f32 %v3298_v30, %v3109_v4  ;;  %v2624_v37 = vadd.f32 %v2197_v31, %v2196_v19  ;;  %v11575_v4 = vld [vmem:[#allocation267_spill] sm:$0xff]  ;;  %v2205_v29 = vmul.f32 %v11563_v48, %v11563_v48  ;;  %v11576_v19 = vld [vmem:[#allocation268_spill] sm:$0xff]  ;;  %v2206_v48 = vmul.f32 %v11564_v38, %v11564_v38 }
 0x3aa   :  { %v2200_v43 = vmul.f32 %v11575_v4, %v11575_v4  ;;  %v1765_v31 = vsel %vm1539_vm2, %v11576_v19, 0.0 }
 0x3ab   :  { %v2625_v14 = vadd.f32 %v2624_v37, %v2198_v41  ;;  %v11579_v41 = vld [vmem:[#allocation269_spill] sm:$0xff] }
 0x3ad   :  { %v2626_v36 = vadd.f32 %v2625_v14, %v2199_v32  ;;  %v11582_v32 = vld [vmem:[#allocation20_spill] sm:$0xff] }
 0x3ae   :  { %4645 = vperm.xlu1 %6145, %v3917_v2   ;;  %v1761_v2 = vadd.f32 %v1760_v51, %v11573_v9 }
 0x3b0   :  { %v1762_v47 = vadd.f32 %v1761_v2, %v11574_v46 }
 0x3b2   :  { %v1763_v30 = vadd.f32 %v1762_v47, %v11575_v4  ;;  %v2231_v47 = vmul.f32 %v11577_v52, %v11577_v52 }
 0x3b4   :  { %v1764_v37 = vadd.f32 %v1763_v30, %v11579_v41  ;;  %v2627_v30 = vadd.f32 %v2626_v36, %v2200_v43 }
 0x3b5   :  { %4017 = vperm.xlu0 %6144, %v3759_v63   ;;  %v2203_v63 = vmul.f32 %v11557_v16, %v11557_v16 }
 0x3b6   :  { %v1766_v28 = vadd.f32 %v1765_v31, %v1764_v37  ;;  %v2202_v31 = vmul.f32 %v11576_v19, %v11576_v19  ;;  %v11588_v37 = vld [vmem:[#allocation182_spill] sm:$0xff] }
 0x3b7   :  { %v2633_v51 = vadd.f32 %v2204_v60, %v2203_v63  ;;  %v1805_v63 = vadd.f32 %v11580_v11, %v11577_v52  ;;  %v2232_v60 = vmul.f32 %v11580_v11, %v11580_v11  ;;  %v11585_v11 = vld [vmem:[#allocation167_spill] sm:$0xff] }
 0x3b9   :  { %v2669_v44 = vadd.f32 %v2232_v60, %v2231_v47  ;;  %v2209_v60 = vmul.f32 %v11566_v5, %v11566_v5  ;;  %v11601_v5 = vld [vmem:[#allocation186_spill] sm:$0xff] }
 0x3bd   :  { %4665 = vperm.xlu0 %6144, %v3921_v61   ;;  %4007 = vperm.xlu2 %6146, %v8405_v24   ;;  %v8430_v55 = vpop.xlane.xlu1 %1740  ;;  %v8439_v61 = vadd.f32 1e-05, %v3056_v3  ;;  %v11578_v3 = vld [vmem:[#allocation271_spill] sm:$0xff] }
 0x3be   :  { %v8416_v57 = vpop.xlane.xlu0 %1758  ;;  %v8454_v16 = vmul.f32 0.0012755102, %v11578_v3  ;;  %v2201_v3 = vmul.f32 %v11579_v41, %v11579_v41  ;;  %v11590_v41 = vld [vmem:[#allocation127_spill] sm:$0xff] }
 0x3bf   :  { %6167 = vrsqrt.f32 %v8439_v61  ;;  %v2233_v19 = vmul.f32 %v11590_v41, %v11590_v41  ;;  %vm3305_vm4 = vweird.f32 %v8439_v61 }
 0x3c0   :  { %v3006_v38 = vmul.f32 %v8454_v16, %v8454_v16 }
 0x3c6   :  { %v8447_v2 = vpop.xlane.xlu0 %2622 }
 0x3d5   :  { %v3988_v17 = vpop.permute.xlu1 %3987 }
 0x3d6   :  { %v4263_v14 = vmul.f32 %v3988_v17, %v11582_v32  ;;  %v4264_v52 = vmul.f32 %v3988_v17, %v11583_v6  ;;  %v4265_v7 = vmul.f32 %v3988_v17, %v11584_v10  ;;  %v4266_v49 = vmul.f32 %v3988_v17, %v11585_v11 }
 0x3d7   :  { %v4267_v13 = vmul.f32 %v3988_v17, %v11586_v58  ;;  %v4268_v53 = vmul.f32 %v3988_v17, %v11587_v23  ;;  %v4269_v36 = vmul.f32 %v3988_v17, %v11588_v37  ;;  %v3060_v11 = vsub.f32 %v2952_v22, %v3006_v38  ;;  %v8482_v1 = vpop.xlane.xlu2 %2613  ;;  %v8484_v58 = vpop.eup %6167 }
 0x3d8   :  { %v4911_v43 = vadd.f32 %v8408_v18, %v4263_v14  ;;  %v4912_v6 = vadd.f32 %v8408_v18, %v4264_v52  ;;  %v4913_v10 = vadd.f32 %v8408_v18, %v4265_v7  ;;  %1767 = vadd.xlane.f32.xlu1 %v1766_v28  ;;  %v4914_v32 = vadd.f32 %v8408_v18, %v4266_v49  ;;  %v8488_v17 = vpop.f32.mrf.mxu3 }
 0x3d9   :  { %11589 = vst [vmem:[#allocation173_spill] sm:$0xff] %v8482_v1  ;;  %v2634_v23 = vadd.f32 %v2633_v51, %v2205_v29  ;;  %v4915_v14 = vadd.f32 %v8408_v18, %v4267_v13  ;;  %v8491_v52 = vpop.permute.xlu0 %4002  ;;  %v1806_v22 = vadd.f32 %v1805_v63, %v11590_v41  ;;  %v2207_v49 = vmul.f32 %v11565_v56, %v11565_v56  ;;  %v8498_v51 = vpop.f32.mrf.mxu0 }
 0x3da   :  { %11591 = vst [vmem:[#allocation175_spill] sm:$0xff] %v8488_v17  ;;  %v4916_v28 = vadd.f32 %v8408_v18, %v4268_v53  ;;  %v2629_v7 = vsel %vm1539_vm2, %v2202_v31, 0.0  ;;  %v4917_v29 = vadd.f32 %v8408_v18, %v4269_v36  ;;  %v2628_v13 = vadd.f32 %v2627_v30, %v2201_v3  ;;  %v8513_v36 = vpop.f32.mrf.mxu2 }
 0x3db   :  { %5289 = vst [vmem:[#allocation5 + $0xe0] sm:$0xff] %v4911_v43  ;;  %v2635_v38 = vadd.f32 %v2634_v23, %v2206_v48  ;;  %v1807_v47 = vadd.f32 %v1806_v22, %v8488_v17  ;;  %v3300_v63 = vmul.f32 %v8484_v58, %v8439_v61  ;;  %v8506_v37 = vadd.f32 1e-05, %v3060_v11  ;;  %v11594_v43 = vld [vmem:[#allocation24_spill] sm:$0xff]  ;;  %v8524_v23 = vpop.f32.mrf.mxu1 }
 0x3dc   :  { %5290 = vst [vmem:[#allocation5 + $0xe8] sm:$0xff] %v4912_v6  ;;  %v2670_v53 = vadd.f32 %v2669_v44, %v2233_v19  ;;  %v2630_v48 = vadd.f32 %v2629_v7, %v2628_v13  ;;  %v2234_v31 = vmul.f32 %v8488_v17, %v8488_v17  ;;  %v2208_v18 = vmul.f32 %v11567_v45, %v11567_v45  ;;  %v11596_v19 = vld [vmem:[#allocation27_spill] sm:$0xff]  ;;  %v11603_v17 = vld [vmem:[#allocation33_spill] sm:$0xff] }
 0x3dd   :  { %11592 = vst [vmem:[#allocation13_spill] sm:$0xff] %v8498_v51  ;;  %v1808_v3 = vadd.f32 %v1807_v47, %v8498_v51  ;;  %v2636_v30 = vadd.f32 %v2635_v38, %v2207_v49  ;;  %v4270_v6 = vmul.f32 %v8443_v12, %v11594_v43  ;;  %v4272_v11 = vmul.f32 %v8443_v12, %v11596_v19  ;;  %v11599_v7 = vld [vmem:[#allocation183_spill] sm:$0xff] }
 0x3de   :  { %5291 = vst [vmem:[#allocation5 + $0xf0] sm:$0xff] %v4913_v10  ;;  %v11595_v10 = vld [vmem:[#allocation25_spill] sm:$0xff]  ;;  %6169 = vrsqrt.f32 %v8506_v37  ;;  %v4274_v38 = vmul.f32 %v8443_v12, %v11599_v7  ;;  %v1810_v19 = vsel %vm1539_vm2, %v8513_v36, 0.0  ;;  %vm3306_vm1 = vweird.f32 %v8484_v58 }
 0x3df   :  { %5292 = vst [vmem:[#allocation5 + $0xf8] sm:$0xff] %v4914_v32  ;;  %v4271_v44 = vmul.f32 %v8443_v12, %v11595_v10  ;;  %v3301_v32 = vmul.f32 %v8484_v58, %v3300_v63  ;;  %v4641_v49 = vpop.permute.xlu2 %4640  ;;  %v2637_v10 = vadd.f32 %v2636_v30, %v2208_v18  ;;  %vm3307_vm5 = vmor %vm3305_vm4, %vm3306_vm1  ;;  %vm3345_vm7 = vweird.f32 %v8506_v37 }
 0x3e0   :  { %5293 = vst [vmem:[#allocation5 + $0x100] sm:$0xff] %v4915_v14  ;;  %2631 = vadd.xlane.f32.xlu1 %v2630_v48  ;;  %v11598_v14 = vld [vmem:[#allocation170_spill] sm:$0xff]  ;;  %v4918_v13 = vadd.f32 %v4641_v49, %v4270_v6  ;;  %v4920_v43 = vadd.f32 %v4641_v49, %v4272_v11  ;;  %v4922_v45 = vadd.f32 %v4641_v49, %v4274_v38 }
 0x3e1   :  { %5294 = vst [vmem:[#allocation5 + $0x108] sm:$0xff] %v4916_v28  ;;  %v4273_v22 = vmul.f32 %v8443_v12, %v11598_v14  ;;  %v2638_v28 = vsel %vm1539_vm2, %v2209_v60, 0.0  ;;  %v4919_v47 = vadd.f32 %v4641_v49, %v4271_v44  ;;  %v2235_v14 = vmul.f32 %v8498_v51, %v8498_v51  ;;  %v4651_v7 = vpop.permute.xlu0 %4650 }
 0x3e2   :  { %11593 = vst [vmem:[#allocation14_spill] sm:$0xff] %v8513_v36  ;;  %v4276_v60 = vmul.f32 %v8443_v12, %v11601_v5  ;;  %v1809_v6 = vadd.f32 %v1808_v3, %v8524_v23  ;;  %v2671_v44 = vadd.f32 %v2670_v53, %v2234_v31  ;;  %v2639_v30 = vadd.f32 %v2638_v28, %v2637_v10  ;;  %v11604_v31 = vld [vmem:[#allocation35_spill] sm:$0xff] }
 0x3e3   :  { %5295 = vst.msk [vmem:[#allocation5 + $0x110] sm:$0xff] %vm1539_vm2, %v4917_v29  ;;  %v11600_v29 = vld [vmem:[#allocation184_spill] sm:$0xff]  ;;  %v4921_v63 = vadd.f32 %v4641_v49, %v4273_v22  ;;  %v3302_v22 = vmul.f32 0.5, %v3301_v32  ;;  %v4285_v51 = vmul.f32 %v8491_v52, %v11603_v17  ;;  %v2237_v53 = vmul.f32 %v8513_v36, %v8513_v36  ;;  %v11605_v32 = vld [vmem:[#allocation178_spill] sm:$0xff]  ;;  %v11631_v36 = vld [vmem:[#allocation187_spill] sm:$0xff] }
 0x3e4   :  { %11597 = vst [vmem:[#allocation16_spill] sm:$0xff] %v8524_v23  ;;  %v4275_v48 = vmul.f32 %v8443_v12, %v11600_v29  ;;  %v11602_v29 = vld [vmem:[#allocation32_spill] sm:$0xff]  ;;  %v4924_v56 = vadd.f32 %v4641_v49, %v4276_v60  ;;  %v1811_v41 = vadd.f32 %v1810_v19, %v1809_v6  ;;  %v6170_v5 = vpop.eup %6169  ;;  %v2236_v12 = vmul.f32 %v8524_v23, %v8524_v23  ;;  %v11608_v19 = vld [vmem:[#allocation193_spill] sm:$0xff] }
 0x3e5   :  { %5296 = vst [vmem:[#allocation5 + $0x118] sm:$0xff] %v4918_v13  ;;  %v4284_v18 = vmul.f32 %v8491_v52, %v11602_v29  ;;  %v4286_v3 = vmul.f32 %v8491_v52, %v11604_v31  ;;  %v4933_v28 = vadd.f32 %v4651_v7, %v4285_v51  ;;  %v2672_v17 = vadd.f32 %v2671_v44, %v2235_v14  ;;  %v11606_v13 = vld [vmem:[#allocation191_spill] sm:$0xff] }
 0x3e6   :  { %v4923_v11 = vadd.f32 %v4641_v49, %v4275_v48  ;;  %5297 = vst [vmem:[#allocation5 + $0x120] sm:$0xff] %v4919_v47  ;;  %v4287_v49 = vmul.f32 %v8491_v52, %v11605_v32  ;;  %2640 = vadd.xlane.f32.xlu2 %v2639_v30  ;;  %v4288_v47 = vmul.f32 %v8491_v52, %v11606_v13  ;;  %v11607_v48 = vld [vmem:[#allocation192_spill] sm:$0xff]  ;;  %v3303_v44 = vsub.f32 1.5, %v3302_v22  ;;  %v3811_v31 = vld [vmem:[%s10716_s3 + $0x40] sm:$0xff] }
 0x3e7   :  { %5298 = vst [vmem:[#allocation5 + $0x128] sm:$0xff] %v4920_v43  ;;  %v4932_v38 = vadd.f32 %v4651_v7, %v4284_v18  ;;  %1812 = vadd.xlane.f32.xlu0 %v1811_v41  ;;  %v4934_v43 = vadd.f32 %v4651_v7, %v4286_v3  ;;  %v4290_v60 = vmul.f32 %v8491_v52, %v11608_v19  ;;  %v2674_v41 = vsel %vm1539_vm2, %v2237_v53, 0.0  ;;  %v8600_v19 = vpop.f32.mrf.mxu3 }
 0x3e8   :  { %5299 = vst [vmem:[#allocation5 + $0x130] sm:$0xff] %v4921_v63  ;;  %v4289_v63 = vmul.f32 %v8491_v52, %v11607_v48  ;;  %v4935_v10 = vadd.f32 %v4651_v7, %v4287_v49  ;;  %v4936_v51 = vadd.f32 %v4651_v7, %v4288_v47  ;;  %v2673_v6 = vadd.f32 %v2672_v17, %v2236_v12 }
 0x3e9   :  { %5300 = vst [vmem:[#allocation5 + $0x138] sm:$0xff] %v4922_v45  ;;  %v3340_v45 = vmul.f32 %v6170_v5, %v8506_v37  ;;  %v3304_v18 = vmul.f32 %v8484_v58, %v3303_v44  ;;  %v3865_v53 = vmul.f32 %v8405_v24, %v8337_v62  ;;  %vm3346_vm6 = vweird.f32 %v6170_v5  ;;  %v3114_v62 = vld [vmem:[%s10715_s2 + $0x68] sm:$0xff] }
 0x3ea   :  { %5301 = vst [vmem:[#allocation5 + $0x140] sm:$0xff] %v4923_v11  ;;  %v4937_v14 = vadd.f32 %v4651_v7, %v4289_v63  ;;  %v4938_v11 = vadd.f32 %v4651_v7, %v4290_v60  ;;  %v3110_v7 = vld [vmem:[%s10715_s2 + $0x48] sm:$0xff]  ;;  %vm3347_vm8 = vmor %vm3345_vm7, %vm3346_vm6  ;;  %v8587_v13 = vmul.f32 0.0012755102, %v8095_v39 }
 0x3eb   :  { %5302 = vst.msk [vmem:[#allocation5 + $0x148] sm:$0xff] %vm1539_vm2, %v4924_v56  ;;  %v2675_v56 = vadd.f32 %v2674_v41, %v2673_v6  ;;  %v3341_v29 = vmul.f32 %v6170_v5, %v3340_v45  ;;  %v3308_v30 = vsel %vm3307_vm5, %v8484_v58, %v3304_v18  ;;  %v3919_v58 = vsub.f32 %v3811_v31, %v3865_v53  ;;  %v8610_v18 = vpop.f32.mrf.mxu2  ;;  %v8618_v53 = vpop.f32.mrf.mxu1 }
 0x3ec   :  { %5310 = vst [vmem:[#allocation5 + $0x188] sm:$0xff] %v4932_v38  ;;  %v3758_v22 = vmul.f32 %v3308_v30, %v3110_v7  ;;  %v3812_v38 = vld [vmem:[%s10716_s3 + $0x48] sm:$0xff]  ;;  %v3004_v48 = vmul.f32 %v8587_v13, %v8587_v13  ;;  %v11616_v7 = vld [vmem:[#allocation121_spill] sm:$0xff] }
 0x3ed   :  { %5311 = vst [vmem:[#allocation5 + $0x190] sm:$0xff] %v4933_v28  ;;  %v3342_v52 = vmul.f32 0.5, %v3341_v29  ;;  %v3816_v28 = vld [vmem:[%s10716_s3 + $0x68] sm:$0xff] }
 0x3ee   :  { %5312 = vst [vmem:[#allocation5 + $0x198] sm:$0xff] %v4934_v43  ;;  %v3866_v61 = vmul.f32 %v3758_v22, %v8411_v21 }
 0x3ef   :  { %5313 = vst [vmem:[#allocation5 + $0x1a0] sm:$0xff] %v4935_v10  ;;  %2676 = vadd.xlane.f32.xlu0 %v2675_v56  ;;  %v3343_v12 = vsub.f32 1.5, %v3342_v52  ;;  %v11610_v10 = vld [vmem:[#allocation117_spill] sm:$0xff]  ;;  %v11613_v56 = vld [vmem:[#allocation119_spill] sm:$0xff]  ;;  %v11615_v52 = vld [vmem:[#allocation120_spill] sm:$0xff] }
 0x3f0   :  { %5314 = vst [vmem:[#allocation5 + $0x1a8] sm:$0xff] %v4936_v51  ;;  %v3920_v32 = vsub.f32 %v3812_v38, %v3866_v61  ;;  %v2218_v45 = vmul.f32 %v11610_v10, %v11610_v10  ;;  %v2219_v29 = vmul.f32 %v11613_v56, %v11613_v56  ;;  %v1796_v30 = vadd.f32 %v11616_v7, %v11615_v52  ;;  %v11618_v61 = vld [vmem:[#allocation123_spill] sm:$0xff]  ;;  %v11619_v38 = vld [vmem:[#allocation266_spill] sm:$0xff] }
 0x3f1   :  { %5315 = vst [vmem:[#allocation5 + $0x1b0] sm:$0xff] %v4937_v14  ;;  %v3344_v3 = vmul.f32 %v6170_v5, %v3343_v12 }
 0x3f2   :  { %5316 = vst.msk [vmem:[#allocation5 + $0x1b8] sm:$0xff] %vm1539_vm2, %v4938_v11 }
 0x3f3   :  { %v3348_v24 = vsel %vm3347_vm8, %v6170_v5, %v3344_v3  ;;  %v2950_v5 = vmul.f32 0.0012755102, %v8118_v54  ;;  %11611 = vst [vmem:[#allocation157_spill] sm:$0xff] %v8600_v19  ;;  %v8604_v54 = vpop.f32.mrf.mxu0  ;;  %v1797_v3 = vadd.f32 %v1796_v30, %v11618_v61  ;;  %v8669_v35 = vpop.f32.mrf.mxu1 }
 0x3f4   :  { %v3762_v49 = vmul.f32 %v3348_v24, %v3114_v62  ;;  %11612 = vst [vmem:[#allocation176_spill] sm:$0xff] %v8604_v54  ;;  %v11620_v62 = vld [vmem:[#allocation136_spill] sm:$0xff] }
 0x3f5   :  { %v3058_v39 = vsub.f32 %v2950_v5, %v3004_v48  ;;  %11614 = vst [vmem:[#allocation177_spill] sm:$0xff] %v8610_v18  ;;  %v8628_v24 = vmul.f32 %v11620_v62, %v11620_v62 }
 0x3f6   :  { %v3870_v21 = vmul.f32 %v3762_v49, %v8454_v16  ;;  %v11609_v16 = vld [vmem:[#allocation116_spill] sm:$0xff]  ;;  %11617 = vst [vmem:[#allocation17_spill] sm:$0xff] %v8618_v53 }
 0x3f7   :  { %v2217_v63 = vmul.f32 %v11609_v16, %v11609_v16  ;;  %v1787_v14 = vadd.f32 %v11610_v10, %v11609_v16  ;;  %v11633_v16 = vld [vmem:[#allocation188_spill] sm:$0xff]  ;;  %11638 = vst [vmem:[#allocation271_spill] sm:$0xff] %v8669_v35 }
 0x3f8   :  { %v3924_v17 = vsub.f32 %v3816_v28, %v3870_v21  ;;  %v11622_v28 = vld [vmem:[#allocation263_spill] sm:$0xff] }
 0x3f9   :  { %4012 = vperm.xlu1 %6145, %v3758_v22   ;;  %v2651_v11 = vadd.f32 %v2218_v45, %v2217_v63  ;;  %v8614_v22 = vadd.f32 1e-05, %v3058_v39  ;;  %v1788_v31 = vadd.f32 %v1787_v14, %v11613_v56  ;;  %v8636_v63 = vpop.f32.mrf.mxu3  ;;  %v11625_v45 = vld [vmem:[#allocation28_spill] sm:$0xff]  ;;  %v11626_v39 = vld [vmem:[#allocation29_spill] sm:$0xff] }
 0x3fa   :  { %11624 = vst [vmem:[#allocation18_spill] sm:$0xff] %v8636_v63  ;;  %v11632_v56 = vld [vmem:[#allocation281_spill] sm:$0xff] }
 0x3fb   :  { %v8652_v10 = vmul.f32 0.0012755102, %v11632_v56  ;;  %v2221_v56 = vmul.f32 %v8097_v40, %v8097_v40  ;;  %vm3325_vm13 = vweird.f32 %v8614_v22 }
 0x3fe   :  { %4655 = vperm.xlu2 %6146, %v3919_v58   ;;  %v8623_v58 = vmul.f32 0.0012755102, %v11619_v38 }
 0x400   :  { %v8589_v47 = vpop.xlane.xlu1 %2604 }
 0x401   :  { %4660 = vperm.xlu1 %6145, %v3920_v32   ;;  %v2652_v32 = vadd.f32 %v2651_v11, %v2219_v29  ;;  %v11628_v29 = vld [vmem:[#allocation174_spill] sm:$0xff]  ;;  %v8690_v25 = vpop.f32.mrf.mxu3 }
 0x402   :  { %11643 = vst [vmem:[#allocation276_spill] sm:$0xff] %v8690_v25 }
 0x403   :  { %4032 = vperm.xlu0 %6144, %v3762_v49   ;;  %v11621_v49 = vld [vmem:[#allocation258_spill] sm:$0xff] }
 0x404   :  { %v1789_v21 = vadd.f32 %v1788_v31, %v11621_v49  ;;  %v2220_v48 = vmul.f32 %v11621_v49, %v11621_v49 }
 0x406   :  { %v1790_v11 = vadd.f32 %v1789_v21, %v8097_v40  ;;  %v2653_v33 = vadd.f32 %v2652_v32, %v2220_v48  ;;  %v3009_v40 = vmul.f32 %v8652_v10, %v8652_v10 }
 0x40b   :  { %4680 = vperm.xlu0 %6144, %v3924_v17   ;;  %v1798_v17 = vadd.f32 %v1797_v3, %v11622_v28  ;;  %v11629_v3 = vld [vmem:[#allocation287_spill] sm:$0xff] }
 0x40c   :  { %v1786_v37 = vpop.xlane.xlu0 %1785 }
 0x40d   :  { %v8592_v43 = vmul.f32 0.0012755102, %v1786_v37  ;;  %v11623_v37 = vld [vmem:[#allocation270_spill] sm:$0xff]  ;;  %v1799_v38 = vadd.f32 %v1798_v17, %v11629_v3  ;;  %v8657_v17 = vpop.f32.mrf.mxu2 }
 0x40e   :  { %v2951_v5 = vmul.f32 0.0012755102, %v11623_v37  ;;  %v8646_v37 = vpop.f32.mrf.mxu0  ;;  %11635 = vst [vmem:[#allocation261_spill] sm:$0xff] %v8657_v17 }
 0x40f   :  { %v3020_v51 = vmul.f32 %v8592_v43, %v8592_v43  ;;  %11630 = vst [vmem:[#allocation256_spill] sm:$0xff] %v8646_v37 }
 0x414   :  { %v2650_v60 = vpop.xlane.xlu0 %2649 }
 0x415   :  { %v2966_v41 = vmul.f32 0.0012755102, %v2650_v60 }
 0x417   :  { %v3074_v6 = vsub.f32 %v2966_v41, %v3020_v51  ;;  %v11627_v41 = vld [vmem:[#allocation31_spill] sm:$0xff] }
 0x418   :  { %v3998_v44 = vpop.permute.xlu1 %3997 }
 0x419   :  { %v8616_v12 = vadd.f32 1e-05, %v3074_v6  ;;  %v4277_v60 = vmul.f32 %v3998_v44, %v11625_v45  ;;  %v4278_v51 = vmul.f32 %v3998_v44, %v11626_v39  ;;  %v4279_v14 = vmul.f32 %v3998_v44, %v11627_v41 }
 0x41a   :  { %v3005_v6 = vmul.f32 %v8623_v58, %v8623_v58  ;;  %v4280_v30 = vmul.f32 %v3998_v44, %v11628_v29  ;;  %v4281_v23 = vmul.f32 %v3998_v44, %v11631_v36  ;;  %v4282_v21 = vmul.f32 %v3998_v44, %v11633_v16  ;;  %v11634_v29 = vld [vmem:[#allocation137_spill] sm:$0xff] }
 0x41b   :  { %6171 = vrsqrt.f32 %v8616_v12  ;;  %v2253_v46 = vmul.f32 %v11634_v29, %v11634_v29  ;;  %vm3485_vm10 = vweird.f32 %v8616_v12 }
 0x41c   :  { %6173 = vrsqrt.f32 %v8614_v22  ;;  %v3059_v41 = vsub.f32 %v2951_v5, %v3005_v6  ;;  %v11637_v5 = vld [vmem:[#allocation286_spill] sm:$0xff] }
 0x41d   :  { %v2955_v16 = vmul.f32 0.0012755102, %v11637_v5  ;;  %v11641_v5 = vld [vmem:[#allocation283_spill] sm:$0xff] }
 0x41e   :  { %v1792_v27 = vsel %vm1539_vm2, %v11641_v5, 0.0  ;;  %v2223_v48 = vmul.f32 %v11641_v5, %v11641_v5 }
 0x420   :  { %v4646_v31 = vpop.permute.xlu1 %4645 }
 0x421   :  { %v4925_v1 = vadd.f32 %v4646_v31, %v4277_v60  ;;  %v4926_v45 = vadd.f32 %v4646_v31, %v4278_v51  ;;  %v4927_v49 = vadd.f32 %v4646_v31, %v4279_v14  ;;  %v8649_v39 = vpop.eup %6171  ;;  %v4928_v4 = vadd.f32 %v4646_v31, %v4280_v30  ;;  %v11636_v60 = vld [vmem:[#allocation190_spill] sm:$0xff] }
 0x422   :  { %v3480_v36 = vmul.f32 %v8649_v39, %v8616_v12  ;;  %v4283_v51 = vmul.f32 %v3998_v44, %v11636_v60  ;;  %v4929_v14 = vadd.f32 %v4646_v31, %v4281_v23  ;;  %v8662_v9 = vpop.eup %6173  ;;  %v4930_v6 = vadd.f32 %v4646_v31, %v4282_v21  ;;  %v11640_v21 = vld [vmem:[#allocation285_spill] sm:$0xff] }
 0x423   :  { %5303 = vst [vmem:[#allocation5 + $0x150] sm:$0xff] %v4925_v1  ;;  %v1801_v30 = vsel %vm1539_vm2, %v8128_v0, 0.0  ;;  %v11639_v1 = vld [vmem:[#allocation9_spill] sm:$0xff]  ;;  %v8673_v60 = vadd.f32 1e-05, %v3059_v41  ;;  %v3320_v32 = vmul.f32 %v8662_v9, %v8614_v22  ;;  %v3063_v41 = vsub.f32 %v2955_v16, %v3009_v40 }
 0x424   :  { %5304 = vst [vmem:[#allocation5 + $0x158] sm:$0xff] %v4926_v45  ;;  %v3481_v42 = vmul.f32 %v8649_v39, %v3480_v36  ;;  %v4931_v44 = vadd.f32 %v4646_v31, %v4283_v51  ;;  %v1800_v23 = vadd.f32 %v1799_v38, %v11639_v1  ;;  %v1791_v45 = vadd.f32 %v1790_v11, %v11640_v21  ;;  %v11642_v51 = vld [vmem:[#allocation139_spill] sm:$0xff] }
 0x425   :  { %5305 = vst [vmem:[#allocation5 + $0x160] sm:$0xff] %v4927_v49  ;;  %v1832_v38 = vadd.f32 %v11634_v29, %v11620_v62  ;;  %v2654_v36 = vadd.f32 %v2653_v33, %v2221_v56  ;;  %v2254_v50 = vmul.f32 %v11642_v51, %v11642_v51  ;;  %vm3486_vm9 = vweird.f32 %v8649_v39  ;;  %v8698_v33 = vpop.f32.mrf.mxu0  ;;  %v11655_v62 = vld [vmem:[#allocation205_spill] sm:$0xff] }
 0x426   :  { %5306 = vst [vmem:[#allocation5 + $0x168] sm:$0xff] %v4928_v4  ;;  %v3482_v49 = vmul.f32 0.5, %v3481_v42  ;;  %v1802_v31 = vadd.f32 %v1801_v30, %v1800_v23  ;;  %v2222_v4 = vmul.f32 %v11640_v21, %v11640_v21  ;;  %v1793_v42 = vadd.f32 %v1792_v27, %v1791_v45  ;;  %v3128_v27 = vld [vmem:[%s10715_s2 + $0xd8] sm:$0xff]  ;;  %vm3487_vm11 = vmor %vm3485_vm10, %vm3486_vm9  ;;  %v8709_v23 = vpop.f32.mrf.mxu2 }
 0x427   :  { %5307 = vst [vmem:[#allocation5 + $0x170] sm:$0xff] %v4929_v14  ;;  %v4018_v11 = vpop.permute.xlu0 %4017  ;;  %v2696_v14 = vadd.f32 %v2253_v46, %v8628_v24  ;;  %v1833_v30 = vadd.f32 %v1832_v38, %v11642_v51  ;;  %6175 = vrsqrt.f32 %v8673_v60  ;;  %v3321_v40 = vmul.f32 %v8662_v9, %v3320_v32  ;;  %v11648_v38 = vld [vmem:[#allocation44_spill] sm:$0xff] }
 0x428   :  { %5308 = vst [vmem:[#allocation5 + $0x178] sm:$0xff] %v4930_v6  ;;  %v3483_v34 = vsub.f32 1.5, %v3482_v49  ;;  %1803 = vadd.xlane.f32.xlu2 %v1802_v31  ;;  %v2656_v56 = vsel %vm1539_vm2, %v2223_v48, 0.0  ;;  %v8707_v24 = vadd.f32 1e-05, %v3063_v41  ;;  %v2655_v6 = vadd.f32 %v2654_v36, %v2222_v4  ;;  %v8717_v31 = vpop.f32.mrf.mxu1  ;;  %v11649_v4 = vld [vmem:[#allocation45_spill] sm:$0xff] }
 0x429   :  { %5309 = vst.msk [vmem:[#allocation5 + $0x180] sm:$0xff] %vm1539_vm2, %v4931_v44  ;;  %v1834_v46 = vadd.f32 %v1833_v30, %v8690_v25  ;;  %v2697_v44 = vadd.f32 %v2696_v14, %v2254_v50  ;;  %v2255_v45 = vmul.f32 %v8690_v25, %v8690_v25  ;;  %v4305_v41 = vmul.f32 %v4018_v11, %v11648_v38  ;;  %v11650_v50 = vld [vmem:[#allocation47_spill] sm:$0xff] }
 0x42a   :  { %11644 = vst [vmem:[#allocation20_spill] sm:$0xff] %v8698_v33  ;;  %v3484_v16 = vmul.f32 %v8649_v39, %v3483_v34  ;;  %v2657_v48 = vadd.f32 %v2656_v56, %v2655_v6  ;;  %v3322_v34 = vmul.f32 0.5, %v3321_v40  ;;  %v4306_v36 = vmul.f32 %v4018_v11, %v11649_v4 }
 0x42b   :  { %1794 = vadd.xlane.f32.xlu1 %v1793_v42  ;;  %11645 = vst [vmem:[#allocation21_spill] sm:$0xff] %v8709_v23  ;;  %v1835_v32 = vadd.f32 %v1834_v46, %v8698_v33  ;;  %v4307_v42 = vmul.f32 %v4018_v11, %v11650_v50  ;;  %6177 = vrsqrt.f32 %v8707_v24  ;;  %v1837_v56 = vsel %vm1539_vm2, %v8709_v23, 0.0  ;;  %v11654_v50 = vld [vmem:[#allocation203_spill] sm:$0xff] }
 0x42c   :  { %v3488_v12 = vsel %vm3487_vm11, %v8649_v39, %v3484_v16  ;;  %11647 = vst [vmem:[#allocation167_spill] sm:$0xff] %v8717_v31  ;;  %v11651_v39 = vld [vmem:[#allocation189_spill] sm:$0xff]  ;;  %v2256_v4 = vmul.f32 %v8698_v33, %v8698_v33  ;;  %v4310_v25 = vmul.f32 %v4018_v11, %v11654_v50  ;;  %v4311_v5 = vmul.f32 %v4018_v11, %v11655_v62 }
 0x42d   :  { %v8715_v49 = vmul.f32 %v3488_v12, %v3128_v27  ;;  %v8722_v14 = vpop.eup %6175  ;;  %v4308_v30 = vmul.f32 %v4018_v11, %v11651_v39  ;;  %v11653_v27 = vld [vmem:[#allocation202_spill] sm:$0xff]  ;;  %v1836_v39 = vadd.f32 %v1835_v32, %v8717_v31  ;;  %v2258_v33 = vmul.f32 %v8709_v23, %v8709_v23 }
 0x42e   :  { %v4309_v46 = vmul.f32 %v4018_v11, %v11653_v27  ;;  %v3330_v29 = vmul.f32 %v8722_v14, %v8673_v60  ;;  %v2698_v27 = vadd.f32 %v2697_v44, %v2255_v45  ;;  %v2257_v32 = vmul.f32 %v8717_v31, %v8717_v31 }
 0x42f   :  { %11646 = vst [vmem:[#allocation23_spill] sm:$0xff] %v8715_v49  ;;  %v4666_v16 = vpop.permute.xlu0 %4665  ;;  %v8730_v40 = vmul.f32 %v8715_v49, %v8592_v43  ;;  %vm3326_vm12 = vweird.f32 %v8662_v9  ;;  %vm3336_vm15 = vweird.f32 %v8722_v14  ;;  %vm3335_vm0 = vweird.f32 %v8673_v60  ;;  %v3117_v60 = vld [vmem:[%s10715_s2 + $0x80] sm:$0xff] }
 0x430   :  { %v4953_v6 = vadd.f32 %v4666_v16, %v4305_v41  ;;  %v4954_v12 = vadd.f32 %v4666_v16, %v4306_v36  ;;  %v4955_v38 = vadd.f32 %v4666_v16, %v4307_v42  ;;  %v4956_v51 = vadd.f32 %v4666_v16, %v4308_v30  ;;  %vm3327_vm14 = vmor %vm3325_vm13, %vm3326_vm12 }
 0x431   :  { %11652 = vst [vmem:[#allocation179_spill] sm:$0xff] %v8730_v40  ;;  %v4957_v43 = vadd.f32 %v4666_v16, %v4309_v46  ;;  %v4958_v41 = vadd.f32 %v4666_v16, %v4310_v25  ;;  %v1838_v36 = vadd.f32 %v1837_v56, %v1836_v39  ;;  %v3323_v42 = vsub.f32 1.5, %v3322_v34  ;;  %v6178_v30 = vpop.eup %6177  ;;  %vm3337_vm3 = vmor %vm3335_vm0, %vm3336_vm15 }
 0x432   :  { %5331 = vst [vmem:[#allocation5 + $0x230] sm:$0xff] %v4953_v6  ;;  %v4959_v50 = vadd.f32 %v4666_v16, %v4311_v5  ;;  %v2699_v62 = vadd.f32 %v2698_v27, %v2256_v4  ;;  %v3331_v11 = vmul.f32 %v8722_v14, %v3330_v29  ;;  %v3370_v44 = vmul.f32 %v6178_v30, %v8707_v24  ;;  %v3112_v29 = vld [vmem:[%s10715_s2 + $0x58] sm:$0xff] }
 0x433   :  { %2658 = vadd.xlane.f32.xlu1 %v2657_v48  ;;  %5332 = vst [vmem:[#allocation5 + $0x238] sm:$0xff] %v4954_v12  ;;  %v3324_v25 = vmul.f32 %v8662_v9, %v3323_v42  ;;  %v2701_v5 = vsel %vm1539_vm2, %v2258_v33, 0.0  ;;  %vm3376_vm1 = vweird.f32 %v6178_v30  ;;  %vm3375_vm4 = vweird.f32 %v8707_v24 }
 0x434   :  { %5333 = vst [vmem:[#allocation5 + $0x240] sm:$0xff] %v4955_v38  ;;  %v2700_v45 = vadd.f32 %v2699_v62, %v2257_v32  ;;  %v3371_v16 = vmul.f32 %v6178_v30, %v3370_v44  ;;  %v8765_v38 = vpop.xlane.xlu2 %1776  ;;  %vm3377_vm5 = vmor %vm3375_vm4, %vm3376_vm1 }
 0x435   :  { %5334 = vst [vmem:[#allocation5 + $0x248] sm:$0xff] %v4956_v51  ;;  %1839 = vadd.xlane.f32.xlu0 %v1838_v36  ;;  %v3332_v51 = vmul.f32 0.5, %v3331_v11  ;;  %v3328_v34 = vsel %vm3327_vm14, %v8662_v9, %v3324_v25  ;;  %v3113_v9 = vld [vmem:[%s10715_s2 + $0x60] sm:$0xff]  ;;  %v2226_v11 = vmul.f32 %v11618_v61, %v11618_v61 }
 0x436   :  { %5335 = vst [vmem:[#allocation5 + $0x250] sm:$0xff] %v4957_v43  ;;  %v2702_v48 = vadd.f32 %v2701_v5, %v2700_v45  ;;  %v8755_v56 = vmul.f32 %v3328_v34, %v3112_v29  ;;  %v3372_v6 = vmul.f32 0.5, %v3371_v16  ;;  %v8793_v29 = vpop.f32.mrf.mxu3  ;;  %v2229_v34 = vmul.f32 %v11639_v1, %v11639_v1 }
 0x437   :  { %5336 = vst [vmem:[#allocation5 + $0x258] sm:$0xff] %v4958_v41  ;;  %v3333_v46 = vsub.f32 1.5, %v3332_v51  ;;  %v2228_v51 = vmul.f32 %v11629_v3, %v11629_v3  ;;  %v2230_v16 = vmul.f32 %v8128_v0, %v8128_v0 }
 0x438   :  { %5337 = vst.msk [vmem:[#allocation5 + $0x260] sm:$0xff] %vm1539_vm2, %v4959_v50  ;;  %v3373_v22 = vsub.f32 1.5, %v3372_v6  ;;  %v3819_v50 = vld [vmem:[%s10716_s3 + $0x80] sm:$0xff] }
 0x439   :  { %v3334_v33 = vmul.f32 %v8722_v14, %v3333_v46  ;;  %11656 = vst [vmem:[#allocation180_spill] sm:$0xff] %v8765_v38 }
 0x43a   :  { %v3374_v4 = vmul.f32 %v6178_v30, %v3373_v22  ;;  %11658 = vst [vmem:[#allocation24_spill] sm:$0xff] %v8793_v29  ;;  %v11659_v22 = vld [vmem:[#allocation36_spill] sm:$0xff] }
 0x43b   :  { %v3338_v12 = vsel %vm3337_vm3, %v8722_v14, %v3334_v33  ;;  %v3815_v14 = vld [vmem:[%s10716_s3 + $0x60] sm:$0xff] }
 0x43c   :  { %v3761_v39 = vmul.f32 %v3338_v12, %v3113_v9  ;;  %v3378_v43 = vsel %vm3377_vm5, %v6178_v30, %v3374_v4  ;;  %v4008_v42 = vpop.permute.xlu2 %4007  ;;  %v2224_v30 = vmul.f32 %v11615_v52, %v11615_v52  ;;  %v11660_v12 = vld [vmem:[#allocation37_spill] sm:$0xff] }
 0x43d   :  { %2703 = vadd.xlane.f32.xlu0 %v2702_v48  ;;  %v3765_v41 = vmul.f32 %v3378_v43, %v3117_v60  ;;  %v4291_v9 = vmul.f32 %v4008_v42, %v11659_v22  ;;  %v4292_v4 = vmul.f32 %v4008_v42, %v11660_v12  ;;  %v11662_v43 = vld [vmem:[#allocation181_spill] sm:$0xff] }
 0x43e   :  { %v3869_v27 = vmul.f32 %v3761_v39, %v8623_v58  ;;  %v2225_v58 = vmul.f32 %v11616_v7, %v11616_v7 }
 0x43f   :  { %v3873_v24 = vmul.f32 %v3765_v41, %v8652_v10  ;;  %v2227_v10 = vmul.f32 %v11622_v28, %v11622_v28 }
 0x440   :  { %4022 = vperm.xlu2 %6146, %v8755_v56   ;;  %v3923_v36 = vsub.f32 %v3815_v14, %v3869_v27  ;;  %v2660_v25 = vadd.f32 %v2225_v58, %v2224_v30  ;;  %v4294_v27 = vmul.f32 %v4008_v42, %v11662_v43  ;;  %v8815_v43 = vpop.f32.mrf.mxu2 }
 0x441   :  { %v3927_v62 = vsub.f32 %v3819_v50, %v3873_v24  ;;  %11667 = vst [vmem:[#allocation27_spill] sm:$0xff] %v8815_v43 }
 0x442   :  { %v2661_v45 = vadd.f32 %v2660_v25, %v2226_v11  ;;  %v11665_v11 = vld [vmem:[#allocation196_spill] sm:$0xff] }
 0x443   :  { %v4296_v25 = vmul.f32 %v4008_v42, %v11665_v11 }
 0x444   :  { %v2662_v48 = vadd.f32 %v2661_v45, %v2227_v10  ;;  %v2665_v45 = vsel %vm1539_vm2, %v2230_v16, 0.0 }
 0x446   :  { %v2663_v46 = vadd.f32 %v2662_v48, %v2228_v51  ;;  %v11666_v48 = vld [vmem:[#allocation197_spill] sm:$0xff] }
 0x447   :  { %v4297_v22 = vmul.f32 %v4008_v42, %v11666_v48 }
 0x44b   :  { %v8783_v32 = vpop.xlane.xlu1 %1767 }
 0x44c   :  { %4027 = vperm.xlu1 %6145, %v3761_v39   ;;  %v11661_v39 = vld [vmem:[#allocation39_spill] sm:$0xff] }
 0x44d   :  { %v4293_v60 = vmul.f32 %v4008_v42, %v11661_v39 }
 0x451   :  { %4047 = vperm.xlu0 %6144, %v3765_v41  }
 0x453   :  { %v8799_v6 = vpop.xlane.xlu1 %2631 }
 0x454   :  { %4675 = vperm.xlu1 %6145, %v3923_v36   ;;  %v11663_v36 = vld [vmem:[#allocation195_spill] sm:$0xff] }
 0x455   :  { %v4295_v24 = vmul.f32 %v4008_v42, %v11663_v36 }
 0x459   :  { %4695 = vperm.xlu0 %6144, %v3927_v62   ;;  %v8789_v44 = vpop.xlane.xlu2 %2640  ;;  %v8808_v62 = vpop.f32.mrf.mxu0 }
 0x45a   :  { %11657 = vst [vmem:[#allocation182_spill] sm:$0xff] %v8789_v44  ;;  %v1813_v5 = vpop.xlane.xlu0 %1812  ;;  %v11686_v44 = vld [vmem:[#allocation198_spill] sm:$0xff] }
 0x45b   :  { %v8801_v33 = vmul.f32 0.0012755102, %v1813_v5  ;;  %11664 = vst [vmem:[#allocation25_spill] sm:$0xff] %v8808_v62  ;;  %v2664_v5 = vadd.f32 %v2663_v46, %v2229_v34  ;;  %v11669_v34 = vld [vmem:[#allocation128_spill] sm:$0xff]  ;;  %v11670_v46 = vld [vmem:[#allocation129_spill] sm:$0xff] }
 0x45c   :  { %v2238_v16 = vmul.f32 %v11669_v34, %v11669_v34  ;;  %v2239_v42 = vmul.f32 %v11670_v46, %v11670_v46 }
 0x45d   :  { %v3023_v51 = vmul.f32 %v8801_v33, %v8801_v33  ;;  %v2666_v36 = vadd.f32 %v2665_v45, %v2664_v5  ;;  %v1814_v45 = vadd.f32 %v11670_v46, %v11669_v34  ;;  %v2242_v34 = vmul.f32 %v8604_v54, %v8604_v54 }
 0x461   :  { %v4656_v14 = vpop.permute.xlu2 %4655 }
 0x462   :  { %v2677_v41 = vpop.xlane.xlu0 %2676  ;;  %v4939_v50 = vadd.f32 %v4656_v14, %v4291_v9  ;;  %v4940_v30 = vadd.f32 %v4656_v14, %v4292_v4  ;;  %v4941_v58 = vadd.f32 %v4656_v14, %v4293_v60  ;;  %v4942_v10 = vadd.f32 %v4656_v14, %v4294_v27  ;;  %v8817_v27 = vpop.f32.mrf.mxu1 }
 0x463   :  { %v4943_v12 = vadd.f32 %v4656_v14, %v4295_v24  ;;  %v2969_v39 = vmul.f32 0.0012755102, %v2677_v41  ;;  %v4944_v9 = vadd.f32 %v4656_v14, %v4296_v25  ;;  %v4945_v4 = vadd.f32 %v4656_v14, %v4297_v22  ;;  %11668 = vst [vmem:[#allocation170_spill] sm:$0xff] %v8817_v27  ;;  %v11671_v41 = vld [vmem:[#allocation131_spill] sm:$0xff]  ;;  %v8827_v14 = vpop.f32.mrf.mxu3  ;;  %v11674_v25 = vld [vmem:[#allocation149_spill] sm:$0xff] }
 0x464   :  { %5317 = vst [vmem:[#allocation5 + $0x1c0] sm:$0xff] %v4939_v50  ;;  %v2240_v50 = vmul.f32 %v11671_v41, %v11671_v41  ;;  %v2274_v5 = vmul.f32 %v11674_v25, %v11674_v25  ;;  %v2678_v22 = vadd.f32 %v2239_v42, %v2238_v16  ;;  %v2241_v16 = vmul.f32 %v8600_v19, %v8600_v19 }
 0x465   :  { %5318 = vst [vmem:[#allocation5 + $0x1c8] sm:$0xff] %v4940_v30  ;;  %v3077_v60 = vsub.f32 %v2969_v39, %v3023_v51  ;;  %v11675_v51 = vld [vmem:[#allocation275_spill] sm:$0xff]  ;;  %v11676_v39 = vld [vmem:[#allocation280_spill] sm:$0xff] }
 0x466   :  { %5319 = vst [vmem:[#allocation5 + $0x1d0] sm:$0xff] %v4941_v58  ;;  %v11673_v58 = vld [vmem:[#allocation148_spill] sm:$0xff]  ;;  %v8840_v48 = vmul.f32 0.0012755102, %v11675_v51  ;;  %v2679_v28 = vadd.f32 %v2678_v22, %v2240_v50  ;;  %v11682_v50 = vld [vmem:[#allocation41_spill] sm:$0xff] }
 0x467   :  { %5320 = vst [vmem:[#allocation5 + $0x1d8] sm:$0xff] %v4942_v10  ;;  %v8823_v24 = vadd.f32 1e-05, %v3077_v60  ;;  %v2273_v11 = vmul.f32 %v11673_v58, %v11673_v58  ;;  %v1859_v10 = vadd.f32 %v11674_v25, %v11673_v58  ;;  %v8844_v60 = vpop.f32.mrf.mxu0  ;;  %v11685_v58 = vld [vmem:[#allocation185_spill] sm:$0xff] }
 0x468   :  { %5321 = vst [vmem:[#allocation5 + $0x1e0] sm:$0xff] %v4943_v12  ;;  %v1815_v12 = vadd.f32 %v1814_v45, %v11671_v41  ;;  %v3008_v42 = vmul.f32 %v8840_v48, %v8840_v48  ;;  %v8857_v45 = vpop.f32.mrf.mxu2 }
 0x469   :  { %2667 = vadd.xlane.f32.xlu2 %v2666_v36  ;;  %11672 = vst [vmem:[#allocation183_spill] sm:$0xff] %v8827_v14  ;;  %6179 = vrsqrt.f32 %v8823_v24  ;;  %v11678_v36 = vld [vmem:[#allocation288_spill] sm:$0xff]  ;;  %v2723_v1 = vadd.f32 %v2274_v5, %v2273_v11  ;;  %v2958_v11 = vmul.f32 0.0012755102, %v8325_v8  ;;  %vm3515_vm7 = vweird.f32 %v8823_v24 }
 0x46a   :  { %5322 = vst [vmem:[#allocation5 + $0x1e8] sm:$0xff] %v4944_v9  ;;  %v2954_v9 = vmul.f32 0.0012755102, %v11676_v39  ;;  %v8847_v0 = vmul.f32 0.0012755102, %v11678_v36  ;;  %v1816_v51 = vadd.f32 %v1815_v12, %v8600_v19  ;;  %v11681_v5 = vld [vmem:[#allocation40_spill] sm:$0xff]  ;;  %v8865_v12 = vpop.f32.mrf.mxu1 }
 0x46b   :  { %v4013_v30 = vpop.permute.xlu1 %4012  ;;  %5323 = vst.msk [vmem:[#allocation5 + $0x1f0] sm:$0xff] %vm1539_vm2, %v4945_v4  ;;  %v11679_v4 = vld [vmem:[#allocation151_spill] sm:$0xff] }
 0x46c   :  { %11677 = vst [vmem:[#allocation184_spill] sm:$0xff] %v8844_v60  ;;  %v1860_v3 = vadd.f32 %v1859_v10, %v11679_v4  ;;  %v2275_v61 = vmul.f32 %v11679_v4, %v11679_v4  ;;  %v4298_v10 = vmul.f32 %v4013_v30, %v11681_v5  ;;  %v4299_v22 = vmul.f32 %v4013_v30, %v11682_v50  ;;  %v11683_v36 = vld [vmem:[#allocation43_spill] sm:$0xff]  ;;  %v8873_v50 = vpop.f32.mrf.mxu3 }
 0x46d   :  { %11680 = vst [vmem:[#allocation186_spill] sm:$0xff] %v8857_v45  ;;  %v4300_v7 = vmul.f32 %v4013_v30, %v11683_v36  ;;  %v3062_v52 = vsub.f32 %v2954_v9, %v3008_v42  ;;  %v3012_v4 = vmul.f32 %v8847_v0, %v8847_v0  ;;  %v4301_v23 = vmul.f32 %v4013_v30, %v11685_v58  ;;  %v11688_v36 = vld [vmem:[#allocation199_spill] sm:$0xff]  ;;  %v11689_v58 = vld [vmem:[#allocation201_spill] sm:$0xff] }
 0x46e   :  { %11684 = vst [vmem:[#allocation32_spill] sm:$0xff] %v8865_v12  ;;  %v4302_v8 = vmul.f32 %v4013_v30, %v11686_v44  ;;  %v1817_v9 = vadd.f32 %v1816_v51, %v8604_v54  ;;  %v4303_v41 = vmul.f32 %v4013_v30, %v11688_v36  ;;  %v4304_v40 = vmul.f32 %v4013_v30, %v11689_v58  ;;  %v3814_v30 = vld [vmem:[%s10716_s3 + $0x58] sm:$0xff]  ;;  %v11696_v58 = vld [vmem:[#allocation204_spill] sm:$0xff] }
 0x46f   :  { %v8859_v39 = vpop.eup %6179  ;;  %11687 = vst [vmem:[#allocation33_spill] sm:$0xff] %v8873_v50  ;;  %v3066_v21 = vsub.f32 %v2958_v11, %v3012_v4  ;;  %v3868_v51 = vmul.f32 %v8755_v56, %v8587_v13  ;;  %v1861_v36 = vadd.f32 %v1860_v3, %v8873_v50  ;;  %v1819_v13 = vsel %vm1539_vm2, %v8610_v18, 0.0  ;;  %v11693_v4 = vld [vmem:[#allocation56_spill] sm:$0xff]  ;;  %v11694_v11 = vld [vmem:[#allocation57_spill] sm:$0xff] }
 0x470   :  { %v3510_v25 = vmul.f32 %v8859_v39, %v8823_v24  ;;  %vm3516_vm6 = vweird.f32 %v8859_v39 }
 0x471   :  { %vm3517_vm8 = vmor %vm3515_vm7, %vm3516_vm6 }
 0x472   :  { %v3511_v42 = vmul.f32 %v8859_v39, %v3510_v25  ;;  %v2680_v25 = vadd.f32 %v2679_v28, %v2241_v16  ;;  %v1818_v28 = vadd.f32 %v1817_v9, %v8618_v53  ;;  %v8917_v24 = vpop.f32.mrf.mxu1 }
 0x473   :  { %v4661_v31 = vpop.permute.xlu1 %4660  ;;  %11692 = vst [vmem:[#allocation191_spill] sm:$0xff] %v8917_v24 }
 0x474   :  { %v4946_v38 = vadd.f32 %v4661_v31, %v4298_v10  ;;  %v4947_v5 = vadd.f32 %v4661_v31, %v4299_v22  ;;  %v4948_v19 = vadd.f32 %v4661_v31, %v4300_v7  ;;  %v4949_v46 = vadd.f32 %v4661_v31, %v4301_v23 }
 0x475   :  { %v4950_v49 = vadd.f32 %v4661_v31, %v4302_v8  ;;  %v4033_v44 = vpop.permute.xlu0 %4032  ;;  %v2724_v10 = vadd.f32 %v2723_v1, %v2275_v61  ;;  %v3512_v7 = vmul.f32 0.5, %v3511_v42  ;;  %v4951_v22 = vadd.f32 %v4661_v31, %v4303_v41  ;;  %v8891_v1 = vpop.f32.mrf.mxu0 }
 0x476   :  { %5324 = vst [vmem:[#allocation5 + $0x1f8] sm:$0xff] %v4946_v38  ;;  %v8884_v23 = vadd.f32 1e-05, %v3062_v52  ;;  %v4952_v59 = vadd.f32 %v4661_v31, %v4304_v40  ;;  %v2276_v61 = vmul.f32 %v8873_v50, %v8873_v50  ;;  %v2243_v52 = vmul.f32 %v8618_v53, %v8618_v53  ;;  %v8903_v40 = vpop.f32.mrf.mxu2 }
 0x477   :  { %5325 = vst [vmem:[#allocation5 + $0x200] sm:$0xff] %v4947_v5  ;;  %v3513_v38 = vsub.f32 1.5, %v3512_v7  ;;  %v2681_v3 = vadd.f32 %v2680_v25, %v2242_v34  ;;  %v2244_v31 = vmul.f32 %v8610_v18, %v8610_v18  ;;  %v2277_v34 = vmul.f32 %v8891_v1, %v8891_v1  ;;  %v11695_v5 = vld [vmem:[#allocation59_spill] sm:$0xff]  ;;  %v11698_v25 = vld [vmem:[#allocation214_spill] sm:$0xff] }
 0x478   :  { %5326 = vst [vmem:[#allocation5 + $0x208] sm:$0xff] %v4948_v19  ;;  %v8898_v19 = vadd.f32 1e-05, %v3066_v21  ;;  %v3131_v21 = vld [vmem:[%s10715_s2 + $0xf0] sm:$0xff]  ;;  %6181 = vrsqrt.f32 %v8884_v23  ;;  %v1820_v41 = vadd.f32 %v1819_v13, %v1818_v28  ;;  %v4326_v16 = vmul.f32 %v4033_v44, %v11693_v4  ;;  %v11699_v28 = vld [vmem:[#allocation215_spill] sm:$0xff] }
 0x479   :  { %11690 = vst [vmem:[#allocation35_spill] sm:$0xff] %v8891_v1  ;;  %v3514_v56 = vmul.f32 %v8859_v39, %v3513_v38  ;;  %v4327_v8 = vmul.f32 %v4033_v44, %v11694_v11  ;;  %v4328_v9 = vmul.f32 %v4033_v44, %v11695_v5  ;;  %v4329_v7 = vmul.f32 %v4033_v44, %v11696_v58  ;;  %v11701_v5 = vld [vmem:[#allocation216_spill] sm:$0xff] }
 0x47a   :  { %5327 = vst [vmem:[#allocation5 + $0x210] sm:$0xff] %v4949_v46  ;;  %v3922_v46 = vsub.f32 %v3814_v30, %v3868_v51  ;;  %6183 = vrsqrt.f32 %v8898_v19  ;;  %v4331_v4 = vmul.f32 %v4033_v44, %v11699_v28  ;;  %v4332_v58 = vmul.f32 %v4033_v44, %v11701_v5  ;;  %v11703_v28 = vld [vmem:[#allocation150_spill] sm:$0xff] }
 0x47b   :  { %5328 = vst [vmem:[#allocation5 + $0x218] sm:$0xff] %v4950_v49  ;;  %v1862_v49 = vadd.f32 %v1861_v36, %v8891_v1  ;;  %v3518_v42 = vsel %vm3517_vm8, %v8859_v39, %v3514_v56  ;;  %v4330_v36 = vmul.f32 %v4033_v44, %v11698_v25  ;;  %vm3365_vm11 = vweird.f32 %v8884_v23 }
 0x47c   :  { %11691 = vst [vmem:[#allocation178_spill] sm:$0xff] %v8903_v40  ;;  %v8927_v51 = vmul.f32 %v3518_v42, %v3131_v21  ;;  %v2683_v21 = vsel %vm1539_vm2, %v2244_v31, 0.0  ;;  %vm3405_vm13 = vweird.f32 %v8898_v19 }
 0x47d   :  { %5329 = vst [vmem:[#allocation5 + $0x220] sm:$0xff] %v4951_v22  ;;  %v4681_v22 = vpop.permute.xlu0 %4680  ;;  %v1863_v39 = vadd.f32 %v1862_v49, %v8917_v24  ;;  %v2279_v49 = vmul.f32 %v8903_v40, %v8903_v40 }
 0x47e   :  { %5330 = vst.msk [vmem:[#allocation5 + $0x228] sm:$0xff] %vm1539_vm2, %v4952_v59  ;;  %1821 = vadd.xlane.f32.xlu1 %v1820_v41  ;;  %v1864_v59 = vsel %vm1539_vm2, %v8903_v40, 0.0  ;;  %v4974_v30 = vadd.f32 %v4681_v22, %v4326_v16  ;;  %v4975_v38 = vadd.f32 %v4681_v22, %v4327_v8  ;;  %v4976_v13 = vadd.f32 %v4681_v22, %v4328_v9  ;;  %v6182_v42 = vpop.eup %6181 }
 0x47f   :  { %11697 = vst [vmem:[#allocation192_spill] sm:$0xff] %v8927_v51  ;;  %v4977_v11 = vadd.f32 %v4681_v22, %v4329_v7  ;;  %v8934_v56 = vmul.f32 %v8927_v51, %v8801_v33  ;;  %v2725_v41 = vadd.f32 %v2724_v10, %v2276_v61  ;;  %v4978_v1 = vadd.f32 %v4681_v22, %v4330_v36 }
 0x480   :  { %5352 = vst [vmem:[#allocation5 + $0x2d8] sm:$0xff] %v4974_v30  ;;  %v4979_v16 = vadd.f32 %v4681_v22, %v4331_v4  ;;  %v1865_v8 = vadd.f32 %v1864_v59, %v1863_v39  ;;  %v2682_v9 = vadd.f32 %v2681_v3, %v2243_v52  ;;  %v4980_v7 = vadd.f32 %v4681_v22, %v4332_v58  ;;  %v6184_v33 = vpop.eup %6183  ;;  %v3116_v58 = vld [vmem:[%s10715_s2 + $0x78] sm:$0xff] }
 0x481   :  { %11700 = vst [vmem:[#allocation193_spill] sm:$0xff] %v8934_v56  ;;  %4670 = vperm.xlu2 %6146, %v3922_v46   ;;  %v2278_v10 = vmul.f32 %v8917_v24, %v8917_v24  ;;  %v2726_v61 = vadd.f32 %v2725_v41, %v2277_v34  ;;  %v3360_v31 = vmul.f32 %v6182_v42, %v8884_v23  ;;  %v2728_v3 = vsel %vm1539_vm2, %v2279_v49, 0.0  ;;  %v11702_v34 = vld [vmem:[#allocation11_spill] sm:$0xff]  ;;  %v3120_v49 = vld [vmem:[%s10715_s2 + $0x98] sm:$0xff] }
 0x482   :  { %5353 = vst [vmem:[#allocation5 + $0x2e0] sm:$0xff] %v4975_v38  ;;  %v2684_v44 = vadd.f32 %v2683_v21, %v2682_v9  ;;  %v3400_v52 = vmul.f32 %v6184_v33, %v8898_v19  ;;  %v2953_v4 = vmul.f32 0.0012755102, %v11703_v28  ;;  %vm3366_vm9 = vweird.f32 %v6182_v42  ;;  %v11706_v19 = vld [vmem:[#allocation135_spill] sm:$0xff]  ;;  %v8985_v28 = vpop.f32.mrf.mxu3 }
 0x483   :  { %5354 = vst [vmem:[#allocation5 + $0x2e8] sm:$0xff] %v4976_v13  ;;  %1866 = vadd.xlane.f32.xlu0 %v1865_v8  ;;  %v2727_v46 = vadd.f32 %v2726_v61, %v2278_v10  ;;  %v3361_v22 = vmul.f32 %v6182_v42, %v3360_v31  ;;  %vm3406_vm10 = vweird.f32 %v6184_v33  ;;  %vm3367_vm12 = vmor %vm3365_vm11, %vm3366_vm9  ;;  %v11705_v8 = vld [vmem:[#allocation133_spill] sm:$0xff] }
 0x484   :  { %5355 = vst [vmem:[#allocation5 + $0x2f0] sm:$0xff] %v4977_v11  ;;  %v3401_v25 = vmul.f32 %v6184_v33, %v3400_v52  ;;  %vm3407_vm14 = vmor %vm3405_vm13, %vm3406_vm10 }
 0x485   :  { %5356 = vst [vmem:[#allocation5 + $0x2f8] sm:$0xff] %v4978_v1  ;;  %v2729_v59 = vadd.f32 %v2728_v3, %v2727_v46  ;;  %v3362_v36 = vmul.f32 0.5, %v3361_v22  ;;  %v8947_v1 = vmul.f32 0.0012755102, %v11702_v34  ;;  %v3818_v3 = vld [vmem:[%s10716_s3 + $0x78] sm:$0xff] }
 0x486   :  { %5357 = vst [vmem:[#allocation5 + $0x300] sm:$0xff] %v4979_v16  ;;  %2685 = vadd.xlane.f32.xlu1 %v2684_v44  ;;  %v3402_v30 = vmul.f32 0.5, %v3401_v25  ;;  %v11704_v16 = vld [vmem:[#allocation132_spill] sm:$0xff] }
 0x487   :  { %5358 = vst.msk [vmem:[#allocation5 + $0x308] sm:$0xff] %vm1539_vm2, %v4980_v7  ;;  %v3363_v38 = vsub.f32 1.5, %v3362_v36  ;;  %v3007_v39 = vmul.f32 %v8947_v1, %v8947_v1  ;;  %v1823_v9 = vadd.f32 %v11705_v8, %v11704_v16 }
 0x488   :  { %v3403_v13 = vsub.f32 1.5, %v3402_v30  ;;  %11707 = vst [vmem:[#allocation266_spill] sm:$0xff] %v8985_v28 }
 0x489   :  { %v3364_v11 = vmul.f32 %v6182_v42, %v3363_v38  ;;  %v3061_v5 = vsub.f32 %v2953_v4, %v3007_v39  ;;  %v1824_v31 = vadd.f32 %v1823_v9, %v11706_v19 }
 0x48a   :  { %v3404_v41 = vmul.f32 %v6184_v33, %v3403_v13 }
 0x48b   :  { %2730 = vadd.xlane.f32.xlu0 %v2729_v59  ;;  %v3368_v21 = vsel %vm3367_vm12, %v6182_v42, %v3364_v11  ;;  %v8962_v10 = vadd.f32 1e-05, %v3061_v5  ;;  %v1825_v42 = vadd.f32 %v1824_v31, %v8636_v63  ;;  %v3822_v59 = vld [vmem:[%s10716_s3 + $0x98] sm:$0xff]  ;;  %v8996_v31 = vpop.f32.mrf.mxu0 }
 0x48c   :  { %v3408_v7 = vsel %vm3407_vm14, %v6184_v33, %v3404_v41  ;;  %v3764_v23 = vmul.f32 %v3368_v21, %v3116_v58  ;;  %11709 = vst [vmem:[#allocation28_spill] sm:$0xff] %v8996_v31 }
 0x48d   :  { %v3768_v61 = vmul.f32 %v3408_v7, %v3120_v49  ;;  %6185 = vrsqrt.f32 %v8962_v10  ;;  %v1826_v46 = vadd.f32 %v1825_v42, %v8646_v37  ;;  %v8992_v7 = vpop.f32.mrf.mxu3  ;;  %vm3355_vm3 = vweird.f32 %v8962_v10 }
 0x48e   :  { %v3872_v52 = vmul.f32 %v3764_v23, %v8840_v48  ;;  %v1828_v48 = vsel %vm1539_vm2, %v8657_v17, 0.0  ;;  %11708 = vst [vmem:[#allocation270_spill] sm:$0xff] %v8992_v7  ;;  %v11740_v7 = vld [vmem:[#allocation68_spill] sm:$0xff] }
 0x48f   :  { %v3876_v33 = vmul.f32 %v3768_v61, %v8847_v0  ;;  %v1827_v13 = vadd.f32 %v1826_v46, %v8669_v35 }
 0x490   :  { %v3926_v25 = vsub.f32 %v3818_v3, %v3872_v52  ;;  %v8998_v3 = vpop.f32.mrf.mxu2 }
 0x491   :  { %v3930_v30 = vsub.f32 %v3822_v59, %v3876_v33  ;;  %v1829_v39 = vadd.f32 %v1828_v48, %v1827_v13  ;;  %11710 = vst [vmem:[#allocation29_spill] sm:$0xff] %v8998_v3  ;;  %v11714_v13 = vld [vmem:[#allocation159_spill] sm:$0xff] }
 0x493   :  { %v8980_v38 = vpop.eup %6185 }
 0x494   :  { %v3350_v41 = vmul.f32 %v8980_v38, %v8962_v10  ;;  %vm3356_vm15 = vweird.f32 %v8980_v38 }
 0x495   :  { %vm9024_vm4 = vmor %vm3355_vm3, %vm3356_vm15 }
 0x496   :  { %v3351_v58 = vmul.f32 %v8980_v38, %v3350_v41 }
 0x498   :  { %v3352_v49 = vmul.f32 0.5, %v3351_v58 }
 0x49a   :  { %v3353_v59 = vsub.f32 1.5, %v3352_v49 }
 0x49c   :  { %v3354_v58 = vmul.f32 %v8980_v38, %v3353_v59 }
 0x49e   :  { %v1795_v44 = vpop.xlane.xlu1 %1794 }
 0x49f   :  { %4042 = vperm.xlu1 %6145, %v3764_v23   ;;  %4062 = vperm.xlu0 %6144, %v3768_v61   ;;  %v8973_v22 = vmul.f32 0.0012755102, %v1795_v44 }
 0x4a1   :  { %v3021_v34 = vmul.f32 %v8973_v22, %v8973_v22 }
 0x4a6   :  { %v2659_v36 = vpop.xlane.xlu1 %2658 }
 0x4a7   :  { %v2967_v0 = vmul.f32 0.0012755102, %v2659_v36  ;;  %4690 = vperm.xlu1 %6145, %v3926_v25   ;;  %4710 = vperm.xlu0 %6144, %v3930_v30   ;;  %v11711_v25 = vld [vmem:[#allocation140_spill] sm:$0xff]  ;;  %v11712_v30 = vld [vmem:[#allocation141_spill] sm:$0xff] }
 0x4a8   :  { %v1840_v11 = vpop.xlane.xlu0 %1839  ;;  %v2259_v36 = vmul.f32 %v11711_v25, %v11711_v25  ;;  %v2260_v48 = vmul.f32 %v11712_v30, %v11712_v30 }
 0x4a9   :  { %v3075_v4 = vsub.f32 %v2967_v0, %v3021_v34  ;;  %v8990_v21 = vmul.f32 0.0012755102, %v1840_v11  ;;  %v9006_v34 = vpop.f32.mrf.mxu1  ;;  %v11715_v11 = vld [vmem:[#allocation160_spill] sm:$0xff] }
 0x4aa   :  { %1830 = vadd.xlane.f32.xlu2 %v1829_v39  ;;  %11713 = vst [vmem:[#allocation31_spill] sm:$0xff] %v9006_v34  ;;  %v2295_v39 = vmul.f32 %v11715_v11, %v11715_v11  ;;  %v2705_v49 = vadd.f32 %v2260_v48, %v2259_v36  ;;  %v1886_v59 = vadd.f32 %v11715_v11, %v11714_v13  ;;  %v9030_v48 = vpop.f32.mrf.mxu0  ;;  %v3115_v11 = vld [vmem:[%s10715_s2 + $0x70] sm:$0xff] }
 0x4ab   :  { %v3183_v5 = vadd.f32 1e-05, %v3075_v4  ;;  %v3026_v23 = vmul.f32 %v8990_v21, %v8990_v21  ;;  %v2294_v4 = vmul.f32 %v11714_v13, %v11714_v13  ;;  %11721 = vst [vmem:[#allocation187_spill] sm:$0xff] %v9030_v48 }
 0x4ad   :  { %6187 = vrsqrt.f32 %v3183_v5  ;;  %vm3495_vm1 = vweird.f32 %v3183_v5  ;;  %v2750_v36 = vadd.f32 %v2295_v39, %v2294_v4  ;;  %v3358_v4 = vsel %vm9024_vm4, %v8980_v38, %v3354_v58  ;;  %v3129_v39 = vld [vmem:[%s10715_s2 + $0xe0] sm:$0xff]  ;;  %v9060_v38 = vpop.f32.mrf.mxu2 }
 0x4ae   :  { %11724 = vst [vmem:[#allocation281_spill] sm:$0xff] %v9060_v38  ;;  %v2961_v58 = vmul.f32 0.0012755102, %v8589_v47 }
 0x4b0   :  { %v2704_v9 = vpop.xlane.xlu0 %2703 }
 0x4b1   :  { %v2972_v44 = vmul.f32 0.0012755102, %v2704_v9  ;;  %v1841_v9 = vadd.f32 %v11712_v30, %v11711_v25  ;;  %v9064_v10 = vpop.f32.mrf.mxu1 }
 0x4b2   :  { %11725 = vst [vmem:[#allocation188_spill] sm:$0xff] %v9064_v10  ;;  %v2264_v10 = vmul.f32 %v8817_v27, %v8817_v27 }
 0x4b3   :  { %v6188_v61 = vpop.eup %6187  ;;  %v3080_v52 = vsub.f32 %v2972_v44, %v3026_v23  ;;  %v11716_v23 = vld [vmem:[#allocation143_spill] sm:$0xff] }
 0x4b4   :  { %v3490_v42 = vmul.f32 %v6188_v61, %v3183_v5  ;;  %vm3496_vm0 = vweird.f32 %v6188_v61  ;;  %v2261_v44 = vmul.f32 %v11716_v23, %v11716_v23  ;;  %v9041_v5 = vmul.f32 0.0012755102, %v8430_v55 }
 0x4b5   :  { %v9000_v46 = vadd.f32 1e-05, %v3080_v52  ;;  %vm9032_vm5 = vmor %vm3495_vm1, %vm3496_vm0  ;;  %v1842_v30 = vadd.f32 %v1841_v9, %v11716_v23 }
 0x4b6   :  { %v3491_v33 = vmul.f32 %v6188_v61, %v3490_v42  ;;  %v11717_v42 = vld [vmem:[#allocation161_spill] sm:$0xff]  ;;  %v2706_v18 = vadd.f32 %v2705_v49, %v2261_v44  ;;  %v11726_v49 = vld [vmem:[#allocation284_spill] sm:$0xff]  ;;  %v3015_v47 = vmul.f32 %v9041_v5, %v9041_v5 }
 0x4b7   :  { %6189 = vrsqrt.f32 %v9000_v46  ;;  %v2296_v52 = vmul.f32 %v11717_v42, %v11717_v42  ;;  %v1887_v53 = vadd.f32 %v1886_v59, %v11717_v42  ;;  %v1843_v54 = vadd.f32 %v1842_v30, %v8793_v29 }
 0x4b8   :  { %v3492_v0 = vmul.f32 0.5, %v3491_v33  ;;  %v9022_v33 = vpop.f32.mrf.mxu3  ;;  %v9074_v44 = vmul.f32 0.0012755102, %v11726_v49  ;;  %vm3545_vm7 = vweird.f32 %v9000_v46 }
 0x4b9   :  { %11718 = vst [vmem:[#allocation174_spill] sm:$0xff] %v9022_v33  ;;  %v2297_v55 = vmul.f32 %v9022_v33, %v9022_v33  ;;  %v1844_v30 = vadd.f32 %v1843_v54, %v8808_v62 }
 0x4ba   :  { %v3493_v41 = vsub.f32 1.5, %v3492_v0  ;;  %v2751_v0 = vadd.f32 %v2750_v36, %v2296_v52  ;;  %v1888_v52 = vadd.f32 %v1887_v53, %v9022_v33  ;;  %v11731_v33 = vld [vmem:[#allocation200_spill] sm:$0xff] }
 0x4bc   :  { %v3494_v40 = vmul.f32 %v6188_v61, %v3493_v41  ;;  %v2262_v41 = vmul.f32 %v8793_v29, %v8793_v29  ;;  %v9079_v59 = vadd.f32 %v2751_v0, %v2297_v55  ;;  %v11729_v55 = vld [vmem:[#allocation53_spill] sm:$0xff] }
 0x4bd   :  { %v9036_v24 = vpop.eup %6189 }
 0x4be   :  { %v4028_v50 = vpop.permute.xlu1 %4027  ;;  %v3498_v13 = vsel %vm9032_vm5, %v6188_v61, %v3494_v40  ;;  %v3540_v25 = vmul.f32 %v9036_v24, %v9000_v46  ;;  %v9067_v61 = vmul.f32 %v3358_v4, %v3115_v11  ;;  %v9071_v23 = vadd.f32 %v2706_v18, %v2262_v41  ;;  %v11734_v46 = vld [vmem:[#allocation211_spill] sm:$0xff] }
 0x4bf   :  { %v9069_v9 = vmul.f32 %v3498_v13, %v3129_v39  ;;  %v9089_v18 = vmul.f32 %v8808_v62, %v8808_v62  ;;  %v11727_v13 = vld [vmem:[#allocation289_spill] sm:$0xff]  ;;  %v3069_v11 = vsub.f32 %v2961_v58, %v3015_v47  ;;  %vm3546_vm6 = vweird.f32 %v9036_v24  ;;  %v11728_v39 = vld [vmem:[#allocation52_spill] sm:$0xff]  ;;  %v11732_v62 = vld [vmem:[#allocation210_spill] sm:$0xff]  ;;  %v9101_v47 = vpop.f32.mrf.mxu0 }
 0x4c0   :  { %v3541_v40 = vmul.f32 %v9036_v24, %v3540_v25  ;;  %v2957_v53 = vmul.f32 0.0012755102, %v11727_v13  ;;  %v4319_v54 = vmul.f32 %v4028_v50, %v11728_v39  ;;  %v4320_v0 = vmul.f32 %v4028_v50, %v11729_v55  ;;  %11733 = vst [vmem:[#allocation190_spill] sm:$0xff] %v9101_v47  ;;  %v3134_v55 = vld [vmem:[%s10715_s2 + $0x108] sm:$0xff]  ;;  %vm3547_vm8 = vmor %vm3545_vm7, %vm3546_vm6 }
 0x4c1   :  { %v9085_v25 = vmul.f32 %v9069_v9, %v8973_v22  ;;  %v3011_v22 = vmul.f32 %v9074_v44, %v9074_v44  ;;  %v4322_v42 = vmul.f32 %v4028_v50, %v11731_v33  ;;  %v4323_v13 = vmul.f32 %v4028_v50, %v11732_v62 }
 0x4c2   :  { %v3542_v36 = vmul.f32 0.5, %v3541_v40  ;;  %4037 = vperm.xlu2 %6146, %v9067_v61   ;;  %v11730_v40 = vld [vmem:[#allocation55_spill] sm:$0xff]  ;;  %v9107_v51 = vadd.f32 1e-05, %v3069_v11  ;;  %v4324_v62 = vmul.f32 %v4028_v50, %v11734_v46  ;;  %v1889_v38 = vadd.f32 %v1888_v52, %v9101_v47  ;;  %v9124_v46 = vpop.xlane.xlu2 %1803 }
 0x4c3   :  { %v4048_v41 = vpop.permute.xlu0 %4047  ;;  %v4321_v49 = vmul.f32 %v4028_v50, %v11730_v40  ;;  %v3065_v40 = vsub.f32 %v2957_v53, %v3011_v22  ;;  %v9117_v53 = vpop.f32.mrf.mxu2  ;;  %v1845_v22 = vadd.f32 %v1844_v30, %v8817_v27  ;;  %11739 = vst [vmem:[#allocation47_spill] sm:$0xff] %v9124_v46  ;;  %v11742_v30 = vld [vmem:[#allocation71_spill] sm:$0xff]  ;;  %v11746_v46 = vld [vmem:[#allocation226_spill] sm:$0xff] }
 0x4c4   :  { %v3543_v4 = vsub.f32 1.5, %v3542_v36  ;;  %11736 = vst [vmem:[#allocation286_spill] sm:$0xff] %v9117_v53  ;;  %6191 = vrsqrt.f32 %v9107_v51  ;;  %vm3435_vm10 = vweird.f32 %v9107_v51 }
 0x4c5   :  { %v9130_v52 = vadd.f32 1e-05, %v3065_v40  ;;  %v2298_v40 = vmul.f32 %v9101_v47, %v9101_v47 }
 0x4c6   :  { %v4676_v58 = vpop.permute.xlu1 %4675  ;;  %v3544_v36 = vmul.f32 %v9036_v24, %v3543_v4  ;;  %v11735_v4 = vld [vmem:[#allocation212_spill] sm:$0xff] }
 0x4c7   :  { %v4967_v29 = vadd.f32 %v4676_v58, %v4319_v54  ;;  %v4968_v39 = vadd.f32 %v4676_v58, %v4320_v0  ;;  %v4969_v56 = vadd.f32 %v4676_v58, %v4321_v49  ;;  %v4970_v33 = vadd.f32 %v4676_v58, %v4322_v42  ;;  %v9122_v42 = vpop.f32.mrf.mxu1 }
 0x4c8   :  { %v4325_v54 = vmul.f32 %v4028_v50, %v11735_v4  ;;  %v4971_v0 = vadd.f32 %v4676_v58, %v4323_v13  ;;  %v3548_v49 = vsel %vm3547_vm8, %v9036_v24, %v3544_v36  ;;  %v4972_v11 = vadd.f32 %v4676_v58, %v4324_v62  ;;  %11738 = vst [vmem:[#allocation45_spill] sm:$0xff] %v9122_v42  ;;  %v11741_v13 = vld [vmem:[#allocation69_spill] sm:$0xff] }
 0x4c9   :  { %5345 = vst [vmem:[#allocation5 + $0x2a0] sm:$0xff] %v4967_v29  ;;  %v9120_v48 = vmul.f32 %v3548_v49, %v3134_v55  ;;  %v4347_v50 = vmul.f32 %v4048_v41, %v11740_v7  ;;  %v4348_v29 = vmul.f32 %v4048_v41, %v11741_v13  ;;  %v1846_v24 = vsel %vm1539_vm2, %v8815_v43, 0.0  ;;  %v11744_v7 = vld [vmem:[#allocation219_spill] sm:$0xff]  ;;  %v11745_v49 = vld [vmem:[#allocation225_spill] sm:$0xff] }
 0x4ca   :  { %5346 = vst [vmem:[#allocation5 + $0x2a8] sm:$0xff] %v4968_v39  ;;  %v4973_v4 = vadd.f32 %v4676_v58, %v4325_v54  ;;  %v4349_v36 = vmul.f32 %v4048_v41, %v11742_v30  ;;  %v4350_v62 = vmul.f32 %v4048_v41, %v11744_v7  ;;  %v1891_v54 = vsel %vm1539_vm2, %v9117_v53, 0.0 }
 0x4cb   :  { %11737 = vst [vmem:[#allocation44_spill] sm:$0xff] %v9120_v48  ;;  %v4696_v39 = vpop.permute.xlu0 %4695  ;;  %v9136_v55 = vmul.f32 %v9120_v48, %v8990_v21  ;;  %v4351_v13 = vmul.f32 %v4048_v41, %v11745_v49  ;;  %v1890_v30 = vadd.f32 %v1889_v38, %v9122_v42  ;;  %v2265_v21 = vmul.f32 %v8815_v43, %v8815_v43  ;;  %v11790_v48 = vld [vmem:[#allocation224_spill] sm:$0xff] }
 0x4cc   :  { %5347 = vst [vmem:[#allocation5 + $0x2b0] sm:$0xff] %v4969_v56  ;;  %v4995_v58 = vadd.f32 %v4696_v39, %v4347_v50  ;;  %v4996_v56 = vadd.f32 %v4696_v39, %v4348_v29  ;;  %v4352_v7 = vmul.f32 %v4048_v41, %v11746_v46  ;;  %v1847_v50 = vadd.f32 %v1846_v24, %v1845_v22  ;;  %v11747_v29 = vld [vmem:[#allocation228_spill] sm:$0xff] }
 0x4cd   :  { %5348 = vst [vmem:[#allocation5 + $0x2b8] sm:$0xff] %v4970_v33  ;;  %v4997_v33 = vadd.f32 %v4696_v39, %v4349_v36  ;;  %6193 = vrsqrt.f32 %v9130_v52  ;;  %v4353_v27 = vmul.f32 %v4048_v41, %v11747_v29  ;;  %v4999_v47 = vadd.f32 %v4696_v39, %v4351_v13  ;;  %v9155_v36 = vpop.eup %6191 }
 0x4ce   :  { %11743 = vst [vmem:[#allocation189_spill] sm:$0xff] %v9136_v55  ;;  %v1892_v49 = vadd.f32 %v1891_v54, %v1890_v30  ;;  %v5000_v38 = vadd.f32 %v4696_v39, %v4352_v7  ;;  %v2708_v46 = vadd.f32 %v9071_v23, %v9089_v18  ;;  %v2299_v22 = vmul.f32 %v9122_v42, %v9122_v42 }
 0x4cf   :  { %5349 = vst [vmem:[#allocation5 + $0x2c0] sm:$0xff] %v4971_v0  ;;  %v4998_v0 = vadd.f32 %v4696_v39, %v4350_v62  ;;  %v2753_v41 = vadd.f32 %v9079_v59, %v2298_v40  ;;  %v2710_v24 = vsel %vm1539_vm2, %v2265_v21, 0.0  ;;  %v3430_v62 = vmul.f32 %v9155_v36, %v9107_v51 }
 0x4d0   :  { %5350 = vst [vmem:[#allocation5 + $0x2c8] sm:$0xff] %v4972_v11  ;;  %v2300_v11 = vmul.f32 %v9117_v53, %v9117_v53  ;;  %v2709_v23 = vadd.f32 %v2708_v46, %v2264_v10  ;;  %v2245_v59 = vmul.f32 %v11704_v16, %v11704_v16  ;;  %v2249_v29 = vmul.f32 %v8646_v37, %v8646_v37  ;;  %v11775_v53 = vld [vmem:[#allocation147_spill] sm:$0xff] }
 0x4d1   :  { %5351 = vst.msk [vmem:[#allocation5 + $0x2d0] sm:$0xff] %vm1539_vm2, %v4973_v4  ;;  %1848 = vadd.xlane.f32.xlu1 %v1847_v50  ;;  %v5001_v4 = vadd.f32 %v4696_v39, %v4353_v27  ;;  %1893 = vadd.xlane.f32.xlu0 %v1892_v49  ;;  %v2754_v27 = vadd.f32 %v2753_v41, %v2299_v22  ;;  %vm3436_vm9 = vweird.f32 %v9155_v36  ;;  %vm3395_vm13 = vweird.f32 %v9130_v52 }
 0x4d2   :  { %5373 = vst [vmem:[#allocation5 + $0x380] sm:$0xff] %v4995_v58  ;;  %v4023_v58 = vpop.permute.xlu2 %4022  ;;  %v2755_v18 = vsel %vm1539_vm2, %v2300_v11, 0.0  ;;  %v2711_v39 = vadd.f32 %v2710_v24, %v2709_v23  ;;  %v3431_v10 = vmul.f32 %v9155_v36, %v3430_v62  ;;  %v2250_v46 = vmul.f32 %v8669_v35, %v8669_v35  ;;  %v11750_v24 = vld [vmem:[#allocation49_spill] sm:$0xff]  ;;  %v11751_v23 = vld [vmem:[#allocation51_spill] sm:$0xff]  ;;  %vm3437_vm11 = vmor %vm3435_vm10, %vm3436_vm9 }
 0x4d3   :  { %5374 = vst [vmem:[#allocation5 + $0x388] sm:$0xff] %v4996_v56  ;;  %v9164_v56 = vpop.eup %6193  ;;  %v2756_v54 = vadd.f32 %v2755_v18, %v2754_v27  ;;  %v2251_v22 = vmul.f32 %v8657_v17, %v8657_v17  ;;  %v4313_v62 = vmul.f32 %v4023_v58, %v11750_v24  ;;  %v4314_v18 = vmul.f32 %v4023_v58, %v11751_v23 }
 0x4d4   :  { %5375 = vst [vmem:[#allocation5 + $0x390] sm:$0xff] %v4997_v33  ;;  %v3390_v40 = vmul.f32 %v9164_v56, %v9130_v52  ;;  %v2247_v33 = vmul.f32 %v11706_v19, %v11706_v19  ;;  %v3432_v21 = vmul.f32 0.5, %v3431_v10  ;;  %v11753_v10 = vld [vmem:[#allocation206_spill] sm:$0xff]  ;;  %vm3396_vm12 = vweird.f32 %v9164_v56  ;;  %v3825_v52 = vld [vmem:[%s10716_s3 + $0xb0] sm:$0xff] }
 0x4d5   :  { %5376 = vst [vmem:[#allocation5 + $0x398] sm:$0xff] %v4998_v0  ;;  %v2248_v0 = vmul.f32 %v8636_v63, %v8636_v63  ;;  %v2692_v24 = vsel %vm1539_vm2, %v2251_v22, 0.0  ;;  %vm3397_vm14 = vmor %vm3395_vm13, %vm3396_vm12  ;;  %v11773_v63 = vld [vmem:[#allocation144_spill] sm:$0xff]  ;;  %v11774_v19 = vld [vmem:[#allocation145_spill] sm:$0xff] }
 0x4d6   :  { %5377 = vst [vmem:[#allocation5 + $0x3a0] sm:$0xff] %v4999_v47  ;;  %v2246_v47 = vmul.f32 %v11705_v8, %v11705_v8  ;;  %v3391_v30 = vmul.f32 %v9164_v56, %v3390_v40  ;;  %v3433_v11 = vsub.f32 1.5, %v3432_v21 }
 0x4d7   :  { %5378 = vst [vmem:[#allocation5 + $0x3a8] sm:$0xff] %v5000_v38 }
 0x4d8   :  { %5379 = vst.msk [vmem:[#allocation5 + $0x3b0] sm:$0xff] %vm1539_vm2, %v5001_v4  ;;  %v2687_v13 = vadd.f32 %v2246_v47, %v2245_v59  ;;  %v3392_v49 = vmul.f32 0.5, %v3391_v30  ;;  %v11749_v4 = vld [vmem:[#allocation48_spill] sm:$0xff] }
 0x4d9   :  { %2712 = vadd.xlane.f32.xlu1 %v2711_v39  ;;  %2757 = vadd.xlane.f32.xlu0 %v2756_v54  ;;  %v4312_v41 = vmul.f32 %v4023_v58, %v11749_v4  ;;  %v11752_v39 = vld [vmem:[#allocation194_spill] sm:$0xff]  ;;  %v3434_v54 = vmul.f32 %v9155_v36, %v3433_v11 }
 0x4da   :  { %v2688_v50 = vadd.f32 %v2687_v13, %v2247_v33  ;;  %v4315_v59 = vmul.f32 %v4023_v58, %v11752_v39  ;;  %v3393_v40 = vsub.f32 1.5, %v3392_v49  ;;  %v4316_v13 = vmul.f32 %v4023_v58, %v11753_v10  ;;  %v3123_v49 = vld [vmem:[%s10715_s2 + $0xb0] sm:$0xff] }
 0x4dc   :  { %v9177_v7 = vpop.xlane.xlu2 %2667  ;;  %v2689_v38 = vadd.f32 %v2688_v50, %v2248_v0  ;;  %v11754_v0 = vld [vmem:[#allocation207_spill] sm:$0xff] }
 0x4dd   :  { %11748 = vst [vmem:[#allocation202_spill] sm:$0xff] %v9177_v7  ;;  %v4317_v50 = vmul.f32 %v4023_v58, %v11754_v0 }
 0x4de   :  { %v2690_v27 = vadd.f32 %v2689_v38, %v2249_v29  ;;  %v11755_v29 = vld [vmem:[#allocation209_spill] sm:$0xff] }
 0x4df   :  { %v4318_v38 = vmul.f32 %v4023_v58, %v11755_v29  ;;  %v3817_v29 = vld [vmem:[%s10716_s3 + $0x70] sm:$0xff] }
 0x4e0   :  { %v2691_v11 = vadd.f32 %v2690_v27, %v2250_v46  ;;  %v3119_v46 = vld [vmem:[%s10715_s2 + $0x90] sm:$0xff] }
 0x4e2   :  { %v2693_v51 = vadd.f32 %v2692_v24, %v2691_v11 }
 0x4e4   :  { %v4671_v47 = vpop.permute.xlu2 %4670 }
 0x4e5   :  { %v4960_v33 = vadd.f32 %v4671_v47, %v4312_v41  ;;  %v4961_v30 = vadd.f32 %v4671_v47, %v4313_v62  ;;  %v4962_v21 = vadd.f32 %v4671_v47, %v4314_v18  ;;  %v4963_v4 = vadd.f32 %v4671_v47, %v4315_v59 }
 0x4e6   :  { %v4964_v23 = vadd.f32 %v4671_v47, %v4316_v13  ;;  %v4965_v39 = vadd.f32 %v4671_v47, %v4317_v50  ;;  %v3438_v41 = vsel %vm3437_vm11, %v9155_v36, %v3434_v54  ;;  %v3394_v62 = vmul.f32 %v9164_v56, %v3393_v40  ;;  %v3821_v40 = vld [vmem:[%s10716_s3 + $0x90] sm:$0xff] }
 0x4e7   :  { %5338 = vst [vmem:[#allocation5 + $0x268] sm:$0xff] %v4960_v33  ;;  %v4966_v22 = vadd.f32 %v4671_v47, %v4318_v38  ;;  %v3771_v58 = vmul.f32 %v3438_v41, %v3123_v49  ;;  %v9231_v38 = vpop.f32.mrf.mxu0  ;;  %v9235_v41 = vpop.f32.mrf.mxu2 }
 0x4e8   :  { %5339 = vst [vmem:[#allocation5 + $0x270] sm:$0xff] %v4961_v30  ;;  %v3398_v36 = vsel %vm3397_vm14, %v9164_v56, %v3394_v62 }
 0x4e9   :  { %5340 = vst [vmem:[#allocation5 + $0x278] sm:$0xff] %v4962_v21  ;;  %v3767_v18 = vmul.f32 %v3398_v36, %v3119_v46  ;;  %v3879_v27 = vmul.f32 %v3771_v58, %v9041_v5  ;;  %v9222_v21 = vpop.f32.mrf.mxu3  ;;  %v11762_v36 = vld [vmem:[#allocation10_spill] sm:$0xff] }
 0x4ea   :  { %5341 = vst [vmem:[#allocation5 + $0x280] sm:$0xff] %v4963_v4  ;;  %v3871_v4 = vmul.f32 %v9067_v61, %v8947_v1  ;;  %v9241_v61 = vpop.f32.mrf.mxu1 }
 0x4eb   :  { %5342 = vst [vmem:[#allocation5 + $0x288] sm:$0xff] %v4964_v23  ;;  %2694 = vadd.xlane.f32.xlu2 %v2693_v51  ;;  %v3933_v47 = vsub.f32 %v3825_v52, %v3879_v27  ;;  %v3875_v54 = vmul.f32 %v3767_v18, %v9074_v44  ;;  %v11761_v51 = vld [vmem:[#allocation54_spill] sm:$0xff] }
 0x4ec   :  { %5343 = vst [vmem:[#allocation5 + $0x290] sm:$0xff] %v4965_v39  ;;  %v3925_v49 = vsub.f32 %v3817_v29, %v3871_v4  ;;  %v1913_v52 = vadd.f32 %v11761_v51, %v11762_v36  ;;  %v11766_v4 = vld [vmem:[#allocation169_spill] sm:$0xff]  ;;  %v11767_v29 = vld [vmem:[#allocation102_spill] sm:$0xff] }
 0x4ed   :  { %5344 = vst.msk [vmem:[#allocation5 + $0x298] sm:$0xff] %vm1539_vm2, %v4966_v22  ;;  %4077 = vperm.xlu0 %6144, %v3771_v58   ;;  %v3929_v13 = vsub.f32 %v3821_v40, %v3875_v54  ;;  %v2316_v58 = vmul.f32 %v11761_v51, %v11761_v51  ;;  %v9257_v54 = vmul.f32 0.0012755102, %v8783_v32  ;;  %v2964_v32 = vmul.f32 0.0012755102, %v8799_v6 }
 0x4ee   :  { %11756 = vst [vmem:[#allocation203_spill] sm:$0xff] %v9222_v21 }
 0x4ef   :  { %11757 = vst [vmem:[#allocation205_spill] sm:$0xff] %v9231_v38  ;;  %v3018_v6 = vmul.f32 %v9257_v54, %v9257_v54 }
 0x4f0   :  { %11758 = vst [vmem:[#allocation36_spill] sm:$0xff] %v9235_v41 }
 0x4f1   :  { %v1822_v59 = vpop.xlane.xlu1 %1821  ;;  %v9239_v1 = vpop.f32.mrf.mxu3  ;;  %11760 = vst [vmem:[#allocation39_spill] sm:$0xff] %v9241_v61  ;;  %v3072_v51 = vsub.f32 %v2964_v32, %v3018_v6 }
 0x4f2   :  { %4057 = vperm.xlu1 %6145, %v3767_v18   ;;  %v9218_v56 = vmul.f32 0.0012755102, %v1822_v59  ;;  %11759 = vst [vmem:[#allocation37_spill] sm:$0xff] %v9239_v1  ;;  %v2315_v18 = vmul.f32 %v11762_v36, %v11762_v36  ;;  %v9252_v59 = vpop.f32.mrf.mxu0 }
 0x4f3   :  { %11763 = vst [vmem:[#allocation181_spill] sm:$0xff] %v9252_v59  ;;  %v9328_v6 = vadd.f32 1e-05, %v3072_v51  ;;  %v3137_v51 = vld [vmem:[%s10715_s2 + $0x120] sm:$0xff] }
 0x4f4   :  { %v3024_v5 = vmul.f32 %v9218_v56, %v9218_v56 }
 0x4f5   :  { %4725 = vperm.xlu0 %6144, %v3933_v47   ;;  %v2777_v47 = vadd.f32 %v2316_v58, %v2315_v18  ;;  %v11768_v58 = vld [vmem:[#allocation154_spill] sm:$0xff]  ;;  %vm3465_vm7 = vweird.f32 %v9328_v6 }
 0x4f6   :  { %v1867_v10 = vpop.xlane.xlu0 %1866 }
 0x4f7   :  { %v9224_v0 = vmul.f32 0.0012755102, %v1867_v10 }
 0x4f9   :  { %v2686_v33 = vpop.xlane.xlu1 %2685  ;;  %v3029_v23 = vmul.f32 %v9224_v0, %v9224_v0  ;;  %v9282_v35 = vpop.f32.mrf.mxu3 }
 0x4fa   :  { %v2970_v30 = vmul.f32 0.0012755102, %v2686_v33  ;;  %4705 = vperm.xlu1 %6145, %v3929_v13   ;;  %v11764_v13 = vld [vmem:[#allocation152_spill] sm:$0xff]  ;;  %11771 = vst [vmem:[#allocation196_spill] sm:$0xff] %v9282_v35 }
 0x4fb   :  { %v2280_v33 = vmul.f32 %v11764_v13, %v11764_v13 }
 0x4fc   :  { %v3078_v44 = vsub.f32 %v2970_v30, %v3024_v5  ;;  %v11765_v5 = vld [vmem:[#allocation153_spill] sm:$0xff] }
 0x4fd   :  { %v1868_v30 = vadd.f32 %v11765_v5, %v11764_v13 }
 0x4fe   :  { %v3186_v50 = vadd.f32 1e-05, %v3078_v44  ;;  %v2731_v24 = vpop.xlane.xlu0 %2730  ;;  %v2281_v44 = vmul.f32 %v11765_v5, %v11765_v5 }
 0x4ff   :  { %v2975_v11 = vmul.f32 0.0012755102, %v2731_v24  ;;  %v9268_v24 = vmul.f32 0.0012755102, %v11766_v4  ;;  %v1869_v18 = vadd.f32 %v1868_v30, %v11768_v58  ;;  %v9280_v4 = vpop.f32.mrf.mxu2  ;;  %v1850_v30 = vadd.f32 %v11774_v19, %v11773_v63 }
 0x500   :  { %6195 = vrsqrt.f32 %v3186_v50  ;;  %11770 = vst [vmem:[#allocation195_spill] sm:$0xff] %v9280_v4  ;;  %v2732_v8 = vadd.f32 %v2281_v44, %v2280_v33  ;;  %vm3525_vm0 = vweird.f32 %v3186_v50  ;;  %v11783_v33 = vld [vmem:[#allocation65_spill] sm:$0xff] }
 0x501   :  { %v3083_v39 = vsub.f32 %v2975_v11, %v3029_v23  ;;  %v1914_v23 = vadd.f32 %v1913_v52, %v11767_v29  ;;  %v9284_v52 = vpop.f32.mrf.mxu1  ;;  %v3010_v16 = vmul.f32 %v9268_v24, %v9268_v24  ;;  %v1851_v42 = vadd.f32 %v1850_v30, %v11775_v53 }
 0x502   :  { %11772 = vst [vmem:[#allocation197_spill] sm:$0xff] %v9284_v52 }
 0x503   :  { %v9237_v62 = vadd.f32 1e-05, %v3083_v39  ;;  %4685 = vperm.xlu2 %6146, %v3925_v49   ;;  %v2317_v49 = vmul.f32 %v11767_v29, %v11767_v29  ;;  %v1870_v29 = vadd.f32 %v1869_v18, %v8985_v28  ;;  %v1915_v18 = vadd.f32 %v1914_v23, %v9282_v35 }
 0x504   :  { %v2960_v23 = vmul.f32 0.0012755102, %v8396_v26 }
 0x505   :  { %6197 = vrsqrt.f32 %v9237_v62  ;;  %v1871_v32 = vadd.f32 %v1870_v29, %v8996_v31  ;;  %v9323_v29 = vpop.f32.mrf.mxu0  ;;  %vm3575_vm4 = vweird.f32 %v9237_v62 }
 0x506   :  { %v9243_v22 = vpop.eup %6195  ;;  %11778 = vst [vmem:[#allocation275_spill] sm:$0xff] %v9323_v29  ;;  %6199 = vrsqrt.f32 %v9328_v6  ;;  %v2319_v55 = vmul.f32 %v9323_v29, %v9323_v29 }
 0x507   :  { %v3520_v46 = vmul.f32 %v9243_v22, %v3186_v50  ;;  %vm3526_vm15 = vweird.f32 %v9243_v22 }
 0x508   :  { %vm9303_vm3 = vmor %vm3525_vm0, %vm3526_vm15 }
 0x509   :  { %v3521_v27 = vmul.f32 %v9243_v22, %v3520_v46  ;;  %v2282_v46 = vmul.f32 %v11768_v58, %v11768_v58  ;;  %v2318_v58 = vmul.f32 %v9282_v35, %v9282_v35 }
 0x50b   :  { %v3522_v40 = vmul.f32 0.5, %v3521_v27  ;;  %v9259_v10 = vpop.eup %6197  ;;  %v11769_v27 = vld [vmem:[#allocation171_spill] sm:$0xff]  ;;  %v2733_v7 = vadd.f32 %v2732_v8, %v2282_v46  ;;  %v9318_v8 = vadd.f32 %v1851_v42, %v8827_v14  ;;  %v9336_v42 = vmul.f32 %v8996_v31, %v8996_v31 }
 0x50c   :  { %v3570_v39 = vmul.f32 %v9259_v10, %v9237_v62  ;;  %v2956_v17 = vmul.f32 0.0012755102, %v11769_v27  ;;  %v2283_v27 = vmul.f32 %v8985_v28, %v8985_v28  ;;  %vm3576_vm1 = vweird.f32 %v9259_v10 }
 0x50d   :  { %v3523_v11 = vsub.f32 1.5, %v3522_v40  ;;  %vm9340_vm5 = vmor %vm3575_vm4, %vm3576_vm1  ;;  %v1916_v62 = vadd.f32 %v1915_v18, %v9323_v29  ;;  %v9364_v18 = vpop.f32.mrf.mxu1 }
 0x50e   :  { %v3571_v37 = vmul.f32 %v9259_v10, %v3570_v39  ;;  %v3064_v39 = vsub.f32 %v2956_v17, %v3010_v16  ;;  %v2778_v16 = vadd.f32 %v2777_v47, %v2317_v49  ;;  %v9320_v46 = vadd.f32 %v2733_v7, %v2283_v27  ;;  %v11782_v27 = vld [vmem:[#allocation64_spill] sm:$0xff]  ;;  %11785 = vst [vmem:[#allocation288_spill] sm:$0xff] %v9364_v18 }
 0x50f   :  { %v3524_v40 = vmul.f32 %v9243_v22, %v3523_v11  ;;  %v1872_v49 = vadd.f32 %v1871_v32, %v9006_v34 }
 0x510   :  { %v3572_v36 = vmul.f32 0.5, %v3571_v37  ;;  %v3132_v37 = vld [vmem:[%s10715_s2 + $0xf8] sm:$0xff]  ;;  %v2779_v47 = vadd.f32 %v2778_v16, %v2318_v58 }
 0x511   :  { %v4043_v11 = vpop.permute.xlu1 %4042  ;;  %v9307_v44 = vpop.permute.xlu0 %4062  ;;  %v3528_v17 = vsel %vm9303_vm3, %v9243_v22, %v3524_v40  ;;  %v9332_v22 = vadd.f32 1e-05, %v3064_v39 }
 0x512   :  { %v3573_v50 = vsub.f32 1.5, %v3572_v36  ;;  %v9326_v36 = vmul.f32 0.0012755102, %v8390_v20  ;;  %v9344_v20 = vmul.f32 %v3528_v17, %v3132_v37  ;;  %v9355_v40 = vpop.f32.mrf.mxu2  ;;  %v4340_v39 = vmul.f32 %v4043_v11, %v11782_v27  ;;  %v11784_v37 = vld [vmem:[#allocation67_spill] sm:$0xff]  ;;  %v11788_v27 = vld [vmem:[#allocation221_spill] sm:$0xff] }
 0x513   :  { %11781 = vst [vmem:[#allocation280_spill] sm:$0xff] %v9355_v40  ;;  %v4342_v17 = vmul.f32 %v4043_v11, %v11784_v37  ;;  %v1918_v43 = vsel %vm1539_vm2, %v9355_v40, 0.0  ;;  %6201 = vrsqrt.f32 %v9332_v22  ;;  %vm3385_vm11 = vweird.f32 %v9332_v22 }
 0x514   :  { %v3574_v30 = vmul.f32 %v9259_v10, %v3573_v50  ;;  %v4341_v50 = vmul.f32 %v4043_v11, %v11783_v33  ;;  %v9362_v16 = vmul.f32 %v9344_v20, %v9218_v56  ;;  %v3014_v26 = vmul.f32 %v9326_v36, %v9326_v36  ;;  %v11789_v56 = vld [vmem:[#allocation222_spill] sm:$0xff] }
 0x515   :  { %v4344_v33 = vmul.f32 %v4043_v11, %v11788_v27  ;;  %v4345_v5 = vmul.f32 %v4043_v11, %v11789_v56  ;;  %v9392_v27 = vpop.eup %6199 }
 0x516   :  { %v3578_v58 = vsel %vm9340_vm5, %v9259_v10, %v3574_v30  ;;  %v11786_v10 = vld [vmem:[#allocation213_spill] sm:$0xff]  ;;  %v3068_v28 = vsub.f32 %v2960_v23, %v3014_v26  ;;  %vm3466_vm6 = vweird.f32 %v9392_v27 }
 0x517   :  { %v4343_v32 = vmul.f32 %v4043_v11, %v11786_v10  ;;  %v9370_v7 = vmul.f32 %v3578_v58, %v3137_v51  ;;  %v4346_v10 = vmul.f32 %v4043_v11, %v11790_v48  ;;  %v1917_v58 = vadd.f32 %v1916_v62, %v9364_v18  ;;  %v11793_v11 = vld [vmem:[#allocation81_spill] sm:$0xff]  ;;  %vm3467_vm8 = vmor %vm3465_vm7, %vm3466_vm6 }
 0x518   :  { %v2321_v48 = vmul.f32 %v9355_v40, %v9355_v40  ;;  %v11808_v40 = vld [vmem:[#allocation164_spill] sm:$0xff] }
 0x519   :  { %v4691_v30 = vpop.permute.xlu1 %4690  ;;  %11787 = vst [vmem:[#allocation40_spill] sm:$0xff] %v9370_v7  ;;  %v4711_v51 = vpop.permute.xlu0 %4710  ;;  %v9386_v26 = vmul.f32 %v9370_v7, %v9224_v0  ;;  %v1919_v62 = vadd.f32 %v1918_v43, %v1917_v58  ;;  %v2780_v43 = vadd.f32 %v2779_v47, %v2319_v55  ;;  %v3460_v47 = vmul.f32 %v9392_v27, %v9328_v6 }
 0x51a   :  { %v4988_v35 = vadd.f32 %v4691_v30, %v4340_v39  ;;  %v4989_v37 = vadd.f32 %v4691_v30, %v4341_v50  ;;  %v4990_v31 = vadd.f32 %v4691_v30, %v4342_v17  ;;  %v4991_v13 = vadd.f32 %v4691_v30, %v4343_v32  ;;  %v11791_v39 = vld [vmem:[#allocation80_spill] sm:$0xff] }
 0x51b   :  { %v4992_v52 = vadd.f32 %v4691_v30, %v4344_v33  ;;  %v4368_v50 = vmul.f32 %v9307_v44, %v11791_v39  ;;  %v4993_v23 = vadd.f32 %v4691_v30, %v4345_v5  ;;  %v1873_v17 = vsel %vm1539_vm2, %v8998_v3, 0.0  ;;  %11792 = vst [vmem:[#allocation41_spill] sm:$0xff] %v9386_v26  ;;  %v11795_v39 = vld [vmem:[#allocation232_spill] sm:$0xff] }
 0x51c   :  { %5366 = vst [vmem:[#allocation5 + $0x348] sm:$0xff] %v4988_v35  ;;  %v4369_v35 = vmul.f32 %v9307_v44, %v11793_v11  ;;  %v4994_v32 = vadd.f32 %v4691_v30, %v4346_v10  ;;  %v2320_v5 = vmul.f32 %v9364_v18, %v9364_v18  ;;  %v9396_v33 = vadd.f32 1e-05, %v3068_v28  ;;  %v11796_v10 = vld [vmem:[#allocation237_spill] sm:$0xff] }
 0x51d   :  { %5367 = vst [vmem:[#allocation5 + $0x350] sm:$0xff] %v4989_v37  ;;  %v11794_v37 = vld [vmem:[#allocation83_spill] sm:$0xff]  ;;  %v5016_v56 = vadd.f32 %v4711_v51, %v4368_v50  ;;  %v4371_v11 = vmul.f32 %v9307_v44, %v11795_v39  ;;  %v2285_v30 = vmul.f32 %v9006_v34, %v9006_v34  ;;  %v2286_v28 = vmul.f32 %v8998_v3, %v8998_v3  ;;  %v11797_v50 = vld [vmem:[#allocation238_spill] sm:$0xff] }
 0x51e   :  { %5368 = vst [vmem:[#allocation5 + $0x358] sm:$0xff] %v4990_v31  ;;  %v4370_v0 = vmul.f32 %v9307_v44, %v11794_v37  ;;  %v5017_v31 = vadd.f32 %v4711_v51, %v4369_v35  ;;  %v4372_v58 = vmul.f32 %v9307_v44, %v11796_v10  ;;  %v4373_v37 = vmul.f32 %v9307_v44, %v11797_v50 }
 0x51f   :  { %5369 = vst [vmem:[#allocation5 + $0x360] sm:$0xff] %v4991_v13  ;;  %1920 = vadd.xlane.f32.xlu0 %v1919_v62  ;;  %v1874_v35 = vadd.f32 %v1873_v17, %v1872_v49  ;;  %v2782_v55 = vsel %vm1539_vm2, %v2321_v48, 0.0  ;;  %6203 = vrsqrt.f32 %v9396_v33  ;;  %v11798_v62 = vld [vmem:[#allocation239_spill] sm:$0xff]  ;;  %v1853_v49 = vadd.f32 %v9318_v8, %v8844_v60  ;;  %v6202_v48 = vpop.eup %6201 }
 0x520   :  { %5370 = vst [vmem:[#allocation5 + $0x368] sm:$0xff] %v4992_v52  ;;  %v5018_v13 = vadd.f32 %v4711_v51, %v4370_v0  ;;  %v5019_v52 = vadd.f32 %v4711_v51, %v4371_v11  ;;  %v4374_v39 = vmul.f32 %v9307_v44, %v11798_v62  ;;  %v5020_v10 = vadd.f32 %v4711_v51, %v4372_v58 }
 0x521   :  { %5371 = vst [vmem:[#allocation5 + $0x370] sm:$0xff] %v4993_v23  ;;  %v5021_v23 = vadd.f32 %v4711_v51, %v4373_v37  ;;  %v2781_v0 = vadd.f32 %v2780_v43, %v2320_v5  ;;  %v3461_v50 = vmul.f32 %v9392_v27, %v3460_v47  ;;  %v2737_v44 = vsel %vm1539_vm2, %v2286_v28, 0.0 }
 0x522   :  { %5372 = vst.msk [vmem:[#allocation5 + $0x378] sm:$0xff] %vm1539_vm2, %v4994_v32  ;;  %v2735_v32 = vadd.f32 %v9320_v46, %v9336_v42  ;;  %v5022_v17 = vadd.f32 %v4711_v51, %v4374_v39  ;;  %v1855_v5 = vsel %vm1539_vm2, %v8857_v45, 0.0  ;;  %v1854_v8 = vadd.f32 %v1853_v49, %v8865_v12 }
 0x523   :  { %5394 = vst [vmem:[#allocation5 + $0x428] sm:$0xff] %v5016_v56  ;;  %v2783_v11 = vadd.f32 %v2782_v55, %v2781_v0  ;;  %v3462_v51 = vmul.f32 0.5, %v3461_v50  ;;  %v3380_v43 = vmul.f32 %v6202_v48, %v9332_v22  ;;  %v3126_v55 = vld [vmem:[%s10715_s2 + $0xc8] sm:$0xff]  ;;  %vm3386_vm9 = vweird.f32 %v6202_v48 }
 0x524   :  { %5395 = vst [vmem:[#allocation5 + $0x430] sm:$0xff] %v5017_v31  ;;  %1875 = vadd.xlane.f32.xlu1 %v1874_v35  ;;  %v2736_v56 = vadd.f32 %v2735_v32, %v2285_v30  ;;  %v1856_v31 = vadd.f32 %v1855_v5, %v1854_v8  ;;  %vm3387_vm12 = vmor %vm3385_vm11, %vm3386_vm9  ;;  %vm3425_vm13 = vweird.f32 %v9396_v33  ;;  %v3828_v32 = vld [vmem:[%s10716_s3 + $0xc8] sm:$0xff]  ;;  %v9458_v8 = vpop.f32.mrf.mxu3 }
 0x525   :  { %5396 = vst [vmem:[#allocation5 + $0x438] sm:$0xff] %v5018_v13  ;;  %v6204_v46 = vpop.eup %6203  ;;  %v3463_v28 = vsub.f32 1.5, %v3462_v51  ;;  %v3381_v13 = vmul.f32 %v6202_v48, %v3380_v43 }
 0x526   :  { %5397 = vst [vmem:[#allocation5 + $0x440] sm:$0xff] %v5019_v52  ;;  %v2738_v42 = vadd.f32 %v2737_v44, %v2736_v56  ;;  %v3420_v58 = vmul.f32 %v6204_v46, %v9396_v33  ;;  %vm3426_vm10 = vweird.f32 %v6204_v46 }
 0x527   :  { %5398 = vst [vmem:[#allocation5 + $0x448] sm:$0xff] %v5020_v10  ;;  %2784 = vadd.xlane.f32.xlu0 %v2783_v11  ;;  %v3464_v52 = vmul.f32 %v9392_v27, %v3463_v28  ;;  %v3382_v30 = vmul.f32 0.5, %v3381_v13  ;;  %vm3427_vm14 = vmor %vm3425_vm13, %vm3426_vm10 }
 0x528   :  { %5399 = vst [vmem:[#allocation5 + $0x450] sm:$0xff] %v5021_v23  ;;  %v3421_v37 = vmul.f32 %v6204_v46, %v3420_v58 }
 0x529   :  { %5400 = vst.msk [vmem:[#allocation5 + $0x458] sm:$0xff] %vm1539_vm2, %v5022_v17  ;;  %v3468_v47 = vsel %vm3467_vm8, %v9392_v27, %v3464_v52  ;;  %v3383_v62 = vsub.f32 1.5, %v3382_v30  ;;  %v3118_v27 = vld [vmem:[%s10715_s2 + $0x88] sm:$0xff] }
 0x52a   :  { %v3422_v35 = vmul.f32 0.5, %v3421_v37  ;;  %v3774_v10 = vmul.f32 %v3468_v47, %v3126_v55  ;;  %v3122_v17 = vld [vmem:[%s10715_s2 + $0xa8] sm:$0xff]  ;;  %v9468_v37 = vpop.f32.mrf.mxu0  ;;  %v9470_v55 = vpop.f32.mrf.mxu2 }
 0x52b   :  { %v3384_v23 = vmul.f32 %v6202_v48, %v3383_v62  ;;  %v2266_v62 = vmul.f32 %v11773_v63, %v11773_v63 }
 0x52c   :  { %2739 = vadd.xlane.f32.xlu1 %v2738_v42  ;;  %1857 = vadd.xlane.f32.xlu2 %v1856_v31  ;;  %v3423_v39 = vsub.f32 1.5, %v3422_v35  ;;  %v3882_v6 = vmul.f32 %v3774_v10, %v9257_v54  ;;  %v9462_v31 = vpop.xlane.xlu2 %1830 }
 0x52d   :  { %v3388_v49 = vsel %vm3387_vm12, %v6202_v48, %v3384_v23  ;;  %v3824_v48 = vld [vmem:[%s10716_s3 + $0xa8] sm:$0xff]  ;;  %11799 = vst [vmem:[#allocation43_spill] sm:$0xff] %v9462_v31  ;;  %v9480_v23 = vpop.f32.mrf.mxu1 }
 0x52e   :  { %v3424_v0 = vmul.f32 %v6204_v46, %v3423_v39  ;;  %v3936_v11 = vsub.f32 %v3828_v32, %v3882_v6  ;;  %v9449_v50 = vmul.f32 %v3388_v49, %v3118_v27  ;;  %v2267_v39 = vmul.f32 %v11774_v19, %v11774_v19  ;;  %v11806_v19 = vld [vmem:[#allocation114_spill] sm:$0xff] }
 0x52f   :  { %v2269_v27 = vmul.f32 %v8827_v14, %v8827_v14  ;;  %v2338_v63 = vmul.f32 %v11806_v19, %v11806_v19 }
 0x530   :  { %v3428_v22 = vsel %vm3427_vm14, %v6204_v46, %v3424_v0  ;;  %v2268_v0 = vmul.f32 %v11775_v53, %v11775_v53  ;;  %v2714_v32 = vadd.f32 %v2267_v39, %v2266_v62  ;;  %v2272_v39 = vmul.f32 %v8857_v45, %v8857_v45 }
 0x531   :  { %v3770_v54 = vmul.f32 %v3428_v22, %v3122_v17 }
 0x532   :  { %v9491_v17 = vpop.f32.mrf.mxu0 }
 0x533   :  { %v3878_v5 = vmul.f32 %v3770_v54, %v9326_v36 }
 0x534   :  { %v9485_v6 = vpop.permute.xlu2 %4037 }
 0x535   :  { %v3932_v42 = vsub.f32 %v3824_v48, %v3878_v5 }
 0x53b   :  { %4092 = vperm.xlu0 %6144, %v3774_v10   ;;  %v9478_v10 = vpop.f32.mrf.mxu3 }
 0x543   :  { %4740 = vperm.xlu0 %6144, %v3936_v11   ;;  %v2715_v11 = vadd.f32 %v2714_v32, %v2268_v0  ;;  %v2271_v32 = vmul.f32 %v8865_v12, %v8865_v12  ;;  %v2303_v12 = vmul.f32 %v11808_v40, %v11808_v40 }
 0x544   :  { %v1849_v33 = vpop.xlane.xlu1 %1848  ;;  %4052 = vperm.xlu2 %6146, %v9449_v50   ;;  %v1894_v44 = vpop.xlane.xlu0 %1893 }
 0x545   :  { %4072 = vperm.xlu1 %6145, %v3770_v54   ;;  %v9456_v56 = vmul.f32 0.0012755102, %v1849_v33  ;;  %v9460_v46 = vmul.f32 0.0012755102, %v1894_v44  ;;  %v2270_v54 = vmul.f32 %v8844_v60, %v8844_v60  ;;  %v11800_v44 = vld [vmem:[#allocation66_spill] sm:$0xff]  ;;  %v9518_v60 = vpop.f32.mrf.mxu3 }
 0x546   :  { %v2337_v5 = vmul.f32 %v11800_v44, %v11800_v44  ;;  %11804 = vst [vmem:[#allocation185_spill] sm:$0xff] %v9518_v60 }
 0x547   :  { %v3027_v43 = vmul.f32 %v9456_v56, %v9456_v56  ;;  %v3032_v36 = vmul.f32 %v9460_v46, %v9460_v46 }
 0x54c   :  { %v2713_v51 = vpop.xlane.xlu1 %2712  ;;  %v2758_v28 = vpop.xlane.xlu0 %2757 }
 0x54d   :  { %v2973_v58 = vmul.f32 0.0012755102, %v2713_v51  ;;  %4720 = vperm.xlu1 %6145, %v3932_v42   ;;  %v2978_v13 = vmul.f32 0.0012755102, %v2758_v28  ;;  %v11801_v42 = vld [vmem:[#allocation162_spill] sm:$0xff]  ;;  %v2716_v28 = vadd.f32 %v2715_v11, %v2269_v27  ;;  %v9520_v27 = vpop.f32.mrf.mxu1 }
 0x54e   :  { %v2301_v51 = vmul.f32 %v11801_v42, %v11801_v42  ;;  %11805 = vst [vmem:[#allocation198_spill] sm:$0xff] %v9520_v27 }
 0x54f   :  { %v3081_v52 = vsub.f32 %v2973_v58, %v3027_v43  ;;  %v3086_v30 = vsub.f32 %v2978_v13, %v3032_v36  ;;  %v11802_v43 = vld [vmem:[#allocation163_spill] sm:$0xff]  ;;  %v9506_v36 = vpop.f32.mrf.mxu2 }
 0x550   :  { %v2302_v58 = vmul.f32 %v11802_v43, %v11802_v43  ;;  %v1895_v62 = vadd.f32 %v11802_v43, %v11801_v42  ;;  %v11862_v43 = vld [vmem:[#allocation107_spill] sm:$0xff] }
 0x551   :  { %v3189_v35 = vadd.f32 1e-05, %v3081_v52  ;;  %v9472_v47 = vadd.f32 1e-05, %v3086_v30  ;;  %v11803_v52 = vld [vmem:[#allocation19_spill] sm:$0xff] }
 0x552   :  { %v2336_v30 = vmul.f32 %v11803_v52, %v11803_v52  ;;  %v1940_v14 = vadd.f32 %v11800_v44, %v11803_v52  ;;  %v11815_v44 = vld [vmem:[#allocation63_spill] sm:$0xff]  ;;  %v2963_v52 = vmul.f32 0.0012755102, %v8447_v2 }
 0x553   :  { %6205 = vrsqrt.f32 %v3189_v35  ;;  %vm3555_vm0 = vweird.f32 %v3189_v35  ;;  %vm3605_vm4 = vweird.f32 %v9472_v47 }
 0x554   :  { %6207 = vrsqrt.f32 %v9472_v47  ;;  %v2804_v53 = vadd.f32 %v2337_v5, %v2336_v30  ;;  %v2339_v5 = vmul.f32 %v9518_v60, %v9518_v60  ;;  %v1941_v30 = vadd.f32 %v1940_v14, %v11806_v19  ;;  %v3135_v14 = vld [vmem:[%s10715_s2 + $0x110] sm:$0xff] }
 0x559   :  { %v9489_v49 = vpop.eup %6205 }
 0x55a   :  { %v9493_v22 = vpop.eup %6207  ;;  %v3550_v33 = vmul.f32 %v9489_v49, %v3189_v35  ;;  %vm3556_vm15 = vweird.f32 %v9489_v49 }
 0x55b   :  { %v3600_v48 = vmul.f32 %v9493_v22, %v9472_v47  ;;  %vm9542_vm3 = vmor %vm3555_vm0, %vm3556_vm15  ;;  %vm3606_vm1 = vweird.f32 %v9493_v22 }
 0x55c   :  { %v3551_v13 = vmul.f32 %v9489_v49, %v3550_v33  ;;  %v2717_v33 = vadd.f32 %v2716_v28, %v2270_v54  ;;  %v1896_v54 = vadd.f32 %v1895_v62, %v11808_v40  ;;  %vm9583_vm5 = vmor %vm3605_vm4, %vm3606_vm1  ;;  %v11826_v40 = vld [vmem:[#allocation244_spill] sm:$0xff] }
 0x55d   :  { %v3601_v0 = vmul.f32 %v9493_v22, %v3600_v48  ;;  %v2759_v48 = vadd.f32 %v2302_v58, %v2301_v51 }
 0x55e   :  { %v3552_v11 = vmul.f32 0.5, %v3551_v13  ;;  %v9526_v45 = vpop.xlane.xlu2 %2694  ;;  %v2719_v13 = vsel %vm1539_vm2, %v2272_v39, 0.0  ;;  %v2718_v58 = vadd.f32 %v2717_v33, %v2271_v32  ;;  %v9561_v32 = vpop.f32.mrf.mxu2  ;;  %v11813_v33 = vld [vmem:[#allocation60_spill] sm:$0xff] }
 0x55f   :  { %v3602_v31 = vmul.f32 0.5, %v3601_v0  ;;  %11807 = vst [vmem:[#allocation199_spill] sm:$0xff] %v9526_v45  ;;  %v9531_v29 = vpop.permute.xlu0 %4077  ;;  %v1897_v0 = vadd.f32 %v1896_v54, %v9222_v21  ;;  %v9540_v45 = vpop.f32.mrf.mxu0  ;;  %v9546_v62 = vadd.f32 %v2759_v48, %v2303_v12  ;;  %v4333_v48 = vmul.f32 %v9485_v6, %v11813_v33  ;;  %v11814_v54 = vld [vmem:[#allocation61_spill] sm:$0xff] }
 0x560   :  { %v3553_v18 = vsub.f32 1.5, %v3552_v11  ;;  %v2805_v11 = vadd.f32 %v2804_v53, %v2338_v63  ;;  %11809 = vst [vmem:[#allocation201_spill] sm:$0xff] %v9540_v45  ;;  %v2720_v39 = vadd.f32 %v2719_v13, %v2718_v58  ;;  %v4334_v13 = vmul.f32 %v9485_v6, %v11814_v54 }
 0x561   :  { %v3603_v28 = vsub.f32 1.5, %v3602_v31  ;;  %v1942_v31 = vadd.f32 %v1941_v30, %v9518_v60  ;;  %v9556_v53 = vadd.f32 %v1897_v0, %v9231_v38  ;;  %11812 = vst [vmem:[#allocation56_spill] sm:$0xff] %v9561_v32  ;;  %v11816_v30 = vld [vmem:[#allocation208_spill] sm:$0xff]  ;;  %v2340_v47 = vmul.f32 %v9540_v45, %v9540_v45 }
 0x562   :  { %v3554_v51 = vmul.f32 %v9489_v49, %v3553_v18  ;;  %v2806_v63 = vadd.f32 %v2805_v11, %v2339_v5  ;;  %v9570_v5 = vmul.f32 0.0012755102, %v8416_v57  ;;  %v9579_v11 = vpop.f32.mrf.mxu1 }
 0x563   :  { %v3604_v35 = vmul.f32 %v9493_v22, %v3603_v28  ;;  %v1943_v12 = vadd.f32 %v1942_v31, %v9540_v45  ;;  %v4336_v28 = vmul.f32 %v9485_v6, %v11816_v30  ;;  %11817 = vst [vmem:[#allocation57_spill] sm:$0xff] %v9579_v11  ;;  %v11818_v31 = vld [vmem:[#allocation217_spill] sm:$0xff]  ;;  %v11821_v30 = vld [vmem:[#allocation218_spill] sm:$0xff] }
 0x564   :  { %v3558_v18 = vsel %vm9542_vm3, %v9489_v49, %v3554_v51  ;;  %v4335_v49 = vmul.f32 %v9485_v6, %v11815_v44  ;;  %v9575_v51 = vpop.permute.xlu1 %4057  ;;  %v4337_v33 = vmul.f32 %v9485_v6, %v11818_v31  ;;  %v4338_v19 = vmul.f32 %v9485_v6, %v11821_v30 }
 0x565   :  { %v9577_v0 = vmul.f32 %v3558_v18, %v3135_v14  ;;  %v3140_v18 = vld [vmem:[%s10715_s2 + $0x138] sm:$0xff]  ;;  %v3608_v31 = vsel %vm9583_vm5, %v9493_v22, %v3604_v35  ;;  %v1945_v30 = vsel %vm1539_vm2, %v9561_v32, 0.0  ;;  %v1944_v7 = vadd.f32 %v1943_v12, %v9579_v11 }
 0x566   :  { %v4686_v58 = vpop.permute.xlu2 %4685  ;;  %v3017_v2 = vmul.f32 %v9570_v5, %v9570_v5  ;;  %v9613_v54 = vmul.f32 %v3608_v31, %v3140_v18 }
 0x567   :  { %v4981_v57 = vadd.f32 %v4686_v58, %v4333_v48  ;;  %v4982_v44 = vadd.f32 %v4686_v58, %v4334_v13  ;;  %v4983_v60 = vadd.f32 %v4686_v58, %v4335_v49  ;;  %v4984_v14 = vadd.f32 %v4686_v58, %v4336_v28  ;;  %v11822_v48 = vld [vmem:[#allocation220_spill] sm:$0xff]  ;;  %v4726_v45 = vpop.permute.xlu0 %4725 }
 0x568   :  { %v4339_v13 = vmul.f32 %v9485_v6, %v11822_v48  ;;  %v4985_v49 = vadd.f32 %v4686_v58, %v4337_v33  ;;  %v4389_v28 = vmul.f32 %v9531_v29, %v11535_v15  ;;  %v4986_v26 = vadd.f32 %v4686_v58, %v4338_v19  ;;  %v11823_v6 = vld [vmem:[#allocation93_spill] sm:$0xff]  ;;  %11824 = vst [vmem:[#allocation59_spill] sm:$0xff] %v9613_v54  ;;  %v11825_v19 = vld [vmem:[#allocation95_spill] sm:$0xff] }
 0x569   :  { %5359 = vst [vmem:[#allocation5 + $0x310] sm:$0xff] %v4981_v57  ;;  %v9607_v22 = vmul.f32 %v9577_v0, %v9456_v56  ;;  %v4390_v35 = vmul.f32 %v9531_v29, %v11823_v6  ;;  %v2341_v15 = vmul.f32 %v9579_v11, %v9579_v11  ;;  %v4391_v12 = vmul.f32 %v9531_v29, %v11825_v19 }
 0x56a   :  { %5360 = vst [vmem:[#allocation5 + $0x318] sm:$0xff] %v4982_v44  ;;  %v4987_v33 = vadd.f32 %v4686_v58, %v4339_v13  ;;  %v5037_v57 = vadd.f32 %v4726_v45, %v4389_v28  ;;  %v1946_v56 = vadd.f32 %v1945_v30, %v1944_v7  ;;  %v2342_v44 = vmul.f32 %v9561_v32, %v9561_v32  ;;  %v11827_v58 = vld [vmem:[#allocation252_spill] sm:$0xff] }
 0x56b   :  { %5361 = vst [vmem:[#allocation5 + $0x320] sm:$0xff] %v4983_v60  ;;  %v3071_v48 = vsub.f32 %v2963_v52, %v3017_v2  ;;  %v4392_v6 = vmul.f32 %v9531_v29, %v11826_v40  ;;  %v5038_v60 = vadd.f32 %v4726_v45, %v4390_v35  ;;  %v4393_v18 = vmul.f32 %v9531_v29, %v11827_v58  ;;  %v11831_v35 = vld [vmem:[#allocation76_spill] sm:$0xff] }
 0x56c   :  { %5362 = vst [vmem:[#allocation5 + $0x328] sm:$0xff] %v4984_v14  ;;  %v5039_v31 = vadd.f32 %v4726_v45, %v4391_v12  ;;  %v2807_v13 = vadd.f32 %v2806_v63, %v2340_v47  ;;  %v2304_v7 = vmul.f32 %v9222_v21, %v9222_v21  ;;  %v11828_v14 = vld [vmem:[#allocation255_spill] sm:$0xff]  ;;  %v9632_v40 = vmul.f32 %v9613_v54, %v9460_v46  ;;  %v4706_v47 = vpop.permute.xlu1 %4705  ;;  %v11832_v12 = vld [vmem:[#allocation77_spill] sm:$0xff] }
 0x56d   :  { %5363 = vst [vmem:[#allocation5 + $0x330] sm:$0xff] %v4985_v49  ;;  %2721 = vadd.xlane.f32.xlu2 %v2720_v39  ;;  %1947 = vadd.xlane.f32.xlu0 %v1946_v56  ;;  %v4394_v30 = vmul.f32 %v9531_v29, %v11828_v14  ;;  %v5040_v52 = vadd.f32 %v4726_v45, %v4392_v6  ;;  %v11830_v49 = vld [vmem:[#allocation254_spill] sm:$0xff]  ;;  %v1900_v28 = vsel %vm1539_vm2, %v9235_v41, 0.0  ;;  %v3179_v2 = vadd.f32 1e-05, %v3071_v48 }
 0x56e   :  { %5364 = vst [vmem:[#allocation5 + $0x338] sm:$0xff] %v4986_v26  ;;  %v2305_v26 = vmul.f32 %v9231_v38, %v9231_v38  ;;  %v4395_v39 = vmul.f32 %v9531_v29, %v11830_v49  ;;  %v5041_v63 = vadd.f32 %v4726_v45, %v4393_v18  ;;  %v2809_v46 = vsel %vm1539_vm2, %v2342_v44, 0.0  ;;  %v11833_v18 = vld [vmem:[#allocation79_spill] sm:$0xff]  ;;  %v11836_v49 = vld [vmem:[#allocation234_spill] sm:$0xff]  ;;  %v11861_v38 = vld [vmem:[#allocation105_spill] sm:$0xff] }
 0x56f   :  { %5365 = vst.msk [vmem:[#allocation5 + $0x340] sm:$0xff] %vm1539_vm2, %v4987_v33  ;;  %v4361_v33 = vmul.f32 %v9575_v51, %v11831_v35  ;;  %v5042_v19 = vadd.f32 %v4726_v45, %v4394_v30  ;;  %v4362_v56 = vmul.f32 %v9575_v51, %v11832_v12  ;;  %v2808_v29 = vadd.f32 %v2807_v13, %v2341_v15  ;;  %v11834_v44 = vld [vmem:[#allocation227_spill] sm:$0xff] }
 0x570   :  { %11829 = vst [vmem:[#allocation204_spill] sm:$0xff] %v9632_v40  ;;  %v5043_v6 = vadd.f32 %v4726_v45, %v4395_v39  ;;  %v2761_v58 = vadd.f32 %v9546_v62, %v2304_v7  ;;  %v2306_v48 = vmul.f32 %v9241_v61, %v9241_v61  ;;  %v4363_v14 = vmul.f32 %v9575_v51, %v11833_v18  ;;  %v11835_v62 = vld [vmem:[#allocation233_spill] sm:$0xff]  ;;  %v11837_v35 = vld [vmem:[#allocation235_spill] sm:$0xff]  ;;  %v11857_v40 = vld [vmem:[#allocation58_spill] sm:$0xff] }
 0x571   :  { %5415 = vst [vmem:[#allocation5 + $0x4d0] sm:$0xff] %v5037_v57  ;;  %v1899_v57 = vadd.f32 %v9556_v53, %v9241_v61  ;;  %v4364_v30 = vmul.f32 %v9575_v51, %v11834_v44  ;;  %v5010_v45 = vadd.f32 %v4706_v47, %v4362_v56  ;;  %v2307_v53 = vmul.f32 %v9235_v41, %v9235_v41 }
 0x572   :  { %5416 = vst [vmem:[#allocation5 + $0x4d8] sm:$0xff] %v5038_v60  ;;  %v5009_v60 = vadd.f32 %v4706_v47, %v4361_v33  ;;  %6209 = vrsqrt.f32 %v3179_v2  ;;  %v4365_v13 = vmul.f32 %v9575_v51, %v11835_v62  ;;  %v5011_v7 = vadd.f32 %v4706_v47, %v4363_v14  ;;  %v3831_v14 = vld [vmem:[%s10716_s3 + $0xe0] sm:$0xff] }
 0x573   :  { %5417 = vst [vmem:[#allocation5 + $0x4e0] sm:$0xff] %v5039_v31  ;;  %v2810_v31 = vadd.f32 %v2809_v46, %v2808_v29  ;;  %v1901_v15 = vadd.f32 %v1900_v28, %v1899_v57  ;;  %v5012_v39 = vadd.f32 %v4706_v47, %v4364_v30  ;;  %v4367_v28 = vmul.f32 %v9575_v51, %v11837_v35 }
 0x574   :  { %5418 = vst [vmem:[#allocation5 + $0x4e8] sm:$0xff] %v5040_v52  ;;  %v4366_v52 = vmul.f32 %v9575_v51, %v11836_v49  ;;  %v5013_v33 = vadd.f32 %v4706_v47, %v4365_v13  ;;  %v3874_v51 = vmul.f32 %v9449_v50, %v9268_v24  ;;  %v3939_v44 = vsub.f32 %v3831_v14, %v9085_v25  ;;  %v3125_v50 = vld [vmem:[%s10715_s2 + $0xc0] sm:$0xff] }
 0x575   :  { %5419 = vst [vmem:[#allocation5 + $0x4f0] sm:$0xff] %v5041_v63  ;;  %2811 = vadd.xlane.f32.xlu0 %v2810_v31  ;;  %v2762_v63 = vadd.f32 %v2761_v58, %v2305_v26  ;;  %v5015_v12 = vadd.f32 %v4706_v47, %v4367_v28  ;;  %vm3455_vm7 = vweird.f32 %v3179_v2 }
 0x576   :  { %5420 = vst [vmem:[#allocation5 + $0x4f8] sm:$0xff] %v5042_v19  ;;  %v5014_v46 = vadd.f32 %v4706_v47, %v4366_v52  ;;  %v2764_v19 = vsel %vm1539_vm2, %v2307_v53, 0.0  ;;  %v3820_v47 = vld [vmem:[%s10716_s3 + $0x88] sm:$0xff]  ;;  %v3827_v52 = vld [vmem:[%s10716_s3 + $0xc0] sm:$0xff] }
 0x577   :  { %5421 = vst.msk [vmem:[#allocation5 + $0x500] sm:$0xff] %vm1539_vm2, %v5043_v6  ;;  %1902 = vadd.xlane.f32.xlu1 %v1901_v15  ;;  %v2763_v56 = vadd.f32 %v2762_v63, %v2306_v48  ;;  %v3928_v58 = vsub.f32 %v3820_v47, %v3874_v51  ;;  %v11839_v15 = vld [vmem:[#allocation290_spill] sm:$0xff] }
 0x578   :  { %5387 = vst [vmem:[#allocation5 + $0x3f0] sm:$0xff] %v5009_v60  ;;  %v6210_v29 = vpop.eup %6209  ;;  %v2959_v53 = vmul.f32 0.0012755102, %v11839_v15 }
 0x579   :  { %5388 = vst [vmem:[#allocation5 + $0x3f8] sm:$0xff] %v5010_v45  ;;  %v2765_v6 = vadd.f32 %v2764_v19, %v2763_v56  ;;  %v3450_v26 = vmul.f32 %v6210_v29, %v3179_v2  ;;  %vm3456_vm6 = vweird.f32 %v6210_v29  ;;  %v11838_v45 = vld [vmem:[#allocation92_spill] sm:$0xff]  ;;  %v11840_v56 = vld [vmem:[#allocation155_spill] sm:$0xff] }
 0x57a   :  { %5389 = vst [vmem:[#allocation5 + $0x400] sm:$0xff] %v5011_v7  ;;  %vm3457_vm8 = vmor %vm3455_vm7, %vm3456_vm6 }
 0x57b   :  { %5390 = vst [vmem:[#allocation5 + $0x408] sm:$0xff] %v5012_v39  ;;  %v3451_v57 = vmul.f32 %v6210_v29, %v3450_v26  ;;  %v9690_v39 = vpop.f32.mrf.mxu3 }
 0x57c   :  { %5391 = vst [vmem:[#allocation5 + $0x410] sm:$0xff] %v5013_v33  ;;  %v9696_v33 = vpop.f32.mrf.mxu0 }
 0x57d   :  { %5392 = vst [vmem:[#allocation5 + $0x418] sm:$0xff] %v5014_v46  ;;  %v3452_v18 = vmul.f32 0.5, %v3451_v57  ;;  %v9704_v57 = vpop.f32.mrf.mxu2 }
 0x57e   :  { %5393 = vst.msk [vmem:[#allocation5 + $0x420] sm:$0xff] %vm1539_vm2, %v5015_v12 }
 0x57f   :  { %2766 = vadd.xlane.f32.xlu1 %v2765_v6  ;;  %v3453_v48 = vsub.f32 1.5, %v3452_v18 }
 0x581   :  { %v3454_v60 = vmul.f32 %v6210_v29, %v3453_v48  ;;  %v11842_v48 = vld [vmem:[#allocation158_spill] sm:$0xff] }
 0x583   :  { %v3458_v30 = vsel %vm3457_vm8, %v6210_v29, %v3454_v60  ;;  %v11841_v29 = vld [vmem:[#allocation156_spill] sm:$0xff] }
 0x584   :  { %v3773_v31 = vmul.f32 %v3458_v30, %v3125_v50  ;;  %v1877_v6 = vadd.f32 %v11841_v29, %v11840_v56  ;;  %v9713_v50 = vpop.f32.mrf.mxu3  ;;  %v9717_v15 = vpop.f32.mrf.mxu0 }
 0x585   :  { %4700 = vperm.xlu2 %6146, %v3928_v58   ;;  %v9706_v58 = vpop.f32.mrf.mxu1  ;;  %11844 = vst [vmem:[#allocation214_spill] sm:$0xff] %v9713_v50 }
 0x586   :  { %v3881_v2 = vmul.f32 %v3773_v31, %v9570_v5  ;;  %v1878_v14 = vadd.f32 %v1877_v6, %v11842_v48  ;;  %11846 = vst [vmem:[#allocation215_spill] sm:$0xff] %v9717_v15 }
 0x588   :  { %v3935_v12 = vsub.f32 %v3827_v52, %v3881_v2 }
 0x589   :  { %4107 = vperm.xlu0 %6144, %v9069_v9   ;;  %v9679_v9 = vmul.f32 0.0012755102, %v11838_v45  ;;  %v11845_v45 = vld [vmem:[#allocation187_spill] sm:$0xff] }
 0x58b   :  { %v3013_v25 = vmul.f32 %v9679_v9, %v9679_v9 }
 0x58c   :  { %v9750_v50 = vpop.f32.mrf.mxu0 }
 0x58d   :  { %v3067_v7 = vsub.f32 %v2959_v53, %v3013_v25  ;;  %v9721_v25 = vpop.f32.mrf.mxu2  ;;  %11855 = vst [vmem:[#allocation284_spill] sm:$0xff] %v9750_v50 }
 0x58e   :  { %11847 = vst [vmem:[#allocation216_spill] sm:$0xff] %v9721_v25 }
 0x58f   :  { %v9698_v19 = vadd.f32 1e-05, %v3067_v7  ;;  %v11848_v7 = vld [vmem:[#allocation281_spill] sm:$0xff] }
 0x591   :  { %4755 = vperm.xlu0 %6144, %v3939_v44   ;;  %v11843_v44 = vld [vmem:[#allocation270_spill] sm:$0xff]  ;;  %vm3415_vm0 = vweird.f32 %v9698_v19 }
 0x592   :  { %v1921_v24 = vpop.xlane.xlu0 %1920 }
 0x593   :  { %v9682_v13 = vmul.f32 0.0012755102, %v1921_v24  ;;  %v1879_v24 = vadd.f32 %v1878_v14, %v11843_v44 }
 0x595   :  { %v3035_v63 = vmul.f32 %v9682_v13, %v9682_v13 }
 0x597   :  { %v1876_v62 = vpop.xlane.xlu1 %1875 }
 0x598   :  { %4087 = vperm.xlu1 %6145, %v3773_v31   ;;  %v9694_v35 = vmul.f32 0.0012755102, %v1876_v62  ;;  %v1880_v31 = vadd.f32 %v1879_v24, %v11845_v45  ;;  %v11852_v24 = vld [vmem:[#allocation30_spill] sm:$0xff] }
 0x599   :  { %v2357_v25 = vmul.f32 %v11852_v24, %v11852_v24 }
 0x59a   :  { %v2785_v49 = vpop.xlane.xlu0 %2784  ;;  %v3030_v26 = vmul.f32 %v9694_v35, %v9694_v35 }
 0x59b   :  { %v2981_v28 = vmul.f32 0.0012755102, %v2785_v49  ;;  %v1882_v49 = vsel %vm1539_vm2, %v11848_v7, 0.0 }
 0x59d   :  { %v3089_v46 = vsub.f32 %v2981_v28, %v3035_v63  ;;  %v9729_v28 = vpop.f32.mrf.mxu1 }
 0x59e   :  { %11849 = vst [vmem:[#allocation11_spill] sm:$0xff] %v9729_v28  ;;  %v9743_v28 = vpop.f32.mrf.mxu3 }
 0x59f   :  { %v2740_v5 = vpop.xlane.xlu1 %2739  ;;  %v3197_v51 = vadd.f32 1e-05, %v3089_v46  ;;  %v11850_v46 = vld [vmem:[#allocation188_spill] sm:$0xff]  ;;  %11854 = vst [vmem:[#allocation150_spill] sm:$0xff] %v9743_v28 }
 0x5a0   :  { %v2976_v47 = vmul.f32 0.0012755102, %v2740_v5  ;;  %4735 = vperm.xlu1 %6145, %v3935_v12   ;;  %v1881_v12 = vadd.f32 %v1880_v31, %v11850_v46  ;;  %v11853_v31 = vld [vmem:[#allocation126_spill] sm:$0xff] }
 0x5a1   :  { %6211 = vrsqrt.f32 %v3197_v51  ;;  %vm3635_vm10 = vweird.f32 %v3197_v51 }
 0x5a2   :  { %v3084_v18 = vsub.f32 %v2976_v47, %v3030_v26  ;;  %6213 = vrsqrt.f32 %v9698_v19  ;;  %v11851_v26 = vld [vmem:[#allocation78_spill] sm:$0xff] }
 0x5a3   :  { %v2358_v47 = vmul.f32 %v11851_v26, %v11851_v26 }
 0x5a4   :  { %v9710_v60 = vadd.f32 1e-05, %v3084_v18  ;;  %v1883_v18 = vadd.f32 %v1882_v49, %v1881_v12 }
 0x5a6   :  { %6215 = vrsqrt.f32 %v9710_v60  ;;  %vm3585_vm13 = vweird.f32 %v9710_v60 }
 0x5a7   :  { %v6212_v30 = vpop.eup %6211 }
 0x5a8   :  { %v9719_v53 = vpop.eup %6213  ;;  %v3630_v62 = vmul.f32 %v6212_v30, %v3197_v51  ;;  %vm3636_vm9 = vweird.f32 %v6212_v30 }
 0x5a9   :  { %v3410_v63 = vmul.f32 %v9719_v53, %v9698_v19  ;;  %vm3637_vm11 = vmor %vm3635_vm10, %vm3636_vm9  ;;  %vm3416_vm15 = vweird.f32 %v9719_v53  ;;  %v3121_v19 = vld [vmem:[%s10715_s2 + $0xa0] sm:$0xff] }
 0x5aa   :  { %v3631_v2 = vmul.f32 %v6212_v30, %v3630_v62  ;;  %v1967_v62 = vadd.f32 %v11851_v26, %v11852_v24  ;;  %v11856_v24 = vld [vmem:[#allocation12_spill] sm:$0xff]  ;;  %vm9820_vm3 = vmor %vm3415_vm0, %vm3416_vm15 }
 0x5ab   :  { %v3411_v15 = vmul.f32 %v9719_v53, %v3410_v63  ;;  %v1922_v54 = vadd.f32 %v11857_v40, %v11856_v24  ;;  %v2322_v27 = vmul.f32 %v11856_v24, %v11856_v24 }
 0x5ac   :  { %v9725_v52 = vpop.eup %6215  ;;  %v3632_v5 = vmul.f32 0.5, %v3631_v2  ;;  %v2359_v2 = vmul.f32 %v11853_v31, %v11853_v31  ;;  %v1968_v49 = vadd.f32 %v1967_v62, %v11853_v31 }
 0x5ad   :  { %v3580_v6 = vmul.f32 %v9725_v52, %v9710_v60  ;;  %v4093_v14 = vpop.permute.xlu0 %4092  ;;  %vm3586_vm12 = vweird.f32 %v9725_v52 }
 0x5ae   :  { %v3633_v32 = vsub.f32 1.5, %v3632_v5  ;;  %1884 = vadd.xlane.f32.xlu2 %v1883_v18  ;;  %v3143_v5 = vld [vmem:[%s10715_s2 + $0x150] sm:$0xff]  ;;  %v1969_v41 = vadd.f32 %v1968_v49, %v9743_v28  ;;  %v4411_v21 = vmul.f32 %v4093_v14, %v11861_v38  ;;  %v4412_v42 = vmul.f32 %v4093_v14, %v11862_v43  ;;  %v9765_v49 = vpop.f32.mrf.mxu1  ;;  %vm3587_vm14 = vmor %vm3585_vm13, %vm3586_vm12 }
 0x5af   :  { %v3581_v11 = vmul.f32 %v9725_v52, %v3580_v6  ;;  %v2831_v6 = vadd.f32 %v2358_v47, %v2357_v25  ;;  %v9760_v25 = vpop.f32.mrf.mxu2  ;;  %v11860_v47 = vld [vmem:[#allocation104_spill] sm:$0xff]  ;;  %11863 = vst [vmem:[#allocation53_spill] sm:$0xff] %v9765_v49 }
 0x5b0   :  { %v3634_v12 = vmul.f32 %v6212_v30, %v3633_v32  ;;  %v2360_v32 = vmul.f32 %v9743_v28, %v9743_v28  ;;  %v1970_v62 = vadd.f32 %v1969_v41, %v9750_v50  ;;  %11859 = vst [vmem:[#allocation52_spill] sm:$0xff] %v9760_v25  ;;  %v4410_v31 = vmul.f32 %v4093_v14, %v11860_v47 }
 0x5b1   :  { %v3582_v26 = vmul.f32 0.5, %v3581_v11  ;;  %v2832_v61 = vadd.f32 %v2831_v6, %v2359_v2  ;;  %v3412_v11 = vmul.f32 0.5, %v3411_v15  ;;  %v1972_v43 = vsel %vm1539_vm2, %v9760_v25, 0.0 }
 0x5b2   :  { %v3638_v18 = vsel %vm3637_vm11, %v6212_v30, %v3634_v12  ;;  %v11866_v12 = vld [vmem:[#allocation267_spill] sm:$0xff] }
 0x5b3   :  { %v3583_v63 = vsub.f32 1.5, %v3582_v26  ;;  %v9757_v51 = vmul.f32 %v3638_v18, %v3143_v5  ;;  %v11864_v26 = vld [vmem:[#allocation247_spill] sm:$0xff]  ;;  %v4414_v5 = vmul.f32 %v4093_v14, %v11866_v12  ;;  %v2833_v60 = vadd.f32 %v2832_v61, %v2360_v32  ;;  %v11869_v61 = vld [vmem:[#allocation106_spill] sm:$0xff] }
 0x5b4   :  { %v4413_v15 = vmul.f32 %v4093_v14, %v11864_v26  ;;  %v3138_v26 = vld [vmem:[%s10715_s2 + $0x128] sm:$0xff] }
 0x5b5   :  { %11858 = vst [vmem:[#allocation289_spill] sm:$0xff] %v9757_v51  ;;  %v3584_v30 = vmul.f32 %v9725_v52, %v3583_v63  ;;  %v4741_v2 = vpop.permute.xlu0 %4740  ;;  %v9772_v41 = vmul.f32 %v9757_v51, %v9682_v13  ;;  %v11867_v63 = vld [vmem:[#allocation269_spill] sm:$0xff]  ;;  %v2361_v13 = vmul.f32 %v9750_v50, %v9750_v50  ;;  %v2363_v51 = vmul.f32 %v9760_v25, %v9760_v25 }
 0x5b6   :  { %v5058_v6 = vadd.f32 %v4741_v2, %v4410_v31  ;;  %v5059_v18 = vadd.f32 %v4741_v2, %v4411_v21  ;;  %v5060_v38 = vadd.f32 %v4741_v2, %v4412_v42  ;;  %v4415_v28 = vmul.f32 %v4093_v14, %v11867_v63  ;;  %v11868_v21 = vld [vmem:[#allocation268_spill] sm:$0xff] }
 0x5b7   :  { %11865 = vst [vmem:[#allocation55_spill] sm:$0xff] %v9772_v41  ;;  %v4073_v47 = vpop.permute.xlu1 %4072  ;;  %v5061_v3 = vadd.f32 %v4741_v2, %v4413_v15  ;;  %v1971_v31 = vadd.f32 %v1970_v62, %v9765_v49  ;;  %v4416_v42 = vmul.f32 %v4093_v14, %v11868_v21  ;;  %v5062_v12 = vadd.f32 %v4741_v2, %v4414_v5 }
 0x5b8   :  { %5436 = vst [vmem:[#allocation5 + $0x578] sm:$0xff] %v5058_v6  ;;  %v5063_v41 = vadd.f32 %v4741_v2, %v4415_v28  ;;  %v3413_v15 = vsub.f32 1.5, %v3412_v11  ;;  %v3588_v63 = vsel %vm3587_vm14, %v9725_v52, %v3584_v30  ;;  %v2323_v14 = vmul.f32 %v11857_v40, %v11857_v40  ;;  %v11871_v6 = vld [vmem:[#allocation89_spill] sm:$0xff] }
 0x5b9   :  { %5437 = vst [vmem:[#allocation5 + $0x580] sm:$0xff] %v5059_v18  ;;  %v5064_v34 = vadd.f32 %v4741_v2, %v4416_v42  ;;  %v1973_v50 = vadd.f32 %v1972_v43, %v1971_v31  ;;  %v9791_v62 = vmul.f32 %v3588_v63, %v3138_v26  ;;  %v1923_v28 = vadd.f32 %v1922_v54, %v11869_v61  ;;  %v11870_v2 = vld [vmem:[#allocation88_spill] sm:$0xff] }
 0x5ba   :  { %5438 = vst [vmem:[#allocation5 + $0x588] sm:$0xff] %v5060_v38  ;;  %v2834_v32 = vadd.f32 %v2833_v60, %v2361_v13  ;;  %v2362_v52 = vmul.f32 %v9765_v49, %v9765_v49  ;;  %v4382_v5 = vmul.f32 %v4073_v47, %v11870_v2  ;;  %v4383_v18 = vmul.f32 %v4073_v47, %v11871_v6  ;;  %v11872_v38 = vld [vmem:[#allocation91_spill] sm:$0xff]  ;;  %v11876_v2 = vld [vmem:[#allocation250_spill] sm:$0xff] }
 0x5bb   :  { %5439 = vst [vmem:[#allocation5 + $0x590] sm:$0xff] %v5061_v3  ;;  %1974 = vadd.xlane.f32.xlu0 %v1973_v50  ;;  %v9802_v11 = vmul.f32 %v9791_v62, %v9694_v35  ;;  %v1924_v30 = vadd.f32 %v1923_v28, %v9458_v8  ;;  %v4384_v54 = vmul.f32 %v4073_v47, %v11872_v38  ;;  %v11873_v3 = vld [vmem:[#allocation240_spill] sm:$0xff]  ;;  %v2836_v50 = vsel %vm1539_vm2, %v2363_v51, 0.0  ;;  %v11875_v60 = vld [vmem:[#allocation251_spill] sm:$0xff]  ;;  %v11944_v49 = vld [vmem:[#allocation278_spill] sm:$0xff] }
 0x5bc   :  { %5440 = vst [vmem:[#allocation5 + $0x598] sm:$0xff] %v5062_v12  ;;  %v4385_v43 = vmul.f32 %v4073_v47, %v11873_v3  ;;  %v3414_v13 = vmul.f32 %v9719_v53, %v3413_v15  ;;  %v11874_v35 = vld [vmem:[#allocation248_spill] sm:$0xff]  ;;  %v2835_v12 = vadd.f32 %v2834_v32, %v2362_v52  ;;  %v4387_v63 = vmul.f32 %v4073_v47, %v11875_v60  ;;  %v3834_v60 = vld [vmem:[%s10716_s3 + $0xf8] sm:$0xff] }
 0x5bd   :  { %5441 = vst [vmem:[#allocation5 + $0x5a0] sm:$0xff] %v5063_v41  ;;  %v4386_v31 = vmul.f32 %v4073_v47, %v11874_v35  ;;  %v1925_v51 = vadd.f32 %v1924_v30, %v9468_v37  ;;  %v4388_v15 = vmul.f32 %v4073_v47, %v11876_v2  ;;  %v2786_v30 = vadd.f32 %v2323_v14, %v2322_v27 }
 0x5be   :  { %5442 = vst.msk [vmem:[#allocation5 + $0x5a8] sm:$0xff] %vm1539_vm2, %v5064_v34  ;;  %v2324_v34 = vmul.f32 %v11869_v61, %v11869_v61  ;;  %v2837_v32 = vadd.f32 %v2836_v50, %v2835_v12  ;;  %v3418_v52 = vsel %vm9820_vm3, %v9719_v53, %v3414_v13  ;;  %v2325_v47 = vmul.f32 %v9458_v8, %v9458_v8 }
 0x5bf   :  { %v4721_v26 = vpop.permute.xlu1 %4720  ;;  %v9836_v50 = vmul.f32 %v3418_v52, %v3121_v19  ;;  %v1926_v53 = vadd.f32 %v1925_v51, %v9480_v23  ;;  %v2327_v13 = vmul.f32 %v9480_v23, %v9480_v23  ;;  %v2289_v2 = vmul.f32 %v11842_v48, %v11842_v48 }
 0x5c0   :  { %v5030_v41 = vadd.f32 %v4721_v26, %v4382_v5  ;;  %v5031_v21 = vadd.f32 %v4721_v26, %v4383_v18  ;;  %v5032_v42 = vadd.f32 %v4721_v26, %v4384_v54  ;;  %v5033_v28 = vadd.f32 %v4721_v26, %v4385_v43 }
 0x5c1   :  { %v5034_v6 = vadd.f32 %v4721_v26, %v4386_v31  ;;  %v5035_v5 = vadd.f32 %v4721_v26, %v4387_v63  ;;  %v5036_v18 = vadd.f32 %v4721_v26, %v4388_v15  ;;  %v1927_v54 = vsel %vm1539_vm2, %v9470_v55, 0.0 }
 0x5c2   :  { %5408 = vst [vmem:[#allocation5 + $0x498] sm:$0xff] %v5030_v41  ;;  %v2787_v3 = vadd.f32 %v2786_v30, %v2324_v34  ;;  %v2326_v43 = vmul.f32 %v9468_v37, %v9468_v37  ;;  %v1928_v14 = vadd.f32 %v1927_v54, %v1926_v53  ;;  %v2328_v26 = vmul.f32 %v9470_v55, %v9470_v55  ;;  %v9871_v30 = vpop.f32.mrf.mxu3  ;;  %v11882_v54 = vld [vmem:[#allocation73_spill] sm:$0xff] }
 0x5c3   :  { %5409 = vst [vmem:[#allocation5 + $0x4a0] sm:$0xff] %v5031_v21  ;;  %2838 = vadd.xlane.f32.xlu0 %v2837_v32  ;;  %v9846_v21 = vpop.xlane.xlu2 %1857  ;;  %v2287_v63 = vmul.f32 %v11840_v56, %v11840_v56  ;;  %v3942_v34 = vsub.f32 %v3834_v60, %v9362_v16  ;;  %v2293_v32 = vmul.f32 %v11848_v7, %v11848_v7 }
 0x5c4   :  { %5410 = vst [vmem:[#allocation5 + $0x4a8] sm:$0xff] %v5032_v42  ;;  %v2788_v27 = vadd.f32 %v2787_v3, %v2325_v47  ;;  %v2791_v31 = vsel %vm1539_vm2, %v2328_v26, 0.0  ;;  %v2292_v16 = vmul.f32 %v11850_v46, %v11850_v46  ;;  %v11881_v47 = vld [vmem:[#allocation72_spill] sm:$0xff] }
 0x5c5   :  { %5411 = vst [vmem:[#allocation5 + $0x4b0] sm:$0xff] %v5033_v28  ;;  %v2288_v28 = vmul.f32 %v11841_v29, %v11841_v29 }
 0x5c6   :  { %5412 = vst [vmem:[#allocation5 + $0x4b8] sm:$0xff] %v5034_v6  ;;  %4067 = vperm.xlu2 %6146, %v9836_v50   ;;  %v2789_v35 = vadd.f32 %v2788_v27, %v2326_v43  ;;  %v2290_v6 = vmul.f32 %v11843_v44, %v11843_v44  ;;  %v11883_v43 = vld [vmem:[#allocation75_spill] sm:$0xff] }
 0x5c7   :  { %5413 = vst [vmem:[#allocation5 + $0x4c0] sm:$0xff] %v5035_v5  ;;  %v2741_v51 = vadd.f32 %v2288_v28, %v2287_v63  ;;  %v2291_v5 = vmul.f32 %v11845_v45, %v11845_v45  ;;  %v11905_v45 = vld [vmem:[#allocation119_spill] sm:$0xff] }
 0x5c8   :  { %5414 = vst.msk [vmem:[#allocation5 + $0x4c8] sm:$0xff] %vm1539_vm2, %v5036_v18  ;;  %v2790_v41 = vadd.f32 %v2789_v35, %v2327_v13 }
 0x5c9   :  { %11879 = vst [vmem:[#allocation200_spill] sm:$0xff] %v9846_v21  ;;  %v2742_v38 = vadd.f32 %v2741_v51, %v2289_v2  ;;  %v9880_v51 = vpop.f32.mrf.mxu0  ;;  %v11887_v2 = vld [vmem:[#allocation230_spill] sm:$0xff] }
 0x5ca   :  { %1929 = vadd.xlane.f32.xlu1 %v1928_v14  ;;  %v2792_v42 = vadd.f32 %v2791_v31, %v2790_v41  ;;  %v11884_v14 = vld [vmem:[#allocation223_spill] sm:$0xff]  ;;  %v2746_v31 = vsel %vm1539_vm2, %v2293_v32, 0.0  ;;  %v11885_v41 = vld [vmem:[#allocation229_spill] sm:$0xff] }
 0x5cb   :  { %v4053_v12 = vpop.permute.xlu2 %4052  ;;  %v2743_v19 = vadd.f32 %v2742_v38, %v2290_v6 }
 0x5cc   :  { %v4354_v18 = vmul.f32 %v4053_v12, %v11881_v47  ;;  %v4355_v3 = vmul.f32 %v4053_v12, %v11882_v54  ;;  %v4356_v53 = vmul.f32 %v4053_v12, %v11883_v43  ;;  %v4357_v26 = vmul.f32 %v4053_v12, %v11884_v14  ;;  %v9886_v43 = vpop.f32.mrf.mxu2 }
 0x5cd   :  { %v2744_v27 = vadd.f32 %v2743_v19, %v2291_v5  ;;  %v11888_v19 = vld [vmem:[#allocation231_spill] sm:$0xff]  ;;  %11889 = vst [vmem:[#allocation211_spill] sm:$0xff] %v9886_v43 }
 0x5ce   :  { %v4360_v47 = vmul.f32 %v4053_v12, %v11888_v19 }
 0x5cf   :  { %v2745_v32 = vadd.f32 %v2744_v27, %v2292_v16  ;;  %v9895_v27 = vpop.f32.mrf.mxu3 }
 0x5d0   :  { %11892 = vst [vmem:[#allocation68_spill] sm:$0xff] %v9895_v27 }
 0x5d2   :  { %2793 = vadd.xlane.f32.xlu1 %v2792_v42  ;;  %v4358_v42 = vmul.f32 %v4053_v12, %v11885_v41  ;;  %v2747_v41 = vadd.f32 %v2746_v31, %v2745_v32  ;;  %v11899_v32 = vld [vmem:[#allocation138_spill] sm:$0xff] }
 0x5d7   :  { %4122 = vperm.xlu0 %6144, %v9344_v20  }
 0x5df   :  { %4770 = vperm.xlu0 %6144, %v3942_v34   ;;  %v11886_v34 = vld [vmem:[#allocation23_spill] sm:$0xff] }
 0x5e0   :  { %v9859_v15 = vpop.xlane.xlu2 %2721  ;;  %v1948_v20 = vpop.xlane.xlu0 %1947 }
 0x5e1   :  { %11880 = vst [vmem:[#allocation210_spill] sm:$0xff] %v9859_v15  ;;  %v9869_v52 = vmul.f32 0.0012755102, %v1948_v20  ;;  %v4359_v20 = vmul.f32 %v4053_v12, %v11887_v2  ;;  %v11891_v12 = vld [vmem:[#allocation179_spill] sm:$0xff]  ;;  %v11896_v2 = vld [vmem:[#allocation90_spill] sm:$0xff] }
 0x5e3   :  { %v3038_v6 = vmul.f32 %v9869_v52, %v9869_v52 }
 0x5e8   :  { %v4701_v13 = vpop.permute.xlu2 %4700  ;;  %v2812_v35 = vpop.xlane.xlu0 %2811 }
 0x5e9   :  { %v5002_v60 = vadd.f32 %v4701_v13, %v4354_v18  ;;  %v5003_v63 = vadd.f32 %v4701_v13, %v4355_v3  ;;  %v5004_v28 = vadd.f32 %v4701_v13, %v4356_v53  ;;  %v5005_v38 = vadd.f32 %v4701_v13, %v4357_v26  ;;  %v3830_v53 = vld [vmem:[%s10716_s3 + $0xd8] sm:$0xff] }
 0x5ea   :  { %v2984_v5 = vmul.f32 0.0012755102, %v2812_v35  ;;  %v5006_v54 = vadd.f32 %v4701_v13, %v4358_v42  ;;  %v5007_v18 = vadd.f32 %v4701_v13, %v4359_v20  ;;  %v5008_v14 = vadd.f32 %v4701_v13, %v4360_v47  ;;  %v9897_v35 = vpop.f32.mrf.mxu0  ;;  %v9899_v42 = vpop.f32.mrf.mxu2 }
 0x5eb   :  { %4102 = vperm.xlu1 %6145, %v11886_v34   ;;  %5380 = vst [vmem:[#allocation5 + $0x3b8] sm:$0xff] %v5002_v60  ;;  %v9891_v34 = vpop.f32.mrf.mxu1  ;;  %v3938_v16 = vsub.f32 %v3830_v53, %v11891_v12  ;;  %v9901_v31 = vpop.xlane.xlu1 %1902  ;;  %v2379_v20 = vmul.f32 %v11896_v2, %v11896_v2 }
 0x5ec   :  { %5381 = vst [vmem:[#allocation5 + $0x3c0] sm:$0xff] %v5003_v63  ;;  %v3092_v3 = vsub.f32 %v2984_v5, %v3038_v6  ;;  %v11897_v6 = vld [vmem:[#allocation42_spill] sm:$0xff] }
 0x5ed   :  { %5382 = vst [vmem:[#allocation5 + $0x3c8] sm:$0xff] %v5004_v28  ;;  %v2378_v47 = vmul.f32 %v11897_v6, %v11897_v6 }
 0x5ee   :  { %11890 = vst [vmem:[#allocation212_spill] sm:$0xff] %v9891_v34  ;;  %v3200_v26 = vadd.f32 1e-05, %v3092_v3 }
 0x5ef   :  { %5383 = vst [vmem:[#allocation5 + $0x3d0] sm:$0xff] %v5005_v38  ;;  %2748 = vadd.xlane.f32.xlu2 %v2747_v41  ;;  %v1994_v38 = vadd.f32 %v11896_v2, %v11897_v6 }
 0x5f0   :  { %5384 = vst [vmem:[#allocation5 + $0x3d8] sm:$0xff] %v5006_v54  ;;  %6217 = vrsqrt.f32 %v3200_v26  ;;  %v9911_v54 = vpop.f32.mrf.mxu3  ;;  %vm3665_vm4 = vweird.f32 %v3200_v26 }
 0x5f1   :  { %5385 = vst [vmem:[#allocation5 + $0x3e0] sm:$0xff] %v5007_v18  ;;  %v2380_v18 = vmul.f32 %v11899_v32, %v11899_v32  ;;  %v1995_v3 = vadd.f32 %v1994_v38, %v11899_v32  ;;  %v2381_v29 = vmul.f32 %v9911_v54, %v9911_v54 }
 0x5f2   :  { %5386 = vst.msk [vmem:[#allocation5 + $0x3e8] sm:$0xff] %vm1539_vm2, %v5008_v14  ;;  %v2858_v14 = vadd.f32 %v2379_v20, %v2378_v47  ;;  %v9916_v41 = vpop.f32.mrf.mxu0  ;;  %v9924_v7 = vpop.f32.mrf.mxu2  ;;  %v3823_v20 = vld [vmem:[%s10716_s3 + $0xa0] sm:$0xff] }
 0x5f3   :  { %4750 = vperm.xlu1 %6145, %v3938_v16   ;;  %11893 = vst [vmem:[#allocation69_spill] sm:$0xff] %v9897_v35  ;;  %v9903_v63 = vpop.f32.mrf.mxu1  ;;  %v1996_v12 = vadd.f32 %v1995_v3, %v9911_v54  ;;  %v9926_v38 = vpop.xlane.xlu1 %2766  ;;  %v1999_v56 = vsel %vm1539_vm2, %v9924_v7, 0.0  ;;  %v11909_v35 = vld [vmem:[#allocation283_spill] sm:$0xff] }
 0x5f4   :  { %11894 = vst [vmem:[#allocation71_spill] sm:$0xff] %v9899_v42 }
 0x5f5   :  { %11895 = vst [vmem:[#allocation219_spill] sm:$0xff] %v9903_v63  ;;  %v1997_v47 = vadd.f32 %v1996_v12, %v9916_v41 }
 0x5f6   :  { %v6218_v13 = vpop.eup %6217  ;;  %11898 = vst [vmem:[#allocation225_spill] sm:$0xff] %v9911_v54 }
 0x5f7   :  { %v3660_v60 = vmul.f32 %v6218_v13, %v3200_v26  ;;  %vm3666_vm1 = vweird.f32 %v6218_v13  ;;  %11900 = vst [vmem:[#allocation226_spill] sm:$0xff] %v9916_v41 }
 0x5f8   :  { %11901 = vst [vmem:[#allocation228_spill] sm:$0xff] %v9924_v7  ;;  %vm3667_vm5 = vmor %vm3665_vm4, %vm3666_vm1 }
 0x5f9   :  { %v3661_v28 = vmul.f32 %v6218_v13, %v3660_v60  ;;  %v3877_v60 = vmul.f32 %v9836_v50, %v9679_v9  ;;  %v11903_v9 = vld [vmem:[#allocation116_spill] sm:$0xff] }
 0x5fb   :  { %v3662_v5 = vmul.f32 0.5, %v3661_v28  ;;  %v4108_v19 = vpop.permute.xlu0 %4107  ;;  %v3146_v28 = vld [vmem:[%s10715_s2 + $0x168] sm:$0xff]  ;;  %v9932_v3 = vpop.f32.mrf.mxu1 }
 0x5fc   :  { %11902 = vst [vmem:[#allocation48_spill] sm:$0xff] %v9932_v3  ;;  %v4431_v50 = vmul.f32 %v4108_v19, %v11903_v9  ;;  %v4433_v44 = vmul.f32 %v4108_v19, %v11905_v45  ;;  %v2382_v45 = vmul.f32 %v9916_v41, %v9916_v41  ;;  %v4437_v54 = vmul.f32 %v4108_v19, %v11909_v35 }
 0x5fd   :  { %v3663_v53 = vsub.f32 1.5, %v3662_v5  ;;  %v2859_v5 = vadd.f32 %v2858_v14, %v2380_v18  ;;  %v11906_v18 = vld [vmem:[#allocation258_spill] sm:$0xff] }
 0x5fe   :  { %v4434_v14 = vmul.f32 %v4108_v19, %v11906_v18 }
 0x5ff   :  { %v3664_v16 = vmul.f32 %v6218_v13, %v3663_v53  ;;  %v11904_v53 = vld [vmem:[#allocation117_spill] sm:$0xff] }
 0x600   :  { %v4432_v46 = vmul.f32 %v4108_v19, %v11904_v53 }
 0x601   :  { %v3668_v26 = vsel %vm3667_vm5, %v6218_v13, %v3664_v16  ;;  %v3931_v13 = vsub.f32 %v3823_v20, %v3877_v60  ;;  %v11907_v16 = vld [vmem:[#allocation282_spill] sm:$0xff]  ;;  %v2860_v20 = vadd.f32 %v2859_v5, %v2381_v29 }
 0x602   :  { %v9937_v48 = vmul.f32 %v3668_v26, %v3146_v28  ;;  %v4435_v15 = vmul.f32 %v4108_v19, %v11907_v16  ;;  %v1998_v28 = vadd.f32 %v1997_v47, %v9932_v3  ;;  %v11908_v26 = vld [vmem:[#allocation285_spill] sm:$0xff]  ;;  %v11911_v29 = vld [vmem:[#allocation70_spill] sm:$0xff]  ;;  %v11915_v16 = vld [vmem:[#allocation103_spill] sm:$0xff] }
 0x603   :  { %v4756_v12 = vpop.permute.xlu0 %4755  ;;  %v4436_v53 = vmul.f32 %v4108_v19, %v11908_v26  ;;  %v11912_v19 = vld [vmem:[#allocation118_spill] sm:$0xff] }
 0x604   :  { %v5079_v21 = vadd.f32 %v4756_v12, %v4431_v50  ;;  %v5080_v9 = vadd.f32 %v4756_v12, %v4432_v46  ;;  %v5081_v63 = vadd.f32 %v4756_v12, %v4433_v44  ;;  %v5082_v42 = vadd.f32 %v4756_v12, %v4434_v14 }
 0x605   :  { %v5083_v27 = vadd.f32 %v4756_v12, %v4435_v15  ;;  %v9952_v60 = vmul.f32 %v9937_v48, %v9869_v52  ;;  %v5084_v50 = vadd.f32 %v4756_v12, %v4436_v53  ;;  %v2000_v44 = vadd.f32 %v1999_v56, %v1998_v28  ;;  %v11916_v28 = vld [vmem:[#allocation246_spill] sm:$0xff] }
 0x606   :  { %5457 = vst [vmem:[#allocation5 + $0x620] sm:$0xff] %v5079_v21  ;;  %v2384_v46 = vmul.f32 %v9924_v7, %v9924_v7  ;;  %v5085_v47 = vadd.f32 %v4756_v12, %v4437_v54  ;;  %v2861_v14 = vadd.f32 %v2860_v20, %v2382_v45  ;;  %v2383_v15 = vmul.f32 %v9932_v3, %v9932_v3  ;;  %v11910_v21 = vld [vmem:[#allocation22_spill] sm:$0xff]  ;;  %v11914_v12 = vld [vmem:[#allocation101_spill] sm:$0xff] }
 0x607   :  { %5458 = vst [vmem:[#allocation5 + $0x628] sm:$0xff] %v5080_v9  ;;  %4715 = vperm.xlu2 %6146, %v3931_v13   ;;  %v1949_v52 = vadd.f32 %v11911_v29, %v11910_v21  ;;  %v11917_v20 = vld [vmem:[#allocation262_spill] sm:$0xff]  ;;  %v11933_v7 = vld [vmem:[#allocation17_spill] sm:$0xff] }
 0x608   :  { %5459 = vst [vmem:[#allocation5 + $0x630] sm:$0xff] %v5081_v63  ;;  %v2863_v56 = vsel %vm1539_vm2, %v2384_v46, 0.0  ;;  %v2862_v35 = vadd.f32 %v2861_v14, %v2383_v15  ;;  %v11913_v63 = vld [vmem:[#allocation100_spill] sm:$0xff]  ;;  %v2343_v14 = vmul.f32 %v11910_v21, %v11910_v21  ;;  %v11918_v15 = vld [vmem:[#allocation265_spill] sm:$0xff] }
 0x609   :  { %5460 = vst [vmem:[#allocation5 + $0x638] sm:$0xff] %v5082_v42  ;;  %2001 = vadd.xlane.f32.xlu0 %v2000_v44  ;;  %v1950_v54 = vadd.f32 %v1949_v52, %v11912_v19 }
 0x60a   :  { %v4088_v18 = vpop.permute.xlu1 %4087  ;;  %5461 = vst [vmem:[#allocation5 + $0x640] sm:$0xff] %v5083_v27  ;;  %v2864_v42 = vadd.f32 %v2863_v56, %v2862_v35  ;;  %v2344_v27 = vmul.f32 %v11911_v29, %v11911_v29  ;;  %v2345_v35 = vmul.f32 %v11912_v19, %v11912_v19 }
 0x60b   :  { %5462 = vst [vmem:[#allocation5 + $0x648] sm:$0xff] %v5084_v50  ;;  %v4403_v5 = vmul.f32 %v4088_v18, %v11913_v63  ;;  %v4404_v13 = vmul.f32 %v4088_v18, %v11914_v12  ;;  %v4405_v9 = vmul.f32 %v4088_v18, %v11915_v16  ;;  %v1951_v45 = vadd.f32 %v1950_v54, %v9690_v39  ;;  %v11919_v63 = vld [vmem:[#allocation264_spill] sm:$0xff] }
 0x60c   :  { %5463 = vst.msk [vmem:[#allocation5 + $0x650] sm:$0xff] %vm1539_vm2, %v5085_v47  ;;  %v4406_v26 = vmul.f32 %v4088_v18, %v11916_v28  ;;  %v4407_v50 = vmul.f32 %v4088_v18, %v11917_v20  ;;  %v4408_v52 = vmul.f32 %v4088_v18, %v11918_v15  ;;  %v4409_v12 = vmul.f32 %v4088_v18, %v11919_v63 }
 0x60d   :  { %v1952_v54 = vadd.f32 %v1951_v45, %v9696_v33  ;;  %v2347_v18 = vmul.f32 %v9696_v33, %v9696_v33 }
 0x60f   :  { %v1953_v20 = vadd.f32 %v1952_v54, %v9706_v58 }
 0x611   :  { %2865 = vadd.xlane.f32.xlu0 %v2864_v42 }
 0x612   :  { %v4736_v53 = vpop.permute.xlu1 %4735 }
 0x613   :  { %v5051_v44 = vadd.f32 %v4736_v53, %v4403_v5  ;;  %v5052_v46 = vadd.f32 %v4736_v53, %v4404_v13  ;;  %v5053_v47 = vadd.f32 %v4736_v53, %v4405_v9  ;;  %v5054_v56 = vadd.f32 %v4736_v53, %v4406_v26 }
 0x614   :  { %v5055_v16 = vadd.f32 %v4736_v53, %v4407_v50  ;;  %v5056_v28 = vadd.f32 %v4736_v53, %v4408_v52  ;;  %v2813_v5 = vadd.f32 %v2344_v27, %v2343_v14  ;;  %v2346_v13 = vmul.f32 %v9690_v39, %v9690_v39  ;;  %v11920_v50 = vld [vmem:[#allocation172_spill] sm:$0xff]  ;;  %v11921_v14 = vld [vmem:[#allocation173_spill] sm:$0xff] }
 0x615   :  { %5429 = vst [vmem:[#allocation5 + $0x540] sm:$0xff] %v5051_v44  ;;  %v9981_v9 = vmul.f32 0.0012755102, %v9901_v31  ;;  %v5057_v42 = vadd.f32 %v4736_v53, %v4409_v12  ;;  %v1954_v26 = vsel %vm1539_vm2, %v9704_v57, 0.0  ;;  %v2979_v27 = vmul.f32 0.0012755102, %v9926_v38 }
 0x616   :  { %5430 = vst [vmem:[#allocation5 + $0x548] sm:$0xff] %v5052_v46  ;;  %v2814_v45 = vadd.f32 %v2813_v5, %v2345_v35  ;;  %v9990_v44 = vmul.f32 0.0012755102, %v11920_v50  ;;  %v1955_v46 = vadd.f32 %v1954_v26, %v1953_v20  ;;  %v2962_v15 = vmul.f32 0.0012755102, %v11921_v14  ;;  %v11922_v5 = vld [vmem:[#allocation165_spill] sm:$0xff] }
 0x617   :  { %5431 = vst [vmem:[#allocation5 + $0x550] sm:$0xff] %v5053_v47  ;;  %v3033_v53 = vmul.f32 %v9981_v9, %v9981_v9  ;;  %v2349_v47 = vmul.f32 %v9704_v57, %v9704_v57  ;;  %v2348_v38 = vmul.f32 %v9706_v58, %v9706_v58  ;;  %v3837_v50 = vld [vmem:[%s10716_s3 + $0x110] sm:$0xff] }
 0x618   :  { %5432 = vst [vmem:[#allocation5 + $0x558] sm:$0xff] %v5054_v56  ;;  %v2815_v31 = vadd.f32 %v2814_v45, %v2346_v13  ;;  %v3016_v35 = vmul.f32 %v9990_v44, %v9990_v44  ;;  %v11923_v13 = vld [vmem:[#allocation166_spill] sm:$0xff]  ;;  %v11924_v45 = vld [vmem:[#allocation168_spill] sm:$0xff] }
 0x619   :  { %5433 = vst [vmem:[#allocation5 + $0x560] sm:$0xff] %v5055_v16  ;;  %v3087_v56 = vsub.f32 %v2979_v27, %v3033_v53  ;;  %v2818_v63 = vsel %vm1539_vm2, %v2349_v47, 0.0  ;;  %v3945_v53 = vsub.f32 %v3837_v50, %v9607_v22 }
 0x61a   :  { %5434 = vst [vmem:[#allocation5 + $0x568] sm:$0xff] %v5056_v28  ;;  %v2816_v52 = vadd.f32 %v2815_v31, %v2347_v18  ;;  %v3070_v54 = vsub.f32 %v2962_v15, %v3016_v35  ;;  %v11925_v15 = vld [vmem:[#allocation197_spill] sm:$0xff] }
 0x61b   :  { %5435 = vst.msk [vmem:[#allocation5 + $0x570] sm:$0xff] %vm1539_vm2, %v5057_v42  ;;  %v3195_v16 = vadd.f32 1e-05, %v3087_v56  ;;  %v1904_v42 = vadd.f32 %v11923_v13, %v11922_v5 }
 0x61c   :  { %v2817_v12 = vadd.f32 %v2816_v52, %v2348_v38  ;;  %v3178_v26 = vadd.f32 1e-05, %v3070_v54 }
 0x61d   :  { %1956 = vadd.xlane.f32.xlu1 %v1955_v46  ;;  %6219 = vrsqrt.f32 %v3195_v16  ;;  %v1905_v18 = vadd.f32 %v1904_v42, %v11924_v45  ;;  %v1909_v46 = vsel %vm1539_vm2, %v9280_v4, 0.0  ;;  %vm3615_vm7 = vweird.f32 %v3195_v16 }
 0x61e   :  { %v2819_v28 = vadd.f32 %v2818_v63, %v2817_v12  ;;  %6221 = vrsqrt.f32 %v3178_v26  ;;  %vm3445_vm10 = vweird.f32 %v3178_v26 }
 0x61f   :  { %v1906_v20 = vadd.f32 %v1905_v18, %v9239_v1 }
 0x621   :  { %v1907_v27 = vadd.f32 %v1906_v20, %v9252_v59 }
 0x623   :  { %v6220_v31 = vpop.eup %6219  ;;  %v1908_v52 = vadd.f32 %v1907_v27, %v11925_v15  ;;  %v3840_v27 = vld [vmem:[%s10716_s3 + $0x128] sm:$0xff] }
 0x624   :  { %v6222_v47 = vpop.eup %6221  ;;  %v3610_v14 = vmul.f32 %v6220_v31, %v3195_v16  ;;  %vm3616_vm6 = vweird.f32 %v6220_v31 }
 0x625   :  { %2820 = vadd.xlane.f32.xlu1 %v2819_v28  ;;  %4137 = vperm.xlu0 %6144, %v9577_v0   ;;  %v1910_v38 = vadd.f32 %v1909_v46, %v1908_v52  ;;  %v3440_v56 = vmul.f32 %v6222_v47, %v3178_v26  ;;  %vm3617_vm8 = vmor %vm3615_vm7, %vm3616_vm6  ;;  %vm3446_vm9 = vweird.f32 %v6222_v47 }
 0x626   :  { %v3611_v35 = vmul.f32 %v6220_v31, %v3610_v14  ;;  %v3948_v14 = vsub.f32 %v3840_v27, %v9802_v11  ;;  %v3141_v11 = vld [vmem:[%s10715_s2 + $0x140] sm:$0xff]  ;;  %vm3447_vm11 = vmor %vm3445_vm10, %vm3446_vm9 }
 0x627   :  { %v3441_v54 = vmul.f32 %v6222_v47, %v3440_v56 }
 0x628   :  { %v3612_v12 = vmul.f32 0.5, %v3611_v35 }
 0x629   :  { %v3442_v28 = vmul.f32 0.5, %v3441_v54 }
 0x62a   :  { %v3613_v20 = vsub.f32 1.5, %v3612_v12  ;;  %v11927_v12 = vld [vmem:[#allocation193_spill] sm:$0xff] }
 0x62b   :  { %v3443_v52 = vsub.f32 1.5, %v3442_v28 }
 0x62d   :  { %4785 = vperm.xlu0 %6144, %v3945_v53   ;;  %v3444_v56 = vmul.f32 %v6222_v47, %v3443_v52 }
 0x62e   :  { %v1975_v0 = vpop.xlane.xlu0 %1974 }
 0x62f   :  { %v10016_v63 = vmul.f32 0.0012755102, %v1975_v0  ;;  %v3614_v0 = vmul.f32 %v6220_v31, %v3613_v20  ;;  %v3448_v20 = vsel %vm3447_vm11, %v6222_v47, %v3444_v56  ;;  %v3843_v47 = vld [vmem:[%s10716_s3 + $0x140] sm:$0xff] }
 0x630   :  { %1911 = vadd.xlane.f32.xlu2 %v1910_v38  ;;  %v3833_v38 = vld [vmem:[%s10716_s3 + $0xf0] sm:$0xff] }
 0x631   :  { %v3041_v42 = vmul.f32 %v10016_v63, %v10016_v63  ;;  %v3618_v54 = vsel %vm3617_vm8, %v6220_v31, %v3614_v0 }
 0x635   :  { %4152 = vperm.xlu0 %6144, %v9791_v62   ;;  %v11926_v62 = vld [vmem:[#allocation192_spill] sm:$0xff] }
 0x636   :  { %v2839_v22 = vpop.xlane.xlu0 %2838 }
 0x637   :  { %v2987_v18 = vmul.f32 0.0012755102, %v2839_v22  ;;  %v3941_v22 = vsub.f32 %v3833_v38, %v11927_v12  ;;  %v3149_v12 = vld [vmem:[%s10715_s2 + $0x180] sm:$0xff] }
 0x639   :  { %v3095_v50 = vsub.f32 %v2987_v18, %v3041_v42  ;;  %v3789_v42 = vmul.f32 %v3618_v54, %v3141_v11  ;;  %v3124_v18 = vld [vmem:[%s10715_s2 + $0xb8] sm:$0xff] }
 0x63b   :  { %v3203_v53 = vadd.f32 1e-05, %v3095_v50  ;;  %v3897_v52 = vmul.f32 %v3789_v42, %v9981_v9 }
 0x63d   :  { %v1930_v46 = vpop.xlane.xlu1 %1929  ;;  %6223 = vrsqrt.f32 %v3203_v53  ;;  %4800 = vperm.xlu0 %6144, %v3948_v14   ;;  %v10040_v14 = vmul.f32 %v3448_v20, %v3124_v18  ;;  %v3951_v11 = vsub.f32 %v3843_v47, %v3897_v52  ;;  %vm3695_vm13 = vweird.f32 %v3203_v53  ;;  %v11928_v18 = vld [vmem:[#allocation128_spill] sm:$0xff]  ;;  %v11931_v52 = vld [vmem:[#allocation157_spill] sm:$0xff] }
 0x63e   :  { %4117 = vperm.xlu1 %6145, %v11926_v62   ;;  %v10029_v35 = vmul.f32 0.0012755102, %v1930_v46 }
 0x640   :  { %v3036_v50 = vmul.f32 %v10029_v35, %v10029_v35 }
 0x643   :  { %v6224_v28 = vpop.eup %6223 }
 0x644   :  { %v3690_v27 = vmul.f32 %v6224_v28, %v3203_v53  ;;  %vm3696_vm12 = vweird.f32 %v6224_v28 }
 0x645   :  { %v2794_v16 = vpop.xlane.xlu1 %2793  ;;  %4167 = vperm.xlu0 %6144, %v3789_v42   ;;  %vm3697_vm14 = vmor %vm3695_vm13, %vm3696_vm12  ;;  %v1885_v42 = vpop.xlane.xlu2 %1884 }
 0x646   :  { %v2982_v46 = vmul.f32 0.0012755102, %v2794_v16  ;;  %4765 = vperm.xlu1 %6145, %v3941_v22   ;;  %v3691_v31 = vmul.f32 %v6224_v28, %v3690_v27  ;;  %v11929_v27 = vld [vmem:[#allocation129_spill] sm:$0xff] }
 0x648   :  { %v3090_v26 = vsub.f32 %v2982_v46, %v3036_v50  ;;  %v3692_v0 = vmul.f32 0.5, %v3691_v31  ;;  %4082 = vperm.xlu2 %6146, %v10040_v14   ;;  %v11930_v46 = vld [vmem:[#allocation131_spill] sm:$0xff] }
 0x649   :  { %v4123_v38 = vpop.permute.xlu0 %4122 }
 0x64a   :  { %v3198_v62 = vadd.f32 1e-05, %v3090_v26  ;;  %v3693_v56 = vsub.f32 1.5, %v3692_v0  ;;  %v4452_v20 = vmul.f32 %v4123_v38, %v11928_v18  ;;  %v4453_v50 = vmul.f32 %v4123_v38, %v11929_v27  ;;  %v11934_v27 = vld [vmem:[#allocation177_spill] sm:$0xff] }
 0x64b   :  { %v4454_v31 = vmul.f32 %v4123_v38, %v11930_v46  ;;  %v4455_v53 = vmul.f32 %v4123_v38, %v11931_v52  ;;  %v4457_v18 = vmul.f32 %v4123_v38, %v11933_v7  ;;  %v4458_v41 = vmul.f32 %v4123_v38, %v11934_v27 }
 0x64c   :  { %6225 = vrsqrt.f32 %v3198_v62  ;;  %v3694_v54 = vmul.f32 %v6224_v28, %v3693_v56  ;;  %v11932_v56 = vld [vmem:[#allocation176_spill] sm:$0xff]  ;;  %v2309_v7 = vmul.f32 %v11923_v13, %v11923_v13  ;;  %vm3645_vm0 = vweird.f32 %v3198_v62 }
 0x64d   :  { %4815 = vperm.xlu0 %6144, %v3951_v11  }
 0x64e   :  { %v3698_v9 = vsel %vm3697_vm14, %v6224_v28, %v3694_v54  ;;  %v4456_v28 = vmul.f32 %v4123_v38, %v11932_v56  ;;  %v10067_v38 = vpop.permute.xlu2 %4067 }
 0x64f   :  { %v10050_v22 = vmul.f32 %v3698_v9, %v3149_v12 }
 0x651   :  { %v4771_v0 = vpop.permute.xlu0 %4770  ;;  %v10058_v47 = vmul.f32 %v10050_v22, %v10016_v63 }
 0x652   :  { %v6226_v16 = vpop.eup %6225  ;;  %v5100_v11 = vadd.f32 %v4771_v0, %v4452_v20  ;;  %v5101_v54 = vadd.f32 %v4771_v0, %v4453_v50  ;;  %v5102_v12 = vadd.f32 %v4771_v0, %v4454_v31  ;;  %v5103_v3 = vadd.f32 %v4771_v0, %v4455_v53 }
 0x653   :  { %v3640_v26 = vmul.f32 %v6226_v16, %v3198_v62  ;;  %v5104_v46 = vadd.f32 %v4771_v0, %v4456_v28  ;;  %v5105_v52 = vadd.f32 %v4771_v0, %v4457_v18  ;;  %v5106_v2 = vadd.f32 %v4771_v0, %v4458_v41  ;;  %v11936_v28 = vld [vmem:[#allocation34_spill] sm:$0xff] }
 0x654   :  { %5478 = vst [vmem:[#allocation5 + $0x6c8] sm:$0xff] %v5100_v11  ;;  %vm3646_vm15 = vweird.f32 %v6226_v16  ;;  %v2308_v20 = vmul.f32 %v11922_v5, %v11922_v5  ;;  %v2310_v41 = vmul.f32 %v11924_v45, %v11924_v45  ;;  %v2311_v62 = vmul.f32 %v9239_v1, %v9239_v1 }
 0x655   :  { %v3641_v9 = vmul.f32 %v6226_v16, %v3640_v26  ;;  %5479 = vst [vmem:[#allocation5 + $0x6d0] sm:$0xff] %v5101_v54  ;;  %vm3647_vm3 = vmor %vm3645_vm0, %vm3646_vm15  ;;  %v11935_v26 = vld [vmem:[#allocation82_spill] sm:$0xff] }
 0x656   :  { %5480 = vst [vmem:[#allocation5 + $0x6d8] sm:$0xff] %v5102_v12  ;;  %v2365_v53 = vmul.f32 %v11935_v26, %v11935_v26  ;;  %v2768_v0 = vadd.f32 %v2309_v7, %v2308_v20  ;;  %v1976_v11 = vadd.f32 %v11935_v26, %v11936_v28  ;;  %v10083_v12 = vmul.f32 0.0012755102, %v1885_v42  ;;  %v11938_v20 = vld [vmem:[#allocation112_spill] sm:$0xff] }
 0x657   :  { %v3642_v32 = vmul.f32 0.5, %v3641_v9  ;;  %5481 = vst [vmem:[#allocation5 + $0x6e0] sm:$0xff] %v5103_v3 }
 0x658   :  { %5482 = vst [vmem:[#allocation5 + $0x6e8] sm:$0xff] %v5104_v46  ;;  %v2769_v54 = vadd.f32 %v2768_v0, %v2310_v41  ;;  %v11940_v41 = vld [vmem:[#allocation115_spill] sm:$0xff] }
 0x659   :  { %v3643_v63 = vsub.f32 1.5, %v3642_v32  ;;  %5483 = vst [vmem:[#allocation5 + $0x6f0] sm:$0xff] %v5105_v52  ;;  %v3144_v32 = vld [vmem:[%s10715_s2 + $0x158] sm:$0xff] }
 0x65a   :  { %5484 = vst.msk [vmem:[#allocation5 + $0x6f8] sm:$0xff] %vm1539_vm2, %v5106_v2  ;;  %v2364_v2 = vmul.f32 %v11936_v28, %v11936_v28  ;;  %v2770_v27 = vadd.f32 %v2769_v54, %v2311_v62  ;;  %v3031_v62 = vmul.f32 %v10083_v12, %v10083_v12  ;;  %v11942_v54 = vld [vmem:[#allocation277_spill] sm:$0xff] }
 0x65b   :  { %v3644_v50 = vmul.f32 %v6226_v16, %v3643_v63  ;;  %v2312_v63 = vmul.f32 %v9252_v59, %v9252_v59 }
 0x65c   :  { %v2840_v9 = vadd.f32 %v2365_v53, %v2364_v2  ;;  %v3846_v53 = vld [vmem:[%s10716_s3 + $0x158] sm:$0xff] }
 0x65d   :  { %v4103_v3 = vpop.permute.xlu1 %4102  ;;  %v3648_v31 = vsel %vm3647_vm3, %v6226_v16, %v3644_v50  ;;  %v11937_v16 = vld [vmem:[#allocation130_spill] sm:$0xff]  ;;  %v11939_v50 = vld [vmem:[#allocation113_spill] sm:$0xff] }
 0x65e   :  { %v3792_v56 = vmul.f32 %v3648_v31, %v3144_v32  ;;  %v2366_v18 = vmul.f32 %v11937_v16, %v11937_v16  ;;  %v1977_v46 = vadd.f32 %v1976_v11, %v11937_v16  ;;  %v4424_v7 = vmul.f32 %v4103_v3, %v11938_v20 }
 0x65f   :  { %v4425_v32 = vmul.f32 %v4103_v3, %v11939_v50  ;;  %v4426_v42 = vmul.f32 %v4103_v3, %v11940_v41  ;;  %v4428_v20 = vmul.f32 %v4103_v3, %v11942_v54  ;;  %v11943_v41 = vld [vmem:[#allocation279_spill] sm:$0xff]  ;;  %v4430_v16 = vmul.f32 %v4103_v3, %v11944_v49  ;;  %v11945_v49 = vld [vmem:[#allocation84_spill] sm:$0xff] }
 0x660   :  { %4182 = vperm.xlu0 %6144, %v3792_v56   ;;  %v3900_v52 = vmul.f32 %v3792_v56, %v10029_v35  ;;  %v1978_v0 = vadd.f32 %v1977_v46, %v9871_v30  ;;  %v11941_v35 = vld [vmem:[#allocation253_spill] sm:$0xff]  ;;  %v4429_v45 = vmul.f32 %v4103_v3, %v11943_v41  ;;  %v2314_v46 = vmul.f32 %v9280_v4, %v9280_v4 }
 0x661   :  { %v4427_v56 = vmul.f32 %v4103_v3, %v11941_v35  ;;  %v11946_v3 = vld [vmem:[#allocation85_spill] sm:$0xff] }
 0x662   :  { %v2749_v31 = vpop.xlane.xlu2 %2748  ;;  %v3954_v6 = vsub.f32 %v3846_v53, %v3900_v52  ;;  %v1979_v25 = vadd.f32 %v1978_v0, %v9880_v51  ;;  %v2367_v52 = vmul.f32 %v9871_v30, %v9871_v30  ;;  %v1981_v53 = vsel %vm1539_vm2, %v9886_v43, 0.0 }
 0x663   :  { %v2977_v2 = vmul.f32 0.0012755102, %v2749_v31  ;;  %v2313_v31 = vmul.f32 %v11925_v15, %v11925_v15  ;;  %v2771_v0 = vadd.f32 %v2770_v27, %v2312_v63  ;;  %v2773_v27 = vsel %vm1539_vm2, %v2314_v46, 0.0  ;;  %v11949_v63 = vld [vmem:[#allocation241_spill] sm:$0xff]  ;;  %v11976_v15 = vld [vmem:[#allocation31_spill] sm:$0xff] }
 0x665   :  { %v4751_v11 = vpop.permute.xlu1 %4750  ;;  %v3085_v13 = vsub.f32 %v2977_v2, %v3031_v62  ;;  %v4379_v2 = vmul.f32 %v10067_v38, %v11949_v63 }
 0x666   :  { %v5072_v59 = vadd.f32 %v4751_v11, %v4424_v7  ;;  %v5073_v50 = vadd.f32 %v4751_v11, %v4425_v32  ;;  %v5074_v1 = vadd.f32 %v4751_v11, %v4426_v42  ;;  %v5075_v5 = vadd.f32 %v4751_v11, %v4427_v56 }
 0x667   :  { %v5076_v35 = vadd.f32 %v4751_v11, %v4428_v20  ;;  %v2841_v7 = vadd.f32 %v2840_v9, %v2366_v18  ;;  %v3193_v32 = vadd.f32 1e-05, %v3085_v13  ;;  %v5077_v42 = vadd.f32 %v4751_v11, %v4429_v45  ;;  %v11947_v9 = vld [vmem:[#allocation87_spill] sm:$0xff]  ;;  %v11948_v18 = vld [vmem:[#allocation236_spill] sm:$0xff] }
 0x668   :  { %5450 = vst [vmem:[#allocation5 + $0x5e8] sm:$0xff] %v5072_v59  ;;  %4830 = vperm.xlu0 %6144, %v3954_v6   ;;  %v5078_v62 = vadd.f32 %v4751_v11, %v4430_v16  ;;  %v4375_v59 = vmul.f32 %v10067_v38, %v11945_v49  ;;  %v4376_v56 = vmul.f32 %v10067_v38, %v11946_v3  ;;  %v11951_v3 = vld [vmem:[#allocation242_spill] sm:$0xff] }
 0x669   :  { %5451 = vst [vmem:[#allocation5 + $0x5f0] sm:$0xff] %v5073_v50  ;;  %v4377_v13 = vmul.f32 %v10067_v38, %v11947_v9  ;;  %6227 = vrsqrt.f32 %v3193_v32  ;;  %v2368_v6 = vmul.f32 %v9880_v51, %v9880_v51  ;;  %v1980_v45 = vadd.f32 %v1979_v25, %v9891_v34  ;;  %v11950_v50 = vld [vmem:[#allocation243_spill] sm:$0xff] }
 0x66a   :  { %5452 = vst [vmem:[#allocation5 + $0x5f8] sm:$0xff] %v5074_v1  ;;  %v4378_v1 = vmul.f32 %v10067_v38, %v11948_v18  ;;  %v4716_v16 = vpop.permute.xlu2 %4715  ;;  %v4380_v41 = vmul.f32 %v10067_v38, %v11950_v50  ;;  %v4381_v46 = vmul.f32 %v10067_v38, %v11951_v3  ;;  %vm3595_vm4 = vweird.f32 %v3193_v32 }
 0x66b   :  { %5453 = vst [vmem:[#allocation5 + $0x600] sm:$0xff] %v5075_v5  ;;  %v5023_v11 = vadd.f32 %v4716_v16, %v4375_v59  ;;  %v5024_v54 = vadd.f32 %v4716_v16, %v4376_v56  ;;  %v5025_v20 = vadd.f32 %v4716_v16, %v4377_v13  ;;  %v2842_v5 = vadd.f32 %v2841_v7, %v2367_v52 }
 0x66c   :  { %5454 = vst [vmem:[#allocation5 + $0x608] sm:$0xff] %v5076_v35  ;;  %v5026_v25 = vadd.f32 %v4716_v16, %v4378_v1  ;;  %v1982_v49 = vadd.f32 %v1981_v53, %v1980_v45  ;;  %v2370_v35 = vmul.f32 %v9886_v43, %v9886_v43  ;;  %v5027_v9 = vadd.f32 %v4716_v16, %v4379_v2 }
 0x66d   :  { %5455 = vst [vmem:[#allocation5 + $0x610] sm:$0xff] %v5077_v42  ;;  %v2772_v42 = vadd.f32 %v2771_v0, %v2313_v31  ;;  %v2843_v59 = vadd.f32 %v2842_v5, %v2368_v6  ;;  %v2369_v7 = vmul.f32 %v9891_v34, %v9891_v34  ;;  %v5028_v52 = vadd.f32 %v4716_v16, %v4380_v41  ;;  %v11979_v34 = vld [vmem:[#allocation142_spill] sm:$0xff] }
 0x66e   :  { %5456 = vst.msk [vmem:[#allocation5 + $0x618] sm:$0xff] %vm1539_vm2, %v5078_v62  ;;  %v5029_v62 = vadd.f32 %v4716_v16, %v4381_v46  ;;  %v2845_v38 = vsel %vm1539_vm2, %v2370_v35, 0.0  ;;  %v3139_v16 = vld [vmem:[%s10715_s2 + $0x130] sm:$0xff] }
 0x66f   :  { %5401 = vst [vmem:[#allocation5 + $0x460] sm:$0xff] %v5023_v11  ;;  %v6228_v56 = vpop.eup %6227  ;;  %v2774_v53 = vadd.f32 %v2773_v27, %v2772_v42  ;;  %v2844_v45 = vadd.f32 %v2843_v59, %v2369_v7  ;;  %v11954_v46 = vld [vmem:[#allocation44_spill] sm:$0xff]  ;;  %v11955_v59 = vld [vmem:[#allocation189_spill] sm:$0xff] }
 0x670   :  { %5402 = vst [vmem:[#allocation5 + $0x468] sm:$0xff] %v5024_v54  ;;  %1983 = vadd.xlane.f32.xlu1 %v1982_v49  ;;  %v3590_v13 = vmul.f32 %v6228_v56, %v3193_v32  ;;  %vm3596_vm1 = vweird.f32 %v6228_v56  ;;  %v3826_v32 = vld [vmem:[%s10716_s3 + $0xb8] sm:$0xff] }
 0x671   :  { %5403 = vst [vmem:[#allocation5 + $0x470] sm:$0xff] %v5025_v20  ;;  %2775 = vadd.xlane.f32.xlu2 %v2774_v53  ;;  %v2846_v0 = vadd.f32 %v2845_v38, %v2844_v45  ;;  %vm3597_vm5 = vmor %vm3595_vm4, %vm3596_vm1  ;;  %v3880_v20 = vmul.f32 %v10040_v14, %v9990_v44  ;;  %v3836_v44 = vld [vmem:[%s10716_s3 + $0x108] sm:$0xff] }
 0x672   :  { %5404 = vst [vmem:[#allocation5 + $0x478] sm:$0xff] %v5026_v25  ;;  %v3591_v18 = vmul.f32 %v6228_v56, %v3590_v13  ;;  %v3944_v7 = vsub.f32 %v3836_v44, %v11955_v59  ;;  %v11962_v59 = vld [vmem:[#allocation25_spill] sm:$0xff] }
 0x673   :  { %5405 = vst [vmem:[#allocation5 + $0x480] sm:$0xff] %v5027_v9  ;;  %v3934_v49 = vsub.f32 %v3826_v32, %v3880_v20 }
 0x674   :  { %5406 = vst [vmem:[#allocation5 + $0x488] sm:$0xff] %v5028_v52  ;;  %v3592_v31 = vmul.f32 0.5, %v3591_v18 }
 0x675   :  { %5407 = vst.msk [vmem:[#allocation5 + $0x490] sm:$0xff] %vm1539_vm2, %v5029_v62  ;;  %v11956_v62 = vld [vmem:[#allocation180_spill] sm:$0xff] }
 0x676   :  { %v3593_v6 = vsub.f32 1.5, %v3592_v31  ;;  %v10160_v53 = vmul.f32 0.0012755102, %v11956_v62  ;;  %v11957_v31 = vld [vmem:[#allocation182_spill] sm:$0xff] }
 0x677   :  { %v11963_v62 = vld [vmem:[#allocation170_spill] sm:$0xff] }
 0x678   :  { %2847 = vadd.xlane.f32.xlu1 %v2846_v0  ;;  %v3594_v1 = vmul.f32 %v6228_v56, %v3593_v6  ;;  %v2965_v0 = vmul.f32 0.0012755102, %v11957_v31  ;;  %v11964_v31 = vld [vmem:[#allocation27_spill] sm:$0xff] }
 0x67a   :  { %v3598_v27 = vsel %vm3597_vm5, %v6228_v56, %v3594_v1 }
 0x67b   :  { %v10141_v63 = vmul.f32 %v3598_v27, %v3139_v16  ;;  %v3152_v16 = vld [vmem:[%s10715_s2 + $0x198] sm:$0xff]  ;;  %v3019_v27 = vmul.f32 %v10160_v53, %v10160_v53 }
 0x67c   :  { %v2002_v2 = vpop.xlane.xlu0 %2001 }
 0x67d   :  { %11952 = vst [vmem:[#allocation49_spill] sm:$0xff] %v10141_v63  ;;  %v10145_v11 = vmul.f32 %v10141_v63, %v10083_v12  ;;  %v2936_v54 = vmul.f32 0.0012755102, %v2002_v2 }
 0x67f   :  { %11953 = vst [vmem:[#allocation51_spill] sm:$0xff] %v10145_v11  ;;  %v3044_v50 = vmul.f32 %v2936_v54, %v2936_v54 }
 0x684   :  { %v2866_v5 = vpop.xlane.xlu0 %2865 }
 0x685   :  { %v2990_v41 = vmul.f32 0.0012755102, %v2866_v5  ;;  %v3073_v5 = vsub.f32 %v2965_v0, %v3019_v27 }
 0x687   :  { %v3098_v25 = vsub.f32 %v2990_v41, %v3044_v50  ;;  %v11958_v50 = vld [vmem:[#allocation140_spill] sm:$0xff] }
 0x689   :  { %v3206_v35 = vadd.f32 1e-05, %v3098_v25  ;;  %4730 = vperm.xlu2 %6146, %v3934_v49   ;;  %v11959_v25 = vld [vmem:[#allocation141_spill] sm:$0xff] }
 0x68b   :  { %6229 = vrsqrt.f32 %v3206_v35  ;;  %vm3725_vm7 = vweird.f32 %v3206_v35 }
 0x690   :  { %v1957_v3 = vpop.xlane.xlu1 %1956 }
 0x691   :  { %4132 = vperm.xlu1 %6145, %v11954_v46   ;;  %v6230_v12 = vpop.eup %6229  ;;  %v10156_v42 = vmul.f32 0.0012755102, %v1957_v3  ;;  %v11960_v3 = vld [vmem:[#allocation143_spill] sm:$0xff]  ;;  %v11961_v46 = vld [vmem:[#allocation24_spill] sm:$0xff] }
 0x692   :  { %v3720_v9 = vmul.f32 %v6230_v12, %v3206_v35  ;;  %vm3726_vm6 = vweird.f32 %v6230_v12 }
 0x693   :  { %v3039_v18 = vmul.f32 %v10156_v42, %v10156_v42  ;;  %vm3727_vm8 = vmor %vm3725_vm7, %vm3726_vm6 }
 0x694   :  { %v3721_v14 = vmul.f32 %v6230_v12, %v3720_v9 }
 0x696   :  { %v3722_v52 = vmul.f32 0.5, %v3721_v14 }
 0x697   :  { %v4138_v13 = vpop.permute.xlu0 %4137 }
 0x698   :  { %v2821_v56 = vpop.xlane.xlu1 %2820  ;;  %v3723_v45 = vsub.f32 1.5, %v3722_v52  ;;  %v4473_v41 = vmul.f32 %v4138_v13, %v11958_v50  ;;  %v4474_v49 = vmul.f32 %v4138_v13, %v11959_v25  ;;  %v4475_v35 = vmul.f32 %v4138_v13, %v11960_v3 }
 0x699   :  { %v2985_v38 = vmul.f32 0.0012755102, %v2821_v56  ;;  %4780 = vperm.xlu1 %6145, %v3944_v7   ;;  %v4476_v9 = vmul.f32 %v4138_v13, %v11961_v46  ;;  %v4477_v7 = vmul.f32 %v4138_v13, %v11962_v59  ;;  %v4479_v0 = vmul.f32 %v4138_v13, %v11964_v31  ;;  %v11971_v31 = vld [vmem:[#allocation154_spill] sm:$0xff] }
 0x69a   :  { %v3724_v6 = vmul.f32 %v6230_v12, %v3723_v45  ;;  %v1936_v59 = vsel %vm1539_vm2, %v9506_v36, 0.0 }
 0x69b   :  { %v3093_v1 = vsub.f32 %v2985_v38, %v3039_v18  ;;  %v4478_v38 = vmul.f32 %v4138_v13, %v11963_v62  ;;  %v10181_v18 = vadd.f32 1e-05, %v3073_v5 }
 0x69c   :  { %v3728_v20 = vsel %vm3727_vm8, %v6230_v12, %v3724_v6 }
 0x69d   :  { %v3201_v2 = vadd.f32 1e-05, %v3093_v1  ;;  %v10170_v32 = vmul.f32 %v3728_v20, %v3152_v16  ;;  %v11965_v1 = vld [vmem:[#allocation15_spill] sm:$0xff]  ;;  %v11966_v16 = vld [vmem:[#allocation62_spill] sm:$0xff]  ;;  %vm3475_vm13 = vweird.f32 %v10181_v18 }
 0x69e   :  { %v1931_v27 = vadd.f32 %v11966_v16, %v11965_v1 }
 0x69f   :  { %6231 = vrsqrt.f32 %v3201_v2  ;;  %v4786_v44 = vpop.permute.xlu0 %4785  ;;  %v10177_v14 = vmul.f32 %v10170_v32, %v2936_v54  ;;  %vm3675_vm10 = vweird.f32 %v3201_v2 }
 0x6a0   :  { %v5121_v52 = vadd.f32 %v4786_v44, %v4473_v41  ;;  %v5122_v12 = vadd.f32 %v4786_v44, %v4474_v49  ;;  %v5123_v56 = vadd.f32 %v4786_v44, %v4475_v35  ;;  %v5124_v45 = vadd.f32 %v4786_v44, %v4476_v9  ;;  %v11967_v41 = vld [vmem:[#allocation110_spill] sm:$0xff] }
 0x6a1   :  { %v5125_v6 = vadd.f32 %v4786_v44, %v4477_v7  ;;  %v5126_v20 = vadd.f32 %v4786_v44, %v4478_v38  ;;  %v5127_v50 = vadd.f32 %v4786_v44, %v4479_v0  ;;  %v1932_v25 = vadd.f32 %v1931_v27, %v11967_v41  ;;  %v11968_v7 = vld [vmem:[#allocation198_spill] sm:$0xff]  ;;  %v11970_v38 = vld [vmem:[#allocation153_spill] sm:$0xff] }
 0x6a2   :  { %5499 = vst [vmem:[#allocation5 + $0x770] sm:$0xff] %v5121_v52  ;;  %6233 = vrsqrt.f32 %v10181_v18 }
 0x6a3   :  { %5500 = vst [vmem:[#allocation5 + $0x778] sm:$0xff] %v5122_v12  ;;  %v1933_v5 = vadd.f32 %v1932_v25, %v9478_v10 }
 0x6a4   :  { %5501 = vst [vmem:[#allocation5 + $0x780] sm:$0xff] %v5123_v56  ;;  %v11969_v56 = vld [vmem:[#allocation152_spill] sm:$0xff] }
 0x6a5   :  { %v6232_v54 = vpop.eup %6231  ;;  %5502 = vst [vmem:[#allocation5 + $0x788] sm:$0xff] %v5124_v45  ;;  %v1934_v35 = vadd.f32 %v1933_v5, %v9491_v17  ;;  %v11973_v5 = vld [vmem:[#allocation28_spill] sm:$0xff] }
 0x6a6   :  { %v3670_v49 = vmul.f32 %v6232_v54, %v3201_v2  ;;  %5503 = vst [vmem:[#allocation5 + $0x790] sm:$0xff] %v5125_v6  ;;  %vm3676_vm9 = vweird.f32 %v6232_v54 }
 0x6a7   :  { %5504 = vst [vmem:[#allocation5 + $0x798] sm:$0xff] %v5126_v20  ;;  %v4153_v3 = vpop.permute.xlu0 %4152  ;;  %v1935_v52 = vadd.f32 %v1934_v35, %v11968_v7  ;;  %v11972_v20 = vld [vmem:[#allocation266_spill] sm:$0xff]  ;;  %vm3677_vm11 = vmor %vm3675_vm10, %vm3676_vm9 }
 0x6a8   :  { %v3671_v13 = vmul.f32 %v6232_v54, %v3670_v49  ;;  %5505 = vst.msk [vmem:[#allocation5 + $0x7a0] sm:$0xff] %vm1539_vm2, %v5127_v50  ;;  %v10191_v44 = vpop.eup %6233  ;;  %v4494_v62 = vmul.f32 %v4153_v3, %v11969_v56  ;;  %v4495_v45 = vmul.f32 %v4153_v3, %v11970_v38  ;;  %v4496_v0 = vmul.f32 %v4153_v3, %v11971_v31  ;;  %v3147_v56 = vld [vmem:[%s10715_s2 + $0x170] sm:$0xff]  ;;  %v11974_v38 = vld [vmem:[#allocation46_spill] sm:$0xff] }
 0x6a9   :  { %v3470_v27 = vmul.f32 %v10191_v44, %v10181_v18  ;;  %v4497_v50 = vmul.f32 %v4153_v3, %v11972_v20  ;;  %v1937_v49 = vadd.f32 %v1936_v59, %v1935_v52  ;;  %v11975_v31 = vld [vmem:[#allocation94_spill] sm:$0xff]  ;;  %v4499_v2 = vmul.f32 %v4153_v3, %v11976_v15  ;;  %v11977_v20 = vld [vmem:[#allocation29_spill] sm:$0xff] }
 0x6aa   :  { %v3672_v46 = vmul.f32 0.5, %v3671_v13  ;;  %v4498_v13 = vmul.f32 %v4153_v3, %v11973_v5  ;;  %v2003_v4 = vadd.f32 %v11975_v31, %v11974_v38  ;;  %v4500_v63 = vmul.f32 %v4153_v3, %v11977_v20 }
 0x6ab   :  { %v2386_v43 = vmul.f32 %v11975_v31, %v11975_v31  ;;  %vm3476_vm12 = vweird.f32 %v10191_v44 }
 0x6ac   :  { %v3673_v9 = vsub.f32 1.5, %v3672_v46  ;;  %v2004_v15 = vadd.f32 %v2003_v4, %v11979_v34  ;;  %v11983_v4 = vld [vmem:[#allocation175_spill] sm:$0xff]  ;;  %vm3477_vm14 = vmor %vm3475_vm13, %vm3476_vm12 }
 0x6ae   :  { %v3674_v12 = vmul.f32 %v6232_v54, %v3673_v9 }
 0x6af   :  { %v4801_v25 = vpop.permute.xlu0 %4800 }
 0x6b0   :  { %v4118_v6 = vpop.permute.xlu1 %4117  ;;  %v5142_v46 = vadd.f32 %v4801_v25, %v4494_v62  ;;  %v5143_v35 = vadd.f32 %v4801_v25, %v4495_v45  ;;  %v5144_v9 = vadd.f32 %v4801_v25, %v4496_v0  ;;  %v5145_v11 = vadd.f32 %v4801_v25, %v4497_v50  ;;  %v10213_v45 = vpop.f32.mrf.mxu3 }
 0x6b1   :  { %v5146_v59 = vadd.f32 %v4801_v25, %v4498_v13  ;;  %v3678_v52 = vsel %vm3677_vm11, %v6232_v54, %v3674_v12  ;;  %v2385_v62 = vmul.f32 %v11974_v38, %v11974_v38  ;;  %11978 = vst [vmem:[#allocation194_spill] sm:$0xff] %v10213_v45  ;;  %v5147_v0 = vadd.f32 %v4801_v25, %v4499_v2  ;;  %v11981_v12 = vld [vmem:[#allocation125_spill] sm:$0xff]  ;;  %v10225_v2 = vpop.f32.mrf.mxu0 }
 0x6b2   :  { %5520 = vst [vmem:[#allocation5 + $0x818] sm:$0xff] %v5142_v46  ;;  %1938 = vadd.xlane.f32.xlu2 %v1937_v49  ;;  %v3795_v5 = vmul.f32 %v3678_v52, %v3147_v56  ;;  %v3471_v50 = vmul.f32 %v10191_v44, %v3470_v27  ;;  %v5148_v3 = vadd.f32 %v4801_v25, %v4500_v63  ;;  %v11980_v49 = vld [vmem:[#allocation124_spill] sm:$0xff]  ;;  %v11982_v46 = vld [vmem:[#allocation127_spill] sm:$0xff]  ;;  %v11984_v63 = vld [vmem:[#allocation13_spill] sm:$0xff] }
 0x6b3   :  { %5521 = vst [vmem:[#allocation5 + $0x820] sm:$0xff] %v5143_v35  ;;  %v4445_v54 = vmul.f32 %v4118_v6, %v11980_v49  ;;  %v4446_v13 = vmul.f32 %v4118_v6, %v11981_v12  ;;  %v4447_v20 = vmul.f32 %v4118_v6, %v11982_v46  ;;  %v2387_v35 = vmul.f32 %v11979_v34, %v11979_v34 }
 0x6b4   :  { %5522 = vst [vmem:[#allocation5 + $0x828] sm:$0xff] %v5144_v9  ;;  %4197 = vperm.xlu0 %6144, %v3795_v5   ;;  %v2005_v56 = vadd.f32 %v2004_v15, %v10213_v45  ;;  %v4448_v27 = vmul.f32 %v4118_v6, %v11983_v4  ;;  %v4449_v25 = vmul.f32 %v4118_v6, %v11984_v63  ;;  %v11985_v15 = vld [vmem:[#allocation16_spill] sm:$0xff] }
 0x6b5   :  { %5523 = vst [vmem:[#allocation5 + $0x830] sm:$0xff] %v5145_v11  ;;  %v3903_v46 = vmul.f32 %v3795_v5, %v10156_v42  ;;  %v2867_v31 = vadd.f32 %v2386_v43, %v2385_v62  ;;  %v2388_v34 = vmul.f32 %v10213_v45, %v10213_v45  ;;  %v3849_v4 = vld [vmem:[%s10716_s3 + $0x170] sm:$0xff]  ;;  %v2389_v5 = vmul.f32 %v10225_v2, %v10225_v2 }
 0x6b6   :  { %5524 = vst [vmem:[#allocation5 + $0x838] sm:$0xff] %v5146_v59  ;;  %v4450_v59 = vmul.f32 %v4118_v6, %v11985_v15 }
 0x6b7   :  { %5525 = vst [vmem:[#allocation5 + $0x840] sm:$0xff] %v5147_v0  ;;  %v4168_v9 = vpop.permute.xlu0 %4167  ;;  %v2006_v0 = vadd.f32 %v2005_v56, %v10225_v2  ;;  %v2868_v62 = vadd.f32 %v2867_v31, %v2387_v35  ;;  %v3957_v15 = vsub.f32 %v3849_v4, %v3903_v46  ;;  %v11987_v35 = vld [vmem:[#allocation162_spill] sm:$0xff] }
 0x6b8   :  { %v4766_v11 = vpop.permute.xlu1 %4765  ;;  %5526 = vst.msk [vmem:[#allocation5 + $0x848] sm:$0xff] %vm1539_vm2, %v5148_v3  ;;  %v10243_v3 = vpop.f32.mrf.mxu1 }
 0x6b9   :  { %v5093_v52 = vadd.f32 %v4766_v11, %v4445_v54  ;;  %v5094_v49 = vadd.f32 %v4766_v11, %v4446_v13  ;;  %v5095_v12 = vadd.f32 %v4766_v11, %v4447_v20  ;;  %v5096_v38 = vadd.f32 %v4766_v11, %v4448_v27  ;;  %v10238_v54 = vpop.f32.mrf.mxu2  ;;  %v11986_v20 = vld [vmem:[#allocation14_spill] sm:$0xff] }
 0x6ba   :  { %v3472_v13 = vmul.f32 0.5, %v3471_v50  ;;  %v4451_v42 = vmul.f32 %v4118_v6, %v11986_v20  ;;  %v5097_v43 = vadd.f32 %v4766_v11, %v4449_v25  ;;  %v5098_v27 = vadd.f32 %v4766_v11, %v4450_v59  ;;  %v11989_v59 = vld [vmem:[#allocation164_spill] sm:$0xff] }
 0x6bb   :  { %5471 = vst [vmem:[#allocation5 + $0x690] sm:$0xff] %v5093_v52  ;;  %v2869_v45 = vadd.f32 %v2868_v62, %v2388_v34  ;;  %v2008_v56 = vsel %vm1539_vm2, %v10238_v54, 0.0  ;;  %v2007_v6 = vadd.f32 %v2006_v0, %v10243_v3  ;;  %v4515_v25 = vmul.f32 %v4168_v9, %v11987_v35  ;;  %v11988_v52 = vld [vmem:[#allocation163_spill] sm:$0xff]  ;;  %v11993_v35 = vld [vmem:[#allocation36_spill] sm:$0xff] }
 0x6bc   :  { %5472 = vst [vmem:[#allocation5 + $0x698] sm:$0xff] %v5094_v49  ;;  %v5099_v63 = vadd.f32 %v4766_v11, %v4451_v42  ;;  %4845 = vperm.xlu0 %6144, %v3957_v15   ;;  %v3473_v31 = vsub.f32 1.5, %v3472_v13  ;;  %v4516_v20 = vmul.f32 %v4168_v9, %v11988_v52  ;;  %v4517_v49 = vmul.f32 %v4168_v9, %v11989_v59  ;;  %v11992_v62 = vld [vmem:[#allocation39_spill] sm:$0xff] }
 0x6bd   :  { %5473 = vst [vmem:[#allocation5 + $0x6a0] sm:$0xff] %v5095_v12  ;;  %v2870_v50 = vadd.f32 %v2869_v45, %v2389_v5  ;;  %v2390_v34 = vmul.f32 %v10243_v3, %v10243_v3  ;;  %v2391_v11 = vmul.f32 %v10238_v54, %v10238_v54  ;;  %v2009_v4 = vadd.f32 %v2008_v56, %v2007_v6  ;;  %v11991_v45 = vld [vmem:[#allocation205_spill] sm:$0xff] }
 0x6be   :  { %5474 = vst [vmem:[#allocation5 + $0x6a8] sm:$0xff] %v5096_v38  ;;  %v11990_v38 = vld [vmem:[#allocation203_spill] sm:$0xff]  ;;  %v4519_v0 = vmul.f32 %v4168_v9, %v11991_v45  ;;  %v4520_v5 = vmul.f32 %v4168_v9, %v11992_v62  ;;  %v3474_v15 = vmul.f32 %v10191_v44, %v3473_v31  ;;  %v4521_v52 = vmul.f32 %v4168_v9, %v11993_v35  ;;  %v3127_v31 = vld [vmem:[%s10715_s2 + $0xd0] sm:$0xff] }
 0x6bf   :  { %5475 = vst [vmem:[#allocation5 + $0x6b0] sm:$0xff] %v5097_v43  ;;  %v4518_v12 = vmul.f32 %v4168_v9, %v11990_v38  ;;  %v4816_v46 = vpop.permute.xlu0 %4815  ;;  %v2872_v6 = vsel %vm1539_vm2, %v2391_v11, 0.0  ;;  %v1912_v11 = vpop.xlane.xlu2 %1911  ;;  %v2332_v35 = vmul.f32 %v9478_v10, %v9478_v10 }
 0x6c0   :  { %5476 = vst [vmem:[#allocation5 + $0x6b8] sm:$0xff] %v5098_v27  ;;  %v5163_v13 = vadd.f32 %v4816_v46, %v4515_v25  ;;  %v5164_v42 = vadd.f32 %v4816_v46, %v4516_v20  ;;  %v5165_v43 = vadd.f32 %v4816_v46, %v4517_v49  ;;  %v5167_v59 = vadd.f32 %v4816_v46, %v4519_v0 }
 0x6c1   :  { %5477 = vst.msk [vmem:[#allocation5 + $0x6c0] sm:$0xff] %vm1539_vm2, %v5099_v63  ;;  %v5166_v27 = vadd.f32 %v4816_v46, %v4518_v12  ;;  %v5168_v63 = vadd.f32 %v4816_v46, %v4520_v5  ;;  %v5169_v56 = vadd.f32 %v4816_v46, %v4521_v52  ;;  %v2871_v25 = vadd.f32 %v2870_v50, %v2390_v34 }
 0x6c2   :  { %5541 = vst [vmem:[#allocation5 + $0x8c0] sm:$0xff] %v5163_v13  ;;  %v3478_v20 = vsel %vm3477_vm14, %v10191_v44, %v3474_v15 }
 0x6c3   :  { %2010 = vadd.xlane.f32.xlu1 %v2009_v4  ;;  %5542 = vst [vmem:[#allocation5 + $0x8c8] sm:$0xff] %v5164_v42  ;;  %v2873_v9 = vadd.f32 %v2872_v6, %v2871_v25  ;;  %v10269_v49 = vmul.f32 %v3478_v20, %v3127_v31  ;;  %v2333_v25 = vmul.f32 %v9491_v17, %v9491_v17 }
 0x6c4   :  { %5543 = vst [vmem:[#allocation5 + $0x8d0] sm:$0xff] %v5165_v43 }
 0x6c5   :  { %5544 = vst [vmem:[#allocation5 + $0x8d8] sm:$0xff] %v5166_v27  ;;  %v11994_v27 = vld [vmem:[#allocation40_spill] sm:$0xff] }
 0x6c6   :  { %5545 = vst [vmem:[#allocation5 + $0x8e0] sm:$0xff] %v5167_v59 }
 0x6c7   :  { %5546 = vst [vmem:[#allocation5 + $0x8e8] sm:$0xff] %v5168_v63  ;;  %v4083_v43 = vpop.permute.xlu2 %4082 }
 0x6c8   :  { %5547 = vst.msk [vmem:[#allocation5 + $0x8f0] sm:$0xff] %vm1539_vm2, %v5169_v56  ;;  %v3839_v56 = vld [vmem:[%s10716_s3 + $0x120] sm:$0xff] }
 0x6ca   :  { %4097 = vperm.xlu2 %6146, %v10269_v49  }
 0x6cb   :  { %2874 = vadd.xlane.f32.xlu1 %v2873_v9 }
 0x6d2   :  { %v4183_v18 = vpop.permute.xlu0 %4182 }
 0x6d3   :  { %v4536_v50 = vmul.f32 %v4183_v18, %v11856_v24  ;;  %v4537_v34 = vmul.f32 %v4183_v18, %v11857_v40  ;;  %v4538_v38 = vmul.f32 %v4183_v18, %v11869_v61  ;;  %v4539_v44 = vmul.f32 %v4183_v18, %v9458_v8 }
 0x6d4   :  { %v4540_v46 = vmul.f32 %v4183_v18, %v9468_v37  ;;  %v4541_v13 = vmul.f32 %v4183_v18, %v9480_v23  ;;  %v4542_v62 = vmul.f32 %v4183_v18, %v9470_v55  ;;  %v2330_v8 = vmul.f32 %v11966_v16, %v11966_v16  ;;  %v11995_v18 = vld [vmem:[#allocation41_spill] sm:$0xff] }
 0x6d5   :  { %v10281_v37 = vmul.f32 0.0012755102, %v1912_v11  ;;  %v2329_v23 = vmul.f32 %v11965_v1, %v11965_v1  ;;  %v2331_v55 = vmul.f32 %v11967_v41, %v11967_v41  ;;  %v3947_v11 = vsub.f32 %v3839_v56, %v11995_v18 }
 0x6d7   :  { %v2795_v15 = vadd.f32 %v2330_v8, %v2329_v23  ;;  %v3034_v59 = vmul.f32 %v10281_v37, %v10281_v37  ;;  %v12000_v23 = vld [vmem:[#allocation257_spill] sm:$0xff] }
 0x6d9   :  { %v2796_v6 = vadd.f32 %v2795_v15, %v2331_v55  ;;  %v4400_v55 = vmul.f32 %v4083_v43, %v12000_v23 }
 0x6da   :  { %v4831_v12 = vpop.permute.xlu0 %4830 }
 0x6db   :  { %v5184_v4 = vadd.f32 %v4831_v12, %v4536_v50  ;;  %v5185_v45 = vadd.f32 %v4831_v12, %v4537_v34  ;;  %v5186_v0 = vadd.f32 %v4831_v12, %v4538_v38  ;;  %v5187_v42 = vadd.f32 %v4831_v12, %v4539_v44 }
 0x6dc   :  { %v5188_v5 = vadd.f32 %v4831_v12, %v4540_v46  ;;  %v5189_v24 = vadd.f32 %v4831_v12, %v4541_v13  ;;  %v5190_v40 = vadd.f32 %v4831_v12, %v4542_v62  ;;  %v2797_v9 = vadd.f32 %v2796_v6, %v2332_v35  ;;  %v11997_v13 = vld [vmem:[#allocation97_spill] sm:$0xff]  ;;  %v11998_v62 = vld [vmem:[#allocation99_spill] sm:$0xff] }
 0x6dd   :  { %5562 = vst [vmem:[#allocation5 + $0x968] sm:$0xff] %v5184_v4  ;;  %v2334_v50 = vmul.f32 %v11968_v7, %v11968_v7  ;;  %v2335_v44 = vmul.f32 %v9506_v36, %v9506_v36 }
 0x6de   :  { %5563 = vst [vmem:[#allocation5 + $0x970] sm:$0xff] %v5185_v45  ;;  %v2798_v4 = vadd.f32 %v2797_v9, %v2333_v25  ;;  %v11996_v45 = vld [vmem:[#allocation96_spill] sm:$0xff]  ;;  %v12002_v25 = vld [vmem:[#allocation259_spill] sm:$0xff] }
 0x6df   :  { %5564 = vst [vmem:[#allocation5 + $0x978] sm:$0xff] %v5186_v0  ;;  %v4396_v0 = vmul.f32 %v4083_v43, %v11996_v45  ;;  %v2800_v6 = vsel %vm1539_vm2, %v2335_v44, 0.0 }
 0x6e0   :  { %5565 = vst [vmem:[#allocation5 + $0x980] sm:$0xff] %v5187_v42  ;;  %v4397_v42 = vmul.f32 %v4083_v43, %v11997_v13  ;;  %v2799_v18 = vadd.f32 %v2798_v4, %v2334_v50 }
 0x6e1   :  { %5566 = vst [vmem:[#allocation5 + $0x988] sm:$0xff] %v5188_v5  ;;  %v4398_v5 = vmul.f32 %v4083_v43, %v11998_v62  ;;  %v12004_v62 = vld [vmem:[#allocation204_spill] sm:$0xff] }
 0x6e2   :  { %5567 = vst [vmem:[#allocation5 + $0x990] sm:$0xff] %v5189_v24  ;;  %v11999_v24 = vld [vmem:[#allocation245_spill] sm:$0xff] }
 0x6e3   :  { %v1984_v61 = vpop.xlane.xlu1 %1983  ;;  %5568 = vst.msk [vmem:[#allocation5 + $0x998] sm:$0xff] %vm1539_vm2, %v5190_v40  ;;  %v4399_v40 = vmul.f32 %v4083_v43, %v11999_v24 }
 0x6e4   :  { %4147 = vperm.xlu1 %6145, %v11994_v27   ;;  %v2776_v52 = vpop.xlane.xlu2 %2775  ;;  %v10298_v31 = vmul.f32 0.0012755102, %v1984_v61 }
 0x6e5   :  { %v2980_v63 = vmul.f32 0.0012755102, %v2776_v52  ;;  %v12001_v52 = vld [vmem:[#allocation260_spill] sm:$0xff] }
 0x6e6   :  { %v3042_v12 = vmul.f32 %v10298_v31, %v10298_v31 }
 0x6e7   :  { %v3088_v20 = vsub.f32 %v2980_v63, %v3034_v59  ;;  %v4401_v59 = vmul.f32 %v4083_v43, %v12001_v52 }
 0x6e9   :  { %v3196_v34 = vadd.f32 1e-05, %v3088_v20  ;;  %v4402_v20 = vmul.f32 %v4083_v43, %v12002_v25  ;;  %v3842_v43 = vld [vmem:[%s10716_s3 + $0x138] sm:$0xff]  ;;  %v3883_v25 = vmul.f32 %v10269_v49, %v10160_v53  ;;  %v3852_v53 = vld [vmem:[%s10716_s3 + $0x188] sm:$0xff] }
 0x6ea   :  { %v12010_v49 = vld [vmem:[#allocation276_spill] sm:$0xff] }
 0x6eb   :  { %v2848_v38 = vpop.xlane.xlu1 %2847  ;;  %6235 = vrsqrt.f32 %v3196_v34  ;;  %vm3625_vm0 = vweird.f32 %v3196_v34 }
 0x6ec   :  { %v2988_v46 = vmul.f32 0.0012755102, %v2848_v38  ;;  %4795 = vperm.xlu1 %6145, %v3947_v11   ;;  %v4731_v8 = vpop.permute.xlu2 %4730 }
 0x6ed   :  { %v5044_v27 = vadd.f32 %v4731_v8, %v4396_v0  ;;  %v5045_v15 = vadd.f32 %v4731_v8, %v4397_v42  ;;  %v5046_v35 = vadd.f32 %v4731_v8, %v4398_v5  ;;  %v5047_v63 = vadd.f32 %v4731_v8, %v4399_v40  ;;  %v12003_v0 = vld [vmem:[#allocation59_spill] sm:$0xff] }
 0x6ee   :  { %v3096_v61 = vsub.f32 %v2988_v46, %v3042_v12  ;;  %v5048_v9 = vadd.f32 %v4731_v8, %v4400_v55  ;;  %v5049_v11 = vadd.f32 %v4731_v8, %v4401_v59  ;;  %v5050_v12 = vadd.f32 %v4731_v8, %v4402_v20  ;;  %v3142_v8 = vld [vmem:[%s10715_s2 + $0x148] sm:$0xff] }
 0x6ef   :  { %5422 = vst [vmem:[#allocation5 + $0x508] sm:$0xff] %v5044_v27  ;;  %v2801_v46 = vadd.f32 %v2800_v6, %v2799_v18  ;;  %v3950_v5 = vsub.f32 %v3842_v43, %v12004_v62 }
 0x6f0   :  { %v3204_v56 = vadd.f32 1e-05, %v3096_v61  ;;  %5423 = vst [vmem:[#allocation5 + $0x510] sm:$0xff] %v5045_v15 }
 0x6f1   :  { %v6236_v38 = vpop.eup %6235  ;;  %5424 = vst [vmem:[#allocation5 + $0x518] sm:$0xff] %v5046_v35 }
 0x6f2   :  { %6237 = vrsqrt.f32 %v3204_v56  ;;  %v3620_v45 = vmul.f32 %v6236_v38, %v3196_v34  ;;  %5425 = vst [vmem:[#allocation5 + $0x520] sm:$0xff] %v5047_v63  ;;  %vm3626_vm15 = vweird.f32 %v6236_v38  ;;  %vm3705_vm4 = vweird.f32 %v3204_v56  ;;  %v3150_v34 = vld [vmem:[%s10715_s2 + $0x188] sm:$0xff]  ;;  %v12005_v63 = vld [vmem:[#allocation289_spill] sm:$0xff] }
 0x6f3   :  { %5426 = vst [vmem:[#allocation5 + $0x528] sm:$0xff] %v5048_v9  ;;  %2802 = vadd.xlane.f32.xlu2 %v2801_v46  ;;  %vm3627_vm3 = vmor %vm3625_vm0, %vm3626_vm15  ;;  %v12006_v9 = vld [vmem:[#allocation136_spill] sm:$0xff] }
 0x6f4   :  { %4162 = vperm.xlu1 %6145, %v12003_v0   ;;  %v3621_v13 = vmul.f32 %v6236_v38, %v3620_v45  ;;  %5427 = vst [vmem:[#allocation5 + $0x530] sm:$0xff] %v5049_v11  ;;  %v12007_v11 = vld [vmem:[#allocation137_spill] sm:$0xff]  ;;  %v12009_v45 = vld [vmem:[#allocation55_spill] sm:$0xff] }
 0x6f5   :  { %5428 = vst.msk [vmem:[#allocation5 + $0x538] sm:$0xff] %vm1539_vm2, %v5050_v12  ;;  %v12008_v12 = vld [vmem:[#allocation139_spill] sm:$0xff] }
 0x6f6   :  { %v3622_v44 = vmul.f32 0.5, %v3621_v13 }
 0x6f8   :  { %v6238_v50 = vpop.eup %6237  ;;  %v3623_v42 = vsub.f32 1.5, %v3622_v44  ;;  %v12011_v44 = vld [vmem:[#allocation20_spill] sm:$0xff] }
 0x6f9   :  { %v3700_v4 = vmul.f32 %v6238_v50, %v3204_v56  ;;  %vm3706_vm1 = vweird.f32 %v6238_v50  ;;  %v3845_v56 = vld [vmem:[%s10716_s3 + $0x150] sm:$0xff] }
 0x6fa   :  { %v3624_v40 = vmul.f32 %v6236_v38, %v3623_v42  ;;  %vm3707_vm5 = vmor %vm3705_vm4, %vm3706_vm1  ;;  %v3953_v0 = vsub.f32 %v3845_v56, %v12009_v45 }
 0x6fb   :  { %v3701_v24 = vmul.f32 %v6238_v50, %v3700_v4 }
 0x6fc   :  { %4810 = vperm.xlu1 %6145, %v3950_v5   ;;  %v3628_v23 = vsel %vm3627_vm3, %v6236_v38, %v3624_v40  ;;  %v12012_v5 = vld [vmem:[#allocation167_spill] sm:$0xff] }
 0x6fd   :  { %v3702_v61 = vmul.f32 0.5, %v3701_v24  ;;  %v10324_v27 = vmul.f32 %v3628_v23, %v3142_v8 }
 0x6ff   :  { %v3703_v55 = vsub.f32 1.5, %v3702_v61  ;;  %v10328_v35 = vmul.f32 %v10324_v27, %v10281_v37  ;;  %v3829_v37 = vld [vmem:[%s10716_s3 + $0xd0] sm:$0xff] }
 0x700   :  { %v3937_v43 = vsub.f32 %v3829_v37, %v3883_v25  ;;  %v12013_v61 = vld [vmem:[#allocation21_spill] sm:$0xff]  ;;  %v12015_v25 = vld [vmem:[#allocation202_spill] sm:$0xff] }
 0x701   :  { %v3704_v15 = vmul.f32 %v6238_v50, %v3703_v55  ;;  %v2968_v56 = vmul.f32 0.0012755102, %v12015_v25 }
 0x703   :  { %v4133_v52 = vpop.permute.xlu1 %4132  ;;  %v3708_v59 = vsel %vm3707_vm5, %v6238_v50, %v3704_v15 }
 0x704   :  { %4177 = vperm.xlu1 %6145, %v12005_v63   ;;  %v3798_v6 = vmul.f32 %v3708_v59, %v3150_v34  ;;  %v4466_v18 = vmul.f32 %v4133_v52, %v12006_v9  ;;  %v4467_v38 = vmul.f32 %v4133_v52, %v12007_v11  ;;  %v4468_v46 = vmul.f32 %v4133_v52, %v12008_v12  ;;  %v3848_v59 = vld [vmem:[%s10716_s3 + $0x168] sm:$0xff]  ;;  %v12016_v9 = vld [vmem:[#allocation26_spill] sm:$0xff] }
 0x705   :  { %v4469_v13 = vmul.f32 %v4133_v52, %v12010_v49  ;;  %v4470_v4 = vmul.f32 %v4133_v52, %v12011_v44  ;;  %v4471_v24 = vmul.f32 %v4133_v52, %v12012_v5  ;;  %v4472_v23 = vmul.f32 %v4133_v52, %v12013_v61  ;;  %v12014_v63 = vld [vmem:[#allocation47_spill] sm:$0xff] }
 0x706   :  { %4212 = vperm.xlu0 %6144, %v3798_v6   ;;  %v3906_v20 = vmul.f32 %v3798_v6, %v10298_v31  ;;  %v3956_v52 = vsub.f32 %v3848_v59, %v9952_v60  ;;  %v10361_v6 = vmul.f32 0.0012755102, %v12014_v63  ;;  %v3851_v11 = vld [vmem:[%s10716_s3 + $0x180] sm:$0xff] }
 0x707   :  { %v3959_v45 = vsub.f32 %v3851_v11, %v10058_v47  ;;  %v12020_v49 = vld [vmem:[#allocation215_spill] sm:$0xff] }
 0x708   :  { %v3960_v8 = vsub.f32 %v3852_v53, %v3906_v20  ;;  %v3022_v37 = vmul.f32 %v10361_v6, %v10361_v6  ;;  %v12021_v44 = vld [vmem:[#allocation11_spill] sm:$0xff] }
 0x70a   :  { %v3076_v20 = vsub.f32 %v2968_v56, %v3022_v37 }
 0x70b   :  { %v4781_v50 = vpop.permute.xlu1 %4780  ;;  %4745 = vperm.xlu2 %6146, %v3937_v43  }
 0x70c   :  { %v5114_v42 = vadd.f32 %v4781_v50, %v4466_v18  ;;  %v5115_v31 = vadd.f32 %v4781_v50, %v4467_v38  ;;  %v5116_v62 = vadd.f32 %v4781_v50, %v4468_v46  ;;  %4825 = vperm.xlu1 %6145, %v3953_v0   ;;  %v5117_v40 = vadd.f32 %v4781_v50, %v4469_v13  ;;  %v12018_v38 = vld [vmem:[#allocation122_spill] sm:$0xff] }
 0x70d   :  { %v5118_v55 = vadd.f32 %v4781_v50, %v4470_v4  ;;  %v5119_v15 = vadd.f32 %v4781_v50, %v4471_v24  ;;  %v5120_v34 = vadd.f32 %v4781_v50, %v4472_v23  ;;  %v3184_v60 = vadd.f32 1e-05, %v3076_v20  ;;  %v12019_v0 = vld [vmem:[#allocation214_spill] sm:$0xff] }
 0x70e   :  { %5492 = vst [vmem:[#allocation5 + $0x738] sm:$0xff] %v5114_v42  ;;  %4860 = vperm.xlu0 %6144, %v3960_v8   ;;  %v12022_v42 = vld [vmem:[#allocation216_spill] sm:$0xff] }
 0x70f   :  { %5493 = vst [vmem:[#allocation5 + $0x740] sm:$0xff] %v5115_v31  ;;  %6239 = vrsqrt.f32 %v3184_v60  ;;  %v1963_v31 = vsel %vm1539_vm2, %v12022_v42, 0.0  ;;  %vm3505_vm7 = vweird.f32 %v3184_v60 }
 0x710   :  { %5494 = vst [vmem:[#allocation5 + $0x748] sm:$0xff] %v5116_v62 }
 0x711   :  { %5495 = vst [vmem:[#allocation5 + $0x750] sm:$0xff] %v5117_v40 }
 0x712   :  { %5496 = vst [vmem:[#allocation5 + $0x758] sm:$0xff] %v5118_v55 }
 0x713   :  { %5497 = vst [vmem:[#allocation5 + $0x760] sm:$0xff] %v5119_v15 }
 0x714   :  { %5498 = vst.msk [vmem:[#allocation5 + $0x768] sm:$0xff] %vm1539_vm2, %v5120_v34  ;;  %4192 = vperm.xlu1 %6145, %v9937_v48   ;;  %v12017_v48 = vld [vmem:[#allocation74_spill] sm:$0xff] }
 0x715   :  { %v1958_v18 = vadd.f32 %v12017_v48, %v12016_v9  ;;  %v6240_v5 = vpop.eup %6239 }
 0x716   :  { %v3500_v15 = vmul.f32 %v6240_v5, %v3184_v60  ;;  %vm3506_vm6 = vweird.f32 %v6240_v5  ;;  %v3153_v60 = vld [vmem:[%s10715_s2 + $0x1a0] sm:$0xff] }
 0x717   :  { %v1959_v12 = vadd.f32 %v1958_v18, %v12018_v38  ;;  %vm3507_vm8 = vmor %vm3505_vm7, %vm3506_vm6 }
 0x718   :  { %v3501_v59 = vmul.f32 %v6240_v5, %v3500_v15 }
 0x719   :  { %v1960_v53 = vadd.f32 %v1959_v12, %v12019_v0  ;;  %v3130_v12 = vld [vmem:[%s10715_s2 + $0xe8] sm:$0xff] }
 0x71b   :  { %v1961_v13 = vadd.f32 %v1960_v53, %v12020_v49 }
 0x71c   :  { %4840 = vperm.xlu1 %6145, %v3956_v52   ;;  %v3502_v52 = vmul.f32 0.5, %v3501_v59 }
 0x71d   :  { %v1962_v4 = vadd.f32 %v1961_v13, %v12021_v44 }
 0x71e   :  { %v3503_v37 = vsub.f32 1.5, %v3502_v52 }
 0x71f   :  { %v1964_v55 = vadd.f32 %v1963_v31, %v1962_v4 }
 0x720   :  { %v3504_v11 = vmul.f32 %v6240_v5, %v3503_v37 }
 0x724   :  { %4207 = vperm.xlu1 %6145, %v10050_v22  }
 0x725   :  { %v1939_v4 = vpop.xlane.xlu2 %1938 }
 0x726   :  { %v4198_v46 = vpop.permute.xlu0 %4197 }
 0x727   :  { %v4557_v22 = vmul.f32 %v4198_v46, %v11910_v21  ;;  %v4558_v43 = vmul.f32 %v4198_v46, %v11911_v29  ;;  %v4559_v50 = vmul.f32 %v4198_v46, %v11912_v19  ;;  %v4560_v62 = vmul.f32 %v4198_v46, %v9690_v39 }
 0x728   :  { %v4561_v24 = vmul.f32 %v4198_v46, %v9696_v33  ;;  %v4562_v21 = vmul.f32 %v4198_v46, %v9706_v58  ;;  %v4563_v29 = vmul.f32 %v4198_v46, %v9704_v57  ;;  %v3854_v58 = vld [vmem:[%s10716_s3 + $0x198] sm:$0xff]  ;;  %v3508_v46 = vsel %vm3507_vm8, %v6240_v5, %v3504_v11 }
 0x729   :  { %v3962_v57 = vsub.f32 %v3854_v58, %v10177_v14  ;;  %v10395_v53 = vmul.f32 %v3508_v46, %v3130_v12  ;;  %v2351_v11 = vmul.f32 %v12017_v48, %v12017_v48  ;;  %v2350_v46 = vmul.f32 %v12016_v9, %v12016_v9 }
 0x72c   :  { %4855 = vperm.xlu1 %6145, %v3959_v45  }
 0x72e   :  { %v4846_v47 = vpop.permute.xlu0 %4845 }
 0x72f   :  { %v5205_v40 = vadd.f32 %v4846_v47, %v4557_v22  ;;  %v5206_v8 = vadd.f32 %v4846_v47, %v4558_v43  ;;  %v5207_v61 = vadd.f32 %v4846_v47, %v4559_v50  ;;  %v5208_v23 = vadd.f32 %v4846_v47, %v4560_v62 }
 0x730   :  { %v5209_v19 = vadd.f32 %v4846_v47, %v4561_v24  ;;  %v5210_v34 = vadd.f32 %v4846_v47, %v4562_v21  ;;  %v5211_v39 = vadd.f32 %v4846_v47, %v4563_v29  ;;  %v12023_v24 = vld [vmem:[#allocation148_spill] sm:$0xff]  ;;  %v12025_v21 = vld [vmem:[#allocation151_spill] sm:$0xff] }
 0x731   :  { %5583 = vst [vmem:[#allocation5 + $0xa10] sm:$0xff] %v5205_v40  ;;  %v3855_v29 = vld [vmem:[%s10716_s3 + $0x1a0] sm:$0xff] }
 0x732   :  { %5584 = vst [vmem:[#allocation5 + $0xa18] sm:$0xff] %v5206_v8  ;;  %v12024_v8 = vld [vmem:[#allocation149_spill] sm:$0xff] }
 0x733   :  { %5585 = vst [vmem:[#allocation5 + $0xa20] sm:$0xff] %v5207_v61 }
 0x734   :  { %4222 = vperm.xlu1 %6145, %v10170_v32   ;;  %1965 = vadd.xlane.f32.xlu2 %v1964_v55  ;;  %5586 = vst [vmem:[#allocation5 + $0xa28] sm:$0xff] %v5208_v23 }
 0x735   :  { %5587 = vst [vmem:[#allocation5 + $0xa30] sm:$0xff] %v5209_v19  ;;  %v12026_v19 = vld [vmem:[#allocation33_spill] sm:$0xff] }
 0x736   :  { %v2011_v33 = vpop.xlane.xlu1 %2010  ;;  %5588 = vst [vmem:[#allocation5 + $0xa38] sm:$0xff] %v5210_v34  ;;  %v12027_v34 = vld [vmem:[#allocation35_spill] sm:$0xff] }
 0x737   :  { %5589 = vst.msk [vmem:[#allocation5 + $0xa40] sm:$0xff] %vm1539_vm2, %v5211_v39  ;;  %v2937_v32 = vmul.f32 0.0012755102, %v2011_v33 }
 0x739   :  { %v3045_v25 = vmul.f32 %v2937_v32, %v2937_v32 }
 0x73c   :  { %4870 = vperm.xlu1 %6145, %v3962_v57   ;;  %v4098_v57 = vpop.permute.xlu2 %4097 }
 0x73e   :  { %v2875_v63 = vpop.xlane.xlu1 %2874 }
 0x73f   :  { %v2991_v56 = vmul.f32 0.0012755102, %v2875_v63 }
 0x741   :  { %v3099_v20 = vsub.f32 %v2991_v56, %v3045_v25  ;;  %v12029_v56 = vld [vmem:[#allocation178_spill] sm:$0xff] }
 0x743   :  { %v3207_v18 = vadd.f32 1e-05, %v3099_v20 }
 0x745   :  { %6241 = vrsqrt.f32 %v3207_v18  ;;  %vm3735_vm10 = vweird.f32 %v3207_v18 }
 0x74b   :  { %v6242_v14 = vpop.eup %6241 }
 0x74c   :  { %v3730_v45 = vmul.f32 %v6242_v14, %v3207_v18  ;;  %4112 = vperm.xlu2 %6146, %v10395_v53   ;;  %vm3736_vm9 = vweird.f32 %v6242_v14 }
 0x74d   :  { %vm3737_vm11 = vmor %vm3735_vm10, %vm3736_vm9 }
 0x74e   :  { %v3731_v13 = vmul.f32 %v6242_v14, %v3730_v45  ;;  %v10417_v45 = vmul.f32 0.0012755102, %v1939_v4 }
 0x750   :  { %v3732_v22 = vmul.f32 0.5, %v3731_v13 }
 0x752   :  { %v3733_v43 = vsub.f32 1.5, %v3732_v22  ;;  %v2822_v22 = vadd.f32 %v2351_v11, %v2350_v46  ;;  %v12037_v46 = vld [vmem:[#allocation274_spill] sm:$0xff] }
 0x754   :  { %v3734_v50 = vmul.f32 %v6242_v14, %v3733_v43  ;;  %v2353_v43 = vmul.f32 %v12019_v0, %v12019_v0 }
 0x756   :  { %v4148_v31 = vpop.permute.xlu1 %4147  ;;  %v3738_v62 = vsel %vm3737_vm11, %v6242_v14, %v3734_v50  ;;  %v2352_v14 = vmul.f32 %v12018_v38, %v12018_v38 }
 0x757   :  { %v3801_v47 = vmul.f32 %v3738_v62, %v3153_v60  ;;  %v4487_v40 = vmul.f32 %v4148_v31, %v12023_v24  ;;  %v4488_v61 = vmul.f32 %v4148_v31, %v12024_v8  ;;  %v4489_v23 = vmul.f32 %v4148_v31, %v12025_v21  ;;  %v12030_v8 = vld [vmem:[#allocation159_spill] sm:$0xff]  ;;  %v12031_v21 = vld [vmem:[#allocation160_spill] sm:$0xff] }
 0x758   :  { %v4490_v55 = vmul.f32 %v4148_v31, %v12026_v19  ;;  %v4491_v39 = vmul.f32 %v4148_v31, %v12027_v34  ;;  %v4493_v37 = vmul.f32 %v4148_v31, %v12029_v56  ;;  %v2823_v60 = vadd.f32 %v2822_v22, %v2352_v14  ;;  %v12033_v34 = vld [vmem:[#allocation109_spill] sm:$0xff] }
 0x759   :  { %4227 = vperm.xlu0 %6144, %v3801_v47   ;;  %v3909_v5 = vmul.f32 %v3801_v47, %v2937_v32  ;;  %v12028_v32 = vld [vmem:[#allocation191_spill] sm:$0xff]  ;;  %v3037_v62 = vmul.f32 %v10417_v45, %v10417_v45  ;;  %v2356_v19 = vmul.f32 %v12022_v42, %v12022_v42  ;;  %v4422_v14 = vmul.f32 %v4098_v57, %v12037_v46  ;;  %v12045_v46 = vld [vmem:[#allocation54_spill] sm:$0xff] }
 0x75a   :  { %v4492_v52 = vmul.f32 %v4148_v31, %v12028_v32  ;;  %v2354_v31 = vmul.f32 %v12020_v49, %v12020_v49  ;;  %v2824_v4 = vadd.f32 %v2823_v60, %v2353_v43  ;;  %v12038_v60 = vld [vmem:[#allocation273_spill] sm:$0xff] }
 0x75b   :  { %v3963_v25 = vsub.f32 %v3855_v29, %v3909_v5  ;;  %v2355_v29 = vmul.f32 %v12021_v44, %v12021_v44  ;;  %v2827_v43 = vsel %vm1539_vm2, %v2356_v19, 0.0 }
 0x75c   :  { %v2825_v24 = vadd.f32 %v2824_v4, %v2354_v31  ;;  %v4423_v31 = vmul.f32 %v4098_v57, %v12038_v60 }
 0x75e   :  { %v4796_v15 = vpop.permute.xlu1 %4795 }
 0x75f   :  { %v5135_v33 = vadd.f32 %v4796_v15, %v4487_v40  ;;  %v5136_v58 = vadd.f32 %v4796_v15, %v4488_v61  ;;  %v5137_v59 = vadd.f32 %v4796_v15, %v4489_v23  ;;  %v5138_v63 = vadd.f32 %v4796_v15, %v4490_v55  ;;  %v12032_v55 = vld [vmem:[#allocation108_spill] sm:$0xff] }
 0x760   :  { %v5139_v20 = vadd.f32 %v4796_v15, %v4491_v39  ;;  %v5140_v18 = vadd.f32 %v4796_v15, %v4492_v52  ;;  %v5141_v12 = vadd.f32 %v4796_v15, %v4493_v37  ;;  %v4417_v15 = vmul.f32 %v4098_v57, %v12032_v55  ;;  %v12036_v37 = vld [vmem:[#allocation272_spill] sm:$0xff] }
 0x761   :  { %5513 = vst [vmem:[#allocation5 + $0x7e0] sm:$0xff] %v5135_v33  ;;  %4875 = vperm.xlu0 %6144, %v3963_v25   ;;  %v4418_v39 = vmul.f32 %v4098_v57, %v12033_v34  ;;  %v12041_v34 = vld [vmem:[#allocation190_spill] sm:$0xff] }
 0x762   :  { %5514 = vst [vmem:[#allocation5 + $0x7e8] sm:$0xff] %v5136_v58  ;;  %v12034_v58 = vld [vmem:[#allocation111_spill] sm:$0xff] }
 0x763   :  { %5515 = vst [vmem:[#allocation5 + $0x7f0] sm:$0xff] %v5137_v59  ;;  %v4419_v59 = vmul.f32 %v4098_v57, %v12034_v58 }
 0x764   :  { %5516 = vst [vmem:[#allocation5 + $0x7f8] sm:$0xff] %v5138_v63  ;;  %v12035_v63 = vld [vmem:[#allocation249_spill] sm:$0xff] }
 0x765   :  { %5517 = vst [vmem:[#allocation5 + $0x800] sm:$0xff] %v5139_v20  ;;  %v4420_v25 = vmul.f32 %v4098_v57, %v12035_v63  ;;  %v4421_v20 = vmul.f32 %v4098_v57, %v12036_v37  ;;  %v12042_v57 = vld [vmem:[#allocation45_spill] sm:$0xff] }
 0x766   :  { %5518 = vst [vmem:[#allocation5 + $0x808] sm:$0xff] %v5140_v18  ;;  %v4163_v13 = vpop.permute.xlu1 %4162  ;;  %v2803_v50 = vpop.xlane.xlu2 %2802 }
 0x767   :  { %5519 = vst.msk [vmem:[#allocation5 + $0x810] sm:$0xff] %vm1539_vm2, %v5141_v12  ;;  %v2983_v47 = vmul.f32 0.0012755102, %v2803_v50  ;;  %v4508_v61 = vmul.f32 %v4163_v13, %v12030_v8  ;;  %v4509_v23 = vmul.f32 %v4163_v13, %v12031_v21  ;;  %v2826_v50 = vadd.f32 %v2825_v24, %v2355_v29 }
 0x768   :  { %v4513_v19 = vmul.f32 %v4163_v13, %v12042_v57 }
 0x769   :  { %v3091_v5 = vsub.f32 %v2983_v47, %v3037_v62  ;;  %v12039_v47 = vld [vmem:[#allocation161_spill] sm:$0xff]  ;;  %v2828_v55 = vadd.f32 %v2827_v43, %v2826_v50  ;;  %v12047_v50 = vld [vmem:[#allocation196_spill] sm:$0xff] }
 0x76a   :  { %v4510_v4 = vmul.f32 %v4163_v13, %v12039_v47 }
 0x76b   :  { %v10426_v40 = vadd.f32 1e-05, %v3091_v5 }
 0x76d   :  { %6243 = vrsqrt.f32 %v10426_v40  ;;  %vm3655_vm13 = vweird.f32 %v10426_v40 }
 0x76e   :  { %v4811_v33 = vpop.permute.xlu1 %4810  ;;  %v4746_v56 = vpop.permute.xlu2 %4745 }
 0x76f   :  { %v5156_v32 = vadd.f32 %v4811_v33, %v4508_v61  ;;  %v5157_v52 = vadd.f32 %v4811_v33, %v4509_v23  ;;  %v5065_v18 = vadd.f32 %v4746_v56, %v4417_v15  ;;  %v5066_v11 = vadd.f32 %v4746_v56, %v4418_v39  ;;  %v12040_v61 = vld [vmem:[#allocation174_spill] sm:$0xff] }
 0x770   :  { %v5067_v12 = vadd.f32 %v4746_v56, %v4419_v59  ;;  %v5068_v22 = vadd.f32 %v4746_v56, %v4420_v25  ;;  %v5069_v62 = vadd.f32 %v4746_v56, %v4421_v20  ;;  %v5070_v5 = vadd.f32 %v4746_v56, %v4422_v14 }
 0x771   :  { %5534 = vst [vmem:[#allocation5 + $0x888] sm:$0xff] %v5156_v32  ;;  %v4511_v21 = vmul.f32 %v4163_v13, %v12040_v61  ;;  %v5071_v23 = vadd.f32 %v4746_v56, %v4423_v31  ;;  %v4512_v39 = vmul.f32 %v4163_v13, %v12041_v34  ;;  %v5158_v24 = vadd.f32 %v4811_v33, %v4510_v4  ;;  %v12043_v32 = vld [vmem:[#allocation286_spill] sm:$0xff] }
 0x772   :  { %5535 = vst [vmem:[#allocation5 + $0x890] sm:$0xff] %v5157_v52  ;;  %v4514_v52 = vmul.f32 %v4163_v13, %v12043_v32  ;;  %v5161_v25 = vadd.f32 %v4811_v33, %v4513_v19  ;;  %v3145_v31 = vld [vmem:[%s10715_s2 + $0x160] sm:$0xff] }
 0x773   :  { %5443 = vst [vmem:[#allocation5 + $0x5b0] sm:$0xff] %v5065_v18  ;;  %v6244_v8 = vpop.eup %6243  ;;  %v5159_v58 = vadd.f32 %v4811_v33, %v4511_v21  ;;  %v5160_v63 = vadd.f32 %v4811_v33, %v4512_v39  ;;  %v12049_v21 = vld [vmem:[#allocation288_spill] sm:$0xff] }
 0x774   :  { %5444 = vst [vmem:[#allocation5 + $0x5b8] sm:$0xff] %v5066_v11  ;;  %v3650_v15 = vmul.f32 %v6244_v8, %v10426_v40  ;;  %v5162_v20 = vadd.f32 %v4811_v33, %v4514_v52  ;;  %vm3656_vm12 = vweird.f32 %v6244_v8  ;;  %v12044_v11 = vld [vmem:[#allocation10_spill] sm:$0xff]  ;;  %v12050_v40 = vld [vmem:[#allocation280_spill] sm:$0xff] }
 0x775   :  { %5445 = vst [vmem:[#allocation5 + $0x5c0] sm:$0xff] %v5067_v12  ;;  %2829 = vadd.xlane.f32.xlu2 %v2828_v55  ;;  %vm3657_vm14 = vmor %vm3655_vm13, %vm3656_vm12 }
 0x776   :  { %5446 = vst [vmem:[#allocation5 + $0x5c8] sm:$0xff] %v5068_v22  ;;  %v4178_v29 = vpop.permute.xlu1 %4177  ;;  %v3651_v59 = vmul.f32 %v6244_v8, %v3650_v15  ;;  %v12046_v22 = vld [vmem:[#allocation102_spill] sm:$0xff] }
 0x777   :  { %5447 = vst [vmem:[#allocation5 + $0x5d0] sm:$0xff] %v5069_v62  ;;  %v4529_v12 = vmul.f32 %v4178_v29, %v12044_v11  ;;  %v4530_v14 = vmul.f32 %v4178_v29, %v12045_v46  ;;  %v4531_v13 = vmul.f32 %v4178_v29, %v12046_v22  ;;  %v4532_v60 = vmul.f32 %v4178_v29, %v12047_v50  ;;  %v12048_v62 = vld [vmem:[#allocation275_spill] sm:$0xff] }
 0x778   :  { %5448 = vst [vmem:[#allocation5 + $0x5d8] sm:$0xff] %v5070_v5  ;;  %v4213_v56 = vpop.permute.xlu0 %4212  ;;  %v3652_v37 = vmul.f32 0.5, %v3651_v59  ;;  %v4533_v47 = vmul.f32 %v4178_v29, %v12048_v62  ;;  %v4535_v34 = vmul.f32 %v4178_v29, %v12050_v40 }
 0x779   :  { %5449 = vst.msk [vmem:[#allocation5 + $0x5e0] sm:$0xff] %vm1539_vm2, %v5071_v23  ;;  %v4534_v23 = vmul.f32 %v4178_v29, %v12049_v21  ;;  %v4578_v19 = vmul.f32 %v4213_v56, %v11936_v28  ;;  %v4579_v59 = vmul.f32 %v4213_v56, %v11935_v26  ;;  %v4582_v28 = vmul.f32 %v4213_v56, %v9880_v51  ;;  %v12052_v26 = vld [vmem:[#allocation212_spill] sm:$0xff] }
 0x77a   :  { %5536 = vst [vmem:[#allocation5 + $0x898] sm:$0xff] %v5158_v24  ;;  %v3653_v18 = vsub.f32 1.5, %v3652_v37  ;;  %v4583_v11 = vmul.f32 %v4213_v56, %v12052_v26  ;;  %v3832_v51 = vld [vmem:[%s10716_s3 + $0xe8] sm:$0xff] }
 0x77b   :  { %5537 = vst [vmem:[#allocation5 + $0x8a0] sm:$0xff] %v5159_v58  ;;  %v12065_v26 = vld [vmem:[#allocation284_spill] sm:$0xff] }
 0x77c   :  { %5538 = vst [vmem:[#allocation5 + $0x8a8] sm:$0xff] %v5160_v63  ;;  %v3654_v43 = vmul.f32 %v6244_v8, %v3653_v18 }
 0x77d   :  { %5539 = vst [vmem:[#allocation5 + $0x8b0] sm:$0xff] %v5161_v25  ;;  %v4581_v25 = vmul.f32 %v4213_v56, %v9871_v30  ;;  %v3886_v30 = vmul.f32 %v10395_v53, %v10361_v6 }
 0x77e   :  { %5540 = vst.msk [vmem:[#allocation5 + $0x8b8] sm:$0xff] %vm1539_vm2, %v5162_v20  ;;  %v4826_v33 = vpop.permute.xlu1 %4825  ;;  %v3658_v15 = vsel %vm3657_vm14, %v6244_v8, %v3654_v43  ;;  %v12051_v8 = vld [vmem:[#allocation130_spill] sm:$0xff]  ;;  %v12054_v43 = vld [vmem:[#allocation19_spill] sm:$0xff] }
 0x77f   :  { %v5177_v4 = vadd.f32 %v4826_v33, %v4529_v12  ;;  %v5178_v5 = vadd.f32 %v4826_v33, %v4530_v14  ;;  %v5179_v61 = vadd.f32 %v4826_v33, %v4531_v13  ;;  %v5180_v55 = vadd.f32 %v4826_v33, %v4532_v60  ;;  %v12055_v60 = vld [vmem:[#allocation66_spill] sm:$0xff] }
 0x780   :  { %v5181_v39 = vadd.f32 %v4826_v33, %v4533_v47  ;;  %v4861_v24 = vpop.permute.xlu0 %4860  ;;  %v10462_v57 = vmul.f32 %v3658_v15, %v3145_v31  ;;  %v5182_v58 = vadd.f32 %v4826_v33, %v4534_v23  ;;  %v5183_v32 = vadd.f32 %v4826_v33, %v4535_v34  ;;  %v12056_v33 = vld [vmem:[#allocation114_spill] sm:$0xff]  ;;  %v12057_v47 = vld [vmem:[#allocation185_spill] sm:$0xff]  ;;  %v12060_v34 = vld [vmem:[#allocation56_spill] sm:$0xff] }
 0x781   :  { %5555 = vst [vmem:[#allocation5 + $0x930] sm:$0xff] %v5177_v4  ;;  %v4580_v63 = vmul.f32 %v4213_v56, %v12051_v8  ;;  %v5226_v29 = vadd.f32 %v4861_v24, %v4578_v19  ;;  %v5227_v37 = vadd.f32 %v4861_v24, %v4579_v59  ;;  %v5229_v12 = vadd.f32 %v4861_v24, %v4581_v25  ;;  %v12058_v4 = vld [vmem:[#allocation201_spill] sm:$0xff]  ;;  %v12063_v25 = vld [vmem:[#allocation126_spill] sm:$0xff] }
 0x782   :  { %5556 = vst [vmem:[#allocation5 + $0x938] sm:$0xff] %v5178_v5  ;;  %v10468_v52 = vmul.f32 %v10462_v57, %v10417_v45  ;;  %v12053_v45 = vld [vmem:[#allocation211_spill] sm:$0xff]  ;;  %v5230_v14 = vadd.f32 %v4861_v24, %v4582_v28  ;;  %v5231_v22 = vadd.f32 %v4861_v24, %v4583_v11  ;;  %v3940_v62 = vsub.f32 %v3832_v51, %v3886_v30  ;;  %v12064_v28 = vld [vmem:[#allocation150_spill] sm:$0xff]  ;;  %v12067_v30 = vld [vmem:[#allocation53_spill] sm:$0xff] }
 0x783   :  { %5557 = vst [vmem:[#allocation5 + $0x940] sm:$0xff] %v5179_v61  ;;  %v5228_v20 = vadd.f32 %v4861_v24, %v4580_v63  ;;  %v4584_v46 = vmul.f32 %v4213_v56, %v12053_v45  ;;  %v12062_v63 = vld [vmem:[#allocation78_spill] sm:$0xff] }
 0x784   :  { %5558 = vst [vmem:[#allocation5 + $0x948] sm:$0xff] %v5180_v55  ;;  %v12059_v55 = vld [vmem:[#allocation57_spill] sm:$0xff] }
 0x785   :  { %5559 = vst [vmem:[#allocation5 + $0x950] sm:$0xff] %v5181_v39  ;;  %v5232_v13 = vadd.f32 %v4861_v24, %v4584_v46 }
 0x786   :  { %5560 = vst [vmem:[#allocation5 + $0x958] sm:$0xff] %v5182_v58  ;;  %v4193_v18 = vpop.permute.xlu1 %4192 }
 0x787   :  { %5561 = vst.msk [vmem:[#allocation5 + $0x960] sm:$0xff] %vm1539_vm2, %v5183_v32  ;;  %v4550_v50 = vmul.f32 %v4193_v18, %v12054_v43  ;;  %v4551_v56 = vmul.f32 %v4193_v18, %v12055_v60  ;;  %v4552_v31 = vmul.f32 %v4193_v18, %v12056_v33  ;;  %v4553_v6 = vmul.f32 %v4193_v18, %v12057_v47  ;;  %v12061_v32 = vld [vmem:[#allocation30_spill] sm:$0xff]  ;;  %v12068_v43 = vld [vmem:[#allocation52_spill] sm:$0xff] }
 0x788   :  { %5604 = vst [vmem:[#allocation5 + $0xab8] sm:$0xff] %v5226_v29  ;;  %v4554_v5 = vmul.f32 %v4193_v18, %v12058_v4  ;;  %v4555_v15 = vmul.f32 %v4193_v18, %v12059_v55  ;;  %v4556_v39 = vmul.f32 %v4193_v18, %v12060_v34  ;;  %v12070_v4 = vld [vmem:[#allocation38_spill] sm:$0xff] }
 0x789   :  { %5605 = vst [vmem:[#allocation5 + $0xac0] sm:$0xff] %v5227_v37  ;;  %v12074_v34 = vld [vmem:[#allocation90_spill] sm:$0xff] }
 0x78a   :  { %5606 = vst [vmem:[#allocation5 + $0xac8] sm:$0xff] %v5228_v20 }
 0x78b   :  { %5607 = vst [vmem:[#allocation5 + $0xad0] sm:$0xff] %v5229_v12 }
 0x78c   :  { %5608 = vst [vmem:[#allocation5 + $0xad8] sm:$0xff] %v5230_v14  ;;  %v12066_v14 = vld [vmem:[#allocation43_spill] sm:$0xff] }
 0x78d   :  { %5609 = vst [vmem:[#allocation5 + $0xae0] sm:$0xff] %v5231_v22  ;;  %4760 = vperm.xlu2 %6146, %v3940_v62   ;;  %v10496_v22 = vmul.f32 0.0012755102, %v12066_v14 }
 0x78e   :  { %5610 = vst.msk [vmem:[#allocation5 + $0xae8] sm:$0xff] %vm1539_vm2, %v5232_v13  ;;  %v4841_v53 = vpop.permute.xlu1 %4840 }
 0x78f   :  { %v5198_v61 = vadd.f32 %v4841_v53, %v4550_v50  ;;  %v5199_v21 = vadd.f32 %v4841_v53, %v4551_v56  ;;  %v5200_v23 = vadd.f32 %v4841_v53, %v4552_v31  ;;  %v5201_v40 = vadd.f32 %v4841_v53, %v4553_v6  ;;  %v12069_v56 = vld [vmem:[#allocation199_spill] sm:$0xff] }
 0x790   :  { %v5202_v24 = vadd.f32 %v4841_v53, %v4554_v5  ;;  %v5203_v19 = vadd.f32 %v4841_v53, %v4555_v15  ;;  %v5204_v58 = vadd.f32 %v4841_v53, %v4556_v39  ;;  %v2971_v33 = vmul.f32 0.0012755102, %v12069_v56  ;;  %v12071_v5 = vld [vmem:[#allocation86_spill] sm:$0xff]  ;;  %v12083_v56 = vld [vmem:[#allocation219_spill] sm:$0xff] }
 0x791   :  { %5576 = vst [vmem:[#allocation5 + $0x9d8] sm:$0xff] %v5198_v61  ;;  %v3025_v47 = vmul.f32 %v10496_v22, %v10496_v22  ;;  %v1985_v61 = vadd.f32 %v12071_v5, %v12070_v4  ;;  %v12073_v15 = vld [vmem:[#allocation42_spill] sm:$0xff] }
 0x792   :  { %5577 = vst [vmem:[#allocation5 + $0x9e0] sm:$0xff] %v5199_v21 }
 0x793   :  { %5578 = vst [vmem:[#allocation5 + $0x9e8] sm:$0xff] %v5200_v23  ;;  %v3079_v6 = vsub.f32 %v2971_v33, %v3025_v47  ;;  %v12072_v23 = vld [vmem:[#allocation134_spill] sm:$0xff] }
 0x794   :  { %5579 = vst [vmem:[#allocation5 + $0x9f0] sm:$0xff] %v5201_v40  ;;  %v1986_v55 = vadd.f32 %v1985_v61, %v12072_v23 }
 0x795   :  { %5580 = vst [vmem:[#allocation5 + $0x9f8] sm:$0xff] %v5202_v24  ;;  %v3187_v21 = vadd.f32 1e-05, %v3079_v6  ;;  %v12075_v24 = vld [vmem:[#allocation138_spill] sm:$0xff] }
 0x796   :  { %5581 = vst [vmem:[#allocation5 + $0xa00] sm:$0xff] %v5203_v19  ;;  %v4208_v59 = vpop.permute.xlu1 %4207 }
 0x797   :  { %5582 = vst.msk [vmem:[#allocation5 + $0xa08] sm:$0xff] %vm1539_vm2, %v5204_v58  ;;  %v4571_v8 = vmul.f32 %v4208_v59, %v12061_v32  ;;  %v4572_v29 = vmul.f32 %v4208_v59, %v12062_v63  ;;  %v4573_v37 = vmul.f32 %v4208_v59, %v12063_v25  ;;  %v4574_v20 = vmul.f32 %v4208_v59, %v12064_v28  ;;  %v12076_v58 = vld [vmem:[#allocation68_spill] sm:$0xff]  ;;  %v12077_v32 = vld [vmem:[#allocation225_spill] sm:$0xff] }
 0x798   :  { %v4575_v11 = vmul.f32 %v4208_v59, %v12065_v26  ;;  %v4576_v13 = vmul.f32 %v4208_v59, %v12067_v30  ;;  %v4577_v50 = vmul.f32 %v4208_v59, %v12068_v43  ;;  %v1987_v59 = vadd.f32 %v1986_v55, %v12076_v58  ;;  %v3133_v55 = vld [vmem:[%s10715_s2 + $0x100] sm:$0xff] }
 0x799   :  { %6245 = vrsqrt.f32 %v3187_v21  ;;  %vm3535_vm0 = vweird.f32 %v3187_v21 }
 0x79e   :  { %v4856_v18 = vpop.permute.xlu1 %4855 }
 0x79f   :  { %v5219_v12 = vadd.f32 %v4856_v18, %v4571_v8  ;;  %v5220_v45 = vadd.f32 %v4856_v18, %v4572_v29  ;;  %v5221_v46 = vadd.f32 %v4856_v18, %v4573_v37  ;;  %v5222_v51 = vadd.f32 %v4856_v18, %v4574_v20  ;;  %v12078_v29 = vld [vmem:[#allocation226_spill] sm:$0xff] }
 0x7a0   :  { %v5223_v60 = vadd.f32 %v4856_v18, %v4575_v11  ;;  %v5224_v31 = vadd.f32 %v4856_v18, %v4576_v13  ;;  %v5225_v62 = vadd.f32 %v4856_v18, %v4577_v50  ;;  %v12079_v18 = vld [vmem:[#allocation69_spill] sm:$0xff]  ;;  %v12080_v11 = vld [vmem:[#allocation48_spill] sm:$0xff] }
 0x7a1   :  { %5597 = vst [vmem:[#allocation5 + $0xa80] sm:$0xff] %v5219_v12  ;;  %v1988_v26 = vadd.f32 %v1987_v59, %v12079_v18 }
 0x7a2   :  { %5598 = vst [vmem:[#allocation5 + $0xa88] sm:$0xff] %v5220_v45 }
 0x7a3   :  { %5599 = vst [vmem:[#allocation5 + $0xa90] sm:$0xff] %v5221_v46  ;;  %v12081_v46 = vld [vmem:[#allocation228_spill] sm:$0xff]  ;;  %v1989_v33 = vadd.f32 %v1988_v26, %v12083_v56 }
 0x7a4   :  { %5600 = vst [vmem:[#allocation5 + $0xa98] sm:$0xff] %v5222_v51  ;;  %v12082_v51 = vld [vmem:[#allocation71_spill] sm:$0xff] }
 0x7a5   :  { %5601 = vst [vmem:[#allocation5 + $0xaa0] sm:$0xff] %v5223_v60  ;;  %v1990_v43 = vsel %vm1539_vm2, %v12082_v51, 0.0  ;;  %v6246_v60 = vpop.eup %6245 }
 0x7a6   :  { %5602 = vst [vmem:[#allocation5 + $0xaa8] sm:$0xff] %v5224_v31  ;;  %v4223_v53 = vpop.permute.xlu1 %4222  ;;  %v1991_v31 = vadd.f32 %v1990_v43, %v1989_v33  ;;  %vm3536_vm15 = vweird.f32 %v6246_v60  ;;  %v2373_v43 = vmul.f32 %v12072_v23, %v12072_v23 }
 0x7a7   :  { %5603 = vst.msk [vmem:[#allocation5 + $0xab0] sm:$0xff] %vm1539_vm2, %v5225_v62  ;;  %v4592_v40 = vmul.f32 %v4223_v53, %v12073_v15  ;;  %v4593_v39 = vmul.f32 %v4223_v53, %v12074_v34  ;;  %v4594_v19 = vmul.f32 %v4223_v53, %v12075_v24  ;;  %v4595_v8 = vmul.f32 %v4223_v53, %v12077_v32  ;;  %vm3537_vm3 = vmor %vm3535_vm0, %vm3536_vm15  ;;  %v12086_v32 = vld [vmem:[#allocation142_spill] sm:$0xff] }
 0x7a8   :  { %v4596_v25 = vmul.f32 %v4223_v53, %v12078_v29  ;;  %v4597_v12 = vmul.f32 %v4223_v53, %v12080_v11  ;;  %v4598_v14 = vmul.f32 %v4223_v53, %v12081_v46  ;;  %v3530_v62 = vmul.f32 %v6246_v60, %v3187_v21  ;;  %v1966_v46 = vpop.xlane.xlu2 %1965 }
 0x7aa   :  { %v3531_v47 = vmul.f32 %v6246_v60, %v3530_v62 }
 0x7ac   :  { %v3532_v6 = vmul.f32 0.5, %v3531_v47 }
 0x7ae   :  { %v4871_v63 = vpop.permute.xlu1 %4870  ;;  %v3533_v53 = vsub.f32 1.5, %v3532_v6  ;;  %v2375_v6 = vmul.f32 %v12079_v18, %v12079_v18 }
 0x7af   :  { %v5240_v37 = vadd.f32 %v4871_v63, %v4592_v40  ;;  %v5241_v28 = vadd.f32 %v4871_v63, %v4593_v39  ;;  %v5242_v20 = vadd.f32 %v4871_v63, %v4594_v19  ;;  %v5243_v45 = vadd.f32 %v4871_v63, %v4595_v8  ;;  %v12084_v39 = vld [vmem:[#allocation46_spill] sm:$0xff] }
 0x7b0   :  { %v5244_v30 = vadd.f32 %v4871_v63, %v4596_v25  ;;  %v5245_v13 = vadd.f32 %v4871_v63, %v4597_v12  ;;  %v5246_v50 = vadd.f32 %v4871_v63, %v4598_v14  ;;  %v3534_v61 = vmul.f32 %v6246_v60, %v3533_v53  ;;  %v12085_v19 = vld [vmem:[#allocation94_spill] sm:$0xff] }
 0x7b1   :  { %5618 = vst [vmem:[#allocation5 + $0xb28] sm:$0xff] %v5240_v37  ;;  %v12087_v63 = vld [vmem:[#allocation194_spill] sm:$0xff] }
 0x7b2   :  { %5619 = vst [vmem:[#allocation5 + $0xb30] sm:$0xff] %v5241_v28  ;;  %v3538_v15 = vsel %vm3537_vm3, %v6246_v60, %v3534_v61  ;;  %v2374_v60 = vmul.f32 %v12076_v58, %v12076_v58 }
 0x7b3   :  { %5620 = vst [vmem:[#allocation5 + $0xb38] sm:$0xff] %v5242_v20  ;;  %v10523_v34 = vmul.f32 %v3538_v15, %v3133_v55 }
 0x7b4   :  { %5621 = vst [vmem:[#allocation5 + $0xb40] sm:$0xff] %v5243_v45 }
 0x7b5   :  { %5622 = vst [vmem:[#allocation5 + $0xb48] sm:$0xff] %v5244_v30 }
 0x7b6   :  { %5623 = vst [vmem:[#allocation5 + $0xb50] sm:$0xff] %v5245_v13  ;;  %1992 = vadd.xlane.f32.xlu2 %v1991_v31  ;;  %v2372_v13 = vmul.f32 %v12071_v5, %v12071_v5 }
 0x7b7   :  { %5624 = vst.msk [vmem:[#allocation5 + $0xb58] sm:$0xff] %vm1539_vm2, %v5246_v50 }
 0x7cb   :  { %v4228_v40 = vpop.permute.xlu0 %4227 }
 0x7cc   :  { %v4599_v24 = vmul.f32 %v4228_v40, %v12084_v39  ;;  %v4600_v59 = vmul.f32 %v4228_v40, %v12085_v19  ;;  %v4601_v8 = vmul.f32 %v4228_v40, %v12086_v32  ;;  %v4602_v29 = vmul.f32 %v4228_v40, %v12087_v63 }
 0x7cd   :  { %v4603_v25 = vmul.f32 %v4228_v40, %v10225_v2  ;;  %v4604_v26 = vmul.f32 %v4228_v40, %v10243_v3  ;;  %v4605_v12 = vmul.f32 %v4228_v40, %v10238_v54  ;;  %v4113_v2 = vpop.permute.xlu2 %4112  ;;  %v2932_v3 = vmul.f32 0.0012755102, %v1966_v46 }
 0x7ce   :  { %4127 = vperm.xlu2 %6146, %v10523_v34   ;;  %v2371_v54 = vmul.f32 %v12070_v4, %v12070_v4  ;;  %v2376_v40 = vmul.f32 %v12083_v56, %v12083_v56  ;;  %v2377_v39 = vmul.f32 %v12082_v51, %v12082_v51 }
 0x7cf   :  { %v3040_v31 = vmul.f32 %v2932_v3, %v2932_v3 }
 0x7d0   :  { %v2849_v50 = vadd.f32 %v2372_v13, %v2371_v54  ;;  %v12094_v13 = vld [vmem:[#allocation8_spill] sm:$0xff] }
 0x7d1   :  { %v4444_v54 = vmul.f32 %v4113_v2, %v12094_v13 }
 0x7d2   :  { %v2850_v47 = vadd.f32 %v2849_v50, %v2373_v43 }
 0x7d3   :  { %v4876_v21 = vpop.permute.xlu0 %4875 }
 0x7d4   :  { %v5247_v37 = vadd.f32 %v4876_v21, %v4599_v24  ;;  %v5248_v28 = vadd.f32 %v4876_v21, %v4600_v59  ;;  %v5249_v20 = vadd.f32 %v4876_v21, %v4601_v8  ;;  %v5250_v11 = vadd.f32 %v4876_v21, %v4602_v29  ;;  %v12088_v24 = vld [vmem:[#allocation120_spill] sm:$0xff]  ;;  %v12089_v59 = vld [vmem:[#allocation121_spill] sm:$0xff]  ;;  %v12090_v8 = vld [vmem:[#allocation123_spill] sm:$0xff] }
 0x7d5   :  { %v5251_v45 = vadd.f32 %v4876_v21, %v4603_v25  ;;  %v5252_v14 = vadd.f32 %v4876_v21, %v4604_v26  ;;  %v5253_v30 = vadd.f32 %v4876_v21, %v4605_v12  ;;  %v2851_v61 = vadd.f32 %v2850_v47, %v2374_v60  ;;  %v12091_v29 = vld [vmem:[#allocation263_spill] sm:$0xff]  ;;  %v12093_v12 = vld [vmem:[#allocation9_spill] sm:$0xff] }
 0x7d6   :  { %5625 = vst [vmem:[#allocation5 + $0xb60] sm:$0xff] %v5247_v37  ;;  %v4438_v19 = vmul.f32 %v4113_v2, %v12088_v24  ;;  %v4439_v32 = vmul.f32 %v4113_v2, %v12089_v59  ;;  %v4440_v63 = vmul.f32 %v4113_v2, %v12090_v8  ;;  %v4441_v21 = vmul.f32 %v4113_v2, %v12091_v29  ;;  %v12092_v37 = vld [vmem:[#allocation287_spill] sm:$0xff]  ;;  %v12096_v8 = vld [vmem:[#allocation210_spill] sm:$0xff] }
 0x7d7   :  { %5626 = vst [vmem:[#allocation5 + $0xb68] sm:$0xff] %v5248_v28  ;;  %v2852_v15 = vadd.f32 %v2851_v61, %v2375_v6  ;;  %v4442_v28 = vmul.f32 %v4113_v2, %v12092_v37  ;;  %v3148_v61 = vld [vmem:[%s10715_s2 + $0x178] sm:$0xff]  ;;  %v3889_v24 = vmul.f32 %v10523_v34, %v10496_v22  ;;  %v10578_v22 = vpop.f32.mrf.mxu3 }
 0x7d8   :  { %5627 = vst [vmem:[#allocation5 + $0xb70] sm:$0xff] %v5249_v20  ;;  %v12099_v34 = vld [vmem:[#allocation146_spill] sm:$0xff] }
 0x7d9   :  { %5628 = vst [vmem:[#allocation5 + $0xb78] sm:$0xff] %v5250_v11 }
 0x7da   :  { %5629 = vst [vmem:[#allocation5 + $0xb80] sm:$0xff] %v5251_v45  ;;  %v4443_v45 = vmul.f32 %v4113_v2, %v12093_v12 }
 0x7db   :  { %5630 = vst [vmem:[#allocation5 + $0xb88] sm:$0xff] %v5252_v14  ;;  %v2854_v14 = vsel %vm1539_vm2, %v2377_v39, 0.0 }
 0x7dc   :  { %5631 = vst.msk [vmem:[#allocation5 + $0xb90] sm:$0xff] %vm1539_vm2, %v5253_v30  ;;  %v2853_v30 = vadd.f32 %v2852_v15, %v2376_v40 }
 0x7e8   :  { %v2830_v33 = vpop.xlane.xlu2 %2829 }
 0x7e9   :  { %v2986_v62 = vmul.f32 0.0012755102, %v2830_v33 }
 0x7eb   :  { %v3094_v53 = vsub.f32 %v2986_v62, %v3040_v31  ;;  %v2855_v31 = vadd.f32 %v2854_v14, %v2853_v30 }
 0x7ed   :  { %v3202_v55 = vadd.f32 1e-05, %v3094_v53 }
 0x7ef   :  { %6247 = vrsqrt.f32 %v3202_v55  ;;  %vm3685_vm4 = vweird.f32 %v3202_v55 }
 0x7f0   :  { %v4761_v25 = vpop.permute.xlu2 %4760 }
 0x7f1   :  { %v5086_v20 = vadd.f32 %v4761_v25, %v4438_v19  ;;  %v5087_v26 = vadd.f32 %v4761_v25, %v4439_v32  ;;  %v5088_v11 = vadd.f32 %v4761_v25, %v4440_v63  ;;  %v5089_v46 = vadd.f32 %v4761_v25, %v4441_v21  ;;  %v3835_v19 = vld [vmem:[%s10716_s3 + $0x100] sm:$0xff] }
 0x7f2   :  { %v5090_v43 = vadd.f32 %v4761_v25, %v4442_v28  ;;  %v5091_v50 = vadd.f32 %v4761_v25, %v4443_v45  ;;  %v5092_v33 = vadd.f32 %v4761_v25, %v4444_v54  ;;  %v3943_v59 = vsub.f32 %v3835_v19, %v3889_v24  ;;  %v12098_v25 = vld [vmem:[#allocation98_spill] sm:$0xff]  ;;  %v10585_v45 = vpop.f32.mrf.mxu2 }
 0x7f3   :  { %5464 = vst [vmem:[#allocation5 + $0x658] sm:$0xff] %v5086_v20  ;;  %v2974_v63 = vmul.f32 0.0012755102, %v12096_v8  ;;  %v2017_v14 = vsel %vm1539_vm2, %v10585_v45, 0.0  ;;  %v2394_v19 = vmul.f32 %v12099_v34, %v12099_v34 }
 0x7f4   :  { %5465 = vst [vmem:[#allocation5 + $0x660] sm:$0xff] %v5087_v26  ;;  %v10581_v26 = vpop.f32.mrf.mxu0 }
 0x7f5   :  { %v6248_v60 = vpop.eup %6247  ;;  %5466 = vst [vmem:[#allocation5 + $0x668] sm:$0xff] %v5088_v11 }
 0x7f6   :  { %v3680_v62 = vmul.f32 %v6248_v60, %v3202_v55  ;;  %5467 = vst [vmem:[#allocation5 + $0x670] sm:$0xff] %v5089_v46  ;;  %vm3686_vm1 = vweird.f32 %v6248_v60  ;;  %v12095_v55 = vld [vmem:[#allocation200_spill] sm:$0xff]  ;;  %v10587_v46 = vpop.f32.mrf.mxu1 }
 0x7f7   :  { %5468 = vst [vmem:[#allocation5 + $0x678] sm:$0xff] %v5090_v43  ;;  %2856 = vadd.xlane.f32.xlu2 %v2855_v31  ;;  %vm3687_vm5 = vmor %vm3685_vm4, %vm3686_vm1  ;;  %v10571_v32 = vmul.f32 0.0012755102, %v12095_v55 }
 0x7f8   :  { %v3681_v47 = vmul.f32 %v6248_v60, %v3680_v62  ;;  %5469 = vst [vmem:[#allocation5 + $0x680] sm:$0xff] %v5091_v50  ;;  %v3136_v62 = vld [vmem:[%s10715_s2 + $0x118] sm:$0xff] }
 0x7f9   :  { %5470 = vst.msk [vmem:[#allocation5 + $0x688] sm:$0xff] %vm1539_vm2, %v5092_v33  ;;  %v3028_v29 = vmul.f32 %v10571_v32, %v10571_v32 }
 0x7fa   :  { %v3682_v6 = vmul.f32 0.5, %v3681_v47 }
 0x7fb   :  { %v3082_v21 = vsub.f32 %v2974_v63, %v3028_v29 }
 0x7fc   :  { %v3683_v53 = vsub.f32 1.5, %v3682_v6 }
 0x7fd   :  { %v3190_v28 = vadd.f32 1e-05, %v3082_v21 }
 0x7fe   :  { %v3684_v2 = vmul.f32 %v6248_v60, %v3683_v53 }
 0x7ff   :  { %6249 = vrsqrt.f32 %v3190_v28  ;;  %vm3565_vm7 = vweird.f32 %v3190_v28 }
 0x800   :  { %v3688_v15 = vsel %vm3687_vm5, %v6248_v60, %v3684_v2 }
 0x801   :  { %v10560_v40 = vmul.f32 %v3688_v15, %v3148_v61  ;;  %v2393_v61 = vmul.f32 %v12098_v25, %v12098_v25 }
 0x803   :  { %v10563_v39 = vmul.f32 %v10560_v40, %v2932_v3  ;;  %v12097_v3 = vld [vmem:[#allocation50_spill] sm:$0xff] }
 0x804   :  { %v2012_v37 = vadd.f32 %v12098_v25, %v12097_v3  ;;  %v2392_v24 = vmul.f32 %v12097_v3, %v12097_v3 }
 0x805   :  { %v6250_v30 = vpop.eup %6249 }
 0x806   :  { %v2013_v20 = vadd.f32 %v2012_v37, %v12099_v34  ;;  %v3560_v43 = vmul.f32 %v6250_v30, %v3190_v28  ;;  %vm3566_vm6 = vweird.f32 %v6250_v30  ;;  %v2876_v55 = vadd.f32 %v2393_v61, %v2392_v24 }
 0x807   :  { %vm3567_vm8 = vmor %vm3565_vm7, %vm3566_vm6  ;;  %v2396_v37 = vmul.f32 %v10581_v26, %v10581_v26 }
 0x808   :  { %v2014_v11 = vadd.f32 %v2013_v20, %v10578_v22  ;;  %v3561_v50 = vmul.f32 %v6250_v30, %v3560_v43  ;;  %v2877_v21 = vadd.f32 %v2876_v55, %v2394_v19  ;;  %v12101_v43 = vld [vmem:[#allocation133_spill] sm:$0xff] }
 0x80a   :  { %v2015_v12 = vadd.f32 %v2014_v11, %v10581_v26  ;;  %v3562_v60 = vmul.f32 0.5, %v3561_v50 }
 0x80c   :  { %v2016_v13 = vadd.f32 %v2015_v12, %v10587_v46  ;;  %v3563_v33 = vsub.f32 1.5, %v3562_v60  ;;  %v12102_v60 = vld [vmem:[#allocation135_spill] sm:$0xff] }
 0x80e   :  { %v2018_v54 = vadd.f32 %v2017_v14, %v2016_v13  ;;  %v3564_v31 = vmul.f32 %v6250_v30, %v3563_v33  ;;  %v2397_v14 = vmul.f32 %v10587_v46, %v10587_v46  ;;  %v12100_v13 = vld [vmem:[#allocation132_spill] sm:$0xff] }
 0x80f   :  { %4775 = vperm.xlu2 %6146, %v3943_v59   ;;  %v2395_v59 = vmul.f32 %v10578_v22, %v10578_v22 }
 0x810   :  { %v3568_v47 = vsel %vm3567_vm8, %v6250_v30, %v3564_v31  ;;  %v2398_v30 = vmul.f32 %v10585_v45, %v10585_v45  ;;  %v12103_v31 = vld [vmem:[#allocation18_spill] sm:$0xff] }
 0x811   :  { %v3784_v6 = vmul.f32 %v3568_v47, %v3136_v62  ;;  %v2878_v20 = vadd.f32 %v2877_v21, %v2395_v59 }
 0x812   :  { %v2881_v55 = vsel %vm1539_vm2, %v2398_v30, 0.0 }
 0x813   :  { %v2879_v12 = vadd.f32 %v2878_v20, %v2396_v37  ;;  %v12106_v37 = vld [vmem:[#allocation261_spill] sm:$0xff] }
 0x815   :  { %v2880_v21 = vadd.f32 %v2879_v12, %v2397_v14  ;;  %v3151_v14 = vld [vmem:[%s10715_s2 + $0x190] sm:$0xff] }
 0x829   :  { %v1993_v53 = vpop.xlane.xlu2 %1992 }
 0x82a   :  { %v2935_v15 = vmul.f32 0.0012755102, %v1993_v53  ;;  %v12104_v53 = vld [vmem:[#allocation256_spill] sm:$0xff] }
 0x82c   :  { %v3043_v63 = vmul.f32 %v2935_v15, %v2935_v15 }
 0x831   :  { %v4128_v2 = vpop.permute.xlu2 %4127 }
 0x832   :  { %v4460_v50 = vmul.f32 %v4128_v2, %v12101_v43  ;;  %v4461_v33 = vmul.f32 %v4128_v2, %v12102_v60  ;;  %v4462_v62 = vmul.f32 %v4128_v2, %v12103_v31  ;;  %v4463_v61 = vmul.f32 %v4128_v2, %v12104_v53 }
 0x833   :  { %v2882_v31 = vadd.f32 %v2881_v55, %v2880_v21 }
 0x838   :  { %2019 = vadd.xlane.f32.xlu2 %v2018_v54  ;;  %v4459_v54 = vmul.f32 %v4128_v2, %v12100_v13 }
 0x850   :  { %4142 = vperm.xlu2 %6146, %v3784_v6  }
 0x86a   :  { %v2857_v8 = vpop.xlane.xlu2 %2856 }
 0x86b   :  { %v2989_v29 = vmul.f32 0.0012755102, %v2857_v8  ;;  %v12105_v8 = vld [vmem:[#allocation271_spill] sm:$0xff] }
 0x86d   :  { %v3097_v28 = vsub.f32 %v2989_v29, %v3043_v63  ;;  %v4464_v63 = vmul.f32 %v4128_v2, %v12105_v8 }
 0x86f   :  { %v3205_v11 = vadd.f32 1e-05, %v3097_v28  ;;  %v4465_v28 = vmul.f32 %v4128_v2, %v12106_v37 }
 0x871   :  { %6251 = vrsqrt.f32 %v3205_v11  ;;  %vm3715_vm10 = vweird.f32 %v3205_v11 }
 0x872   :  { %v4776_v47 = vpop.permute.xlu2 %4775 }
 0x873   :  { %v5107_v24 = vadd.f32 %v4776_v47, %v4459_v54  ;;  %v5108_v19 = vadd.f32 %v4776_v47, %v4460_v50  ;;  %v5109_v59 = vadd.f32 %v4776_v47, %v4461_v33  ;;  %v5110_v29 = vadd.f32 %v4776_v47, %v4462_v62 }
 0x874   :  { %v5111_v20 = vadd.f32 %v4776_v47, %v4463_v61  ;;  %v5112_v13 = vadd.f32 %v4776_v47, %v4464_v63  ;;  %v5113_v60 = vadd.f32 %v4776_v47, %v4465_v28  ;;  %v3892_v47 = vmul.f32 %v3784_v6, %v10571_v32  ;;  %v3838_v61 = vld [vmem:[%s10716_s3 + $0x118] sm:$0xff]  ;;  %v3844_v32 = vld [vmem:[%s10716_s3 + $0x148] sm:$0xff] }
 0x875   :  { %5485 = vst [vmem:[#allocation5 + $0x700] sm:$0xff] %v5107_v24  ;;  %v3952_v6 = vsub.f32 %v3844_v32, %v10328_v35 }
 0x876   :  { %5486 = vst [vmem:[#allocation5 + $0x708] sm:$0xff] %v5108_v19  ;;  %v3946_v24 = vsub.f32 %v3838_v61, %v3892_v47  ;;  %v12107_v19 = vld [vmem:[#allocation49_spill] sm:$0xff]  ;;  %v12114_v61 = vld [vmem:[#allocation32_spill] sm:$0xff] }
 0x877   :  { %v6252_v43 = vpop.eup %6251  ;;  %5487 = vst [vmem:[#allocation5 + $0x710] sm:$0xff] %v5109_v59  ;;  %v12108_v59 = vld [vmem:[#allocation51_spill] sm:$0xff] }
 0x878   :  { %v3710_v53 = vmul.f32 %v6252_v43, %v3205_v11  ;;  %5488 = vst [vmem:[#allocation5 + $0x718] sm:$0xff] %v5110_v29  ;;  %vm3716_vm9 = vweird.f32 %v6252_v43  ;;  %v3841_v11 = vld [vmem:[%s10716_s3 + $0x130] sm:$0xff] }
 0x879   :  { %5489 = vst [vmem:[#allocation5 + $0x720] sm:$0xff] %v5111_v20  ;;  %2883 = vadd.xlane.f32.xlu2 %v2882_v31  ;;  %vm3717_vm11 = vmor %vm3715_vm10, %vm3716_vm9  ;;  %v3949_v55 = vsub.f32 %v3841_v11, %v12108_v59  ;;  %v12110_v31 = vld [vmem:[#allocation145_spill] sm:$0xff]  ;;  %v12115_v11 = vld [vmem:[#allocation186_spill] sm:$0xff] }
 0x87a   :  { %v3711_v54 = vmul.f32 %v6252_v43, %v3710_v53  ;;  %5490 = vst [vmem:[#allocation5 + $0x728] sm:$0xff] %v5112_v13  ;;  %v12111_v53 = vld [vmem:[#allocation147_spill] sm:$0xff] }
 0x87b   :  { %5491 = vst.msk [vmem:[#allocation5 + $0x730] sm:$0xff] %vm1539_vm2, %v5113_v60 }
 0x87c   :  { %v3712_v30 = vmul.f32 0.5, %v3711_v54 }
 0x87e   :  { %v3713_v12 = vsub.f32 1.5, %v3712_v30  ;;  %v12112_v30 = vld [vmem:[#allocation183_spill] sm:$0xff] }
 0x880   :  { %v3714_v2 = vmul.f32 %v6252_v43, %v3713_v12 }
 0x882   :  { %v3718_v50 = vsel %vm3717_vm11, %v6252_v43, %v3714_v2  ;;  %v12109_v43 = vld [vmem:[#allocation144_spill] sm:$0xff] }
 0x883   :  { %v3799_v33 = vmul.f32 %v3718_v50, %v3151_v14  ;;  %v12113_v14 = vld [vmem:[#allocation184_spill] sm:$0xff] }
 0x885   :  { %v3907_v62 = vmul.f32 %v3799_v33, %v2935_v15  ;;  %v3847_v15 = vld [vmem:[%s10716_s3 + $0x160] sm:$0xff] }
 0x886   :  { %v3955_v8 = vsub.f32 %v3847_v15, %v10468_v52 }
 0x891   :  { %4790 = vperm.xlu2 %6146, %v3946_v24  }
 0x899   :  { %4157 = vperm.xlu2 %6146, %v12107_v19  }
 0x8a1   :  { %4805 = vperm.xlu2 %6146, %v3949_v55  }
 0x8a9   :  { %4172 = vperm.xlu2 %6146, %v10324_v27   ;;  %v3850_v27 = vld [vmem:[%s10716_s3 + $0x178] sm:$0xff] }
 0x8aa   :  { %v3958_v63 = vsub.f32 %v3850_v27, %v10563_v39 }
 0x8ab   :  { %v2020_v35 = vpop.xlane.xlu2 %2019 }
 0x8ac   :  { %v2938_v52 = vmul.f32 0.0012755102, %v2020_v35 }
 0x8ae   :  { %v3046_v28 = vmul.f32 %v2938_v52, %v2938_v52 }
 0x8b1   :  { %4820 = vperm.xlu2 %6146, %v3952_v6  }
 0x8b3   :  { %v4143_v21 = vpop.permute.xlu2 %4142 }
 0x8b4   :  { %v4480_v60 = vmul.f32 %v4143_v21, %v12109_v43  ;;  %v4481_v39 = vmul.f32 %v4143_v21, %v12110_v31  ;;  %v4482_v54 = vmul.f32 %v4143_v21, %v12111_v53  ;;  %v4483_v12 = vmul.f32 %v4143_v21, %v12112_v30  ;;  %v12119_v31 = vld [vmem:[#allocation270_spill] sm:$0xff]  ;;  %v12120_v30 = vld [vmem:[#allocation187_spill] sm:$0xff] }
 0x8b5   :  { %v4484_v50 = vmul.f32 %v4143_v21, %v12113_v14  ;;  %v4485_v24 = vmul.f32 %v4143_v21, %v12114_v61  ;;  %v4486_v59 = vmul.f32 %v4143_v21, %v12115_v11  ;;  %v12116_v21 = vld [vmem:[#allocation155_spill] sm:$0xff]  ;;  %v12122_v61 = vld [vmem:[#allocation281_spill] sm:$0xff] }
 0x8b9   :  { %4187 = vperm.xlu2 %6146, %v10462_v57   ;;  %v3853_v57 = vld [vmem:[%s10716_s3 + $0x190] sm:$0xff] }
 0x8ba   :  { %v3961_v29 = vsub.f32 %v3853_v57, %v3907_v62 }
 0x8c1   :  { %4835 = vperm.xlu2 %6146, %v3955_v8  }
 0x8c9   :  { %4202 = vperm.xlu2 %6146, %v10560_v40  }
 0x8d1   :  { %4850 = vperm.xlu2 %6146, %v3958_v63  }
 0x8d9   :  { %4217 = vperm.xlu2 %6146, %v3799_v33  }
 0x8e1   :  { %4865 = vperm.xlu2 %6146, %v3961_v29  }
 0x8ec   :  { %v2884_v37 = vpop.xlane.xlu2 %2883 }
 0x8ed   :  { %v2992_v40 = vmul.f32 0.0012755102, %v2884_v37 }
 0x8ef   :  { %v3100_v20 = vsub.f32 %v2992_v40, %v3046_v28  ;;  %v12117_v28 = vld [vmem:[#allocation156_spill] sm:$0xff] }
 0x8f1   :  { %v3208_v13 = vadd.f32 1e-05, %v3100_v20  ;;  %v12118_v20 = vld [vmem:[#allocation158_spill] sm:$0xff] }
 0x8f3   :  { %6253 = vrsqrt.f32 %v3208_v13  ;;  %vm3745_vm13 = vweird.f32 %v3208_v13 }
 0x8f4   :  { %v4791_v2 = vpop.permute.xlu2 %4790 }
 0x8f5   :  { %v5128_v33 = vadd.f32 %v4791_v2, %v4480_v60  ;;  %v5129_v62 = vadd.f32 %v4791_v2, %v4481_v39  ;;  %v5130_v47 = vadd.f32 %v4791_v2, %v4482_v54  ;;  %v5131_v19 = vadd.f32 %v4791_v2, %v4483_v12  ;;  %v3154_v60 = vld [vmem:[%s10715_s2 + $0x1a8] sm:$0xff] }
 0x8f6   :  { %v5132_v55 = vadd.f32 %v4791_v2, %v4484_v50  ;;  %v5133_v32 = vadd.f32 %v4791_v2, %v4485_v24  ;;  %v5134_v15 = vadd.f32 %v4791_v2, %v4486_v59  ;;  %v12121_v50 = vld [vmem:[#allocation188_spill] sm:$0xff] }
 0x8f7   :  { %5506 = vst [vmem:[#allocation5 + $0x7a8] sm:$0xff] %v5128_v33 }
 0x8f8   :  { %5507 = vst [vmem:[#allocation5 + $0x7b0] sm:$0xff] %v5129_v62 }
 0x8f9   :  { %v6254_v6 = vpop.eup %6253  ;;  %5508 = vst [vmem:[#allocation5 + $0x7b8] sm:$0xff] %v5130_v47 }
 0x8fa   :  { %v3740_v8 = vmul.f32 %v6254_v6, %v3208_v13  ;;  %5509 = vst [vmem:[#allocation5 + $0x7c0] sm:$0xff] %v5131_v19  ;;  %vm3746_vm12 = vweird.f32 %v6254_v6 }
 0x8fb   :  { %5510 = vst [vmem:[#allocation5 + $0x7c8] sm:$0xff] %v5132_v55  ;;  %vm3747_vm14 = vmor %vm3745_vm13, %vm3746_vm12 }
 0x8fc   :  { %v3741_v27 = vmul.f32 %v6254_v6, %v3740_v8  ;;  %5511 = vst [vmem:[#allocation5 + $0x7d0] sm:$0xff] %v5133_v32  ;;  %v4158_v63 = vpop.permute.xlu2 %4157  ;;  %v3856_v32 = vld [vmem:[%s10716_s3 + $0x1a8] sm:$0xff]  ;;  %v12123_v8 = vld [vmem:[#allocation165_spill] sm:$0xff]  ;;  %s6325_s3 = smov [#allocation5]  }
 0x8fd   :  { %5512 = vst.msk [vmem:[#allocation5 + $0x7d8] sm:$0xff] %vm1539_vm2, %v5134_v15  ;;  %v4501_v37 = vmul.f32 %v4158_v63, %v12116_v21  ;;  %v4502_v40 = vmul.f32 %v4158_v63, %v12117_v28  ;;  %v4503_v43 = vmul.f32 %v4158_v63, %v12118_v20  ;;  %v4504_v39 = vmul.f32 %v4158_v63, %v12119_v31  ;;  %v12126_v21 = vld [vmem:[#allocation37_spill] sm:$0xff]  ;;  %s5643_s14 = sshll.u32 %s6325_s3, 4  ;;  %s5644_s14 = int_to_ptr.vmem [resolvable:$true] %s5643_s14 }
 0x8fe   :  { %v3742_v35 = vmul.f32 0.5, %v3741_v27  ;;  %v4505_v12 = vmul.f32 %v4158_v63, %v12120_v30  ;;  %v4506_v33 = vmul.f32 %v4158_v63, %v12121_v50  ;;  %v4507_v24 = vmul.f32 %v4158_v63, %v12122_v61  ;;  %v12124_v63 = vld [vmem:[#allocation166_spill] sm:$0xff]  ;;  %v12127_v28 = vld [vmem:[#allocation181_spill] sm:$0xff] }
 0x8ff   :  { %v12128_v31 = vld [vmem:[#allocation197_spill] sm:$0xff] }
 0x900   :  { %v3743_v57 = vsub.f32 1.5, %v3742_v35 }
 0x902   :  { %v3744_v29 = vmul.f32 %v6254_v6, %v3743_v57  ;;  %v12125_v57 = vld [vmem:[#allocation168_spill] sm:$0xff] }
 0x904   :  { %v4806_v53 = vpop.permute.xlu2 %4805  ;;  %v3748_v54 = vsel %vm3747_vm14, %v6254_v6, %v3744_v29 }
 0x905   :  { %v5149_v2 = vadd.f32 %v4806_v53, %v4501_v37  ;;  %v5150_v14 = vadd.f32 %v4806_v53, %v4502_v40  ;;  %v5151_v13 = vadd.f32 %v4806_v53, %v4503_v43  ;;  %v5152_v62 = vadd.f32 %v4806_v53, %v4504_v39 }
 0x906   :  { %v3802_v47 = vmul.f32 %v3748_v54, %v3154_v60  ;;  %v5153_v19 = vadd.f32 %v4806_v53, %v4505_v12  ;;  %v5154_v11 = vadd.f32 %v4806_v53, %v4506_v33  ;;  %v5155_v59 = vadd.f32 %v4806_v53, %v4507_v24  ;;  %v12129_v54 = vld [vmem:[#allocation195_spill] sm:$0xff] }
 0x907   :  { %5527 = vst [vmem:[#allocation5 + $0x850] sm:$0xff] %v5149_v2 }
 0x908   :  { %5528 = vst [vmem:[#allocation5 + $0x858] sm:$0xff] %v5150_v14  ;;  %4232 = vperm.xlu2 %6146, %v3802_v47   ;;  %v3910_v55 = vmul.f32 %v3802_v47, %v2938_v52 }
 0x909   :  { %5529 = vst [vmem:[#allocation5 + $0x860] sm:$0xff] %v5151_v13 }
 0x90a   :  { %5530 = vst [vmem:[#allocation5 + $0x868] sm:$0xff] %v5152_v62  ;;  %v3964_v15 = vsub.f32 %v3856_v32, %v3910_v55 }
 0x90b   :  { %5531 = vst [vmem:[#allocation5 + $0x870] sm:$0xff] %v5153_v19 }
 0x90c   :  { %5532 = vst [vmem:[#allocation5 + $0x878] sm:$0xff] %v5154_v11  ;;  %v4173_v6 = vpop.permute.xlu2 %4172 }
 0x90d   :  { %5533 = vst.msk [vmem:[#allocation5 + $0x880] sm:$0xff] %vm1539_vm2, %v5155_v59  ;;  %v4522_v27 = vmul.f32 %v4173_v6, %v12123_v8  ;;  %v4523_v35 = vmul.f32 %v4173_v6, %v12124_v63  ;;  %v4524_v29 = vmul.f32 %v4173_v6, %v12125_v57  ;;  %v4525_v37 = vmul.f32 %v4173_v6, %v12126_v21 }
 0x90e   :  { %v4526_v40 = vmul.f32 %v4173_v6, %v12127_v28  ;;  %v4527_v39 = vmul.f32 %v4173_v6, %v12128_v31  ;;  %v4528_v30 = vmul.f32 %v4173_v6, %v12129_v54 }
 0x910   :  { %4880 = vperm.xlu2 %6146, %v3964_v15  }
 0x914   :  { %v4821_v52 = vpop.permute.xlu2 %4820 }
 0x915   :  { %v5170_v20 = vadd.f32 %v4821_v52, %v4522_v27  ;;  %v5171_v43 = vadd.f32 %v4821_v52, %v4523_v35  ;;  %v5172_v60 = vadd.f32 %v4821_v52, %v4524_v29  ;;  %v5173_v53 = vadd.f32 %v4821_v52, %v4525_v37 }
 0x916   :  { %v5174_v12 = vadd.f32 %v4821_v52, %v4526_v40  ;;  %v5175_v2 = vadd.f32 %v4821_v52, %v4527_v39  ;;  %v5176_v14 = vadd.f32 %v4821_v52, %v4528_v30 }
 0x917   :  { %5548 = vst [vmem:[#allocation5 + $0x8f8] sm:$0xff] %v5170_v20 }
 0x918   :  { %5549 = vst [vmem:[#allocation5 + $0x900] sm:$0xff] %v5171_v43 }
 0x919   :  { %5550 = vst [vmem:[#allocation5 + $0x908] sm:$0xff] %v5172_v60 }
 0x91a   :  { %5551 = vst [vmem:[#allocation5 + $0x910] sm:$0xff] %v5173_v53 }
 0x91b   :  { %5552 = vst [vmem:[#allocation5 + $0x918] sm:$0xff] %v5174_v12 }
 0x91c   :  { %5553 = vst [vmem:[#allocation5 + $0x920] sm:$0xff] %v5175_v2  ;;  %v4188_v13 = vpop.permute.xlu2 %4187 }
 0x91d   :  { %5554 = vst.msk [vmem:[#allocation5 + $0x928] sm:$0xff] %vm1539_vm2, %v5176_v14  ;;  %v4543_v50 = vmul.f32 %v4188_v13, %v11965_v1  ;;  %v4544_v33 = vmul.f32 %v4188_v13, %v11966_v16  ;;  %v4545_v62 = vmul.f32 %v4188_v13, %v11967_v41  ;;  %v4546_v47 = vmul.f32 %v4188_v13, %v9478_v10 }
 0x91e   :  { %v4547_v24 = vmul.f32 %v4188_v13, %v9491_v17  ;;  %v4548_v55 = vmul.f32 %v4188_v13, %v11968_v7  ;;  %v4549_v6 = vmul.f32 %v4188_v13, %v9506_v36 }
 0x924   :  { %v4836_v61 = vpop.permute.xlu2 %4835 }
 0x925   :  { %v5191_v19 = vadd.f32 %v4836_v61, %v4543_v50  ;;  %v5192_v11 = vadd.f32 %v4836_v61, %v4544_v33  ;;  %v5193_v59 = vadd.f32 %v4836_v61, %v4545_v62  ;;  %v5194_v32 = vadd.f32 %v4836_v61, %v4546_v47 }
 0x926   :  { %v5195_v15 = vadd.f32 %v4836_v61, %v4547_v24  ;;  %v5196_v1 = vadd.f32 %v4836_v61, %v4548_v55  ;;  %v5197_v16 = vadd.f32 %v4836_v61, %v4549_v6 }
 0x927   :  { %5569 = vst [vmem:[#allocation5 + $0x9a0] sm:$0xff] %v5191_v19 }
 0x928   :  { %5570 = vst [vmem:[#allocation5 + $0x9a8] sm:$0xff] %v5192_v11 }
 0x929   :  { %5571 = vst [vmem:[#allocation5 + $0x9b0] sm:$0xff] %v5193_v59 }
 0x92a   :  { %5572 = vst [vmem:[#allocation5 + $0x9b8] sm:$0xff] %v5194_v32 }
 0x92b   :  { %5573 = vst [vmem:[#allocation5 + $0x9c0] sm:$0xff] %v5195_v15 }
 0x92c   :  { %5574 = vst [vmem:[#allocation5 + $0x9c8] sm:$0xff] %v5196_v1  ;;  %v4203_v10 = vpop.permute.xlu2 %4202 }
 0x92d   :  { %5575 = vst.msk [vmem:[#allocation5 + $0x9d0] sm:$0xff] %vm1539_vm2, %v5197_v16  ;;  %v4564_v17 = vmul.f32 %v4203_v10, %v12016_v9  ;;  %v4565_v41 = vmul.f32 %v4203_v10, %v12017_v48  ;;  %v4566_v7 = vmul.f32 %v4203_v10, %v12018_v38  ;;  %v4567_v36 = vmul.f32 %v4203_v10, %v12019_v0 }
 0x92e   :  { %v4568_v27 = vmul.f32 %v4203_v10, %v12020_v49  ;;  %v4569_v29 = vmul.f32 %v4203_v10, %v12021_v44  ;;  %v4570_v37 = vmul.f32 %v4203_v10, %v12022_v42 }
 0x934   :  { %v4851_v8 = vpop.permute.xlu2 %4850 }
 0x935   :  { %v5212_v63 = vadd.f32 %v4851_v8, %v4564_v17  ;;  %v5213_v35 = vadd.f32 %v4851_v8, %v4565_v41  ;;  %v5214_v57 = vadd.f32 %v4851_v8, %v4566_v7  ;;  %v5215_v21 = vadd.f32 %v4851_v8, %v4567_v36 }
 0x936   :  { %v5216_v52 = vadd.f32 %v4851_v8, %v4568_v27  ;;  %v5217_v9 = vadd.f32 %v4851_v8, %v4569_v29  ;;  %v5218_v48 = vadd.f32 %v4851_v8, %v4570_v37 }
 0x937   :  { %5590 = vst [vmem:[#allocation5 + $0xa48] sm:$0xff] %v5212_v63 }
 0x938   :  { %5591 = vst [vmem:[#allocation5 + $0xa50] sm:$0xff] %v5213_v35 }
 0x939   :  { %5592 = vst [vmem:[#allocation5 + $0xa58] sm:$0xff] %v5214_v57 }
 0x93a   :  { %5593 = vst [vmem:[#allocation5 + $0xa60] sm:$0xff] %v5215_v21 }
 0x93b   :  { %5594 = vst [vmem:[#allocation5 + $0xa68] sm:$0xff] %v5216_v52 }
 0x93c   :  { %5595 = vst [vmem:[#allocation5 + $0xa70] sm:$0xff] %v5217_v9  ;;  %v4218_v38 = vpop.permute.xlu2 %4217 }
 0x93d   :  { %5596 = vst.msk [vmem:[#allocation5 + $0xa78] sm:$0xff] %vm1539_vm2, %v5218_v48  ;;  %v4585_v0 = vmul.f32 %v4218_v38, %v12070_v4  ;;  %v4586_v49 = vmul.f32 %v4218_v38, %v12071_v5  ;;  %v4587_v44 = vmul.f32 %v4218_v38, %v12072_v23  ;;  %v4588_v42 = vmul.f32 %v4218_v38, %v12076_v58 }
 0x93e   :  { %v4589_v40 = vmul.f32 %v4218_v38, %v12079_v18  ;;  %v4590_v31 = vmul.f32 %v4218_v38, %v12083_v56  ;;  %v4591_v53 = vmul.f32 %v4218_v38, %v12082_v51 }
 0x944   :  { %v4866_v28 = vpop.permute.xlu2 %4865 }
 0x945   :  { %v5233_v20 = vadd.f32 %v4866_v28, %v4585_v0  ;;  %v5234_v43 = vadd.f32 %v4866_v28, %v4586_v49  ;;  %v5235_v60 = vadd.f32 %v4866_v28, %v4587_v44  ;;  %v5236_v39 = vadd.f32 %v4866_v28, %v4588_v42 }
 0x946   :  { %v5237_v54 = vadd.f32 %v4866_v28, %v4589_v40  ;;  %v5238_v4 = vadd.f32 %v4866_v28, %v4590_v31  ;;  %v5239_v5 = vadd.f32 %v4866_v28, %v4591_v53 }
 0x947   :  { %5611 = vst [vmem:[#allocation5 + $0xaf0] sm:$0xff] %v5233_v20 }
 0x948   :  { %5612 = vst [vmem:[#allocation5 + $0xaf8] sm:$0xff] %v5234_v43 }
 0x949   :  { %5613 = vst [vmem:[#allocation5 + $0xb00] sm:$0xff] %v5235_v60 }
 0x94a   :  { %5614 = vst [vmem:[#allocation5 + $0xb08] sm:$0xff] %v5236_v39 }
 0x94b   :  { %5615 = vst [vmem:[#allocation5 + $0xb10] sm:$0xff] %v5237_v54 }
 0x94c   :  { %5616 = vst [vmem:[#allocation5 + $0xb18] sm:$0xff] %v5238_v4 }
 0x94d   :  { %5617 = vst.msk [vmem:[#allocation5 + $0xb20] sm:$0xff] %vm1539_vm2, %v5239_v5 }
 0x962   :  { %v4233_v23 = vpop.permute.xlu2 %4232 }
 0x963   :  { %v4606_v58 = vmul.f32 %v4233_v23, %v12097_v3  ;;  %v4607_v18 = vmul.f32 %v4233_v23, %v12098_v25  ;;  %v4608_v56 = vmul.f32 %v4233_v23, %v12099_v34  ;;  %v4609_v51 = vmul.f32 %v4233_v23, %v10578_v22 }
 0x964   :  { %v4610_v12 = vmul.f32 %v4233_v23, %v10581_v26  ;;  %v4611_v50 = vmul.f32 %v4233_v23, %v10587_v46  ;;  %v4612_v62 = vmul.f32 %v4233_v23, %v10585_v45 }
 0x96a   :  { %v4881_v30 = vpop.permute.xlu2 %4880 }
 0x96b   :  { %v5254_v2 = vadd.f32 %v4881_v30, %v4606_v58  ;;  %v5255_v14 = vadd.f32 %v4881_v30, %v4607_v18  ;;  %v5256_v13 = vadd.f32 %v4881_v30, %v4608_v56  ;;  %v5257_v33 = vadd.f32 %v4881_v30, %v4609_v51 }
 0x96c   :  { %v5258_v47 = vadd.f32 %v4881_v30, %v4610_v12  ;;  %v5259_v3 = vadd.f32 %v4881_v30, %v4611_v50  ;;  %v5260_v25 = vadd.f32 %v4881_v30, %v4612_v62 }
 0x96d   :  { %5632 = vst [vmem:[#allocation5 + $0xb98] sm:$0xff] %v5254_v2 }
 0x96e   :  { %5633 = vst [vmem:[#allocation5 + $0xba0] sm:$0xff] %v5255_v14 }
 0x96f   :  { %5634 = vst [vmem:[#allocation5 + $0xba8] sm:$0xff] %v5256_v13 }
 0x970   :  { %5635 = vst [vmem:[#allocation5 + $0xbb0] sm:$0xff] %v5257_v33 }
 0x971   :  { %5636 = vst [vmem:[#allocation5 + $0xbb8] sm:$0xff] %v5258_v47 }
 0x972   :  { %5637 = vst [vmem:[#allocation5 + $0xbc0] sm:$0xff] %v5259_v3 }
 0x973   :  { %5638 = vst.msk [vmem:[#allocation5 + $0xbc8] sm:$0xff] %vm1539_vm2, %v5260_v25 }
 0x974   :  { %5651 = dma.vmem_to_hbm [thread:$0]  %s5644_s14, 48384, %s5646_s17, [#allocation4], %s6326_s18, %s6326_s18, %s6327_s19  }
 0x975   :  { %6319 = dma.done.wait [#allocation4], 48384  }
 0x976   :  { %6320 = vsyncadd [#allocation4], 4294918912 }
 0x977   :  { %5656 = vsyncpa [#allocation3], 1 }
 0x978   :  { %5657 = vsyncpa [#allocation4], 1 }

</bundles_post_ra>
